<compile_context>
chip_gen: v6e
topology: v6e:2x2x1
jax: 0.10.0
libtpu: 0.0.40
codegen_flags: <defaults>
</compile_context>

<pallas_src>
import functools

import jax
import jax.numpy as jnp
from jax.experimental import pallas as pl
from jax.experimental.pallas import tpu as pltpu


# ----------------------------- Pallas kernel --------------------------------
def _fused_matmul_kernel(x_ref, w_ref, o_ref, acc_ref, *, act):
    """Accumulating (TM, TK) @ (TK, TN) matmul; activation on last K step."""
    k = pl.program_id(2)

    @pl.when(k == 0)
    def _():
        acc_ref[...] = jnp.zeros_like(acc_ref)

    acc_ref[...] += jnp.dot(x_ref[...], w_ref[...],
                            preferred_element_type=jnp.float32)

    @pl.when(k == pl.num_programs(2) - 1)
    def _():
        y = acc_ref[...]
        if act == "leaky":
            y = jnp.where(y >= 0.0, y, 0.2 * y)       # LeakyReLU(0.2)
        elif act == "sigmoid":
            y = jax.nn.sigmoid(y)
        o_ref[...] = y.astype(o_ref.dtype)


def _pick_tile(dim, cap, alignment):
    """Largest tile <= cap that divides `dim` and is a multiple of `alignment`;
    falls back to the full dim (a full-dim block is always legal)."""
    if dim <= cap:
        return dim
    t = cap
    while t >= alignment:
        if dim % t == 0 and t % alignment == 0:
            return t
        t -= alignment
    return dim


def fused_conv_matmul(patches, weight, act, out_dtype):
    """patches: (M, K) bf16, weight: (K, N) bf16 (spectral-norm & BN pre-folded)."""
    M, K = patches.shape
    _, N = weight.shape

    TM = _pick_tile(M, 256, 8)
    TN = _pick_tile(N, 256, 128)
    TK = _pick_tile(K, 1024, 128) if K > 1024 else K
    grid = (M // TM, N // TN, K // TK)

    return pl.pallas_call(
        functools.partial(_fused_matmul_kernel, act=act),
        out_shape=jax.ShapeDtypeStruct((M, N), out_dtype),
        grid_spec=pltpu.PrefetchScalarGridSpec(
            num_scalar_prefetch=0,
            grid=grid,
            in_specs=[
                pl.BlockSpec((TM, TK), lambda i, j, k: (i, k)),
                pl.BlockSpec((TK, TN), lambda i, j, k: (k, j)),
            ],
            out_specs=pl.BlockSpec((TM, TN), lambda i, j, k: (i, j)),
            scratch_shapes=[pltpu.VMEM((TM, TN), jnp.float32)],
        ),
        compiler_params=pltpu.CompilerParams(
            dimension_semantics=("parallel", "parallel", "arbitrary"),
        ),
    )(patches, weight)


# ------------------------------ glue (JAX) -----------------------------------
def im2col(x_nhwc, k, stride, pad):
    """x_nhwc: (B, H, W, C) -> (B*Ho*Wo, k*k*C), element order (kh, kw, c)."""
    B, H, W, C = x_nhwc.shape
    xp = jnp.pad(x_nhwc, ((0, 0), (pad, pad), (pad, pad), (0, 0)))
    Ho = (H + 2 * pad - k) // stride + 1
    Wo = (W + 2 * pad - k) // stride + 1
    pieces = []
    for di in range(k):
        for dj in range(k):
            pieces.append(
                xp[:, di:di + stride * Ho:stride, dj:dj + stride * Wo:stride, :]
            )
    p = jnp.stack(pieces, axis=3)              # (B, Ho, Wo, k*k, C)
    return p.reshape(B * Ho * Wo, k * k * C), Ho, Wo


def spectral_normalize(w_oikk, key):
    """w_oikk: (C_out, C_in, kH, kW). One power iteration (torch default)."""
    C_out = w_oikk.shape[0]
    w_mat = w_oikk.reshape(C_out, -1)
    u = jax.random.normal(key, (C_out,), jnp.float32)
    u = u / (jnp.linalg.norm(u) + 1e-12)
    v = w_mat.T @ u
    v = v / (jnp.linalg.norm(v) + 1e-12)
    u = w_mat @ v
    u = u / (jnp.linalg.norm(u) + 1e-12)
    sigma = u @ (w_mat @ v)
    return w_oikk / sigma


def conv_weight_to_km(w_oikk):
    """(C_out, C_in, kH, kW) -> (kH*kW*C_in, C_out) matching im2col order."""
    C_out = w_oikk.shape[0]
    w = jnp.transpose(w_oikk, (0, 2, 3, 1))    # (C_out, kH, kW, C_in)
    return w.reshape(C_out, -1).T              # (K, C_out)


def _forward(cfg, x_nchw, weights):
    """Full discriminator forward; meant to be jax.jit'ed once."""
    # NCHW -> NHWC once; keep inter-layer activations in bf16 (halves HBM traffic).
    x = jnp.transpose(x_nchw, (0, 2, 3, 1)).astype(jnp.bfloat16)
    B = x.shape[0]
    n_layers = len(cfg)
    for li, ((cin, cout, k, s, p, bn, act), w_km) in enumerate(zip(cfg, weights)):
        patches, Ho, Wo = im2col(x, k, s, p)
        out_dtype = jnp.float32 if li == n_layers - 1 else jnp.bfloat16
        y = fused_conv_matmul(patches, w_km, act, out_dtype)
        x = y.reshape(B, Ho, Wo, cout)
    # Flatten + view(-1, 1): last conv gives (B, 1, 1, 1)
    return x.reshape(-1, 1).astype(jnp.float32)


class DiscriminatorPallas:
    # (C_in, C_out, k, stride, pad, batchnorm, activation)
    CFG = (
        (3, 64, 4, 2, 1, False, "leaky"),
        (64, 128, 4, 2, 1, True, "leaky"),
        (128, 256, 4, 2, 1, True, "leaky"),
        (256, 512, 4, 2, 1, True, "leaky"),
        (512, 1, 4, 1, 0, False, "sigmoid"),
    )
    BN_EPS = 1e-5

    def __init__(self, key):
        ws = []
        bn_scale = 1.0 / float(jnp.sqrt(jnp.float32(1.0 + self.BN_EPS)))
        for li, (cin, cout, k, _, _, bn, _) in enumerate(self.CFG):
            kw, ku = jax.random.split(jax.random.fold_in(key, li))
            w = 0.02 * jax.random.normal(kw, (cout, cin, k, k), jnp.float32)
            w = spectral_normalize(w, ku)
            w_km = conv_weight_to_km(w)                      # (K, C_out) f32
            if bn:
                # eval-mode BN with default params folds to a pure per-channel scale
                w_km = w_km * bn_scale
            ws.append(w_km.astype(jnp.bfloat16))
        self.weights = tuple(ws)
        self._jit_forward = jax.jit(functools.partial(_forward, self.CFG))

    def __call__(self, x_nchw):
        return self._jit_forward(x_nchw, self.weights)


if __name__ == "__main__":
    key = jax.random.PRNGKey(0)
    k_params, k_input = jax.random.split(key)

    model = DiscriminatorPallas(k_params)

    # Smallest spatial size the architecture supports (final 4x4 valid conv): 64.
    x = jax.random.normal(k_input, (2, 3, 64, 64), jnp.float32)  # NCHW like PyTorch

    out = jax.block_until_ready(model(x))

    assert out.shape == (2, 1), out.shape
    assert bool(jnp.all(jnp.isfinite(out)))
    assert bool(jnp.all((out >= 0.0) & (out <= 1.0)))
    print("KERNEL_OK")
</pallas_src>

<mosaic_0001>
module attributes {stable_mosaic.version = 11 : i64} {
  func.func @_fused_matmul_kernel(%arg0: i32, %arg1: i32, %arg2: i32, %arg3: memref<256x48xbf16, #tpu.memory_space<vmem>>, %arg4: memref<48x64xbf16, #tpu.memory_space<vmem>>, %arg5: memref<256x64xbf16, #tpu.memory_space<vmem>>, %arg6: memref<256x64xf32, #tpu.memory_space<vmem>>) attributes {dimension_semantics = [#tpu.dimension_semantics<parallel>, #tpu.dimension_semantics<parallel>, #tpu.dimension_semantics<arbitrary>], iteration_bounds = array<i64: 8, 1, 1>, scalar_prefetch = 0 : i64, scratch_operands = 1 : i64, tpu.core_type = #tpu.core_type<tc>, window_params = [{transform_indices = @transform_0, window_bounds = array<i64: 256, 48>}, {transform_indices = @transform_1, window_bounds = array<i64: 48, 64>}, {transform_indices = @transform_2, window_bounds = array<i64: 256, 64>}]} {
    %c0_i32 = arith.constant 0 : i32
    %0 = arith.cmpi eq, %arg2, %c0_i32 : i32
    %1 = arith.extui %0 : i1 to i32
    %c0_i32_0 = arith.constant 0 : i32
    %2 = arith.cmpi ne, %1, %c0_i32_0 : i32
    scf.if %2 {
      %cst_10 = arith.constant 0.000000e+00 : f32
      %12 = vector.broadcast %cst_10 : f32 to vector<256x64xf32>
      %c0_11 = arith.constant 0 : index
      %c0_12 = arith.constant 0 : index
      %13 = vector.load %arg6[%c0_11, %c0_12] : memref<256x64xf32, #tpu.memory_space<vmem>>, vector<256x64xf32>
      tpu.vector_store %arg6[%c0_11, %c0_12], %12 {strides = array<i32>} : memref<256x64xf32, #tpu.memory_space<vmem>>, vector<256x64xf32>,
    } else {
    }
    %c0 = arith.constant 0 : index
    %c0_1 = arith.constant 0 : index
    %3 = vector.load %arg6[%c0, %c0_1] : memref<256x64xf32, #tpu.memory_space<vmem>>, vector<256x64xf32>
    %c0_2 = arith.constant 0 : index
    %c0_3 = arith.constant 0 : index
    %4 = vector.load %arg3[%c0_2, %c0_3] : memref<256x48xbf16, #tpu.memory_space<vmem>>, vector<256x48xbf16>
    %c0_4 = arith.constant 0 : index
    %c0_5 = arith.constant 0 : index
    %5 = vector.load %arg4[%c0_4, %c0_5] : memref<48x64xbf16, #tpu.memory_space<vmem>>, vector<48x64xbf16>
    %cst = arith.constant dense<0.000000e+00> : vector<256x64xf32>
    %6 = tpu.matmul %4, %5, %cst {dimension_numbers = #tpu.dot_dimension_numbers<[1], [0], [0], [1], [0, 0, 1, 1], [], []>} : vector<256x48xbf16>, vector<48x64xbf16>, vector<256x64xf32> -> vector<256x64xf32>
    %7 = arith.addf %3, %6 : vector<256x64xf32>
    %c0_6 = arith.constant 0 : index
    %c0_7 = arith.constant 0 : index
    %8 = vector.load %arg6[%c0_6, %c0_7] : memref<256x64xf32, #tpu.memory_space<vmem>>, vector<256x64xf32>
    tpu.vector_store %arg6[%c0_6, %c0_7], %7 {strides = array<i32>} : memref<256x64xf32, #tpu.memory_space<vmem>>, vector<256x64xf32>,
    %c0_i32_8 = arith.constant 0 : i32
    %9 = arith.cmpi eq, %arg2, %c0_i32_8 : i32
    %10 = arith.extui %9 : i1 to i32
    %c0_i32_9 = arith.constant 0 : i32
    %11 = arith.cmpi ne, %10, %c0_i32_9 : i32
    scf.if %11 {
      %c0_10 = arith.constant 0 : index
      %c0_11 = arith.constant 0 : index
      %12 = vector.load %arg6[%c0_10, %c0_11] : memref<256x64xf32, #tpu.memory_space<vmem>>, vector<256x64xf32>
      %cst_12 = arith.constant 0.000000e+00 : f32
      %13 = vector.broadcast %cst_12 : f32 to vector<256x64xf32>
      %14 = arith.cmpf oge, %12, %13 : vector<256x64xf32>
      %cst_13 = arith.constant 2.000000e-01 : f32
      %15 = vector.broadcast %cst_13 : f32 to vector<256x64xf32>
      %16 = arith.mulf %15, %12 : vector<256x64xf32>
      %17 = arith.select %14, %12, %16 : vector<256x64xi1>, vector<256x64xf32>
      %18 = arith.truncf %17 : vector<256x64xf32> to vector<256x64xbf16>
      %c0_14 = arith.constant 0 : index
      %c0_15 = arith.constant 0 : index
      %19 = vector.load %arg5[%c0_14, %c0_15] : memref<256x64xbf16, #tpu.memory_space<vmem>>, vector<256x64xbf16>
      tpu.vector_store %arg5[%c0_14, %c0_15], %18 {strides = array<i32>} : memref<256x64xbf16, #tpu.memory_space<vmem>>, vector<256x64xbf16>,
    } else {
    }
    return
  }
  func.func @transform_0(%arg0: i32, %arg1: i32, %arg2: i32) -> (i32, i32) {
    %c0_i32 = arith.constant 0 : i32
    return %arg0, %arg2 : i32, i32
  }
  func.func @transform_1(%arg0: i32, %arg1: i32, %arg2: i32) -> (i32, i32) {
    %c0_i32 = arith.constant 0 : i32
    return %arg2, %arg1 : i32, i32
  }
  func.func @transform_2(%arg0: i32, %arg1: i32, %arg2: i32) -> (i32, i32) {
    %c0_i32 = arith.constant 0 : i32
    return %arg0, %arg1 : i32, i32
  }
}

module attributes {stable_mosaic.version = 11 : i64} {
  func.func @_fused_matmul_kernel(%arg0: i32, %arg1: i32, %arg2: i32, %arg3: memref<256x1024xbf16, #tpu.memory_space<vmem>>, %arg4: memref<1024x128xbf16, #tpu.memory_space<vmem>>, %arg5: memref<256x128xbf16, #tpu.memory_space<vmem>>, %arg6: memref<256x128xf32, #tpu.memory_space<vmem>>) attributes {dimension_semantics = [#tpu.dimension_semantics<parallel>, #tpu.dimension_semantics<parallel>, #tpu.dimension_semantics<arbitrary>], iteration_bounds = array<i64: 2, 1, 1>, scalar_prefetch = 0 : i64, scratch_operands = 1 : i64, tpu.core_type = #tpu.core_type<tc>, window_params = [{transform_indices = @transform_0, window_bounds = array<i64: 256, 1024>}, {transform_indices = @transform_1, window_bounds = array<i64: 1024, 128>}, {transform_indices = @transform_2, window_bounds = array<i64: 256, 128>}]} {
    %c0_i32 = arith.constant 0 : i32
    %0 = arith.cmpi eq, %arg2, %c0_i32 : i32
    %1 = arith.extui %0 : i1 to i32
    %c0_i32_0 = arith.constant 0 : i32
    %2 = arith.cmpi ne, %1, %c0_i32_0 : i32
    scf.if %2 {
      %cst_10 = arith.constant 0.000000e+00 : f32
      %12 = vector.broadcast %cst_10 : f32 to vector<256x128xf32>
      %c0_11 = arith.constant 0 : index
      %c0_12 = arith.constant 0 : index
      %13 = vector.load %arg6[%c0_11, %c0_12] : memref<256x128xf32, #tpu.memory_space<vmem>>, vector<256x128xf32>
      tpu.vector_store %arg6[%c0_11, %c0_12], %12 {strides = array<i32>} : memref<256x128xf32, #tpu.memory_space<vmem>>, vector<256x128xf32>,
    } else {
    }
    %c0 = arith.constant 0 : index
    %c0_1 = arith.constant 0 : index
    %3 = vector.load %arg6[%c0, %c0_1] : memref<256x128xf32, #tpu.memory_space<vmem>>, vector<256x128xf32>
    %c0_2 = arith.constant 0 : index
    %c0_3 = arith.constant 0 : index
    %4 = vector.load %arg3[%c0_2, %c0_3] : memref<256x1024xbf16, #tpu.memory_space<vmem>>, vector<256x1024xbf16>
    %c0_4 = arith.constant 0 : index
    %c0_5 = arith.constant 0 : index
    %5 = vector.load %arg4[%c0_4, %c0_5] : memref<1024x128xbf16, #tpu.memory_space<vmem>>, vector<1024x128xbf16>
    %cst = arith.constant dense<0.000000e+00> : vector<256x128xf32>
    %6 = tpu.matmul %4, %5, %cst {dimension_numbers = #tpu.dot_dimension_numbers<[1], [0], [0], [1], [0, 0, 1, 1], [], []>} : vector<256x1024xbf16>, vector<1024x128xbf16>, vector<256x128xf32> -> vector<256x128xf32>
    %7 = arith.addf %3, %6 : vector<256x128xf32>
    %c0_6 = arith.constant 0 : index
    %c0_7 = arith.constant 0 : index
    %8 = vector.load %arg6[%c0_6, %c0_7] : memref<256x128xf32, #tpu.memory_space<vmem>>, vector<256x128xf32>
    tpu.vector_store %arg6[%c0_6, %c0_7], %7 {strides = array<i32>} : memref<256x128xf32, #tpu.memory_space<vmem>>, vector<256x128xf32>,
    %c0_i32_8 = arith.constant 0 : i32
    %9 = arith.cmpi eq, %arg2, %c0_i32_8 : i32
    %10 = arith.extui %9 : i1 to i32
    %c0_i32_9 = arith.constant 0 : i32
    %11 = arith.cmpi ne, %10, %c0_i32_9 : i32
    scf.if %11 {
      %c0_10 = arith.constant 0 : index
      %c0_11 = arith.constant 0 : index
      %12 = vector.load %arg6[%c0_10, %c0_11] : memref<256x128xf32, #tpu.memory_space<vmem>>, vector<256x128xf32>
      %cst_12 = arith.constant 0.000000e+00 : f32
      %13 = vector.broadcast %cst_12 : f32 to vector<256x128xf32>
      %14 = arith.cmpf oge, %12, %13 : vector<256x128xf32>
      %cst_13 = arith.constant 2.000000e-01 : f32
      %15 = vector.broadcast %cst_13 : f32 to vector<256x128xf32>
      %16 = arith.mulf %15, %12 : vector<256x128xf32>
      %17 = arith.select %14, %12, %16 : vector<256x128xi1>, vector<256x128xf32>
      %18 = arith.truncf %17 : vector<256x128xf32> to vector<256x128xbf16>
      %c0_14 = arith.constant 0 : index
      %c0_15 = arith.constant 0 : index
      %19 = vector.load %arg5[%c0_14, %c0_15] : memref<256x128xbf16, #tpu.memory_space<vmem>>, vector<256x128xbf16>
      tpu.vector_store %arg5[%c0_14, %c0_15], %18 {strides = array<i32>} : memref<256x128xbf16, #tpu.memory_space<vmem>>, vector<256x128xbf16>,
    } else {
    }
    return
  }
  func.func @transform_0(%arg0: i32, %arg1: i32, %arg2: i32) -> (i32, i32) {
    %c0_i32 = arith.constant 0 : i32
    return %arg0, %arg2 : i32, i32
  }
  func.func @transform_1(%arg0: i32, %arg1: i32, %arg2: i32) -> (i32, i32) {
    %c0_i32 = arith.constant 0 : i32
    return %arg2, %arg1 : i32, i32
  }
  func.func @transform_2(%arg0: i32, %arg1: i32, %arg2: i32) -> (i32, i32) {
    %c0_i32 = arith.constant 0 : i32
    return %arg0, %arg1 : i32, i32
  }
}

module attributes {stable_mosaic.version = 11 : i64} {
  func.func @_fused_matmul_kernel(%arg0: i32, %arg1: i32, %arg2: i32, %arg3: memref<128x1024xbf16, #tpu.memory_space<vmem>>, %arg4: memref<1024x256xbf16, #tpu.memory_space<vmem>>, %arg5: memref<128x256xbf16, #tpu.memory_space<vmem>>, %arg6: memref<128x256xf32, #tpu.memory_space<vmem>>) attributes {dimension_semantics = [#tpu.dimension_semantics<parallel>, #tpu.dimension_semantics<parallel>, #tpu.dimension_semantics<arbitrary>], iteration_bounds = array<i64: 1, 1, 2>, scalar_prefetch = 0 : i64, scratch_operands = 1 : i64, tpu.core_type = #tpu.core_type<tc>, window_params = [{transform_indices = @transform_0, window_bounds = array<i64: 128, 1024>}, {transform_indices = @transform_1, window_bounds = array<i64: 1024, 256>}, {transform_indices = @transform_2, window_bounds = array<i64: 128, 256>}]} {
    %c0_i32 = arith.constant 0 : i32
    %0 = arith.cmpi eq, %arg2, %c0_i32 : i32
    %1 = arith.extui %0 : i1 to i32
    %c0_i32_0 = arith.constant 0 : i32
    %2 = arith.cmpi ne, %1, %c0_i32_0 : i32
    scf.if %2 {
      %cst_9 = arith.constant 0.000000e+00 : f32
      %12 = vector.broadcast %cst_9 : f32 to vector<128x256xf32>
      %c0_10 = arith.constant 0 : index
      %c0_11 = arith.constant 0 : index
      %13 = vector.load %arg6[%c0_10, %c0_11] : memref<128x256xf32, #tpu.memory_space<vmem>>, vector<128x256xf32>
      tpu.vector_store %arg6[%c0_10, %c0_11], %12 {strides = array<i32>} : memref<128x256xf32, #tpu.memory_space<vmem>>, vector<128x256xf32>,
    } else {
    }
    %c0 = arith.constant 0 : index
    %c0_1 = arith.constant 0 : index
    %3 = vector.load %arg6[%c0, %c0_1] : memref<128x256xf32, #tpu.memory_space<vmem>>, vector<128x256xf32>
    %c0_2 = arith.constant 0 : index
    %c0_3 = arith.constant 0 : index
    %4 = vector.load %arg3[%c0_2, %c0_3] : memref<128x1024xbf16, #tpu.memory_space<vmem>>, vector<128x1024xbf16>
    %c0_4 = arith.constant 0 : index
    %c0_5 = arith.constant 0 : index
    %5 = vector.load %arg4[%c0_4, %c0_5] : memref<1024x256xbf16, #tpu.memory_space<vmem>>, vector<1024x256xbf16>
    %cst = arith.constant dense<0.000000e+00> : vector<128x256xf32>
    %6 = tpu.matmul %4, %5, %cst {dimension_numbers = #tpu.dot_dimension_numbers<[1], [0], [0], [1], [0, 0, 1, 1], [], []>} : vector<128x1024xbf16>, vector<1024x256xbf16>, vector<128x256xf32> -> vector<128x256xf32>
    %7 = arith.addf %3, %6 : vector<128x256xf32>
    %c0_6 = arith.constant 0 : index
    %c0_7 = arith.constant 0 : index
    %8 = vector.load %arg6[%c0_6, %c0_7] : memref<128x256xf32, #tpu.memory_space<vmem>>, vector<128x256xf32>
    tpu.vector_store %arg6[%c0_6, %c0_7], %7 {strides = array<i32>} : memref<128x256xf32, #tpu.memory_space<vmem>>, vector<128x256xf32>,
    %c1_i32 = arith.constant 1 : i32
    %9 = arith.cmpi eq, %arg2, %c1_i32 : i32
    %10 = arith.extui %9 : i1 to i32
    %c0_i32_8 = arith.constant 0 : i32
    %11 = arith.cmpi ne, %10, %c0_i32_8 : i32
    scf.if %11 {
      %c0_9 = arith.constant 0 : index
      %c0_10 = arith.constant 0 : index
      %12 = vector.load %arg6[%c0_9, %c0_10] : memref<128x256xf32, #tpu.memory_space<vmem>>, vector<128x256xf32>
      %cst_11 = arith.constant 0.000000e+00 : f32
      %13 = vector.broadcast %cst_11 : f32 to vector<128x256xf32>
      %14 = arith.cmpf oge, %12, %13 : vector<128x256xf32>
      %cst_12 = arith.constant 2.000000e-01 : f32
      %15 = vector.broadcast %cst_12 : f32 to vector<128x256xf32>
      %16 = arith.mulf %15, %12 : vector<128x256xf32>
      %17 = arith.select %14, %12, %16 : vector<128x256xi1>, vector<128x256xf32>
      %18 = arith.truncf %17 : vector<128x256xf32> to vector<128x256xbf16>
      %c0_13 = arith.constant 0 : index
      %c0_14 = arith.constant 0 : index
      %19 = vector.load %arg5[%c0_13, %c0_14] : memref<128x256xbf16, #tpu.memory_space<vmem>>, vector<128x256xbf16>
      tpu.vector_store %arg5[%c0_13, %c0_14], %18 {strides = array<i32>} : memref<128x256xbf16, #tpu.memory_space<vmem>>, vector<128x256xbf16>,
    } else {
    }
    return
  }
  func.func @transform_0(%arg0: i32, %arg1: i32, %arg2: i32) -> (i32, i32) {
    %c0_i32 = arith.constant 0 : i32
    return %arg0, %arg2 : i32, i32
  }
  func.func @transform_1(%arg0: i32, %arg1: i32, %arg2: i32) -> (i32, i32) {
    %c0_i32 = arith.constant 0 : i32
    return %arg2, %arg1 : i32, i32
  }
  func.func @transform_2(%arg0: i32, %arg1: i32, %arg2: i32) -> (i32, i32) {
    %c0_i32 = arith.constant 0 : i32
    return %arg0, %arg1 : i32, i32
  }
}

module attributes {stable_mosaic.version = 11 : i64} {
  func.func @_fused_matmul_kernel(%arg0: i32, %arg1: i32, %arg2: i32, %arg3: memref<32x1024xbf16, #tpu.memory_space<vmem>>, %arg4: memref<1024x256xbf16, #tpu.memory_space<vmem>>, %arg5: memref<32x256xbf16, #tpu.memory_space<vmem>>, %arg6: memref<32x256xf32, #tpu.memory_space<vmem>>) attributes {dimension_semantics = [#tpu.dimension_semantics<parallel>, #tpu.dimension_semantics<parallel>, #tpu.dimension_semantics<arbitrary>], iteration_bounds = array<i64: 1, 2, 4>, scalar_prefetch = 0 : i64, scratch_operands = 1 : i64, tpu.core_type = #tpu.core_type<tc>, window_params = [{transform_indices = @transform_0, window_bounds = array<i64: 32, 1024>}, {transform_indices = @transform_1, window_bounds = array<i64: 1024, 256>}, {transform_indices = @transform_2, window_bounds = array<i64: 32, 256>}]} {
    %c0_i32 = arith.constant 0 : i32
    %0 = arith.cmpi eq, %arg2, %c0_i32 : i32
    %1 = arith.extui %0 : i1 to i32
    %c0_i32_0 = arith.constant 0 : i32
    %2 = arith.cmpi ne, %1, %c0_i32_0 : i32
    scf.if %2 {
      %cst_9 = arith.constant 0.000000e+00 : f32
      %12 = vector.broadcast %cst_9 : f32 to vector<32x256xf32>
      %c0_10 = arith.constant 0 : index
      %c0_11 = arith.constant 0 : index
      %13 = vector.load %arg6[%c0_10, %c0_11] : memref<32x256xf32, #tpu.memory_space<vmem>>, vector<32x256xf32>
      tpu.vector_store %arg6[%c0_10, %c0_11], %12 {strides = array<i32>} : memref<32x256xf32, #tpu.memory_space<vmem>>, vector<32x256xf32>,
    } else {
    }
    %c0 = arith.constant 0 : index
    %c0_1 = arith.constant 0 : index
    %3 = vector.load %arg6[%c0, %c0_1] : memref<32x256xf32, #tpu.memory_space<vmem>>, vector<32x256xf32>
    %c0_2 = arith.constant 0 : index
    %c0_3 = arith.constant 0 : index
    %4 = vector.load %arg3[%c0_2, %c0_3] : memref<32x1024xbf16, #tpu.memory_space<vmem>>, vector<32x1024xbf16>
    %c0_4 = arith.constant 0 : index
    %c0_5 = arith.constant 0 : index
    %5 = vector.load %arg4[%c0_4, %c0_5] : memref<1024x256xbf16, #tpu.memory_space<vmem>>, vector<1024x256xbf16>
    %cst = arith.constant dense<0.000000e+00> : vector<32x256xf32>
    %6 = tpu.matmul %4, %5, %cst {dimension_numbers = #tpu.dot_dimension_numbers<[1], [0], [0], [1], [0, 0, 1, 1], [], []>} : vector<32x1024xbf16>, vector<1024x256xbf16>, vector<32x256xf32> -> vector<32x256xf32>
    %7 = arith.addf %3, %6 : vector<32x256xf32>
    %c0_6 = arith.constant 0 : index
    %c0_7 = arith.constant 0 : index
    %8 = vector.load %arg6[%c0_6, %c0_7] : memref<32x256xf32, #tpu.memory_space<vmem>>, vector<32x256xf32>
    tpu.vector_store %arg6[%c0_6, %c0_7], %7 {strides = array<i32>} : memref<32x256xf32, #tpu.memory_space<vmem>>, vector<32x256xf32>,
    %c3_i32 = arith.constant 3 : i32
    %9 = arith.cmpi eq, %arg2, %c3_i32 : i32
    %10 = arith.extui %9 : i1 to i32
    %c0_i32_8 = arith.constant 0 : i32
    %11 = arith.cmpi ne, %10, %c0_i32_8 : i32
    scf.if %11 {
      %c0_9 = arith.constant 0 : index
      %c0_10 = arith.constant 0 : index
      %12 = vector.load %arg6[%c0_9, %c0_10] : memref<32x256xf32, #tpu.memory_space<vmem>>, vector<32x256xf32>
      %cst_11 = arith.constant 0.000000e+00 : f32
      %13 = vector.broadcast %cst_11 : f32 to vector<32x256xf32>
      %14 = arith.cmpf oge, %12, %13 : vector<32x256xf32>
      %cst_12 = arith.constant 2.000000e-01 : f32
      %15 = vector.broadcast %cst_12 : f32 to vector<32x256xf32>
      %16 = arith.mulf %15, %12 : vector<32x256xf32>
      %17 = arith.select %14, %12, %16 : vector<32x256xi1>, vector<32x256xf32>
      %18 = arith.truncf %17 : vector<32x256xf32> to vector<32x256xbf16>
      %c0_13 = arith.constant 0 : index
      %c0_14 = arith.constant 0 : index
      %19 = vector.load %arg5[%c0_13, %c0_14] : memref<32x256xbf16, #tpu.memory_space<vmem>>, vector<32x256xbf16>
      tpu.vector_store %arg5[%c0_13, %c0_14], %18 {strides = array<i32>} : memref<32x256xbf16, #tpu.memory_space<vmem>>, vector<32x256xbf16>,
    } else {
    }
    return
  }
  func.func @transform_0(%arg0: i32, %arg1: i32, %arg2: i32) -> (i32, i32) {
    %c0_i32 = arith.constant 0 : i32
    return %arg0, %arg2 : i32, i32
  }
  func.func @transform_1(%arg0: i32, %arg1: i32, %arg2: i32) -> (i32, i32) {
    %c0_i32 = arith.constant 0 : i32
    return %arg2, %arg1 : i32, i32
  }
  func.func @transform_2(%arg0: i32, %arg1: i32, %arg2: i32) -> (i32, i32) {
    %c0_i32 = arith.constant 0 : i32
    return %arg0, %arg1 : i32, i32
  }
}

module attributes {stable_mosaic.version = 11 : i64} {
  func.func @_fused_matmul_kernel(%arg0: i32, %arg1: i32, %arg2: i32, %arg3: memref<2x1024xbf16, #tpu.memory_space<vmem>>, %arg4: memref<1024x1xbf16, #tpu.memory_space<vmem>>, %arg5: memref<2x1xf32, #tpu.memory_space<vmem>>, %arg6: memref<2x1xf32, #tpu.memory_space<vmem>>) attributes {dimension_semantics = [#tpu.dimension_semantics<parallel>, #tpu.dimension_semantics<parallel>, #tpu.dimension_semantics<arbitrary>], iteration_bounds = array<i64: 1, 1, 8>, scalar_prefetch = 0 : i64, scratch_operands = 1 : i64, tpu.core_type = #tpu.core_type<tc>, window_params = [{transform_indices = @transform_0, window_bounds = array<i64: 2, 1024>}, {transform_indices = @transform_1, window_bounds = array<i64: 1024, 1>}, {transform_indices = @transform_2, window_bounds = array<i64: 2, 1>}]} {
    %c0_i32 = arith.constant 0 : i32
    %0 = arith.cmpi eq, %arg2, %c0_i32 : i32
    %1 = arith.extui %0 : i1 to i32
    %c0_i32_0 = arith.constant 0 : i32
    %2 = arith.cmpi ne, %1, %c0_i32_0 : i32
    scf.if %2 {
      %cst_9 = arith.constant 0.000000e+00 : f32
      %12 = vector.broadcast %cst_9 : f32 to vector<2x1xf32>
      %c0_10 = arith.constant 0 : index
      %c0_11 = arith.constant 0 : index
      %13 = vector.load %arg6[%c0_10, %c0_11] : memref<2x1xf32, #tpu.memory_space<vmem>>, vector<2x1xf32>
      tpu.vector_store %arg6[%c0_10, %c0_11], %12 {strides = array<i32>} : memref<2x1xf32, #tpu.memory_space<vmem>>, vector<2x1xf32>,
    } else {
    }
    %c0 = arith.constant 0 : index
    %c0_1 = arith.constant 0 : index
    %3 = vector.load %arg6[%c0, %c0_1] : memref<2x1xf32, #tpu.memory_space<vmem>>, vector<2x1xf32>
    %c0_2 = arith.constant 0 : index
    %c0_3 = arith.constant 0 : index
    %4 = vector.load %arg3[%c0_2, %c0_3] : memref<2x1024xbf16, #tpu.memory_space<vmem>>, vector<2x1024xbf16>
    %c0_4 = arith.constant 0 : index
    %c0_5 = arith.constant 0 : index
    %5 = vector.load %arg4[%c0_4, %c0_5] : memref<1024x1xbf16, #tpu.memory_space<vmem>>, vector<1024x1xbf16>
    %cst = arith.constant dense<0.000000e+00> : vector<2x1xf32>
    %6 = tpu.matmul %4, %5, %cst {dimension_numbers = #tpu.dot_dimension_numbers<[1], [0], [0], [1], [0, 0, 1, 1], [], []>} : vector<2x1024xbf16>, vector<1024x1xbf16>, vector<2x1xf32> -> vector<2x1xf32>
    %7 = arith.addf %3, %6 : vector<2x1xf32>
    %c0_6 = arith.constant 0 : index
    %c0_7 = arith.constant 0 : index
    %8 = vector.load %arg6[%c0_6, %c0_7] : memref<2x1xf32, #tpu.memory_space<vmem>>, vector<2x1xf32>
    tpu.vector_store %arg6[%c0_6, %c0_7], %7 {strides = array<i32>} : memref<2x1xf32, #tpu.memory_space<vmem>>, vector<2x1xf32>,
    %c7_i32 = arith.constant 7 : i32
    %9 = arith.cmpi eq, %arg2, %c7_i32 : i32
    %10 = arith.extui %9 : i1 to i32
    %c0_i32_8 = arith.constant 0 : i32
    %11 = arith.cmpi ne, %10, %c0_i32_8 : i32
    scf.if %11 {
      %c0_9 = arith.constant 0 : index
      %c0_10 = arith.constant 0 : index
      %12 = vector.load %arg6[%c0_9, %c0_10] : memref<2x1xf32, #tpu.memory_space<vmem>>, vector<2x1xf32>
      %13 = arith.negf %12 : vector<2x1xf32>
      %14 = math.exp %13 : vector<2x1xf32>
      %cst_11 = arith.constant 1.000000e+00 : f32
      %15 = vector.broadcast %cst_11 : f32 to vector<2x1xf32>
      %16 = arith.addf %15, %14 : vector<2x1xf32>
      %17 = arith.divf %15, %16 : vector<2x1xf32>
      %c0_12 = arith.constant 0 : index
      %c0_13 = arith.constant 0 : index
      %18 = vector.load %arg5[%c0_12, %c0_13] : memref<2x1xf32, #tpu.memory_space<vmem>>, vector<2x1xf32>
      tpu.vector_store %arg5[%c0_12, %c0_13], %17 {strides = array<i32>} : memref<2x1xf32, #tpu.memory_space<vmem>>, vector<2x1xf32>,
    } else {
    }
    return
  }
  func.func @transform_0(%arg0: i32, %arg1: i32, %arg2: i32) -> (i32, i32) {
    %c0_i32 = arith.constant 0 : i32
    return %arg0, %arg2 : i32, i32
  }
  func.func @transform_1(%arg0: i32, %arg1: i32, %arg2: i32) -> (i32, i32) {
    %c0_i32 = arith.constant 0 : i32
    return %arg2, %arg1 : i32, i32
  }
  func.func @transform_2(%arg0: i32, %arg1: i32, %arg2: i32) -> (i32, i32) {
    %c0_i32 = arith.constant 0 : i32
    return %arg0, %arg1 : i32, i32
  }
}

</mosaic_0001>

<bundles_post_ra>
// kernel: _forward.5
= control target key start
LH: loop header
LB: loop body
LE: loop exit
PB: predicated region body
PF: predicated region fallthrough
CT: control target
= control target key end

     0   :  { %s1348_s9 = smov 0   ;;  %s1350_s10 = smov 0   ;;  %s1581_s0 = inlined_call_operand.vmem [shape: bf16[2048,48], index: 0, kind: input, shape index: {}]   ;;  %s1582_s1 = inlined_call_operand.vmem [shape: bf16[48,64], index: 1, kind: input, shape index: {}]   ;;  %s1583_s2 = inlined_call_operand.vmem [shape: bf16[2048,64], index: 2, kind: output, shape index: {}]  }
   0x1   :  { %s1352_s11 = smov 0  }
   0x2 LB: > { %s31_s12 = sadd.s32 1, %s1326_s10  ;;  %p1095_p0 = scmp.ge.s32.totalorder %s1330_s11, 1  ;;  %s1330_s11 = sphi %s1352_s11, %s12_s11   ;;  %s1326_s10 = sphi %s1350_s10, %s1585_s10   ;;  %s1322_s9 = sphi %s1348_s9, %s1584_s9  }
   0x3   : > { %p33_p1 = scmp.ge.s32.totalorder %s31_s12, 8  ;;  %p155_p2 = scmp.lt.s32.totalorder %s1330_s11, 9 }
   0x5   : > { %s1587_s12 = smov (%p33_p1, %s31_s12), 0  ;;  %p156_p3 = pnand %p1095_p0, %p155_p2 }
   0x6   : > { %s1096_s15 = sshll.u32 (!%p156_p3), %s1322_s9, 5 }
   0x7   : > { %159 = sbr.rel (%p156_p3) target bundleno = 273 (0x111), region = 28  ;;  %p192_p4 = scmp.lt.s32.totalorder (!%p156_p3), %s1096_s15, 255 }
   0xc   : > { %v1289_v0 = vld [vmem:[%s1582_s1 + $0x10] sm:$0xff]   ;;  %v1290_v1 = vld [vmem:[%s1582_s1 + $0x8] sm:$0xff]   ;;  %s1589_s15 = smov (!%p192_p4, %s1096_s15), 255  ;;  %vm223_vm0 = vcmask 523264   ;;  %v1291_v2 = vld [vmem:[%s1582_s1] sm:$0xff]   ;;  %v1332_v3 = vmov 0.0  }
   0xd   : > { %1220 = vmatprep.subr.bf16.mxu0 %v1289_v0  ;;  %1258 = vmatprep.subr.bf16.mxu1 %v1289_v0  ;;  %226 = vst.msk [vmem:[#allocation2 + $0x10] sm:$0xff] %vm223_vm0, %v1332_v3  ;;  %224 = vst.msk [vmem:[#allocation2] sm:$0xff] %vm223_vm0, %v1332_v3  ;;  %s1097_s20 = sshll.u32 %s1589_s15, 2  ;;  %vm424_vm1 = vcmask 392192   ;;  %vm958_vm4 = vcmask 519168  }
   0xe   : > { %1221 = vmatpush3.bf16.msra.mxu0 %v1289_v0  ;;  %1261 = vmatpush3.bf16.msra.mxu1 %v1289_v0  ;;  %225 = vst.msk [vmem:[#allocation2 + $0x8] sm:$0xff] %vm223_vm0, %v1332_v3  ;;  %227 = vst.msk [vmem:[#allocation2 + $0x18] sm:$0xff] %vm223_vm0, %v1332_v3  ;;  %s1415_s23 = scalar_lea.vmem %s1581_s0, %s1097_s20  ;;  %s1466_s26 = scalar_lea.vmem %s1583_s2, %s1097_s20 }
   0xf   : > { %1222 = vmatprep.subr.bf16.mxu0 %v1290_v1  ;;  %1259 = vmatprep.subr.bf16.mxu1 %v1290_v1  ;;  %228 = vst.msk [vmem:[#allocation2 + $0x20] sm:$0xff] %vm223_vm0, %v1332_v3  ;;  %229 = vst.msk [vmem:[#allocation2 + $0x28] sm:$0xff] %vm223_vm0, %v1332_v3  ;;  %v1292_v4 = vld [vmem:[%s1415_s23] sm:$0xff]   ;;  %v1294_v6 = vld [vmem:[%s1415_s23 + $0x8] sm:$0xff]  }
  0x10   : > { %230 = vst.msk [vmem:[#allocation2 + $0x30] sm:$0xff] %vm223_vm0, %v1332_v3  ;;  %231 = vst.msk [vmem:[#allocation2 + $0x38] sm:$0xff] %vm223_vm0, %v1332_v3  ;;  %v1293_v5 = vld [vmem:[%s1415_s23 + $0x40] sm:$0xff]   ;;  %1226 = vmatprep.mubr.msk.bf16.mxu0 %vm424_vm1, %v1292_v4  ;;  %v1295_v7 = vld [vmem:[%s1415_s23 + $0x48] sm:$0xff]  }
  0x11   : > { %232 = vst.msk [vmem:[#allocation2 + $0x40] sm:$0xff] %vm223_vm0, %v1332_v3  ;;  %233 = vst.msk [vmem:[#allocation2 + $0x48] sm:$0xff] %vm223_vm0, %v1332_v3  ;;  %1242 = vmatprep.mubr.msk.bf16.mxu1 %vm424_vm1, %v1293_v5  ;;  %v1296_v8 = vld [vmem:[%s1415_s23 + $0x10] sm:$0xff]   ;;  %v1298_v10 = vld [vmem:[%s1415_s23 + $0x18] sm:$0xff]  }
  0x12   : > { %234 = vst.msk [vmem:[#allocation2 + $0x50] sm:$0xff] %vm223_vm0, %v1332_v3  ;;  %235 = vst.msk [vmem:[#allocation2 + $0x58] sm:$0xff] %vm223_vm0, %v1332_v3  ;;  %1223 = vmatpush3.bf16.msra.mxu0 %v1290_v1  ;;  %1262 = vmatpush3.bf16.msra.mxu1 %v1290_v1  ;;  %v1297_v9 = vld [vmem:[%s1415_s23 + $0x50] sm:$0xff]   ;;  %v1299_v11 = vld [vmem:[%s1415_s23 + $0x58] sm:$0xff]  }
  0x13   : > { %236 = vst.msk [vmem:[#allocation2 + $0x60] sm:$0xff] %vm223_vm0, %v1332_v3  ;;  %237 = vst.msk [vmem:[#allocation2 + $0x68] sm:$0xff] %vm223_vm0, %v1332_v3  ;;  %1224 = vmatprep.subr.bf16.mxu0 %v1291_v2  ;;  %1260 = vmatprep.subr.bf16.mxu1 %v1291_v2  ;;  %v1300_v12 = vld [vmem:[%s1415_s23 + $0x20] sm:$0xff]   ;;  %v1302_v14 = vld [vmem:[%s1415_s23 + $0x28] sm:$0xff]  }
  0x14   : > { %238 = vst.msk [vmem:[#allocation2 + $0x70] sm:$0xff] %vm223_vm0, %v1332_v3  ;;  %239 = vst.msk [vmem:[#allocation2 + $0x78] sm:$0xff] %vm223_vm0, %v1332_v3  ;;  %v1301_v13 = vld [vmem:[%s1415_s23 + $0x60] sm:$0xff]   ;;  %v1303_v15 = vld [vmem:[%s1415_s23 + $0x68] sm:$0xff]  }
  0x15   : > { %240 = vst.msk [vmem:[#allocation2 + $0x80] sm:$0xff] %vm223_vm0, %v1332_v3  ;;  %241 = vst.msk [vmem:[#allocation2 + $0x88] sm:$0xff] %vm223_vm0, %v1332_v3  ;;  %v1304_v16 = vld [vmem:[%s1415_s23 + $0x30] sm:$0xff]   ;;  %v1306_v18 = vld [vmem:[%s1415_s23 + $0x38] sm:$0xff]  }
  0x16   : > { %242 = vst.msk [vmem:[#allocation2 + $0x90] sm:$0xff] %vm223_vm0, %v1332_v3  ;;  %243 = vst.msk [vmem:[#allocation2 + $0x98] sm:$0xff] %vm223_vm0, %v1332_v3  ;;  %1225 = vmatpush3.bf16.msra.mxu0 %v1291_v2  ;;  %1263 = vmatpush3.bf16.msra.mxu1 %v1291_v2  ;;  %v1305_v17 = vld [vmem:[%s1415_s23 + $0x70] sm:$0xff]   ;;  %v1307_v19 = vld [vmem:[%s1415_s23 + $0x78] sm:$0xff]  }
  0x17   : > { %244 = vst.msk [vmem:[#allocation2 + $0xa0] sm:$0xff] %vm223_vm0, %v1332_v3  ;;  %245 = vst.msk [vmem:[#allocation2 + $0xa8] sm:$0xff] %vm223_vm0, %v1332_v3  ;;  %v258_v20 = vld [vmem:[#allocation2 + $0x10] sm:$0xff]  ;;  %v256_v24 = vld [vmem:[#allocation2] sm:$0xff] }
  0x18   : > { %246 = vst.msk [vmem:[#allocation2 + $0xb0] sm:$0xff] %vm223_vm0, %v1332_v3  ;;  %247 = vst.msk [vmem:[#allocation2 + $0xb8] sm:$0xff] %vm223_vm0, %v1332_v3  ;;  %v259_v30 = vld [vmem:[#allocation2 + $0x18] sm:$0xff]  ;;  %v257_v36 = vld [vmem:[#allocation2 + $0x8] sm:$0xff] }
  0x19   : > { %248 = vst.msk [vmem:[#allocation2 + $0xc0] sm:$0xff] %vm223_vm0, %v1332_v3  ;;  %249 = vst.msk [vmem:[#allocation2 + $0xc8] sm:$0xff] %vm223_vm0, %v1332_v3  ;;  %1227 = vmatmul.mubr.msk.bf16.vlgmr.msra.gmra.mxu0 %vm424_vm1, %v1294_v6  ;;  %1243 = vmatmul.mubr.msk.bf16.vlgmr.msra.gmra.mxu1 %vm424_vm1, %v1295_v7  ;;  %v262_v42 = vld [vmem:[#allocation2 + $0x30] sm:$0xff]  ;;  %v260_v50 = vld [vmem:[#allocation2 + $0x20] sm:$0xff] }
  0x1a   : > { %250 = vst.msk [vmem:[#allocation2 + $0xd0] sm:$0xff] %vm223_vm0, %v1332_v3  ;;  %251 = vst.msk [vmem:[#allocation2 + $0xd8] sm:$0xff] %vm223_vm0, %v1332_v3  ;;  %1230 = vmatprep.mubr.msk.bf16.mxu0 %vm424_vm1, %v1296_v8  ;;  %1246 = vmatprep.mubr.msk.bf16.mxu1 %vm424_vm1, %v1297_v9 }
  0x1b   : > { %252 = vst.msk [vmem:[#allocation2 + $0xe0] sm:$0xff] %vm223_vm0, %v1332_v3  ;;  %253 = vst.msk [vmem:[#allocation2 + $0xe8] sm:$0xff] %vm223_vm0, %v1332_v3 }
  0x1c   : > { %254 = vst.msk [vmem:[#allocation2 + $0xf0] sm:$0xff] %vm223_vm0, %v1332_v3  ;;  %255 = vst.msk [vmem:[#allocation2 + $0xf8] sm:$0xff] %vm223_vm0, %v1332_v3  ;;  %v272_v25 = vld [vmem:[#allocation2 + $0x80] sm:$0xff]  ;;  %v273_v37 = vld [vmem:[#allocation2 + $0x88] sm:$0xff] }
  0x1d   : > { %v274_v21 = vld [vmem:[#allocation2 + $0x90] sm:$0xff]  ;;  %v275_v31 = vld [vmem:[#allocation2 + $0x98] sm:$0xff] }
  0x1e   : > { %v276_v51 = vld [vmem:[#allocation2 + $0xa0] sm:$0xff]  ;;  %v263_v3 = vld [vmem:[#allocation2 + $0x38] sm:$0xff] }
  0x1f   : > { %v278_v43 = vld [vmem:[#allocation2 + $0xb0] sm:$0xff] }
  0x21   : > { %1231 = vmatmul.mubr.msk.bf16.gmra.mxu0 %vm424_vm1, %v1298_v10  ;;  %1247 = vmatmul.mubr.msk.bf16.gmra.mxu1 %vm424_vm1, %v1299_v11 }
  0x22   : > { %1234 = vmatprep.mubr.msk.bf16.mxu0 %vm424_vm1, %v1300_v12  ;;  %1250 = vmatprep.mubr.msk.bf16.mxu1 %vm424_vm1, %v1301_v13 }
  0x29   : > { %1235 = vmatmul.mubr.msk.bf16.gmra.mxu0 %vm424_vm1, %v1302_v14  ;;  %1251 = vmatmul.mubr.msk.bf16.gmra.mxu1 %vm424_vm1, %v1303_v15 }
  0x2a   : > { %1238 = vmatprep.mubr.msk.bf16.mxu0 %vm424_vm1, %v1304_v16  ;;  %1254 = vmatprep.mubr.msk.bf16.mxu1 %vm424_vm1, %v1305_v17 }
  0x31   : > { %1239 = vmatmul.mubr.msk.bf16.gmra.mxu0 %vm424_vm1, %v1306_v18  ;;  %1255 = vmatmul.mubr.msk.bf16.gmra.mxu1 %vm424_vm1, %v1307_v19 }
  0xd9   : > { %v1228_v22 = vpop.f32.mrf.mxu0  ;;  %v1244_v23 = vpop.f32.mrf.mxu1 }
  0xda   : > { %v636_v26 = vadd.f32 %v1228_v22, %v258_v20  ;;  %v652_v27 = vadd.f32 %v1244_v23, %v274_v21 }
  0xdb   : > { %v507_v28 = vpop.f32.mrf.mxu0  ;;  %v571_v29 = vpop.f32.mrf.mxu1 }
  0xdc   : > { %669 = vst.msk [vmem:[#allocation2 + $0x10] sm:$0xff] %vm223_vm0, %v636_v26  ;;  %685 = vst.msk [vmem:[#allocation2 + $0x90] sm:$0xff] %vm223_vm0, %v652_v27  ;;  %v634_v32 = vadd.f32 %v507_v28, %v256_v24  ;;  %v650_v33 = vadd.f32 %v571_v29, %v272_v25  ;;  %v279_v24 = vld [vmem:[#allocation2 + $0xb8] sm:$0xff] }
  0xdd   : > { %v1229_v34 = vpop.f32.mrf.mxu0  ;;  %v1245_v35 = vpop.f32.mrf.mxu1 }
  0xde   : > { %667 = vst.msk [vmem:[#allocation2] sm:$0xff] %vm223_vm0, %v634_v32  ;;  %683 = vst.msk [vmem:[#allocation2 + $0x80] sm:$0xff] %vm223_vm0, %v650_v33  ;;  %v637_v38 = vadd.f32 %v1229_v34, %v259_v30  ;;  %v653_v39 = vadd.f32 %v1245_v35, %v275_v31  ;;  %v261_v30 = vld [vmem:[#allocation2 + $0x28] sm:$0xff] }
  0xdf   : > { %v510_v40 = vpop.f32.mrf.mxu0  ;;  %v574_v41 = vpop.f32.mrf.mxu1 }
  0xe0   : > { %670 = vst.msk [vmem:[#allocation2 + $0x18] sm:$0xff] %vm223_vm0, %v637_v38  ;;  %686 = vst.msk [vmem:[#allocation2 + $0x98] sm:$0xff] %vm223_vm0, %v653_v39  ;;  %v635_v44 = vadd.f32 %v510_v40, %v257_v36  ;;  %v651_v45 = vadd.f32 %v574_v41, %v273_v37  ;;  %v277_v39 = vld [vmem:[#allocation2 + $0xa8] sm:$0xff]  ;;  %v266_v40 = vld [vmem:[#allocation2 + $0x50] sm:$0xff] }
  0xe1   : > { %v1232_v46 = vpop.f32.mrf.mxu0  ;;  %v1248_v47 = vpop.f32.mrf.mxu1  ;;  %v282_v41 = vld [vmem:[#allocation2 + $0xd0] sm:$0xff] }
  0xe2   : > { %668 = vst.msk [vmem:[#allocation2 + $0x8] sm:$0xff] %vm223_vm0, %v635_v44  ;;  %684 = vst.msk [vmem:[#allocation2 + $0x88] sm:$0xff] %vm223_vm0, %v651_v45  ;;  %v640_v48 = vadd.f32 %v1232_v46, %v262_v42  ;;  %v656_v49 = vadd.f32 %v1248_v47, %v278_v43 }
  0xe3   : > { %v704_v52 = vld [vmem:[#allocation2 + $0x10] sm:$0xff]  ;;  %v523_v54 = vpop.f32.mrf.mxu0  ;;  %v587_v55 = vpop.f32.mrf.mxu1 }
  0xe4   : > { %v720_v53 = vld [vmem:[#allocation2 + $0x90] sm:$0xff]  ;;  %vm736_vm2 = vcmp.ge.f32.partialorder %v704_v52, 0.0  ;;  %v768_v56 = vmul.f32 0.2, %v704_v52  ;;  %673 = vst.msk [vmem:[#allocation2 + $0x30] sm:$0xff] %vm223_vm0, %v640_v48  ;;  %689 = vst.msk [vmem:[#allocation2 + $0xb0] sm:$0xff] %vm223_vm0, %v656_v49  ;;  %v638_v60 = vadd.f32 %v523_v54, %v260_v50  ;;  %v654_v61 = vadd.f32 %v587_v55, %v276_v51 }
  0xe5   : > { %vm752_vm3 = vcmp.ge.f32.partialorder %v720_v53, 0.0  ;;  %v784_v57 = vmul.f32 0.2, %v720_v53  ;;  %v702_v58 = vld [vmem:[#allocation2] sm:$0xff]  ;;  %v1233_v62 = vpop.f32.mrf.mxu0  ;;  %v1459_v63 = vpop.f32.mrf.mxu1  ;;  %v267_v55 = vld [vmem:[#allocation2 + $0x58] sm:$0xff] }
  0xe6   : > { %v718_v59 = vld [vmem:[#allocation2 + $0x80] sm:$0xff]  ;;  %v800_v0 = vsel %vm736_vm2, %v704_v52, %v768_v56  ;;  %vm734_vm5 = vcmp.ge.f32.partialorder %v702_v58, 0.0  ;;  %v766_v2 = vmul.f32 0.2, %v702_v58  ;;  %671 = vst.msk [vmem:[#allocation2 + $0x20] sm:$0xff] %vm223_vm0, %v638_v60  ;;  %687 = vst.msk [vmem:[#allocation2 + $0xa0] sm:$0xff] %vm223_vm0, %v654_v61  ;;  %v641_v18 = vadd.f32 %v1233_v62, %v263_v3 }
  0xe7   : > { %v816_v1 = vsel %vm752_vm3, %v720_v53, %v784_v57  ;;  %v1171_v4 = vpack.c.bf16 %v800_v0, %v800_v0  ;;  %vm750_vm6 = vcmp.ge.f32.partialorder %v718_v59, 0.0  ;;  %v782_v6 = vmul.f32 0.2, %v718_v59  ;;  %v705_v7 = vld [vmem:[#allocation2 + $0x18] sm:$0xff]  ;;  %v526_v9 = vpop.f32.mrf.mxu0  ;;  %v1470_v10 = vpop.f32.mrf.mxu1  ;;  %v264_v50 = vld [vmem:[#allocation2 + $0x40] sm:$0xff]  ;;  %v265_v62 = vld [vmem:[#allocation2 + $0x48] sm:$0xff] }
  0xe8   : > { %v1187_v5 = vpack.c.bf16 %v816_v1, %v816_v1  ;;  %v721_v8 = vld [vmem:[#allocation2 + $0x98] sm:$0xff]  ;;  %v798_v11 = vsel %vm734_vm5, %v702_v58, %v766_v2  ;;  %vm737_vm7 = vcmp.ge.f32.partialorder %v705_v7, 0.0  ;;  %v769_v12 = vmul.f32 0.2, %v705_v7  ;;  %674 = vst.msk [vmem:[#allocation2 + $0x38] sm:$0xff] %vm223_vm0, %v641_v18  ;;  %v280_v54 = vld [vmem:[#allocation2 + $0xc0] sm:$0xff] }
  0xe9   : > { %vm753_vm8 = vcmp.ge.f32.partialorder %v721_v8, 0.0  ;;  %961 = vst.msk [vmem:[%s1466_s26 + $0x8] sm:$0xf] %vm958_vm4, %v1171_v4  ;;  %v1169_v13 = vpack.c.bf16 %v798_v11, %v798_v11  ;;  %v814_v14 = vsel %vm750_vm6, %v718_v59, %v782_v6  ;;  %v785_v15 = vmul.f32 0.2, %v721_v8  ;;  %v703_v16 = vld [vmem:[#allocation2 + $0x8] sm:$0xff]  ;;  %v1236_v19 = vpop.f32.mrf.mxu0  ;;  %v1252_v20 = vpop.f32.mrf.mxu1 }
  0xea   : > { %977 = vst.msk [vmem:[%s1466_s26 + $0x48] sm:$0xf] %vm958_vm4, %v1187_v5  ;;  %v719_v17 = vld [vmem:[#allocation2 + $0x88] sm:$0xff]  ;;  %v1185_v21 = vpack.c.bf16 %v814_v14, %v814_v14  ;;  %v801_v22 = vsel %vm737_vm7, %v705_v7, %v769_v12  ;;  %vm735_vm9 = vcmp.ge.f32.partialorder %v703_v16, 0.0  ;;  %v767_v23 = vmul.f32 0.2, %v703_v16 }
  0xeb   : > { %959 = vst.msk [vmem:[%s1466_s26] sm:$0xf] %vm958_vm4, %v1169_v13  ;;  %v1172_v25 = vpack.c.bf16 %v801_v22, %v801_v22  ;;  %v817_v26 = vsel %vm753_vm8, %v721_v8, %v785_v15  ;;  %vm751_vm10 = vcmp.ge.f32.partialorder %v719_v17, 0.0  ;;  %v783_v27 = vmul.f32 0.2, %v719_v17  ;;  %v708_v28 = vld [vmem:[#allocation2 + $0x30] sm:$0xff]  ;;  %v539_v31 = vpop.f32.mrf.mxu0  ;;  %v603_v32 = vpop.f32.mrf.mxu1 }
  0xec   : > { %v724_v29 = vld [vmem:[#allocation2 + $0xb0] sm:$0xff]  ;;  %975 = vst.msk [vmem:[%s1466_s26 + $0x40] sm:$0xf] %vm958_vm4, %v1185_v21  ;;  %v1188_v33 = vpack.c.bf16 %v817_v26, %v817_v26  ;;  %v799_v34 = vsel %vm735_vm9, %v703_v16, %v767_v23  ;;  %vm740_vm11 = vcmp.ge.f32.partialorder %v708_v28, 0.0  ;;  %v772_v35 = vmul.f32 0.2, %v708_v28 }
  0xed   : > { %962 = vst.msk [vmem:[%s1466_s26 + $0xc] sm:$0xf] %vm958_vm4, %v1172_v25  ;;  %v1170_v36 = vpack.c.bf16 %v799_v34, %v799_v34  ;;  %v815_v37 = vsel %vm751_vm10, %v719_v17, %v783_v27  ;;  %vm756_vm12 = vcmp.ge.f32.partialorder %v724_v29, 0.0  ;;  %v788_v38 = vmul.f32 0.2, %v724_v29  ;;  %v1237_v42 = vpop.f32.mrf.mxu0  ;;  %v1253_v43 = vpop.f32.mrf.mxu1  ;;  %v706_v46 = vld [vmem:[#allocation2 + $0x20] sm:$0xff] }
  0xee   : > { %978 = vst.msk [vmem:[%s1466_s26 + $0x4c] sm:$0xf] %vm958_vm4, %v1188_v33  ;;  %v1186_v44 = vpack.c.bf16 %v815_v37, %v815_v37  ;;  %v804_v45 = vsel %vm740_vm11, %v708_v28, %v772_v35  ;;  %v722_v47 = vld [vmem:[#allocation2 + $0xa0] sm:$0xff]  ;;  %v657_v48 = vadd.f32 %v1459_v63, %v279_v24  ;;  %v639_v49 = vadd.f32 %v526_v9, %v261_v30  ;;  %v283_v61 = vld [vmem:[#allocation2 + $0xd8] sm:$0xff]  ;;  %v281_v3 = vld [vmem:[#allocation2 + $0xc8] sm:$0xff] }
  0xef   : > { %960 = vst.msk [vmem:[%s1466_s26 + $0x4] sm:$0xf] %vm958_vm4, %v1170_v36  ;;  %v1175_v51 = vpack.c.bf16 %v804_v45, %v804_v45  ;;  %v820_v52 = vsel %vm756_vm12, %v724_v29, %v788_v38  ;;  %vm738_vm13 = vcmp.ge.f32.partialorder %v706_v46, 0.0  ;;  %v770_v53 = vmul.f32 0.2, %v706_v46  ;;  %v542_v56 = vpop.f32.mrf.mxu0  ;;  %v606_v57 = vpop.f32.mrf.mxu1  ;;  %v270_v4 = vld [vmem:[#allocation2 + $0x70] sm:$0xff] }
  0xf0   : > { %976 = vst.msk [vmem:[%s1466_s26 + $0x44] sm:$0xf] %vm958_vm4, %v1186_v44  ;;  %v1191_v58 = vpack.c.bf16 %v820_v52, %v820_v52  ;;  %vm754_vm14 = vcmp.ge.f32.partialorder %v722_v47, 0.0  ;;  %v786_v59 = vmul.f32 0.2, %v722_v47  ;;  %v655_v60 = vadd.f32 %v1470_v10, %v277_v39  ;;  %v286_v6 = vld [vmem:[#allocation2 + $0xf0] sm:$0xff] }
  0xf1   : > { %690 = vst.msk [vmem:[#allocation2 + $0xb8] sm:$0xff] %vm223_vm0, %v657_v48  ;;  %672 = vst.msk [vmem:[#allocation2 + $0x28] sm:$0xff] %vm223_vm0, %v639_v49  ;;  %v802_v63 = vsel %vm738_vm13, %v706_v46, %v770_v53  ;;  %v644_v0 = vadd.f32 %v1236_v19, %v266_v40  ;;  %v660_v1 = vadd.f32 %v1252_v20, %v282_v41  ;;  %v1240_v5 = vpop.f32.mrf.mxu0  ;;  %v1256_v7 = vpop.f32.mrf.mxu1  ;;  %v709_v10 = vld [vmem:[#allocation2 + $0x38] sm:$0xff]  ;;  %v268_v13 = vld [vmem:[#allocation2 + $0x60] sm:$0xff] }
  0xf2   : > { %965 = vst.msk [vmem:[%s1466_s26 + $0x18] sm:$0xf] %vm958_vm4, %v1175_v51  ;;  %v642_v2 = vadd.f32 %v539_v31, %v264_v50  ;;  %981 = vst.msk [vmem:[%s1466_s26 + $0x58] sm:$0xf] %vm958_vm4, %v1191_v58  ;;  %v1173_v8 = vpack.c.bf16 %v802_v63, %v802_v63  ;;  %v818_v9 = vsel %vm754_vm14, %v722_v47, %v786_v59  ;;  %v284_v14 = vld [vmem:[#allocation2 + $0xe0] sm:$0xff]  ;;  %vm741_vm15 = vcmp.ge.f32.partialorder %v709_v10, 0.0 }
  0xf3   : > { %688 = vst.msk [vmem:[#allocation2 + $0xa8] sm:$0xff] %vm223_vm0, %v655_v60  ;;  %v658_v11 = vadd.f32 %v603_v32, %v280_v54  ;;  %v645_v12 = vadd.f32 %v1237_v42, %v267_v55  ;;  %v1189_v15 = vpack.c.bf16 %v818_v9, %v818_v9  ;;  %v773_v16 = vmul.f32 0.2, %v709_v10  ;;  %677 = vst.msk [vmem:[#allocation2 + $0x50] sm:$0xff] %vm223_vm0, %v644_v0  ;;  %v555_v18 = vpop.f32.mrf.mxu0  ;;  %v619_v19 = vpop.f32.mrf.mxu1  ;;  %v271_v20 = vld [vmem:[#allocation2 + $0x78] sm:$0xff]  ;;  %v269_v34 = vld [vmem:[#allocation2 + $0x68] sm:$0xff] }
  0xf4   : > { %693 = vst.msk [vmem:[#allocation2 + $0xd0] sm:$0xff] %vm223_vm0, %v660_v1  ;;  %675 = vst.msk [vmem:[#allocation2 + $0x40] sm:$0xff] %vm223_vm0, %v642_v2  ;;  %v661_v17 = vadd.f32 %v1253_v43, %v283_v61  ;;  %v287_v21 = vld [vmem:[#allocation2 + $0xf8] sm:$0xff]  ;;  %v643_v22 = vadd.f32 %v542_v56, %v265_v62  ;;  %v659_v23 = vadd.f32 %v606_v57, %v281_v3  ;;  %v285_v35 = vld [vmem:[#allocation2 + $0xe8] sm:$0xff] }
  0xf5   : > { %963 = vst.msk [vmem:[%s1466_s26 + $0x10] sm:$0xf] %vm958_vm4, %v1173_v8  ;;  %v648_v24 = vadd.f32 %v1240_v5, %v270_v4  ;;  %v664_v25 = vadd.f32 %v1256_v7, %v286_v6  ;;  %979 = vst.msk [vmem:[%s1466_s26 + $0x50] sm:$0xf] %vm958_vm4, %v1189_v15  ;;  %v805_v26 = vsel %vm741_vm15, %v709_v10, %v773_v16  ;;  %v1241_v29 = vpop.f32.mrf.mxu0  ;;  %v1257_v30 = vpop.f32.mrf.mxu1 }
  0xf6   : > { %691 = vst.msk [vmem:[#allocation2 + $0xc0] sm:$0xff] %vm223_vm0, %v658_v11  ;;  %678 = vst.msk [vmem:[#allocation2 + $0x58] sm:$0xff] %vm223_vm0, %v645_v12  ;;  %v646_v27 = vadd.f32 %v555_v18, %v268_v13  ;;  %v662_v28 = vadd.f32 %v619_v19, %v284_v14  ;;  %v1176_v31 = vpack.c.bf16 %v805_v26, %v805_v26 }
  0xf7   : > { %694 = vst.msk [vmem:[#allocation2 + $0xd8] sm:$0xff] %vm223_vm0, %v661_v17  ;;  %676 = vst.msk [vmem:[#allocation2 + $0x48] sm:$0xff] %vm223_vm0, %v643_v22  ;;  %v649_v32 = vadd.f32 %v1241_v29, %v271_v20  ;;  %v665_v33 = vadd.f32 %v1257_v30, %v287_v21  ;;  %v558_v38 = vpop.f32.mrf.mxu0  ;;  %v622_v39 = vpop.f32.mrf.mxu1 }
  0xf8   : > { %692 = vst.msk [vmem:[#allocation2 + $0xc8] sm:$0xff] %vm223_vm0, %v659_v23  ;;  %681 = vst.msk [vmem:[#allocation2 + $0x70] sm:$0xff] %vm223_vm0, %v648_v24  ;;  %v725_v36 = vld [vmem:[#allocation2 + $0xb8] sm:$0xff]  ;;  %v707_v37 = vld [vmem:[#allocation2 + $0x28] sm:$0xff]  ;;  %v647_v43 = vadd.f32 %v558_v38, %v269_v34  ;;  %v663_v44 = vadd.f32 %v622_v39, %v285_v35 }
  0xf9   : > { %697 = vst.msk [vmem:[#allocation2 + $0xf0] sm:$0xff] %vm223_vm0, %v664_v25  ;;  %679 = vst.msk [vmem:[#allocation2 + $0x60] sm:$0xff] %vm223_vm0, %v646_v27  ;;  %vm757_vm1 = vcmp.ge.f32.partialorder %v725_v36, 0.0  ;;  %v789_v40 = vmul.f32 0.2, %v725_v36  ;;  %vm739_vm2 = vcmp.ge.f32.partialorder %v707_v37, 0.0 }
  0xfa   : > { %695 = vst.msk [vmem:[#allocation2 + $0xe0] sm:$0xff] %vm223_vm0, %v662_v28  ;;  %v771_v41 = vmul.f32 0.2, %v707_v37  ;;  %682 = vst.msk [vmem:[#allocation2 + $0x78] sm:$0xff] %vm223_vm0, %v649_v32  ;;  %v723_v42 = vld [vmem:[#allocation2 + $0xa8] sm:$0xff]  ;;  %v712_v48 = vld [vmem:[#allocation2 + $0x50] sm:$0xff] }
  0xfb   : > { %966 = vst.msk [vmem:[%s1466_s26 + $0x1c] sm:$0xf] %vm958_vm4, %v1176_v31  ;;  %v821_v45 = vsel %vm757_vm1, %v725_v36, %v789_v40  ;;  %vm755_vm3 = vcmp.ge.f32.partialorder %v723_v42, 0.0  ;;  %v787_v47 = vmul.f32 0.2, %v723_v42  ;;  %v728_v49 = vld [vmem:[#allocation2 + $0xd0] sm:$0xff] }
  0xfc   : > { %698 = vst.msk [vmem:[#allocation2 + $0xf8] sm:$0xff] %vm223_vm0, %v665_v33  ;;  %v803_v46 = vsel %vm739_vm2, %v707_v37, %v771_v41  ;;  %v710_v50 = vld [vmem:[#allocation2 + $0x40] sm:$0xff]  ;;  %v1192_v51 = vpack.c.bf16 %v821_v45, %v821_v45  ;;  %vm744_vm5 = vcmp.ge.f32.partialorder %v712_v48, 0.0  ;;  %v776_v53 = vmul.f32 0.2, %v712_v48  ;;  %680 = vst.msk [vmem:[#allocation2 + $0x68] sm:$0xff] %vm223_vm0, %v647_v43 }
  0xfd   : > { %v1174_v52 = vpack.c.bf16 %v803_v46, %v803_v46  ;;  %v726_v54 = vld [vmem:[#allocation2 + $0xc0] sm:$0xff]  ;;  %v713_v55 = vld [vmem:[#allocation2 + $0x58] sm:$0xff]  ;;  %696 = vst.msk [vmem:[#allocation2 + $0xe8] sm:$0xff] %vm223_vm0, %v663_v44  ;;  %v819_v56 = vsel %vm755_vm3, %v723_v42, %v787_v47  ;;  %vm760_vm6 = vcmp.ge.f32.partialorder %v728_v49, 0.0  ;;  %v792_v57 = vmul.f32 0.2, %v728_v49 }
  0xfe   : > { %vm742_vm7 = vcmp.ge.f32.partialorder %v710_v50, 0.0  ;;  %v729_v58 = vld [vmem:[#allocation2 + $0xd8] sm:$0xff]  ;;  %982 = vst.msk [vmem:[%s1466_s26 + $0x5c] sm:$0xf] %vm958_vm4, %v1192_v51  ;;  %v1190_v59 = vpack.c.bf16 %v819_v56, %v819_v56  ;;  %v808_v60 = vsel %vm744_vm5, %v712_v48, %v776_v53  ;;  %v774_v61 = vmul.f32 0.2, %v710_v50 }
  0xff   : > { %964 = vst.msk [vmem:[%s1466_s26 + $0x14] sm:$0xf] %vm958_vm4, %v1174_v52  ;;  %vm758_vm8 = vcmp.ge.f32.partialorder %v726_v54, 0.0  ;;  %v711_v62 = vld [vmem:[#allocation2 + $0x48] sm:$0xff]  ;;  %v1179_v63 = vpack.c.bf16 %v808_v60, %v808_v60  ;;  %v824_v0 = vsel %vm760_vm6, %v728_v49, %v792_v57  ;;  %v790_v1 = vmul.f32 0.2, %v726_v54 }
 0x100   : > { %vm745_vm0 = vcmp.ge.f32.partialorder %v713_v55, 0.0  ;;  %v727_v2 = vld [vmem:[#allocation2 + $0xc8] sm:$0xff]  ;;  %980 = vst.msk [vmem:[%s1466_s26 + $0x54] sm:$0xf] %vm958_vm4, %v1190_v59  ;;  %v1195_v3 = vpack.c.bf16 %v824_v0, %v824_v0  ;;  %v806_v4 = vsel %vm742_vm7, %v710_v50, %v774_v61  ;;  %v777_v5 = vmul.f32 0.2, %v713_v55 }
 0x101   : > { %vm761_vm9 = vcmp.ge.f32.partialorder %v729_v58, 0.0  ;;  %v716_v6 = vld [vmem:[#allocation2 + $0x70] sm:$0xff]  ;;  %969 = vst.msk [vmem:[%s1466_s26 + $0x28] sm:$0xf] %vm958_vm4, %v1179_v63  ;;  %v1177_v7 = vpack.c.bf16 %v806_v4, %v806_v4  ;;  %v822_v8 = vsel %vm758_vm8, %v726_v54, %v790_v1  ;;  %v793_v9 = vmul.f32 0.2, %v729_v58 }
 0x102   : > { %vm743_vm10 = vcmp.ge.f32.partialorder %v711_v62, 0.0  ;;  %v732_v10 = vld [vmem:[#allocation2 + $0xf0] sm:$0xff]  ;;  %985 = vst.msk [vmem:[%s1466_s26 + $0x68] sm:$0xf] %vm958_vm4, %v1195_v3  ;;  %v1193_v11 = vpack.c.bf16 %v822_v8, %v822_v8  ;;  %v809_v12 = vsel %vm745_vm0, %v713_v55, %v777_v5  ;;  %v775_v13 = vmul.f32 0.2, %v711_v62 }
 0x103   : > { %vm759_vm11 = vcmp.ge.f32.partialorder %v727_v2, 0.0  ;;  %v714_v14 = vld [vmem:[#allocation2 + $0x60] sm:$0xff]  ;;  %967 = vst.msk [vmem:[%s1466_s26 + $0x20] sm:$0xf] %vm958_vm4, %v1177_v7  ;;  %v1180_v15 = vpack.c.bf16 %v809_v12, %v809_v12  ;;  %v825_v16 = vsel %vm761_vm9, %v729_v58, %v793_v9  ;;  %v791_v17 = vmul.f32 0.2, %v727_v2 }
 0x104   : > { %vm748_vm12 = vcmp.ge.f32.partialorder %v716_v6, 0.0  ;;  %v730_v18 = vld [vmem:[#allocation2 + $0xe0] sm:$0xff]  ;;  %983 = vst.msk [vmem:[%s1466_s26 + $0x60] sm:$0xf] %vm958_vm4, %v1193_v11  ;;  %v1196_v19 = vpack.c.bf16 %v825_v16, %v825_v16  ;;  %v807_v20 = vsel %vm743_vm10, %v711_v62, %v775_v13  ;;  %v780_v21 = vmul.f32 0.2, %v716_v6 }
 0x105   : > { %vm764_vm13 = vcmp.ge.f32.partialorder %v732_v10, 0.0  ;;  %v717_v22 = vld [vmem:[#allocation2 + $0x78] sm:$0xff]  ;;  %970 = vst.msk [vmem:[%s1466_s26 + $0x2c] sm:$0xf] %vm958_vm4, %v1180_v15  ;;  %v1178_v23 = vpack.c.bf16 %v807_v20, %v807_v20  ;;  %v823_v24 = vsel %vm759_vm11, %v727_v2, %v791_v17  ;;  %v796_v25 = vmul.f32 0.2, %v732_v10 }
 0x106   : > { %vm746_vm14 = vcmp.ge.f32.partialorder %v714_v14, 0.0  ;;  %v733_v26 = vld [vmem:[#allocation2 + $0xf8] sm:$0xff]  ;;  %986 = vst.msk [vmem:[%s1466_s26 + $0x6c] sm:$0xf] %vm958_vm4, %v1196_v19  ;;  %v1194_v27 = vpack.c.bf16 %v823_v24, %v823_v24  ;;  %v812_v28 = vsel %vm748_vm12, %v716_v6, %v780_v21  ;;  %v778_v29 = vmul.f32 0.2, %v714_v14 }
 0x107   : > { %vm762_vm15 = vcmp.ge.f32.partialorder %v730_v18, 0.0  ;;  %v715_v30 = vld [vmem:[#allocation2 + $0x68] sm:$0xff]  ;;  %968 = vst.msk [vmem:[%s1466_s26 + $0x24] sm:$0xf] %vm958_vm4, %v1178_v23  ;;  %v1183_v31 = vpack.c.bf16 %v812_v28, %v812_v28  ;;  %v828_v32 = vsel %vm764_vm13, %v732_v10, %v796_v25  ;;  %v794_v33 = vmul.f32 0.2, %v730_v18 }
 0x108   : > { %vm749_vm1 = vcmp.ge.f32.partialorder %v717_v22, 0.0  ;;  %v731_v34 = vld [vmem:[#allocation2 + $0xe8] sm:$0xff]  ;;  %984 = vst.msk [vmem:[%s1466_s26 + $0x64] sm:$0xf] %vm958_vm4, %v1194_v27  ;;  %v1199_v35 = vpack.c.bf16 %v828_v32, %v828_v32  ;;  %v810_v36 = vsel %vm746_vm14, %v714_v14, %v778_v29  ;;  %v781_v37 = vmul.f32 0.2, %v717_v22 }
 0x109   : > { %vm765_vm2 = vcmp.ge.f32.partialorder %v733_v26, 0.0  ;;  %973 = vst.msk [vmem:[%s1466_s26 + $0x38] sm:$0xf] %vm958_vm4, %v1183_v31  ;;  %v1181_v38 = vpack.c.bf16 %v810_v36, %v810_v36  ;;  %v826_v39 = vsel %vm762_vm15, %v730_v18, %v794_v33  ;;  %v797_v40 = vmul.f32 0.2, %v733_v26 }
 0x10a   : > { %vm747_vm3 = vcmp.ge.f32.partialorder %v715_v30, 0.0  ;;  %989 = vst.msk [vmem:[%s1466_s26 + $0x78] sm:$0xf] %vm958_vm4, %v1199_v35  ;;  %v1197_v41 = vpack.c.bf16 %v826_v39, %v826_v39  ;;  %v813_v42 = vsel %vm749_vm1, %v717_v22, %v781_v37  ;;  %v779_v43 = vmul.f32 0.2, %v715_v30 }
 0x10b   : > { %vm763_vm5 = vcmp.ge.f32.partialorder %v731_v34, 0.0  ;;  %971 = vst.msk [vmem:[%s1466_s26 + $0x30] sm:$0xf] %vm958_vm4, %v1181_v38  ;;  %v1184_v44 = vpack.c.bf16 %v813_v42, %v813_v42  ;;  %v829_v45 = vsel %vm765_vm2, %v733_v26, %v797_v40  ;;  %v795_v46 = vmul.f32 0.2, %v731_v34 }
 0x10c   : > { %987 = vst.msk [vmem:[%s1466_s26 + $0x70] sm:$0xf] %vm958_vm4, %v1197_v41  ;;  %v1200_v47 = vpack.c.bf16 %v829_v45, %v829_v45  ;;  %v811_v48 = vsel %vm747_vm3, %v715_v30, %v779_v43 }
 0x10d   : > { %974 = vst.msk [vmem:[%s1466_s26 + $0x3c] sm:$0xf] %vm958_vm4, %v1184_v44  ;;  %v1182_v49 = vpack.c.bf16 %v811_v48, %v811_v48  ;;  %v827_v50 = vsel %vm763_vm5, %v731_v34, %v795_v46 }
 0x10e   : > { %990 = vst.msk [vmem:[%s1466_s26 + $0x7c] sm:$0xf] %vm958_vm4, %v1200_v47  ;;  %v1198_v51 = vpack.c.bf16 %v827_v50, %v827_v50 }
 0x10f   : > { %972 = vst.msk [vmem:[%s1466_s26 + $0x34] sm:$0xf] %vm958_vm4, %v1182_v49 }
 0x110   : > { %988 = vst.msk [vmem:[%s1466_s26 + $0x74] sm:$0xf] %vm958_vm4, %v1198_v51 }
 0x111 PF: > { %s12_s11 = sadd.s32 1, %s1330_s11   ;;  %s1584_s9 = smov %s1326_s10 }
 0x112   : > { %p9_p5 = scmp.ge.s32.totalorder %s12_s11, 10   ;;  %s1585_s10 = smov %s1587_s12 }
 0x114   :  { %11 = sbr.rel (!%p9_p5) target bundleno = 2 (0x2), region = 69 }

// kernel: _forward.6
= control target key start
LH: loop header
LB: loop body
LE: loop exit
PB: predicated region body
PF: predicated region fallthrough
CT: control target
= control target key end

     0   :  { %s3616_s9 = smov 0   ;;  %s3618_s10 = smov 0   ;;  %s4092_s0 = inlined_call_operand.vmem [shape: bf16[512,1024], index: 0, kind: input, shape index: {}]   ;;  %s4093_s1 = inlined_call_operand.vmem [shape: bf16[1024,128], index: 1, kind: input, shape index: {}]   ;;  %s4094_s2 = inlined_call_operand.vmem [shape: bf16[512,128], index: 2, kind: output, shape index: {}]  }
   0x1   :  { %s3620_s11 = smov 0  }
   0x2 LB: > { %s31_s12 = sadd.s32 1, %s3595_s10  ;;  %p2681_p0 = scmp.ge.s32.totalorder %s3599_s11, 1  ;;  %s3599_s11 = sphi %s3620_s11, %s12_s11   ;;  %s3595_s10 = sphi %s3618_s10, %s4096_s10   ;;  %s3591_s9 = sphi %s3616_s9, %s4095_s9  }
   0x3   : > { %p33_p1 = scmp.ge.s32.totalorder %s31_s12, 2  ;;  %p158_p2 = scmp.lt.s32.totalorder %s3599_s11, 3 }
   0x5   : > { %s4098_s12 = smov (%p33_p1, %s31_s12), 0  ;;  %p159_p3 = pnand %p2681_p0, %p158_p2 }
   0x6   : > { %s2682_s21 = sshll.u32 (!%p159_p3), %s3591_s9, 5 }
   0x7   : > { %162 = sbr.rel (%p159_p3) target bundleno = 505 (0x1f9), region = 28  ;;  %p198_p4 = scmp.lt.s32.totalorder (!%p159_p3), %s2682_s21, 63 }
   0xc   : > { %v3513_v0 = vld [vmem:[%s4093_s1 + $0x78] sm:$0xff]   ;;  %v3517_v4 = vld [vmem:[%s4093_s1 + $0x70] sm:$0xff]   ;;  %v3521_v8 = vld [vmem:[%s4093_s1 + $0x68] sm:$0xff]   ;;  %s4100_s21 = smov (!%p198_p4, %s2682_s21), 63 }
   0xd   : > { %v3514_v1 = vld [vmem:[%s4093_s1 + $0xf8] sm:$0xff]   ;;  %3041 = vmatprep.subr.bf16.mxu0 %v3513_v0  ;;  %v3518_v5 = vld [vmem:[%s4093_s1 + $0xf0] sm:$0xff]   ;;  %v3522_v9 = vld [vmem:[%s4093_s1 + $0xe8] sm:$0xff]   ;;  %s2913_s19 = sshll.u32 %s4100_s21, 5 }
   0xe   : > { %v3515_v2 = vld [vmem:[%s4093_s1 + $0x38] sm:$0xff]   ;;  %3153 = vmatprep.subr.bf16.mxu1 %v3514_v1  ;;  %v3519_v6 = vld [vmem:[%s4093_s1 + $0x30] sm:$0xff]   ;;  %v3523_v10 = vld [vmem:[%s4093_s1 + $0x28] sm:$0xff]   ;;  %s3733_s29 = scalar_lea.vmem %s4092_s0, %s2913_s19 }
   0xf   : > { %v3516_v3 = vld [vmem:[%s4093_s1 + $0xb8] sm:$0xff]   ;;  %3042 = vmatpush3.bf16.msra.mxu0 %v3515_v2  ;;  %v3520_v7 = vld [vmem:[%s4093_s1 + $0xb0] sm:$0xff]   ;;  %v3524_v11 = vld [vmem:[%s4093_s1 + $0xa8] sm:$0xff]  }
  0x10   : > { %3154 = vmatpush3.bf16.msra.mxu1 %v3516_v3  ;;  %3043 = vmatprep.subr.bf16.mxu0 %v3517_v4  ;;  %v3525_v12 = vld [vmem:[%s4093_s1 + $0x60] sm:$0xff]   ;;  %v3529_v16 = vld [vmem:[%s4093_s1 + $0x58] sm:$0xff]   ;;  %v3533_v20 = vld [vmem:[%s4093_s1 + $0x50] sm:$0xff]  }
  0x11   : > { %3155 = vmatprep.subr.bf16.mxu1 %v3518_v5  ;;  %v3526_v13 = vld [vmem:[%s4093_s1 + $0xe0] sm:$0xff]   ;;  %v3530_v17 = vld [vmem:[%s4093_s1 + $0xd8] sm:$0xff]   ;;  %v3534_v21 = vld [vmem:[%s4093_s1 + $0xd0] sm:$0xff]  }
  0x12   : > { %v3527_v14 = vld [vmem:[%s4093_s1 + $0x20] sm:$0xff]   ;;  %v3531_v18 = vld [vmem:[%s4093_s1 + $0x18] sm:$0xff]   ;;  %v3535_v22 = vld [vmem:[%s4093_s1 + $0x10] sm:$0xff]  }
  0x13   : > { %3044 = vmatpush3.bf16.msra.mxu0 %v3519_v6  ;;  %v3528_v15 = vld [vmem:[%s4093_s1 + $0xa0] sm:$0xff]   ;;  %v3532_v19 = vld [vmem:[%s4093_s1 + $0x98] sm:$0xff]   ;;  %v3536_v23 = vld [vmem:[%s4093_s1 + $0x90] sm:$0xff]  }
  0x14   : > { %3156 = vmatpush3.bf16.msra.mxu1 %v3520_v7  ;;  %3045 = vmatprep.subr.bf16.mxu0 %v3521_v8  ;;  %v3537_v24 = vld [vmem:[%s4093_s1 + $0x48] sm:$0xff]   ;;  %v3541_v28 = vld [vmem:[%s4093_s1 + $0x40] sm:$0xff]   ;;  %v3545_v40 = vld [vmem:[%s4093_s1 + $0x178] sm:$0xff]  }
  0x15   : > { %3157 = vmatprep.subr.bf16.mxu1 %v3522_v9  ;;  %v3538_v25 = vld [vmem:[%s4093_s1 + $0xc8] sm:$0xff]   ;;  %v3542_v29 = vld [vmem:[%s4093_s1 + $0xc0] sm:$0xff]   ;;  %v3546_v41 = vld [vmem:[%s4093_s1 + $0x138] sm:$0xff]  }
  0x16   : > { %v3539_v26 = vld [vmem:[%s4093_s1 + $0x8] sm:$0xff]   ;;  %v3543_v30 = vld [vmem:[%s4093_s1] sm:$0xff]   ;;  %v3547_v42 = vld [vmem:[%s4093_s1 + $0x1f8] sm:$0xff]  }
  0x17   : > { %3046 = vmatpush3.bf16.msra.mxu0 %v3523_v10  ;;  %v3540_v27 = vld [vmem:[%s4093_s1 + $0x88] sm:$0xff]   ;;  %v3544_v31 = vld [vmem:[%s4093_s1 + $0x80] sm:$0xff]   ;;  %v3548_v43 = vld [vmem:[%s4093_s1 + $0x1b8] sm:$0xff]  }
  0x18   : > { %3158 = vmatpush3.bf16.msra.mxu1 %v3524_v11  ;;  %3047 = vmatprep.subr.bf16.mxu0 %v3525_v12  ;;  %v295_v32 = vld [vmem:[%s3733_s29] sm:$0xff]  ;;  %v296_v34 = vld [vmem:[%s3733_s29 + $0x8] sm:$0xff]  ;;  %v3549_v55 = vld [vmem:[%s4093_s1 + $0x170] sm:$0xff]  }
  0x19   : > { %3159 = vmatprep.subr.bf16.mxu1 %v3526_v13  ;;  %v299_v33 = vld [vmem:[%s3733_s29 + $0x20] sm:$0xff]  ;;  %v300_v37 = vld [vmem:[%s3733_s29 + $0x28] sm:$0xff]  ;;  %v3550_v58 = vld [vmem:[%s4093_s1 + $0x130] sm:$0xff]  }
  0x1a   : > { %v2687_v35 = vcombine.low %v295_v32, %v299_v33  ;;  %v2688_v36 = vcombine.high %v295_v32, %v299_v33  ;;  %v2689_v38 = vcombine.low %v296_v34, %v300_v37  ;;  %v2690_v39 = vcombine.high %v296_v34, %v300_v37  ;;  %v303_v44 = vld [vmem:[%s3733_s29 + $0x40] sm:$0xff]  ;;  %v304_v47 = vld [vmem:[%s3733_s29 + $0x48] sm:$0xff]  ;;  %v3551_v60 = vld [vmem:[%s4093_s1 + $0x1f0] sm:$0xff]  }
  0x1b   : > { %3048 = vmatpush3.bf16.msra.mxu0 %v3527_v14  ;;  %v307_v45 = vld [vmem:[%s3733_s29 + $0x60] sm:$0xff]  ;;  %v308_v48 = vld [vmem:[%s3733_s29 + $0x68] sm:$0xff]  ;;  %v3552_v61 = vld [vmem:[%s4093_s1 + $0x1b0] sm:$0xff]  }
  0x1c   : > { %3160 = vmatpush3.bf16.msra.mxu1 %v3528_v15  ;;  %3049 = vmatprep.subr.bf16.mxu0 %v3529_v16  ;;  %v2696_v46 = vcombine.high %v303_v44, %v307_v45  ;;  %v311_v49 = vld [vmem:[%s3733_s29 + $0x80] sm:$0xff]  ;;  %v2698_v50 = vcombine.high %v304_v47, %v308_v48  ;;  %v312_v52 = vld [vmem:[%s3733_s29 + $0x88] sm:$0xff]  ;;  %v2695_v54 = vcombine.low %v303_v44, %v307_v45  ;;  %v3565_v34 = vld [vmem:[%s4093_s1 + $0x150] sm:$0xff]  }
  0x1d   : > { %3161 = vmatprep.subr.bf16.mxu1 %v3530_v17  ;;  %1607 = vmatprep.mubr.bf16.mxu0 %v2688_v36  ;;  %v315_v51 = vld [vmem:[%s3733_s29 + $0xa0] sm:$0xff]  ;;  %v316_v53 = vld [vmem:[%s3733_s29 + $0xa8] sm:$0xff]  ;;  %v2697_v56 = vcombine.low %v304_v47, %v308_v48  ;;  %v3566_v36 = vld [vmem:[%s4093_s1 + $0x110] sm:$0xff]  }
  0x1e   : > { %1768 = vmatprep.mubr.bf16.mxu1 %v2690_v39  ;;  %v2704_v57 = vcombine.high %v311_v49, %v315_v51  ;;  %v2706_v59 = vcombine.high %v312_v52, %v316_v53  ;;  %v319_v62 = vld [vmem:[%s3733_s29 + $0xc0] sm:$0xff]  ;;  %v320_v0 = vld [vmem:[%s3733_s29 + $0xc8] sm:$0xff]  ;;  %v2703_v3 = vcombine.low %v311_v49, %v315_v51  ;;  %v2705_v5 = vcombine.low %v312_v52, %v316_v53  ;;  %v3567_v37 = vld [vmem:[%s4093_s1 + $0x1d0] sm:$0xff]  }
  0x1f   : > { %3050 = vmatpush3.bf16.msra.mxu0 %v3531_v18  ;;  %v323_v63 = vld [vmem:[%s3733_s29 + $0xe0] sm:$0xff]  ;;  %v324_v1 = vld [vmem:[%s3733_s29 + $0xe8] sm:$0xff]  ;;  %v3568_v39 = vld [vmem:[%s4093_s1 + $0x190] sm:$0xff]  }
  0x20   : > { %3162 = vmatpush3.bf16.msra.mxu1 %v3532_v19  ;;  %3051 = vmatprep.subr.bf16.mxu0 %v3533_v20  ;;  %v3553_v2 = vld [vmem:[%s4093_s1 + $0x168] sm:$0xff]   ;;  %v2712_v6 = vcombine.high %v319_v62, %v323_v63  ;;  %v2714_v8 = vcombine.high %v320_v0, %v324_v1  ;;  %v327_v10 = vld [vmem:[%s3733_s29 + $0x100] sm:$0xff]  ;;  %v2711_v16 = vcombine.low %v319_v62, %v323_v63 }
  0x21   : > { %3163 = vmatprep.subr.bf16.mxu1 %v3534_v21  ;;  %v3554_v4 = vld [vmem:[%s4093_s1 + $0x128] sm:$0xff]   ;;  %v331_v11 = vld [vmem:[%s3733_s29 + $0x120] sm:$0xff]  ;;  %v2713_v18 = vcombine.low %v320_v0, %v324_v1 }
  0x22   : > { %v3555_v7 = vld [vmem:[%s4093_s1 + $0x1e8] sm:$0xff]   ;;  %v3557_v14 = vld [vmem:[%s4093_s1 + $0x160] sm:$0xff]   ;;  %v2720_v19 = vcombine.high %v327_v10, %v331_v11 }
  0x23   : > { %3052 = vmatpush3.bf16.msra.mxu0 %v3535_v22  ;;  %v3556_v9 = vld [vmem:[%s4093_s1 + $0x1a8] sm:$0xff]   ;;  %v3558_v15 = vld [vmem:[%s4093_s1 + $0x120] sm:$0xff]  }
  0x24   : > { %3164 = vmatpush3.bf16.msra.mxu1 %v3536_v23  ;;  %3053 = vmatprep.subr.bf16.mxu0 %v3537_v24  ;;  %v328_v12 = vld [vmem:[%s3733_s29 + $0x108] sm:$0xff]  ;;  %v3559_v17 = vld [vmem:[%s4093_s1 + $0x1e0] sm:$0xff]   ;;  %v3561_v24 = vld [vmem:[%s4093_s1 + $0x158] sm:$0xff]  }
  0x25   : > { %3165 = vmatprep.subr.bf16.mxu1 %v3538_v25  ;;  %v332_v13 = vld [vmem:[%s3733_s29 + $0x128] sm:$0xff]  ;;  %v3560_v20 = vld [vmem:[%s4093_s1 + $0x1a0] sm:$0xff]  }
  0x26   : > { %v2722_v21 = vcombine.high %v328_v12, %v332_v13  ;;  %v335_v22 = vld [vmem:[%s3733_s29 + $0x140] sm:$0xff]  ;;  %v336_v25 = vld [vmem:[%s3733_s29 + $0x148] sm:$0xff] }
  0x27   : > { %3054 = vmatpush3.bf16.msra.mxu0 %v3539_v26  ;;  %v339_v23 = vld [vmem:[%s3733_s29 + $0x160] sm:$0xff]  ;;  %v340_v26 = vld [vmem:[%s3733_s29 + $0x168] sm:$0xff] }
  0x28   : > { %3166 = vmatpush3.bf16.msra.mxu1 %v3540_v27  ;;  %3055 = vmatprep.subr.bf16.mxu0 %v3541_v28  ;;  %v3562_v27 = vld [vmem:[%s4093_s1 + $0x118] sm:$0xff]   ;;  %v2728_v32 = vcombine.high %v335_v22, %v339_v23  ;;  %v2730_v33 = vcombine.high %v336_v25, %v340_v26  ;;  %v3570_v47 = vld [vmem:[%s4093_s1 + $0x108] sm:$0xff]   ;;  %v355_v51 = vld [vmem:[%s3733_s29 + $0x1e0] sm:$0xff] }
  0x29   : > { %3167 = vmatprep.subr.bf16.mxu1 %v3542_v29  ;;  %v3563_v28 = vld [vmem:[%s4093_s1 + $0x1d8] sm:$0xff]   ;;  %v3571_v48 = vld [vmem:[%s4093_s1 + $0x1c8] sm:$0xff]   ;;  %v359_v62 = vld [vmem:[%s3733_s29 + $0x200] sm:$0xff] }
  0x2a   : > { %v3564_v29 = vld [vmem:[%s4093_s1 + $0x198] sm:$0xff]   ;;  %v3572_v49 = vld [vmem:[%s4093_s1 + $0x188] sm:$0xff]   ;;  %v363_v63 = vld [vmem:[%s3733_s29 + $0x220] sm:$0xff] }
  0x2b   : > { %3056 = vmatpush3.bf16.msra.mxu0 %v3543_v30  ;;  %v2719_v30 = vcombine.low %v327_v10, %v331_v11  ;;  %v352_v52 = vld [vmem:[%s3733_s29 + $0x1c8] sm:$0xff]  ;;  %v2751_v10 = vcombine.low %v359_v62, %v363_v63 }
  0x2c   : > { %3168 = vmatpush3.bf16.msra.mxu1 %v3544_v31  ;;  %3265 = vmatprep.subr.bf16.mxu0 %v3545_v40  ;;  %v2721_v31 = vcombine.low %v328_v12, %v332_v13  ;;  %v344_v40 = vld [vmem:[%s3733_s29 + $0x188] sm:$0xff] }
  0x2d   : > { %3377 = vmatprep.subr.bf16.mxu1 %v3547_v42  ;;  %v2727_v42 = vcombine.low %v335_v22, %v339_v23  ;;  %v356_v53 = vld [vmem:[%s3733_s29 + $0x1e8] sm:$0xff]  ;;  %v383_v22 = vld [vmem:[%s3733_s29 + $0x2c0] sm:$0xff] }
  0x2e   : > { %1608 = vmatmul.mubr.bf16.vlgmr.msra.gmra.mxu0 %v2687_v35  ;;  %v343_v35 = vld [vmem:[%s3733_s29 + $0x180] sm:$0xff]  ;;  %v360_v0 = vld [vmem:[%s3733_s29 + $0x208] sm:$0xff] }
  0x2f   : > { %1769 = vmatmul.mubr.bf16.vlgmr.msra.gmra.mxu1 %v2689_v38  ;;  %3266 = vmatpush3.bf16.msra.mxu0 %v3546_v41  ;;  %v347_v38 = vld [vmem:[%s3733_s29 + $0x1a0] sm:$0xff]  ;;  %v348_v41 = vld [vmem:[%s3733_s29 + $0x1a8] sm:$0xff] }
  0x30   : > { %3378 = vmatpush3.bf16.msra.mxu1 %v3548_v43  ;;  %1615 = vmatprep.mubr.bf16.mxu0 %v2696_v46  ;;  %v2729_v43 = vcombine.low %v336_v25, %v340_v26  ;;  %v2736_v44 = vcombine.high %v343_v35, %v347_v38  ;;  %v2738_v45 = vcombine.high %v344_v40, %v348_v41  ;;  %v3569_v46 = vld [vmem:[%s4093_s1 + $0x148] sm:$0xff]   ;;  %v387_v23 = vld [vmem:[%s3733_s29 + $0x2e0] sm:$0xff] }
  0x31   : > { %1776 = vmatprep.mubr.bf16.mxu1 %v2698_v50  ;;  %3267 = vmatprep.subr.bf16.mxu0 %v3549_v55  ;;  %v351_v50 = vld [vmem:[%s3733_s29 + $0x1c0] sm:$0xff]  ;;  %v364_v1 = vld [vmem:[%s3733_s29 + $0x228] sm:$0xff] }
  0x32   : > { %3379 = vmatprep.subr.bf16.mxu1 %v3551_v60  ;;  %v3573_v55 = vld [vmem:[%s4093_s1 + $0x140] sm:$0xff]   ;;  %v2753_v11 = vcombine.low %v360_v0, %v364_v1  ;;  %v388_v25 = vld [vmem:[%s3733_s29 + $0x2e8] sm:$0xff] }
  0x33   : > { %3268 = vmatpush3.bf16.msra.mxu0 %v3550_v58  ;;  %v3574_v58 = vld [vmem:[%s4093_s1 + $0x100] sm:$0xff]  }
  0x34   : > { %3380 = vmatpush3.bf16.msra.mxu1 %v3552_v61  ;;  %3269 = vmatprep.subr.bf16.mxu0 %v3553_v2  ;;  %v3575_v60 = vld [vmem:[%s4093_s1 + $0x1c0] sm:$0xff]   ;;  %v2743_v2 = vcombine.low %v351_v50, %v355_v51 }
  0x35   : > { %3381 = vmatprep.subr.bf16.mxu1 %v3555_v7  ;;  %v3576_v61 = vld [vmem:[%s4093_s1 + $0x180] sm:$0xff]  }
  0x36   : > { %1616 = vmatmul.mubr.bf16.gmra.mxu0 %v2695_v54  ;;  %v2735_v54 = vcombine.low %v343_v35, %v347_v38  ;;  %v371_v7 = vld [vmem:[%s3733_s29 + $0x260] sm:$0xff] }
  0x37   : > { %1777 = vmatmul.mubr.bf16.gmra.mxu1 %v2697_v56  ;;  %1623 = vmatprep.mubr.bf16.mxu0 %v2704_v57  ;;  %v2737_v56 = vcombine.low %v344_v40, %v348_v41  ;;  %v2744_v57 = vcombine.high %v351_v50, %v355_v51  ;;  %v399_v38 = vld [vmem:[%s3733_s29 + $0x340] sm:$0xff]  ;;  %v400_v40 = vld [vmem:[%s3733_s29 + $0x348] sm:$0xff] }
  0x38   : > { %1784 = vmatprep.mubr.bf16.mxu1 %v2706_v59  ;;  %3270 = vmatpush3.bf16.msra.mxu0 %v3554_v4  ;;  %v2746_v59 = vcombine.high %v352_v52, %v356_v53  ;;  %v2752_v4 = vcombine.high %v359_v62, %v363_v63  ;;  %v404_v41 = vld [vmem:[%s3733_s29 + $0x368] sm:$0xff]  ;;  %v297_v62 = vld [vmem:[%s3733_s29 + $0x10] sm:$0xff] }
  0x39   : > { %3382 = vmatpush3.bf16.msra.mxu1 %v3556_v9  ;;  %3271 = vmatprep.subr.bf16.mxu0 %v3557_v14  ;;  %v372_v9 = vld [vmem:[%s3733_s29 + $0x268] sm:$0xff]  ;;  %v375_v14 = vld [vmem:[%s3733_s29 + $0x280] sm:$0xff]  ;;  %v2793_v51 = vcombine.low %v400_v40, %v404_v41  ;;  %v301_v63 = vld [vmem:[%s3733_s29 + $0x30] sm:$0xff] }
  0x3a   : > { %3383 = vmatprep.subr.bf16.mxu1 %v3559_v17  ;;  %v380_v17 = vld [vmem:[%s3733_s29 + $0x2a8] sm:$0xff] }
  0x3c   : > { %3272 = vmatpush3.bf16.msra.mxu0 %v3558_v15  ;;  %v379_v15 = vld [vmem:[%s3733_s29 + $0x2a0] sm:$0xff] }
  0x3d   : > { %3384 = vmatpush3.bf16.msra.mxu1 %v3560_v20  ;;  %3273 = vmatprep.subr.bf16.mxu0 %v3561_v24  ;;  %v2768_v20 = vcombine.high %v375_v14, %v379_v15  ;;  %v384_v24 = vld [vmem:[%s3733_s29 + $0x2c8] sm:$0xff]  ;;  %v2767_v26 = vcombine.low %v375_v14, %v379_v15  ;;  %v313_v14 = vld [vmem:[%s3733_s29 + $0x90] sm:$0xff] }
  0x3e   : > { %1624 = vmatmul.mubr.bf16.gmra.mxu0 %v2703_v3  ;;  %3385 = vmatprep.subr.bf16.mxu1 %v3563_v28  ;;  %v2745_v3 = vcombine.low %v352_v52, %v356_v53  ;;  %v2776_v28 = vcombine.high %v383_v22, %v387_v23  ;;  %v2777_v35 = vcombine.low %v384_v24, %v388_v25  ;;  %v317_v15 = vld [vmem:[%s3733_s29 + $0xb0] sm:$0xff] }
  0x3f   : > { %1785 = vmatmul.mubr.bf16.gmra.mxu1 %v2705_v5  ;;  %1631 = vmatprep.mubr.bf16.mxu0 %v2712_v6  ;;  %v2754_v5 = vcombine.high %v360_v0, %v364_v1  ;;  %v367_v6 = vld [vmem:[%s3733_s29 + $0x240] sm:$0xff]  ;;  %v298_v0 = vld [vmem:[%s3733_s29 + $0x18] sm:$0xff] }
  0x40   : > { %1792 = vmatprep.mubr.bf16.mxu1 %v2714_v8  ;;  %3274 = vmatpush3.bf16.msra.mxu0 %v3562_v27  ;;  %v368_v8 = vld [vmem:[%s3733_s29 + $0x248] sm:$0xff]  ;;  %v2760_v12 = vcombine.high %v367_v6, %v371_v7  ;;  %v302_v1 = vld [vmem:[%s3733_s29 + $0x38] sm:$0xff] }
  0x41   : > { %3386 = vmatpush3.bf16.msra.mxu1 %v3564_v29  ;;  %3275 = vmatprep.subr.bf16.mxu0 %v3565_v34  ;;  %v2762_v13 = vcombine.high %v368_v8, %v372_v9  ;;  %v2778_v29 = vcombine.high %v384_v24, %v388_v25  ;;  %v2775_v34 = vcombine.low %v383_v22, %v387_v23  ;;  %v321_v22 = vld [vmem:[%s3733_s29 + $0xd0] sm:$0xff]  ;;  %v322_v24 = vld [vmem:[%s3733_s29 + $0xd8] sm:$0xff] }
  0x42   : > { %3387 = vmatprep.subr.bf16.mxu1 %v3567_v37  ;;  %v325_v23 = vld [vmem:[%s3733_s29 + $0xf0] sm:$0xff]  ;;  %v326_v25 = vld [vmem:[%s3733_s29 + $0xf8] sm:$0xff] }
  0x44   : > { %3276 = vmatpush3.bf16.msra.mxu0 %v3566_v36 }
  0x45   : > { %3388 = vmatpush3.bf16.msra.mxu1 %v3568_v39  ;;  %3277 = vmatprep.subr.bf16.mxu0 %v3569_v46  ;;  %v403_v39 = vld [vmem:[%s3733_s29 + $0x360] sm:$0xff] }
  0x46   : > { %1632 = vmatmul.mubr.bf16.gmra.mxu0 %v2711_v16  ;;  %3389 = vmatprep.subr.bf16.mxu1 %v3571_v48  ;;  %v376_v16 = vld [vmem:[%s3733_s29 + $0x288] sm:$0xff]  ;;  %v407_v46 = vld [vmem:[%s3733_s29 + $0x380] sm:$0xff]  ;;  %v2791_v50 = vcombine.low %v399_v38, %v403_v39 }
  0x47   : > { %1793 = vmatmul.mubr.bf16.gmra.mxu1 %v2713_v18  ;;  %1639 = vmatprep.mubr.bf16.mxu0 %v2720_v19  ;;  %v2759_v18 = vcombine.low %v367_v6, %v371_v7  ;;  %v2761_v19 = vcombine.low %v368_v8, %v372_v9  ;;  %v2769_v27 = vcombine.low %v376_v16, %v380_v17  ;;  %v408_v48 = vld [vmem:[%s3733_s29 + $0x388] sm:$0xff]  ;;  %v305_v6 = vld [vmem:[%s3733_s29 + $0x50] sm:$0xff]  ;;  %v306_v8 = vld [vmem:[%s3733_s29 + $0x58] sm:$0xff] }
  0x48   : > { %1800 = vmatprep.mubr.bf16.mxu1 %v2722_v21  ;;  %3278 = vmatpush3.bf16.msra.mxu0 %v3570_v47  ;;  %v2770_v21 = vcombine.high %v376_v16, %v380_v17  ;;  %v411_v47 = vld [vmem:[%s3733_s29 + $0x3a0] sm:$0xff]  ;;  %v309_v7 = vld [vmem:[%s3733_s29 + $0x70] sm:$0xff]  ;;  %v310_v9 = vld [vmem:[%s3733_s29 + $0x78] sm:$0xff] }
  0x49   : > { %3390 = vmatpush3.bf16.msra.mxu1 %v3572_v49  ;;  %3279 = vmatprep.subr.bf16.mxu0 %v3573_v55  ;;  %v412_v49 = vld [vmem:[%s3733_s29 + $0x3a8] sm:$0xff]  ;;  %v2800_v52 = vcombine.high %v407_v46, %v411_v47  ;;  %v419_v55 = vld [vmem:[%s3733_s29 + $0x3e0] sm:$0xff]  ;;  %v314_v16 = vld [vmem:[%s3733_s29 + $0x98] sm:$0xff] }
  0x4a   : > { %3391 = vmatprep.subr.bf16.mxu1 %v3575_v60  ;;  %v2802_v53 = vcombine.high %v408_v48, %v412_v49  ;;  %v318_v17 = vld [vmem:[%s3733_s29 + $0xb8] sm:$0xff] }
  0x4c   : > { %3280 = vmatpush3.bf16.msra.mxu0 %v3574_v58  ;;  %v2799_v58 = vcombine.low %v407_v46, %v411_v47  ;;  %v345_v46 = vld [vmem:[%s3733_s29 + $0x190] sm:$0xff] }
  0x4d   : > { %3392 = vmatpush3.bf16.msra.mxu1 %v3576_v61  ;;  %v349_v47 = vld [vmem:[%s3733_s29 + $0x1b0] sm:$0xff] }
  0x4e   : > { %1640 = vmatmul.mubr.bf16.gmra.mxu0 %v2719_v30  ;;  %v391_v30 = vld [vmem:[%s3733_s29 + $0x300] sm:$0xff] }
  0x4f   : > { %1801 = vmatmul.mubr.bf16.gmra.mxu1 %v2721_v31  ;;  %1647 = vmatprep.mubr.bf16.mxu0 %v2728_v32  ;;  %v395_v31 = vld [vmem:[%s3733_s29 + $0x320] sm:$0xff]  ;;  %v392_v32 = vld [vmem:[%s3733_s29 + $0x308] sm:$0xff] }
  0x50   : > { %1808 = vmatprep.mubr.bf16.mxu1 %v2730_v33  ;;  %v396_v33 = vld [vmem:[%s3733_s29 + $0x328] sm:$0xff]  ;;  %v2784_v36 = vcombine.high %v391_v30, %v395_v31 }
  0x51   : > { %v2786_v37 = vcombine.high %v392_v32, %v396_v33 }
  0x56   : > { %1648 = vmatmul.mubr.bf16.gmra.mxu0 %v2727_v42  ;;  %v2783_v42 = vcombine.low %v391_v30, %v395_v31  ;;  %v329_v30 = vld [vmem:[%s3733_s29 + $0x110] sm:$0xff] }
  0x57   : > { %1809 = vmatmul.mubr.bf16.gmra.mxu1 %v2729_v43  ;;  %1655 = vmatprep.mubr.bf16.mxu0 %v2736_v44  ;;  %v2785_v43 = vcombine.low %v392_v32, %v396_v33  ;;  %v2792_v44 = vcombine.high %v399_v38, %v403_v39  ;;  %v333_v31 = vld [vmem:[%s3733_s29 + $0x130] sm:$0xff]  ;;  %v330_v32 = vld [vmem:[%s3733_s29 + $0x118] sm:$0xff] }
  0x58   : > { %1816 = vmatprep.mubr.bf16.mxu1 %v2738_v45  ;;  %v2794_v45 = vcombine.high %v400_v40, %v404_v41  ;;  %v334_v33 = vld [vmem:[%s3733_s29 + $0x138] sm:$0xff]  ;;  %v337_v38 = vld [vmem:[%s3733_s29 + $0x150] sm:$0xff] }
  0x59   : > { %v341_v39 = vld [vmem:[%s3733_s29 + $0x170] sm:$0xff]  ;;  %v338_v40 = vld [vmem:[%s3733_s29 + $0x158] sm:$0xff] }
  0x5a   : > { %v342_v41 = vld [vmem:[%s3733_s29 + $0x178] sm:$0xff] }
  0x5e   : > { %1656 = vmatmul.mubr.bf16.gmra.mxu0 %v2735_v54  ;;  %v415_v54 = vld [vmem:[%s3733_s29 + $0x3c0] sm:$0xff] }
  0x5f   : > { %1817 = vmatmul.mubr.bf16.gmra.mxu1 %v2737_v56  ;;  %1663 = vmatprep.mubr.bf16.mxu0 %v2744_v57  ;;  %v416_v56 = vld [vmem:[%s3733_s29 + $0x3c8] sm:$0xff]  ;;  %v2808_v60 = vcombine.high %v415_v54, %v419_v55 }
  0x60   : > { %1824 = vmatprep.mubr.bf16.mxu1 %v2746_v59  ;;  %v420_v57 = vld [vmem:[%s3733_s29 + $0x3e8] sm:$0xff]  ;;  %v2801_v59 = vcombine.low %v408_v48, %v412_v49  ;;  %v346_v48 = vld [vmem:[%s3733_s29 + $0x198] sm:$0xff] }
  0x61   : > { %v2810_v61 = vcombine.high %v416_v56, %v420_v57  ;;  %v350_v49 = vld [vmem:[%s3733_s29 + $0x1b8] sm:$0xff] }
  0x66   : > { %1664 = vmatmul.mubr.bf16.gmra.mxu0 %v2743_v2  ;;  %v2807_v2 = vcombine.low %v415_v54, %v419_v55  ;;  %v353_v54 = vld [vmem:[%s3733_s29 + $0x1d0] sm:$0xff] }
  0x67   : > { %1825 = vmatmul.mubr.bf16.gmra.mxu1 %v2745_v3  ;;  %1671 = vmatprep.mubr.bf16.mxu0 %v2752_v4  ;;  %v2809_v3 = vcombine.low %v416_v56, %v420_v57  ;;  %v2692_v4 = vcombine.high %v297_v62, %v301_v63  ;;  %v357_v55 = vld [vmem:[%s3733_s29 + $0x1f0] sm:$0xff]  ;;  %v354_v56 = vld [vmem:[%s3733_s29 + $0x1d8] sm:$0xff] }
  0x68   : > { %1832 = vmatprep.mubr.bf16.mxu1 %v2754_v5  ;;  %v2694_v5 = vcombine.high %v298_v0, %v302_v1  ;;  %v358_v57 = vld [vmem:[%s3733_s29 + $0x1f8] sm:$0xff] }
  0x6e   : > { %1672 = vmatmul.mubr.bf16.gmra.mxu0 %v2751_v10  ;;  %v2691_v10 = vcombine.low %v297_v62, %v301_v63  ;;  %v361_v62 = vld [vmem:[%s3733_s29 + $0x210] sm:$0xff] }
  0x6f   : > { %1833 = vmatmul.mubr.bf16.gmra.mxu1 %v2753_v11  ;;  %1679 = vmatprep.mubr.bf16.mxu0 %v2760_v12  ;;  %v2693_v11 = vcombine.low %v298_v0, %v302_v1  ;;  %v2700_v12 = vcombine.high %v305_v6, %v309_v7  ;;  %v365_v63 = vld [vmem:[%s3733_s29 + $0x230] sm:$0xff]  ;;  %v362_v0 = vld [vmem:[%s3733_s29 + $0x218] sm:$0xff] }
  0x70   : > { %1840 = vmatprep.mubr.bf16.mxu1 %v2762_v13  ;;  %v2702_v13 = vcombine.high %v306_v8, %v310_v9  ;;  %v366_v1 = vld [vmem:[%s3733_s29 + $0x238] sm:$0xff] }
  0x76   : > { %1680 = vmatmul.mubr.bf16.gmra.mxu0 %v2759_v18  ;;  %v2699_v18 = vcombine.low %v305_v6, %v309_v7  ;;  %v369_v6 = vld [vmem:[%s3733_s29 + $0x250] sm:$0xff] }
  0x77   : > { %1841 = vmatmul.mubr.bf16.gmra.mxu1 %v2761_v19  ;;  %1687 = vmatprep.mubr.bf16.mxu0 %v2768_v20  ;;  %v2701_v19 = vcombine.low %v306_v8, %v310_v9  ;;  %v2708_v20 = vcombine.high %v313_v14, %v317_v15  ;;  %v373_v7 = vld [vmem:[%s3733_s29 + $0x270] sm:$0xff]  ;;  %v370_v8 = vld [vmem:[%s3733_s29 + $0x258] sm:$0xff] }
  0x78   : > { %1848 = vmatprep.mubr.bf16.mxu1 %v2770_v21  ;;  %v2710_v21 = vcombine.high %v314_v16, %v318_v17  ;;  %v374_v9 = vld [vmem:[%s3733_s29 + $0x278] sm:$0xff] }
  0x7e   : > { %1688 = vmatmul.mubr.bf16.gmra.mxu0 %v2767_v26  ;;  %v2707_v26 = vcombine.low %v313_v14, %v317_v15 }
  0x7f   : > { %1849 = vmatmul.mubr.bf16.gmra.mxu1 %v2769_v27  ;;  %1695 = vmatprep.mubr.bf16.mxu0 %v2776_v28  ;;  %v2709_v27 = vcombine.low %v314_v16, %v318_v17  ;;  %v2716_v28 = vcombine.high %v321_v22, %v325_v23  ;;  %v377_v17 = vld [vmem:[%s3733_s29 + $0x290] sm:$0xff] }
  0x80   : > { %1856 = vmatprep.mubr.bf16.mxu1 %v2778_v29  ;;  %v2718_v29 = vcombine.high %v322_v24, %v326_v25 }
  0x86   : > { %1696 = vmatmul.mubr.bf16.gmra.mxu0 %v2775_v34  ;;  %v2715_v34 = vcombine.low %v321_v22, %v325_v23  ;;  %v382_v22 = vld [vmem:[%s3733_s29 + $0x2b8] sm:$0xff] }
  0x87   : > { %1857 = vmatmul.mubr.bf16.gmra.mxu1 %v2777_v35  ;;  %1703 = vmatprep.mubr.bf16.mxu0 %v2784_v36  ;;  %v2717_v35 = vcombine.low %v322_v24, %v326_v25  ;;  %v2724_v36 = vcombine.high %v329_v30, %v333_v31  ;;  %v2763_v25 = vcombine.low %v369_v6, %v373_v7 }
  0x88   : > { %1864 = vmatprep.mubr.bf16.mxu1 %v2786_v37  ;;  %v2726_v37 = vcombine.high %v330_v32, %v334_v33 }
  0x8e   : > { %1704 = vmatmul.mubr.bf16.gmra.mxu0 %v2783_v42  ;;  %v2723_v42 = vcombine.low %v329_v30, %v333_v31 }
  0x8f   : > { %1865 = vmatmul.mubr.bf16.gmra.mxu1 %v2785_v43  ;;  %1711 = vmatprep.mubr.bf16.mxu0 %v2792_v44  ;;  %v2725_v43 = vcombine.low %v330_v32, %v334_v33  ;;  %v2732_v44 = vcombine.high %v337_v38, %v341_v39 }
  0x90   : > { %1872 = vmatprep.mubr.bf16.mxu1 %v2794_v45  ;;  %v2734_v45 = vcombine.high %v338_v40, %v342_v41 }
  0x96   : > { %1712 = vmatmul.mubr.bf16.gmra.mxu0 %v2791_v50  ;;  %v2731_v50 = vcombine.low %v337_v38, %v341_v39  ;;  %v385_v39 = vld [vmem:[%s3733_s29 + $0x2d0] sm:$0xff] }
  0x97   : > { %1873 = vmatmul.mubr.bf16.gmra.mxu1 %v2793_v51  ;;  %1719 = vmatprep.mubr.bf16.mxu0 %v2800_v52  ;;  %v2733_v51 = vcombine.low %v338_v40, %v342_v41  ;;  %v2740_v52 = vcombine.high %v345_v46, %v349_v47  ;;  %v389_v40 = vld [vmem:[%s3733_s29 + $0x2f0] sm:$0xff] }
  0x98   : > { %1880 = vmatprep.mubr.bf16.mxu1 %v2802_v53  ;;  %v2742_v53 = vcombine.high %v346_v48, %v350_v49 }
  0x9e   : > { %1720 = vmatmul.mubr.bf16.gmra.mxu0 %v2799_v58  ;;  %v2739_v58 = vcombine.low %v345_v46, %v349_v47 }
  0x9f   : > { %1881 = vmatmul.mubr.bf16.gmra.mxu1 %v2801_v59  ;;  %1727 = vmatprep.mubr.bf16.mxu0 %v2808_v60  ;;  %v2741_v59 = vcombine.low %v346_v48, %v350_v49  ;;  %v2748_v60 = vcombine.high %v353_v54, %v357_v55 }
  0xa0   : > { %1888 = vmatprep.mubr.bf16.mxu1 %v2810_v61  ;;  %v2750_v61 = vcombine.high %v354_v56, %v358_v57 }
  0xa6   : > { %1728 = vmatmul.mubr.bf16.gmra.mxu0 %v2807_v2  ;;  %v2747_v2 = vcombine.low %v353_v54, %v357_v55 }
  0xa7   : > { %1889 = vmatmul.mubr.bf16.gmra.mxu1 %v2809_v3  ;;  %1929 = vmatprep.mubr.bf16.mxu0 %v2692_v4  ;;  %v2749_v3 = vcombine.low %v354_v56, %v358_v57  ;;  %v2756_v4 = vcombine.high %v361_v62, %v365_v63 }
  0xa8   : > { %2090 = vmatprep.mubr.bf16.mxu1 %v2694_v5  ;;  %v2758_v5 = vcombine.high %v362_v0, %v366_v1 }
  0xae   : > { %1930 = vmatmul.mubr.bf16.vlgmr.msra.gmra.mxu0 %v2691_v10  ;;  %v2755_v10 = vcombine.low %v361_v62, %v365_v63  ;;  %v397_v62 = vld [vmem:[%s3733_s29 + $0x330] sm:$0xff] }
  0xaf   : > { %2091 = vmatmul.mubr.bf16.vlgmr.msra.gmra.mxu1 %v2693_v11  ;;  %1937 = vmatprep.mubr.bf16.mxu0 %v2700_v12  ;;  %v2757_v11 = vcombine.low %v362_v0, %v366_v1  ;;  %v2764_v12 = vcombine.high %v369_v6, %v373_v7  ;;  %v394_v1 = vld [vmem:[%s3733_s29 + $0x318] sm:$0xff] }
  0xb0   : > { %2098 = vmatprep.mubr.bf16.mxu1 %v2702_v13  ;;  %v2766_v13 = vcombine.high %v370_v8, %v374_v9 }
  0xb6   : > { %1938 = vmatmul.mubr.bf16.gmra.mxu0 %v2699_v18  ;;  %v381_v18 = vld [vmem:[%s3733_s29 + $0x2b0] sm:$0xff] }
  0xb7   : > { %2099 = vmatmul.mubr.bf16.gmra.mxu1 %v2701_v19  ;;  %1945 = vmatprep.mubr.bf16.mxu0 %v2708_v20  ;;  %v2771_v47 = vcombine.low %v377_v17, %v381_v18 }
  0xb8   : > { %2106 = vmatprep.mubr.bf16.mxu1 %v2710_v21  ;;  %v378_v21 = vld [vmem:[%s3733_s29 + $0x298] sm:$0xff] }
  0xb9   : > { %v2774_v31 = vcombine.high %v378_v21, %v382_v22  ;;  %v2773_v49 = vcombine.low %v378_v21, %v382_v22 }
  0xbe   : > { %1946 = vmatmul.mubr.bf16.gmra.mxu0 %v2707_v26 }
  0xbf   : > { %2107 = vmatmul.mubr.bf16.gmra.mxu1 %v2709_v27  ;;  %1953 = vmatprep.mubr.bf16.mxu0 %v2716_v28  ;;  %v2765_v27 = vcombine.low %v370_v8, %v374_v9  ;;  %v2772_v28 = vcombine.high %v377_v17, %v381_v18 }
  0xc0   : > { %2114 = vmatprep.mubr.bf16.mxu1 %v2718_v29 }
  0xc6   : > { %1954 = vmatmul.mubr.bf16.gmra.mxu0 %v2715_v34 }
  0xc7   : > { %2115 = vmatmul.mubr.bf16.gmra.mxu1 %v2717_v35  ;;  %1961 = vmatprep.mubr.bf16.mxu0 %v2724_v36 }
  0xc8   : > { %2122 = vmatprep.mubr.bf16.mxu1 %v2726_v37 }
  0xce   : > { %1962 = vmatmul.mubr.bf16.gmra.mxu0 %v2723_v42 }
  0xcf   : > { %2123 = vmatmul.mubr.bf16.gmra.mxu1 %v2725_v43  ;;  %1969 = vmatprep.mubr.bf16.mxu0 %v2732_v44  ;;  %v386_v43 = vld [vmem:[%s3733_s29 + $0x2d8] sm:$0xff] }
  0xd0   : > { %2130 = vmatprep.mubr.bf16.mxu1 %v2734_v45  ;;  %v390_v44 = vld [vmem:[%s3733_s29 + $0x2f8] sm:$0xff] }
  0xd1   : > { %v2781_v7 = vcombine.low %v386_v43, %v390_v44 }
  0xd6   : > { %1970 = vmatmul.mubr.bf16.gmra.mxu0 %v2731_v50  ;;  %v2780_v50 = vcombine.high %v385_v39, %v389_v40 }
  0xd7   : > { %2131 = vmatmul.mubr.bf16.gmra.mxu1 %v2733_v51  ;;  %1977 = vmatprep.mubr.bf16.mxu0 %v2740_v52 }
  0xd8   : > { %2138 = vmatprep.mubr.bf16.mxu1 %v2742_v53  ;;  %v2782_v53 = vcombine.high %v386_v43, %v390_v44  ;;  %v409_v43 = vld [vmem:[%s3733_s29 + $0x390] sm:$0xff] }
  0xd9   : > { %v413_v44 = vld [vmem:[%s3733_s29 + $0x3b0] sm:$0xff] }
  0xde   : > { %1978 = vmatmul.mubr.bf16.gmra.mxu0 %v2739_v58 }
  0xdf   : > { %2139 = vmatmul.mubr.bf16.gmra.mxu1 %v2741_v59  ;;  %1985 = vmatprep.mubr.bf16.mxu0 %v2748_v60 }
  0xe0   : > { %2146 = vmatprep.mubr.bf16.mxu1 %v2750_v61  ;;  %v393_v61 = vld [vmem:[%s3733_s29 + $0x310] sm:$0xff] }
  0xe1   : > { %v2788_v8 = vcombine.high %v393_v61, %v397_v62 }
  0xe6   : > { %1986 = vmatmul.mubr.bf16.gmra.mxu0 %v2747_v2  ;;  %v398_v2 = vld [vmem:[%s3733_s29 + $0x338] sm:$0xff] }
  0xe7   : > { %2147 = vmatmul.mubr.bf16.gmra.mxu1 %v2749_v3  ;;  %1993 = vmatprep.mubr.bf16.mxu0 %v2756_v4 }
  0xe8   : > { %2154 = vmatprep.mubr.bf16.mxu1 %v2758_v5  ;;  %v2779_v5 = vcombine.low %v385_v39, %v389_v40 }
  0xee   : > { %v3057_v14 = vpop.f32.mrf.mxu0  ;;  %1994 = vmatmul.mubr.bf16.gmra.mxu0 %v2755_v10 }
  0xef   : > { %v3169_v15 = vpop.f32.mrf.mxu1  ;;  %2155 = vmatmul.mubr.bf16.gmra.mxu1 %v2757_v11  ;;  %2001 = vmatprep.mubr.bf16.mxu0 %v2764_v12  ;;  %v2790_v11 = vcombine.high %v394_v1, %v398_v2 }
  0xf0   : > { %v3058_v16 = vpop.f32.mrf.mxu0  ;;  %2162 = vmatprep.mubr.bf16.mxu1 %v2766_v13 }
  0xf1   : > { %v3059_v19 = vadd.f32 %v3058_v16, %v3057_v14  ;;  %v3170_v20 = vpop.f32.mrf.mxu1 }
  0xf2   : > { %v3171_v23 = vadd.f32 %v3170_v20, %v3169_v15  ;;  %v3060_v24 = vpop.f32.mrf.mxu0  ;;  %v405_v20 = vld [vmem:[%s3733_s29 + $0x370] sm:$0xff] }
  0xf3   : > { %v3172_v26 = vpop.f32.mrf.mxu1 }
  0xf4   : > { %v3945_v29 = vadd.f32 %v3171_v23, %v3059_v19  ;;  %v3061_v30 = vpop.f32.mrf.mxu0  ;;  %v401_v19 = vld [vmem:[%s3733_s29 + $0x350] sm:$0xff]  ;;  %v402_v23 = vld [vmem:[%s3733_s29 + $0x358] sm:$0xff] }
  0xf5   : > { %v3062_v32 = vadd.f32 %v3061_v30, %v3060_v24  ;;  %v3173_v33 = vpop.f32.mrf.mxu1  ;;  %v406_v24 = vld [vmem:[%s3733_s29 + $0x378] sm:$0xff]  ;;  %v2789_v30 = vcombine.low %v394_v1, %v398_v2 }
  0xf6   : > { %v3174_v34 = vadd.f32 %v3173_v33, %v3172_v26  ;;  %v3063_v35 = vpop.f32.mrf.mxu0  ;;  %2002 = vmatmul.mubr.bf16.gmra.mxu0 %v2763_v25 }
  0xf7   : > { %v3175_v36 = vpop.f32.mrf.mxu1  ;;  %2163 = vmatmul.mubr.bf16.gmra.mxu1 %v2765_v27  ;;  %2009 = vmatprep.mubr.bf16.mxu0 %v2772_v28  ;;  %v2787_v27 = vcombine.low %v393_v61, %v397_v62 }
  0xf8   : > { %v3947_v37 = vadd.f32 %v3174_v34, %v3062_v32  ;;  %v3064_v38 = vpop.f32.mrf.mxu0  ;;  %2170 = vmatprep.mubr.bf16.mxu1 %v2774_v31  ;;  %v2796_v31 = vcombine.high %v401_v19, %v405_v20  ;;  %v2798_v34 = vcombine.high %v402_v23, %v406_v24 }
  0xf9   : > { %v3065_v41 = vadd.f32 %v3064_v38, %v3063_v35  ;;  %v3176_v42 = vpop.f32.mrf.mxu1 }
  0xfa   : > { %v3177_v45 = vadd.f32 %v3176_v42, %v3175_v36  ;;  %v3066_v46 = vpop.f32.mrf.mxu0 }
  0xfb   : > { %v3178_v48 = vpop.f32.mrf.mxu1 }
  0xfc   : > { %v3953_v51 = vadd.f32 %v3177_v45, %v3065_v41  ;;  %v3067_v52 = vpop.f32.mrf.mxu0 }
  0xfd   : > { %v3068_v54 = vadd.f32 %v3067_v52, %v3066_v46  ;;  %v3179_v55 = vpop.f32.mrf.mxu1  ;;  %v2795_v52 = vcombine.low %v401_v19, %v405_v20 }
  0xfe   : > { %v3180_v56 = vadd.f32 %v3179_v55, %v3178_v48  ;;  %v3069_v57 = vpop.f32.mrf.mxu0  ;;  %2010 = vmatmul.mubr.bf16.gmra.mxu0 %v2771_v47  ;;  %v410_v47 = vld [vmem:[%s3733_s29 + $0x398] sm:$0xff]  ;;  %v2804_v55 = vcombine.high %v409_v43, %v413_v44 }
  0xff   : > { %v3181_v58 = vpop.f32.mrf.mxu1  ;;  %2171 = vmatmul.mubr.bf16.gmra.mxu1 %v2773_v49  ;;  %2017 = vmatprep.mubr.bf16.mxu0 %v2780_v50  ;;  %v414_v48 = vld [vmem:[%s3733_s29 + $0x3b8] sm:$0xff] }
 0x100   : > { %v3955_v59 = vadd.f32 %v3180_v56, %v3068_v54  ;;  %v3070_v60 = vpop.f32.mrf.mxu0  ;;  %2178 = vmatprep.mubr.bf16.mxu1 %v2782_v53  ;;  %v2797_v54 = vcombine.low %v402_v23, %v406_v24 }
 0x101   : > { %v3071_v63 = vadd.f32 %v3070_v60, %v3069_v57  ;;  %v3182_v0 = vpop.f32.mrf.mxu1 }
 0x102   : > { %v3183_v3 = vadd.f32 %v3182_v0, %v3181_v58  ;;  %v3072_v4 = vpop.f32.mrf.mxu0  ;;  %v2806_v58 = vcombine.high %v410_v47, %v414_v48 }
 0x103   : > { %v3184_v6 = vpop.f32.mrf.mxu1 }
 0x104   : > { %v3961_v9 = vadd.f32 %v3183_v3, %v3071_v63  ;;  %v3073_v10 = vpop.f32.mrf.mxu0  ;;  %v417_v3 = vld [vmem:[%s3733_s29 + $0x3d0] sm:$0xff] }
 0x105   : > { %v3074_v12 = vadd.f32 %v3073_v10, %v3072_v4  ;;  %v3185_v13 = vpop.f32.mrf.mxu1  ;;  %v421_v4 = vld [vmem:[%s3733_s29 + $0x3f0] sm:$0xff] }
 0x106   : > { %v3186_v14 = vadd.f32 %v3185_v13, %v3184_v6  ;;  %v3075_v15 = vpop.f32.mrf.mxu0  ;;  %2018 = vmatmul.mubr.bf16.gmra.mxu0 %v2779_v5 }
 0x107   : > { %v3187_v16 = vpop.f32.mrf.mxu1  ;;  %2179 = vmatmul.mubr.bf16.gmra.mxu1 %v2781_v7  ;;  %2025 = vmatprep.mubr.bf16.mxu0 %v2788_v8  ;;  %v418_v7 = vld [vmem:[%s3733_s29 + $0x3d8] sm:$0xff] }
 0x108   : > { %v3963_v17 = vadd.f32 %v3186_v14, %v3074_v12  ;;  %v3076_v18 = vpop.f32.mrf.mxu0  ;;  %2186 = vmatprep.mubr.bf16.mxu1 %v2790_v11  ;;  %v422_v8 = vld [vmem:[%s3733_s29 + $0x3f8] sm:$0xff]  ;;  %v2803_v12 = vcombine.low %v409_v43, %v413_v44  ;;  %v2805_v14 = vcombine.low %v410_v47, %v414_v48  ;;  %s2686_s29 = sshll.u32 %s4100_s21, 2 }
 0x109   : > { %v3077_v21 = vadd.f32 %v3076_v18, %v3075_v15  ;;  %v3188_v22 = vpop.f32.mrf.mxu1  ;;  %v2812_v15 = vcombine.high %v417_v3, %v421_v4  ;;  %v2814_v19 = vcombine.high %v418_v7, %v422_v8  ;;  %s4036_s30 = scalar_lea.vmem %s4094_s2, %s2686_s29 }
 0x10a   : > { %v3189_v25 = vadd.f32 %v3188_v22, %v3187_v16  ;;  %v3078_v26 = vpop.f32.mrf.mxu0 }
 0x10b   : > { %v3190_v28 = vpop.f32.mrf.mxu1 }
 0x10c   : > { %v3969_v32 = vadd.f32 %v3189_v25, %v3077_v21  ;;  %v3079_v33 = vpop.f32.mrf.mxu0 }
 0x10d   : > { %v3080_v35 = vadd.f32 %v3079_v33, %v3078_v26  ;;  %v3191_v36 = vpop.f32.mrf.mxu1  ;;  %v2811_v33 = vcombine.low %v417_v3, %v421_v4 }
 0x10e   : > { %v3192_v38 = vadd.f32 %v3191_v36, %v3190_v28  ;;  %v3081_v39 = vpop.f32.mrf.mxu0  ;;  %2026 = vmatmul.mubr.bf16.gmra.mxu0 %v2787_v27 }
 0x10f   : > { %v3193_v40 = vpop.f32.mrf.mxu1  ;;  %2187 = vmatmul.mubr.bf16.gmra.mxu1 %v2789_v30  ;;  %2033 = vmatprep.mubr.bf16.mxu0 %v2796_v31 }
 0x110   : > { %v3971_v41 = vadd.f32 %v3192_v38, %v3080_v35  ;;  %v3082_v42 = vpop.f32.mrf.mxu0  ;;  %2194 = vmatprep.mubr.bf16.mxu1 %v2798_v34  ;;  %v2813_v35 = vcombine.low %v418_v7, %v422_v8 }
 0x111   : > { %v3083_v45 = vadd.f32 %v3082_v42, %v3081_v39  ;;  %v3194_v46 = vpop.f32.mrf.mxu1 }
 0x112   : > { %v3195_v49 = vadd.f32 %v3194_v46, %v3193_v40  ;;  %v3084_v50 = vpop.f32.mrf.mxu0 }
 0x113   : > { %v3196_v53 = vpop.f32.mrf.mxu1 }
 0x114   : > { %v3977_v56 = vadd.f32 %v3195_v49, %v3083_v45  ;;  %v3085_v57 = vpop.f32.mrf.mxu0 }
 0x115   : > { %v3086_v60 = vadd.f32 %v3085_v57, %v3084_v50  ;;  %v3197_v61 = vpop.f32.mrf.mxu1 }
 0x116   : > { %v3198_v62 = vadd.f32 %v3197_v61, %v3196_v53  ;;  %v3087_v63 = vpop.f32.mrf.mxu0  ;;  %2034 = vmatmul.mubr.bf16.gmra.mxu0 %v2795_v52 }
 0x117   : > { %v3199_v0 = vpop.f32.mrf.mxu1  ;;  %2195 = vmatmul.mubr.bf16.gmra.mxu1 %v2797_v54  ;;  %2041 = vmatprep.mubr.bf16.mxu0 %v2804_v55 }
 0x118   : > { %v3979_v1 = vadd.f32 %v3198_v62, %v3086_v60  ;;  %v3088_v2 = vpop.f32.mrf.mxu0  ;;  %2202 = vmatprep.mubr.bf16.mxu1 %v2806_v58 }
 0x119   : > { %v3089_v5 = vadd.f32 %v3088_v2, %v3087_v63  ;;  %v3200_v6 = vpop.f32.mrf.mxu1 }
 0x11a   : > { %v3201_v10 = vadd.f32 %v3200_v6, %v3199_v0  ;;  %v3090_v11 = vpop.f32.mrf.mxu0 }
 0x11b   : > { %v3202_v13 = vpop.f32.mrf.mxu1 }
 0x11c   : > { %v3985_v16 = vadd.f32 %v3201_v10, %v3089_v5  ;;  %v3091_v18 = vpop.f32.mrf.mxu0 }
 0x11d   : > { %v3092_v20 = vadd.f32 %v3091_v18, %v3090_v11  ;;  %v3203_v21 = vpop.f32.mrf.mxu1 }
 0x11e   : > { %v3204_v22 = vadd.f32 %v3203_v21, %v3202_v13  ;;  %v3093_v23 = vpop.f32.mrf.mxu0  ;;  %2042 = vmatmul.mubr.bf16.gmra.mxu0 %v2803_v12 }
 0x11f   : > { %v3205_v24 = vpop.f32.mrf.mxu1  ;;  %2203 = vmatmul.mubr.bf16.gmra.mxu1 %v2805_v14  ;;  %2049 = vmatprep.mubr.bf16.mxu0 %v2812_v15 }
 0x120   : > { %v3987_v25 = vadd.f32 %v3204_v22, %v3092_v20  ;;  %v3094_v26 = vpop.f32.mrf.mxu0  ;;  %2210 = vmatprep.mubr.bf16.mxu1 %v2814_v19 }
 0x121   : > { %v3095_v27 = vadd.f32 %v3094_v26, %v3093_v23  ;;  %v3206_v28 = vpop.f32.mrf.mxu1 }
 0x122   : > { %v3207_v30 = vadd.f32 %v3206_v28, %v3205_v24  ;;  %v3096_v31 = vpop.f32.mrf.mxu0 }
 0x123   : > { %v3208_v34 = vpop.f32.mrf.mxu1 }
 0x124   : > { %v3989_v36 = vadd.f32 %v3207_v30, %v3095_v27  ;;  %v3097_v38 = vpop.f32.mrf.mxu0 }
 0x125   : > { %v3098_v39 = vadd.f32 %v3097_v38, %v3096_v31  ;;  %v3209_v40 = vpop.f32.mrf.mxu1 }
 0x126   : > { %v3210_v42 = vadd.f32 %v3209_v40, %v3208_v34  ;;  %v3099_v43 = vpop.f32.mrf.mxu0  ;;  %2050 = vmatmul.mubr.bf16.gmra.mxu0 %v2811_v33 }
 0x127   : > { %v3211_v44 = vpop.f32.mrf.mxu1  ;;  %2211 = vmatmul.mubr.bf16.gmra.mxu1 %v2813_v35 }
 0x128   : > { %v3991_v45 = vadd.f32 %v3210_v42, %v3098_v39  ;;  %v3100_v46 = vpop.f32.mrf.mxu0 }
 0x129   : > { %v3101_v47 = vadd.f32 %v3100_v46, %v3099_v43  ;;  %v3212_v48 = vpop.f32.mrf.mxu1 }
 0x12a   : > { %v3213_v49 = vadd.f32 %v3212_v48, %v3211_v44  ;;  %v3102_v50 = vpop.f32.mrf.mxu0 }
 0x12b   : > { %v3214_v52 = vpop.f32.mrf.mxu1 }
 0x12c   : > { %v3993_v53 = vadd.f32 %v3213_v49, %v3101_v47  ;;  %v3103_v54 = vpop.f32.mrf.mxu0 }
 0x12d   : > { %v3104_v55 = vadd.f32 %v3103_v54, %v3102_v50  ;;  %v3215_v57 = vpop.f32.mrf.mxu1 }
 0x12e   : > { %v3216_v58 = vadd.f32 %v3215_v57, %v3214_v52  ;;  %v3105_v60 = vpop.f32.mrf.mxu0 }
 0x12f   : > { %v3217_v61 = vpop.f32.mrf.mxu1 }
 0x130   : > { %v3995_v62 = vadd.f32 %v3216_v58, %v3104_v55  ;;  %v3106_v63 = vpop.f32.mrf.mxu0 }
 0x131   : > { %v3107_v0 = vadd.f32 %v3106_v63, %v3105_v60  ;;  %v3218_v2 = vpop.f32.mrf.mxu1 }
 0x132   : > { %v3219_v3 = vadd.f32 %v3218_v2, %v3217_v61  ;;  %v3108_v4 = vpop.f32.mrf.mxu0 }
 0x133   : > { %v3220_v5 = vpop.f32.mrf.mxu1 }
 0x134   : > { %v3997_v6 = vadd.f32 %v3219_v3, %v3107_v0  ;;  %v3109_v7 = vpop.f32.mrf.mxu0 }
 0x135   : > { %v3110_v8 = vadd.f32 %v3109_v7, %v3108_v4  ;;  %v3221_v10 = vpop.f32.mrf.mxu1 }
 0x136   : > { %v3222_v11 = vadd.f32 %v3221_v10, %v3220_v5  ;;  %v3111_v12 = vpop.f32.mrf.mxu0 }
 0x137   : > { %v3223_v13 = vpop.f32.mrf.mxu1 }
 0x138   : > { %v3999_v14 = vadd.f32 %v3222_v11, %v3110_v8  ;;  %v3112_v15 = vpop.f32.mrf.mxu0 }
 0x139   : > { %v3113_v18 = vadd.f32 %v3112_v15, %v3111_v12  ;;  %v3224_v19 = vpop.f32.mrf.mxu1 }
 0x13a   : > { %v3225_v20 = vadd.f32 %v3224_v19, %v3223_v13  ;;  %v3114_v21 = vpop.f32.mrf.mxu0 }
 0x13b   : > { %v3226_v22 = vpop.f32.mrf.mxu1 }
 0x13c   : > { %v4001_v23 = vadd.f32 %v3225_v20, %v3113_v18  ;;  %v3115_v24 = vpop.f32.mrf.mxu0 }
 0x13d   : > { %v3116_v26 = vadd.f32 %v3115_v24, %v3114_v21  ;;  %v3227_v27 = vpop.f32.mrf.mxu1 }
 0x13e   : > { %v3228_v28 = vadd.f32 %v3227_v27, %v3226_v22  ;;  %v3117_v30 = vpop.f32.mrf.mxu0 }
 0x13f   : > { %v3229_v31 = vpop.f32.mrf.mxu1 }
 0x140   : > { %v4003_v33 = vadd.f32 %v3228_v28, %v3116_v26  ;;  %v3118_v34 = vpop.f32.mrf.mxu0 }
 0x141   : > { %v3119_v35 = vadd.f32 %v3118_v34, %v3117_v30  ;;  %v3230_v38 = vpop.f32.mrf.mxu1 }
 0x142   : > { %v3231_v39 = vadd.f32 %v3230_v38, %v3229_v31  ;;  %v3120_v40 = vpop.f32.mrf.mxu0 }
 0x143   : > { %v3232_v42 = vpop.f32.mrf.mxu1 }
 0x144   : > { %v4005_v43 = vadd.f32 %v3231_v39, %v3119_v35  ;;  %v3121_v44 = vpop.f32.mrf.mxu0 }
 0x145   : > { %v3122_v46 = vadd.f32 %v3121_v44, %v3120_v40  ;;  %v3233_v47 = vpop.f32.mrf.mxu1 }
 0x146   : > { %v3234_v48 = vadd.f32 %v3233_v47, %v3232_v42  ;;  %v3123_v49 = vpop.f32.mrf.mxu0 }
 0x147   : > { %v3235_v50 = vpop.f32.mrf.mxu1 }
 0x148   : > { %v4007_v52 = vadd.f32 %v3234_v48, %v3122_v46  ;;  %v3124_v54 = vpop.f32.mrf.mxu0 }
 0x149   : > { %v3125_v55 = vadd.f32 %v3124_v54, %v3123_v49  ;;  %v3236_v57 = vpop.f32.mrf.mxu1 }
 0x14a   : > { %v3237_v58 = vadd.f32 %v3236_v57, %v3235_v50  ;;  %v3126_v60 = vpop.f32.mrf.mxu0 }
 0x14b   : > { %v3238_v61 = vpop.f32.mrf.mxu1 }
 0x14c   : > { %v4009_v63 = vadd.f32 %v3237_v58, %v3125_v55  ;;  %v3127_v0 = vpop.f32.mrf.mxu0 }
 0x14d   : > { %v3128_v2 = vadd.f32 %v3127_v0, %v3126_v60  ;;  %v3239_v3 = vpop.f32.mrf.mxu1 }
 0x14e   : > { %v3240_v4 = vadd.f32 %v3239_v3, %v3238_v61  ;;  %v3129_v5 = vpop.f32.mrf.mxu0 }
 0x14f   : > { %v3241_v7 = vpop.f32.mrf.mxu1 }
 0x150   : > { %v4011_v8 = vadd.f32 %v3240_v4, %v3128_v2  ;;  %v3130_v10 = vpop.f32.mrf.mxu0 }
 0x151   : > { %v3131_v11 = vadd.f32 %v3130_v10, %v3129_v5  ;;  %v3242_v12 = vpop.f32.mrf.mxu1 }
 0x152   : > { %v3243_v13 = vadd.f32 %v3242_v12, %v3241_v7  ;;  %v3132_v15 = vpop.f32.mrf.mxu0 }
 0x153   : > { %v3244_v18 = vpop.f32.mrf.mxu1 }
 0x154   : > { %v4013_v19 = vadd.f32 %v3243_v13, %v3131_v11  ;;  %v3133_v20 = vpop.f32.mrf.mxu0 }
 0x155   : > { %v3134_v21 = vadd.f32 %v3133_v20, %v3132_v15  ;;  %v3245_v22 = vpop.f32.mrf.mxu1 }
 0x156   : > { %v3246_v24 = vadd.f32 %v3245_v22, %v3244_v18  ;;  %v3135_v26 = vpop.f32.mrf.mxu0 }
 0x157   : > { %v3247_v27 = vpop.f32.mrf.mxu1 }
 0x158   : > { %v4015_v28 = vadd.f32 %v3246_v24, %v3134_v21  ;;  %v3136_v30 = vpop.f32.mrf.mxu0 }
 0x159   : > { %v3137_v31 = vadd.f32 %v3136_v30, %v3135_v26  ;;  %v3248_v34 = vpop.f32.mrf.mxu1 }
 0x15a   : > { %v3249_v35 = vadd.f32 %v3248_v34, %v3247_v27  ;;  %v3138_v38 = vpop.f32.mrf.mxu0 }
 0x15b   : > { %v3250_v39 = vpop.f32.mrf.mxu1 }
 0x15c   : > { %v4017_v40 = vadd.f32 %v3249_v35, %v3137_v31  ;;  %v3139_v42 = vpop.f32.mrf.mxu0 }
 0x15d   : > { %v3140_v44 = vadd.f32 %v3139_v42, %v3138_v38  ;;  %v3251_v46 = vpop.f32.mrf.mxu1 }
 0x15e   : > { %v3252_v47 = vadd.f32 %v3251_v46, %v3250_v39  ;;  %v3141_v48 = vpop.f32.mrf.mxu0 }
 0x15f   : > { %v3253_v49 = vpop.f32.mrf.mxu1 }
 0x160   : > { %v4019_v50 = vadd.f32 %v3252_v47, %v3140_v44  ;;  %v3142_v54 = vpop.f32.mrf.mxu0 }
 0x161   : > { %v3143_v55 = vadd.f32 %v3142_v54, %v3141_v48  ;;  %v3254_v57 = vpop.f32.mrf.mxu1 }
 0x162   : > { %v3255_v58 = vadd.f32 %v3254_v57, %v3253_v49  ;;  %v3144_v60 = vpop.f32.mrf.mxu0 }
 0x163   : > { %v3256_v61 = vpop.f32.mrf.mxu1 }
 0x164   : > { %v4021_v0 = vadd.f32 %v3255_v58, %v3143_v55  ;;  %v3145_v2 = vpop.f32.mrf.mxu0 }
 0x165   : > { %v3146_v3 = vadd.f32 %v3145_v2, %v3144_v60  ;;  %v3257_v4 = vpop.f32.mrf.mxu1 }
 0x166   : > { %v3258_v5 = vadd.f32 %v3257_v4, %v3256_v61  ;;  %v3147_v7 = vpop.f32.mrf.mxu0 }
 0x167   : > { %v3259_v10 = vpop.f32.mrf.mxu1 }
 0x168   : > { %v4023_v11 = vadd.f32 %v3258_v5, %v3146_v3  ;;  %v3148_v12 = vpop.f32.mrf.mxu0 }
 0x169   : > { %v3149_v13 = vadd.f32 %v3148_v12, %v3147_v7  ;;  %v3260_v15 = vpop.f32.mrf.mxu1 }
 0x16a   : > { %v3261_v18 = vadd.f32 %v3260_v15, %v3259_v10  ;;  %v3150_v20 = vpop.f32.mrf.mxu0 }
 0x16b   : > { %v3262_v21 = vpop.f32.mrf.mxu1 }
 0x16c   : > { %v4025_v22 = vadd.f32 %v3261_v18, %v3149_v13  ;;  %v3151_v24 = vpop.f32.mrf.mxu0 }
 0x16d   : > { %v3152_v26 = vadd.f32 %v3151_v24, %v3150_v20  ;;  %v3263_v27 = vpop.f32.mrf.mxu1 }
 0x16e   : > { %v3264_v30 = vadd.f32 %v3263_v27, %v3262_v21  ;;  %v3281_v31 = vpop.f32.mrf.mxu0 }
 0x16f   : > { %v3393_v34 = vpop.f32.mrf.mxu1 }
 0x170   : > { %v4027_v35 = vadd.f32 %v3264_v30, %v3152_v26  ;;  %v3282_v38 = vpop.f32.mrf.mxu0 }
 0x171   : > { %v3283_v39 = vadd.f32 %v3282_v38, %v3281_v31  ;;  %v3394_v42 = vpop.f32.mrf.mxu1 }
 0x172   : > { %v3284_v44 = vpop.f32.mrf.mxu0  ;;  %v3395_v47 = vadd.f32 %v3394_v42, %v3393_v34 }
 0x173   : > { %v1932_v46 = vadd.f32 %v3283_v39, %v3945_v29  ;;  %v3396_v48 = vpop.f32.mrf.mxu1 }
 0x174   : > { %v3285_v49 = vpop.f32.mrf.mxu0 }
 0x175   : > { %v2093_v54 = vadd.f32 %v3395_v47, %v1932_v46  ;;  %v3286_v55 = vadd.f32 %v3285_v49, %v3284_v44  ;;  %v3397_v57 = vpop.f32.mrf.mxu1 }
 0x176   : > { %v3287_v58 = vpop.f32.mrf.mxu0  ;;  %v3398_v61 = vadd.f32 %v3397_v57, %v3396_v48 }
 0x177   : > { %v1935_v60 = vadd.f32 %v3286_v55, %v3947_v37  ;;  %v3399_v2 = vpop.f32.mrf.mxu1  ;;  %v2350_v4 = vmul.f32 0.2, %v2093_v54  ;;  %vm2318_vm0 = vcmp.ge.f32.partialorder %v2093_v54, 0.0 }
 0x178   : > { %v3288_v3 = vpop.f32.mrf.mxu0 }
 0x179   : > { %v2096_v5 = vadd.f32 %v3398_v61, %v1935_v60  ;;  %v3289_v7 = vadd.f32 %v3288_v3, %v3287_v58  ;;  %v3400_v10 = vpop.f32.mrf.mxu1  ;;  %v2382_v21 = vsel %vm2318_vm0, %v2093_v54, %v2350_v4 }
 0x17a   : > { %v3290_v29 = vpop.f32.mrf.mxu0  ;;  %v3401_v15 = vadd.f32 %v3400_v10, %v3399_v2 }
 0x17b   : > { %vm2319_vm1 = vcmp.ge.f32.partialorder %v2096_v5, 0.0  ;;  %v2351_v12 = vmul.f32 0.2, %v2096_v5  ;;  %v1940_v13 = vadd.f32 %v3289_v7, %v3953_v51  ;;  %v3402_v18 = vpop.f32.mrf.mxu1 }
 0x17c   : > { %v3291_v20 = vpop.f32.mrf.mxu0 }
 0x17d   : > { %v2383_v37 = vsel %vm2319_vm1, %v2096_v5, %v2351_v12  ;;  %v2101_v24 = vadd.f32 %v3401_v15, %v1940_v13  ;;  %v3292_v26 = vadd.f32 %v3291_v20, %v3290_v29  ;;  %v3403_v27 = vpop.f32.mrf.mxu1 }
 0x17e   : > { %v2949_v30 = vpack.c.bf16 %v2383_v37, %v2382_v21  ;;  %v3293_v31 = vpop.f32.mrf.mxu0  ;;  %v3404_v38 = vadd.f32 %v3403_v27, %v3402_v18 }
 0x17f   : > { %v1943_v34 = vadd.f32 %v3292_v26, %v3955_v59  ;;  %v3405_v51 = vpop.f32.mrf.mxu1  ;;  %v2352_v42 = vmul.f32 0.2, %v2101_v24  ;;  %vm2320_vm2 = vcmp.ge.f32.partialorder %v2101_v24, 0.0 }
 0x180   : > { %2950 = vst [vmem:[%s4036_s30] sm:$0xff] %v2949_v30   ;;  %v3294_v39 = vpop.f32.mrf.mxu0 }
 0x181   : > { %v2104_v44 = vadd.f32 %v3404_v38, %v1943_v34  ;;  %v3295_v46 = vadd.f32 %v3294_v39, %v3293_v31  ;;  %v3406_v47 = vpop.f32.mrf.mxu1  ;;  %v2384_v60 = vsel %vm2320_vm2, %v2101_v24, %v2352_v42 }
 0x182   : > { %v3296_v48 = vpop.f32.mrf.mxu0  ;;  %v3407_v55 = vadd.f32 %v3406_v47, %v3405_v51 }
 0x183   : > { %vm2321_vm3 = vcmp.ge.f32.partialorder %v2104_v44, 0.0  ;;  %v2353_v49 = vmul.f32 0.2, %v2104_v44  ;;  %v1948_v54 = vadd.f32 %v3295_v46, %v3961_v9  ;;  %v3408_v57 = vpop.f32.mrf.mxu1 }
 0x184   : > { %v3297_v58 = vpop.f32.mrf.mxu0 }
 0x185   : > { %v2385_v59 = vsel %vm2321_vm3, %v2104_v44, %v2353_v49  ;;  %v2109_v61 = vadd.f32 %v3407_v55, %v1948_v54  ;;  %v3298_v2 = vadd.f32 %v3297_v58, %v3296_v48  ;;  %v3409_v3 = vpop.f32.mrf.mxu1 }
 0x186   : > { %v2954_v4 = vpack.c.bf16 %v2385_v59, %v2384_v60  ;;  %v3299_v5 = vpop.f32.mrf.mxu0  ;;  %v3410_v10 = vadd.f32 %v3409_v3, %v3408_v57 }
 0x187   : > { %v1951_v7 = vadd.f32 %v3298_v2, %v3963_v17  ;;  %v3411_v29 = vpop.f32.mrf.mxu1  ;;  %v2354_v13 = vmul.f32 0.2, %v2109_v61  ;;  %vm2322_vm4 = vcmp.ge.f32.partialorder %v2109_v61, 0.0 }
 0x188   : > { %3026 = vst [vmem:[%s4036_s30 + $0x8] sm:$0xff] %v2954_v4   ;;  %v3300_v12 = vpop.f32.mrf.mxu0 }
 0x189   : > { %v2112_v15 = vadd.f32 %v3410_v10, %v1951_v7  ;;  %v3301_v18 = vadd.f32 %v3300_v12, %v3299_v5  ;;  %v3412_v9 = vpop.f32.mrf.mxu1  ;;  %v2386_v30 = vsel %vm2322_vm4, %v2109_v61, %v2354_v13 }
 0x18a   : > { %v3302_v20 = vpop.f32.mrf.mxu0  ;;  %v3413_v24 = vadd.f32 %v3412_v9, %v3411_v29 }
 0x18b   : > { %vm2323_vm5 = vcmp.ge.f32.partialorder %v2112_v15, 0.0  ;;  %v2355_v21 = vmul.f32 0.2, %v2112_v15  ;;  %v1956_v37 = vadd.f32 %v3301_v18, %v3969_v32  ;;  %v3414_v26 = vpop.f32.mrf.mxu1 }
 0x18c   : > { %v3303_v27 = vpop.f32.mrf.mxu0 }
 0x18d   : > { %v2387_v17 = vsel %vm2323_vm5, %v2112_v15, %v2355_v21  ;;  %v2117_v31 = vadd.f32 %v3413_v24, %v1956_v37  ;;  %v3304_v34 = vadd.f32 %v3303_v27, %v3302_v20  ;;  %v3415_v38 = vpop.f32.mrf.mxu1 }
 0x18e   : > { %v2959_v51 = vpack.c.bf16 %v2387_v17, %v2386_v30  ;;  %v3305_v39 = vpop.f32.mrf.mxu0  ;;  %v3416_v44 = vadd.f32 %v3415_v38, %v3414_v26 }
 0x18f   : > { %v1959_v42 = vadd.f32 %v3304_v34, %v3971_v41  ;;  %v3417_v46 = vpop.f32.mrf.mxu1  ;;  %v2356_v48 = vmul.f32 0.2, %v2117_v31  ;;  %vm2324_vm6 = vcmp.ge.f32.partialorder %v2117_v31, 0.0 }
 0x190   : > { %3027 = vst [vmem:[%s4036_s30 + $0x10] sm:$0xff] %v2959_v51   ;;  %v3306_v47 = vpop.f32.mrf.mxu0 }
 0x191   : > { %v2120_v49 = vadd.f32 %v3416_v44, %v1959_v42  ;;  %v3307_v54 = vadd.f32 %v3306_v47, %v3305_v39  ;;  %v3418_v32 = vpop.f32.mrf.mxu1  ;;  %v2388_v2 = vsel %vm2324_vm6, %v2117_v31, %v2356_v48 }
 0x192   : > { %v3308_v55 = vpop.f32.mrf.mxu0  ;;  %v3419_v60 = vadd.f32 %v3418_v32, %v3417_v46 }
 0x193   : > { %vm2325_vm7 = vcmp.ge.f32.partialorder %v2120_v49, 0.0  ;;  %v2357_v57 = vmul.f32 0.2, %v2120_v49  ;;  %v1964_v58 = vadd.f32 %v3307_v54, %v3977_v56  ;;  %v3420_v59 = vpop.f32.mrf.mxu1 }
 0x194   : > { %v3309_v61 = vpop.f32.mrf.mxu0 }
 0x195   : > { %v2389_v41 = vsel %vm2325_vm7, %v2120_v49, %v2357_v57  ;;  %v2125_v3 = vadd.f32 %v3419_v60, %v1964_v58  ;;  %v3310_v4 = vadd.f32 %v3309_v61, %v3308_v55  ;;  %v3421_v5 = vpop.f32.mrf.mxu1 }
 0x196   : > { %v2964_v7 = vpack.c.bf16 %v2389_v41, %v2388_v2  ;;  %v3311_v10 = vpop.f32.mrf.mxu0  ;;  %v3422_v12 = vadd.f32 %v3421_v5, %v3420_v59 }
 0x197   : > { %v1967_v29 = vadd.f32 %v3310_v4, %v3979_v1  ;;  %v3423_v13 = vpop.f32.mrf.mxu1  ;;  %v2358_v18 = vmul.f32 0.2, %v2125_v3  ;;  %vm2326_vm8 = vcmp.ge.f32.partialorder %v2125_v3, 0.0 }
 0x198   : > { %3028 = vst [vmem:[%s4036_s30 + $0x18] sm:$0xff] %v2964_v7   ;;  %v3312_v15 = vpop.f32.mrf.mxu0 }
 0x199   : > { %v2128_v9 = vadd.f32 %v3422_v12, %v1967_v29  ;;  %v3313_v20 = vadd.f32 %v3312_v15, %v3311_v10  ;;  %v3424_v56 = vpop.f32.mrf.mxu1  ;;  %v2390_v17 = vsel %vm2326_vm8, %v2125_v3, %v2358_v18 }
 0x19a   : > { %v3314_v21 = vpop.f32.mrf.mxu0  ;;  %v3425_v26 = vadd.f32 %v3424_v56, %v3423_v13 }
 0x19b   : > { %vm2327_vm9 = vcmp.ge.f32.partialorder %v2128_v9, 0.0  ;;  %v2359_v37 = vmul.f32 0.2, %v2128_v9  ;;  %v1972_v24 = vadd.f32 %v3313_v20, %v3985_v16  ;;  %v3426_v27 = vpop.f32.mrf.mxu1 }
 0x19c   : > { %v3315_v30 = vpop.f32.mrf.mxu0 }
 0x19d   : > { %v2391_v1 = vsel %vm2327_vm9, %v2128_v9, %v2359_v37  ;;  %v2133_v31 = vadd.f32 %v3425_v26, %v1972_v24  ;;  %v3316_v34 = vadd.f32 %v3315_v30, %v3314_v21  ;;  %v3427_v38 = vpop.f32.mrf.mxu1 }
 0x19e   : > { %v2969_v51 = vpack.c.bf16 %v2391_v1, %v2390_v17  ;;  %v3317_v39 = vpop.f32.mrf.mxu0  ;;  %v3428_v44 = vadd.f32 %v3427_v38, %v3426_v27 }
 0x19f   : > { %v1975_v42 = vadd.f32 %v3316_v34, %v3987_v25  ;;  %v3429_v46 = vpop.f32.mrf.mxu1  ;;  %v2360_v48 = vmul.f32 0.2, %v2133_v31  ;;  %vm2328_vm10 = vcmp.ge.f32.partialorder %v2133_v31, 0.0 }
 0x1a0   : > { %3029 = vst [vmem:[%s4036_s30 + $0x20] sm:$0xff] %v2969_v51   ;;  %v3318_v47 = vpop.f32.mrf.mxu0 }
 0x1a1   : > { %v2136_v49 = vadd.f32 %v3428_v44, %v1975_v42  ;;  %v3319_v54 = vadd.f32 %v3318_v47, %v3317_v39  ;;  %v3430_v16 = vpop.f32.mrf.mxu1  ;;  %v2392_v61 = vsel %vm2328_vm10, %v2133_v31, %v2360_v48 }
 0x1a2   : > { %v3320_v32 = vpop.f32.mrf.mxu0  ;;  %v3431_v58 = vadd.f32 %v3430_v16, %v3429_v46 }
 0x1a3   : > { %vm2329_vm11 = vcmp.ge.f32.partialorder %v2136_v49, 0.0  ;;  %v2361_v55 = vmul.f32 0.2, %v2136_v49  ;;  %v1980_v57 = vadd.f32 %v3319_v54, %v3989_v36  ;;  %v3432_v60 = vpop.f32.mrf.mxu1 }
 0x1a4   : > { %v3321_v59 = vpop.f32.mrf.mxu0 }
 0x1a5   : > { %v2393_v25 = vsel %vm2329_vm11, %v2136_v49, %v2361_v55  ;;  %v2141_v2 = vadd.f32 %v3431_v58, %v1980_v57  ;;  %v3322_v41 = vadd.f32 %v3321_v59, %v3320_v32  ;;  %v3433_v3 = vpop.f32.mrf.mxu1 }
 0x1a6   : > { %v2974_v4 = vpack.c.bf16 %v2393_v25, %v2392_v61  ;;  %v3323_v5 = vpop.f32.mrf.mxu0  ;;  %v3434_v10 = vadd.f32 %v3433_v3, %v3432_v60 }
 0x1a7   : > { %v1983_v7 = vadd.f32 %v3322_v41, %v3991_v45  ;;  %v3435_v29 = vpop.f32.mrf.mxu1  ;;  %v2362_v13 = vmul.f32 0.2, %v2141_v2  ;;  %vm2330_vm12 = vcmp.ge.f32.partialorder %v2141_v2, 0.0 }
 0x1a8   : > { %3030 = vst [vmem:[%s4036_s30 + $0x28] sm:$0xff] %v2974_v4   ;;  %v3324_v12 = vpop.f32.mrf.mxu0 }
 0x1a9   : > { %v2144_v15 = vadd.f32 %v3434_v10, %v1983_v7  ;;  %v3325_v18 = vadd.f32 %v3324_v12, %v3323_v5  ;;  %v3436_v36 = vpop.f32.mrf.mxu1  ;;  %v2394_v26 = vsel %vm2330_vm12, %v2141_v2, %v2362_v13 }
 0x1aa   : > { %v3326_v9 = vpop.f32.mrf.mxu0  ;;  %v3437_v21 = vadd.f32 %v3436_v36, %v3435_v29 }
 0x1ab   : > { %vm2331_vm13 = vcmp.ge.f32.partialorder %v2144_v15, 0.0  ;;  %v2363_v20 = vmul.f32 0.2, %v2144_v15  ;;  %v1988_v56 = vadd.f32 %v3325_v18, %v3993_v53  ;;  %v3438_v37 = vpop.f32.mrf.mxu1 }
 0x1ac   : > { %v3327_v24 = vpop.f32.mrf.mxu0 }
 0x1ad   : > { %v2395_v45 = vsel %vm2331_vm13, %v2144_v15, %v2363_v20  ;;  %v2149_v27 = vadd.f32 %v3437_v21, %v1988_v56  ;;  %v3328_v30 = vadd.f32 %v3327_v24, %v3326_v9  ;;  %v3439_v17 = vpop.f32.mrf.mxu1 }
 0x1ae   : > { %v2979_v1 = vpack.c.bf16 %v2395_v45, %v2394_v26  ;;  %v3329_v31 = vpop.f32.mrf.mxu0  ;;  %v3440_v38 = vadd.f32 %v3439_v17, %v3438_v37 }
 0x1af   : > { %v1991_v34 = vadd.f32 %v3328_v30, %v3995_v62  ;;  %v3441_v51 = vpop.f32.mrf.mxu1  ;;  %v2364_v42 = vmul.f32 0.2, %v2149_v27  ;;  %vm2332_vm14 = vcmp.ge.f32.partialorder %v2149_v27, 0.0 }
 0x1b0   : > { %3031 = vst [vmem:[%s4036_s30 + $0x30] sm:$0xff] %v2979_v1   ;;  %v3330_v39 = vpop.f32.mrf.mxu0 }
 0x1b1   : > { %v2152_v44 = vadd.f32 %v3440_v38, %v1991_v34  ;;  %v3331_v46 = vadd.f32 %v3330_v39, %v3329_v31  ;;  %v3442_v53 = vpop.f32.mrf.mxu1  ;;  %v2396_v55 = vsel %vm2332_vm14, %v2149_v27, %v2364_v42 }
 0x1b2   : > { %v3332_v47 = vpop.f32.mrf.mxu0  ;;  %v3443_v54 = vadd.f32 %v3442_v53, %v3441_v51 }
 0x1b3   : > { %vm2333_vm15 = vcmp.ge.f32.partialorder %v2152_v44, 0.0  ;;  %v2365_v48 = vmul.f32 0.2, %v2152_v44  ;;  %v1996_v49 = vadd.f32 %v3331_v46, %v3997_v6  ;;  %v3444_v16 = vpop.f32.mrf.mxu1 }
 0x1b4   : > { %v3333_v32 = vpop.f32.mrf.mxu0 }
 0x1b5   : > { %v2397_v62 = vsel %vm2333_vm15, %v2152_v44, %v2365_v48  ;;  %v2157_v57 = vadd.f32 %v3443_v54, %v1996_v49  ;;  %v3334_v58 = vadd.f32 %v3333_v32, %v3332_v47  ;;  %v3445_v60 = vpop.f32.mrf.mxu1 }
 0x1b6   : > { %v2984_v59 = vpack.c.bf16 %v2397_v62, %v2396_v55  ;;  %v3335_v61 = vpop.f32.mrf.mxu0  ;;  %v3446_v2 = vadd.f32 %v3445_v60, %v3444_v16 }
 0x1b7   : > { %v1999_v25 = vadd.f32 %v3334_v58, %v3999_v14  ;;  %v3447_v41 = vpop.f32.mrf.mxu1  ;;  %v2366_v4 = vmul.f32 0.2, %v2157_v57  ;;  %vm2334_vm0 = vcmp.ge.f32.partialorder %v2157_v57, 0.0 }
 0x1b8   : > { %3032 = vst [vmem:[%s4036_s30 + $0x38] sm:$0xff] %v2984_v59   ;;  %v3336_v3 = vpop.f32.mrf.mxu0 }
 0x1b9   : > { %v2160_v5 = vadd.f32 %v3446_v2, %v1999_v25  ;;  %v3337_v7 = vadd.f32 %v3336_v3, %v3335_v61  ;;  %v3448_v6 = vpop.f32.mrf.mxu1  ;;  %v2398_v36 = vsel %vm2334_vm0, %v2157_v57, %v2366_v4 }
 0x1ba   : > { %v3338_v10 = vpop.f32.mrf.mxu0  ;;  %v3449_v13 = vadd.f32 %v3448_v6, %v3447_v41 }
 0x1bb   : > { %vm2335_vm1 = vcmp.ge.f32.partialorder %v2160_v5, 0.0  ;;  %v2367_v29 = vmul.f32 0.2, %v2160_v5  ;;  %v2004_v12 = vadd.f32 %v3337_v7, %v4001_v23  ;;  %v3450_v15 = vpop.f32.mrf.mxu1 }
 0x1bc   : > { %v3339_v18 = vpop.f32.mrf.mxu0 }
 0x1bd   : > { %v2399_v14 = vsel %vm2335_vm1, %v2160_v5, %v2367_v29  ;;  %v2165_v9 = vadd.f32 %v3449_v13, %v2004_v12  ;;  %v3340_v20 = vadd.f32 %v3339_v18, %v3338_v10  ;;  %v3451_v56 = vpop.f32.mrf.mxu1 }
 0x1be   : > { %v2989_v21 = vpack.c.bf16 %v2399_v14, %v2398_v36  ;;  %v3341_v37 = vpop.f32.mrf.mxu0  ;;  %v3452_v26 = vadd.f32 %v3451_v56, %v3450_v15 }
 0x1bf   : > { %v2007_v24 = vadd.f32 %v3340_v20, %v4003_v33  ;;  %v3453_v45 = vpop.f32.mrf.mxu1  ;;  %v2368_v30 = vmul.f32 0.2, %v2165_v9  ;;  %vm2336_vm2 = vcmp.ge.f32.partialorder %v2165_v9, 0.0 }
 0x1c0   : > { %3033 = vst [vmem:[%s4036_s30 + $0x40] sm:$0xff] %v2989_v21   ;;  %v3342_v27 = vpop.f32.mrf.mxu0 }
 0x1c1   : > { %v2168_v17 = vadd.f32 %v3452_v26, %v2007_v24  ;;  %v3343_v1 = vadd.f32 %v3342_v27, %v3341_v37  ;;  %v3454_v23 = vpop.f32.mrf.mxu1  ;;  %v2400_v44 = vsel %vm2336_vm2, %v2165_v9, %v2368_v30 }
 0x1c2   : > { %v3344_v31 = vpop.f32.mrf.mxu0  ;;  %v3455_v51 = vadd.f32 %v3454_v23, %v3453_v45 }
 0x1c3   : > { %vm2337_vm3 = vcmp.ge.f32.partialorder %v2168_v17, 0.0  ;;  %v2369_v34 = vmul.f32 0.2, %v2168_v17  ;;  %v2012_v38 = vadd.f32 %v3343_v1, %v4005_v43  ;;  %v3456_v39 = vpop.f32.mrf.mxu1 }
 0x1c4   : > { %v3345_v42 = vpop.f32.mrf.mxu0 }
 0x1c5   : > { %v2401_v33 = vsel %vm2337_vm3, %v2168_v17, %v2369_v34  ;;  %v2173_v46 = vadd.f32 %v3455_v51, %v2012_v38  ;;  %v3346_v53 = vadd.f32 %v3345_v42, %v3344_v31  ;;  %v3457_v47 = vpop.f32.mrf.mxu1 }
 0x1c6   : > { %v2994_v48 = vpack.c.bf16 %v2401_v33, %v2400_v44  ;;  %v3347_v49 = vpop.f32.mrf.mxu0  ;;  %v3458_v16 = vadd.f32 %v3457_v47, %v3456_v39 }
 0x1c7   : > { %v2015_v54 = vadd.f32 %v3346_v53, %v4007_v52  ;;  %v3459_v32 = vpop.f32.mrf.mxu1  ;;  %v2370_v62 = vmul.f32 0.2, %v2173_v46  ;;  %vm2338_vm4 = vcmp.ge.f32.partialorder %v2173_v46, 0.0 }
 0x1c8   : > { %3034 = vst [vmem:[%s4036_s30 + $0x48] sm:$0xff] %v2994_v48   ;;  %v3348_v55 = vpop.f32.mrf.mxu0 }
 0x1c9   : > { %v2176_v57 = vadd.f32 %v3458_v16, %v2015_v54  ;;  %v3349_v58 = vadd.f32 %v3348_v55, %v3347_v49  ;;  %v3460_v43 = vpop.f32.mrf.mxu1  ;;  %v2402_v3 = vsel %vm2338_vm4, %v2173_v46, %v2370_v62 }
 0x1ca   : > { %v3350_v60 = vpop.f32.mrf.mxu0  ;;  %v3461_v25 = vadd.f32 %v3460_v43, %v3459_v32 }
 0x1cb   : > { %vm2339_vm5 = vcmp.ge.f32.partialorder %v2176_v57, 0.0  ;;  %v2371_v59 = vmul.f32 0.2, %v2176_v57  ;;  %v2020_v61 = vadd.f32 %v3349_v58, %v4009_v63  ;;  %v3462_v2 = vpop.f32.mrf.mxu1 }
 0x1cc   : > { %v3351_v41 = vpop.f32.mrf.mxu0 }
 0x1cd   : > { %v2403_v52 = vsel %vm2339_vm5, %v2176_v57, %v2371_v59  ;;  %v2181_v4 = vadd.f32 %v3461_v25, %v2020_v61  ;;  %v3352_v5 = vadd.f32 %v3351_v41, %v3350_v60  ;;  %v3463_v7 = vpop.f32.mrf.mxu1 }
 0x1ce   : > { %v2999_v6 = vpack.c.bf16 %v2403_v52, %v2402_v3  ;;  %v3353_v10 = vpop.f32.mrf.mxu0  ;;  %v3464_v12 = vadd.f32 %v3463_v7, %v3462_v2 }
 0x1cf   : > { %v2023_v29 = vadd.f32 %v3352_v5, %v4011_v8  ;;  %v3465_v13 = vpop.f32.mrf.mxu1  ;;  %v2372_v18 = vmul.f32 0.2, %v2181_v4  ;;  %vm2340_vm6 = vcmp.ge.f32.partialorder %v2181_v4, 0.0 }
 0x1d0   : > { %3035 = vst [vmem:[%s4036_s30 + $0x50] sm:$0xff] %v2999_v6   ;;  %v3354_v15 = vpop.f32.mrf.mxu0 }
 0x1d1   : > { %v2184_v36 = vadd.f32 %v3464_v12, %v2023_v29  ;;  %v3355_v14 = vadd.f32 %v3354_v15, %v3353_v10  ;;  %v3466_v63 = vpop.f32.mrf.mxu1  ;;  %v2404_v26 = vsel %vm2340_vm6, %v2181_v4, %v2372_v18 }
 0x1d2   : > { %v3356_v9 = vpop.f32.mrf.mxu0  ;;  %v3467_v21 = vadd.f32 %v3466_v63, %v3465_v13 }
 0x1d3   : > { %vm2341_vm7 = vcmp.ge.f32.partialorder %v2184_v36, 0.0  ;;  %v2373_v20 = vmul.f32 0.2, %v2184_v36  ;;  %v2028_v56 = vadd.f32 %v3355_v14, %v4013_v19  ;;  %v3468_v37 = vpop.f32.mrf.mxu1 }
 0x1d4   : > { %v3357_v24 = vpop.f32.mrf.mxu0 }
 0x1d5   : > { %v2405_v8 = vsel %vm2341_vm7, %v2184_v36, %v2373_v20  ;;  %v2189_v45 = vadd.f32 %v3467_v21, %v2028_v56  ;;  %v3358_v27 = vadd.f32 %v3357_v24, %v3356_v9  ;;  %v3469_v30 = vpop.f32.mrf.mxu1 }
 0x1d6   : > { %v3004_v17 = vpack.c.bf16 %v2405_v8, %v2404_v26  ;;  %v3359_v1 = vpop.f32.mrf.mxu0  ;;  %v3470_v31 = vadd.f32 %v3469_v30, %v3468_v37 }
 0x1d7   : > { %v2031_v23 = vadd.f32 %v3358_v27, %v4015_v28  ;;  %v3471_v34 = vpop.f32.mrf.mxu1  ;;  %v2374_v51 = vmul.f32 0.2, %v2189_v45  ;;  %vm2342_vm8 = vcmp.ge.f32.partialorder %v2189_v45, 0.0 }
 0x1d8   : > { %3036 = vst [vmem:[%s4036_s30 + $0x58] sm:$0xff] %v3004_v17   ;;  %v3360_v38 = vpop.f32.mrf.mxu0 }
 0x1d9   : > { %v2192_v39 = vadd.f32 %v3470_v31, %v2031_v23  ;;  %v3361_v42 = vadd.f32 %v3360_v38, %v3359_v1  ;;  %v3472_v19 = vpop.f32.mrf.mxu1  ;;  %v2406_v49 = vsel %vm2342_vm8, %v2189_v45, %v2374_v51 }
 0x1da   : > { %v3362_v44 = vpop.f32.mrf.mxu0  ;;  %v3473_v53 = vadd.f32 %v3472_v19, %v3471_v34 }
 0x1db   : > { %vm2343_vm9 = vcmp.ge.f32.partialorder %v2192_v39, 0.0  ;;  %v2375_v33 = vmul.f32 0.2, %v2192_v39  ;;  %v2036_v46 = vadd.f32 %v3361_v42, %v4017_v40  ;;  %v3474_v47 = vpop.f32.mrf.mxu1 }
 0x1dc   : > { %v3363_v48 = vpop.f32.mrf.mxu0 }
 0x1dd   : > { %v2407_v28 = vsel %vm2343_vm9, %v2192_v39, %v2375_v33  ;;  %v2197_v54 = vadd.f32 %v3473_v53, %v2036_v46  ;;  %v3364_v16 = vadd.f32 %v3363_v48, %v3362_v44  ;;  %v3475_v32 = vpop.f32.mrf.mxu1 }
 0x1de   : > { %v3009_v55 = vpack.c.bf16 %v2407_v28, %v2406_v49  ;;  %v3365_v62 = vpop.f32.mrf.mxu0  ;;  %v3476_v58 = vadd.f32 %v3475_v32, %v3474_v47 }
 0x1df   : > { %v2039_v57 = vadd.f32 %v3364_v16, %v4019_v50  ;;  %v3477_v43 = vpop.f32.mrf.mxu1  ;;  %v2376_v59 = vmul.f32 0.2, %v2197_v54  ;;  %vm2344_vm10 = vcmp.ge.f32.partialorder %v2197_v54, 0.0 }
 0x1e0   : > { %3037 = vst [vmem:[%s4036_s30 + $0x60] sm:$0xff] %v3009_v55   ;;  %v3366_v60 = vpop.f32.mrf.mxu0 }
 0x1e1   : > { %v2200_v61 = vadd.f32 %v3476_v58, %v2039_v57  ;;  %v3367_v25 = vadd.f32 %v3366_v60, %v3365_v62  ;;  %v3478_v40 = vpop.f32.mrf.mxu1  ;;  %v2408_v7 = vsel %vm2344_vm10, %v2197_v54, %v2376_v59 }
 0x1e2   : > { %v3368_v2 = vpop.f32.mrf.mxu0  ;;  %v3479_v52 = vadd.f32 %v3478_v40, %v3477_v43 }
 0x1e3   : > { %vm2345_vm11 = vcmp.ge.f32.partialorder %v2200_v61, 0.0  ;;  %v2377_v41 = vmul.f32 0.2, %v2200_v61  ;;  %v2044_v3 = vadd.f32 %v3367_v25, %v4021_v0  ;;  %v3480_v4 = vpop.f32.mrf.mxu1 }
 0x1e4   : > { %v3369_v5 = vpop.f32.mrf.mxu0 }
 0x1e5   : > { %v2409_v50 = vsel %vm2345_vm11, %v2200_v61, %v2377_v41  ;;  %v2205_v6 = vadd.f32 %v3479_v52, %v2044_v3  ;;  %v3370_v10 = vadd.f32 %v3369_v5, %v3368_v2  ;;  %v3481_v29 = vpop.f32.mrf.mxu1 }
 0x1e6   : > { %v3014_v12 = vpack.c.bf16 %v2409_v50, %v2408_v7  ;;  %v3371_v13 = vpop.f32.mrf.mxu0  ;;  %v3482_v18 = vadd.f32 %v3481_v29, %v3480_v4 }
 0x1e7   : > { %v2047_v15 = vadd.f32 %v3370_v10, %v4023_v11  ;;  %v3483_v36 = vpop.f32.mrf.mxu1  ;;  %v2378_v63 = vmul.f32 0.2, %v2205_v6  ;;  %vm2346_vm12 = vcmp.ge.f32.partialorder %v2205_v6, 0.0 }
 0x1e8   : > { %3038 = vst [vmem:[%s4036_s30 + $0x68] sm:$0xff] %v3014_v12   ;;  %v3372_v14 = vpop.f32.mrf.mxu0 }
 0x1e9   : > { %v2208_v9 = vadd.f32 %v3482_v18, %v2047_v15  ;;  %v3373_v20 = vadd.f32 %v3372_v14, %v3371_v13  ;;  %v3484_v0 = vpop.f32.mrf.mxu1  ;;  %v2410_v45 = vsel %vm2346_vm12, %v2205_v6, %v2378_v63 }
 0x1ea   : > { %v3374_v56 = vpop.f32.mrf.mxu0  ;;  %v3485_v24 = vadd.f32 %v3484_v0, %v3483_v36 }
 0x1eb   : > { %vm2347_vm13 = vcmp.ge.f32.partialorder %v2208_v9, 0.0  ;;  %v2379_v21 = vmul.f32 0.2, %v2208_v9  ;;  %v2052_v37 = vadd.f32 %v3373_v20, %v4025_v22  ;;  %v3486_v26 = vpop.f32.mrf.mxu1 }
 0x1ec   : > { %v3375_v8 = vpop.f32.mrf.mxu0 }
 0x1ed   : > { %v2411_v11 = vsel %vm2347_vm13, %v2208_v9, %v2379_v21  ;;  %v2213_v27 = vadd.f32 %v3485_v24, %v2052_v37  ;;  %v3376_v30 = vadd.f32 %v3375_v8, %v3374_v56  ;;  %v3487_v17 = vpop.f32.mrf.mxu1 }
 0x1ee   : > { %v3019_v1 = vpack.c.bf16 %v2411_v11, %v2410_v45  ;;  %v3488_v31 = vadd.f32 %v3487_v17, %v3486_v26 }
 0x1ef   : > { %v2055_v23 = vadd.f32 %v3376_v30, %v4027_v35  ;;  %v2380_v34 = vmul.f32 0.2, %v2213_v27  ;;  %vm2348_vm14 = vcmp.ge.f32.partialorder %v2213_v27, 0.0 }
 0x1f0   : > { %3039 = vst [vmem:[%s4036_s30 + $0x70] sm:$0xff] %v3019_v1  }
 0x1f1   : > { %v2216_v38 = vadd.f32 %v3488_v31, %v2055_v23  ;;  %v2412_v22 = vsel %vm2348_vm14, %v2213_v27, %v2380_v34 }
 0x1f3   : > { %vm2349_vm15 = vcmp.ge.f32.partialorder %v2216_v38, 0.0  ;;  %v2381_v51 = vmul.f32 0.2, %v2216_v38 }
 0x1f5   : > { %v2413_v39 = vsel %vm2349_vm15, %v2216_v38, %v2381_v51 }
 0x1f6   : > { %v3024_v42 = vpack.c.bf16 %v2413_v39, %v2412_v22 }
 0x1f8   : > { %3040 = vst [vmem:[%s4036_s30 + $0x78] sm:$0xff] %v3024_v42  }
 0x1f9 PF: > { %s12_s11 = sadd.s32 1, %s3599_s11   ;;  %s4095_s9 = smov %s3595_s10 }
 0x1fa   : > { %p9_p5 = scmp.ge.s32.totalorder %s12_s11, 4   ;;  %s4096_s10 = smov %s4098_s12 }
 0x1fc   :  { %11 = sbr.rel (!%p9_p5) target bundleno = 2 (0x2), region = 69 }

// kernel: _forward.7
= control target key start
LH: loop header
LB: loop body
LE: loop exit
PB: predicated region body
PF: predicated region fallthrough
CT: control target
= control target key end

     0   :  { %s2994_s9 = smov 0   ;;  %s2996_s10 = smov 0   ;;  %s3637_s0 = inlined_call_operand.vmem [shape: bf16[128,2048], index: 0, kind: input, shape index: {}]   ;;  %s3638_s1 = inlined_call_operand.vmem [shape: bf16[2048,256], index: 1, kind: input, shape index: {}]   ;;  %s3639_s2 = inlined_call_operand.vmem [shape: bf16[128,256], index: 2, kind: output, shape index: {}]  }
   0x1   :  { %s2998_s11 = smov 0   ;;  %s3000_s12 = smov 0  }
   0x2   :  { %s3002_s13 = smov 0  }
   0x3 LB: > { %s24_s14 = sadd.s32 1, %s2972_s12  ;;  %p47_p1 = scmp.ne.s32.totalorder %s2964_s10, %s2960_s9  ;;  %s2976_s13 = sphi %s3002_s13, %s12_s13   ;;  %s2972_s12 = sphi %s3000_s12, %s3677_s12   ;;  %s2968_s11 = sphi %s2998_s11, %s3676_s11   ;;  %s2964_s10 = sphi %s2996_s10, %s3675_s10   ;;  %s2960_s9 = sphi %s2994_s9, %s3674_s9  }
   0x4   : > { %p25_p0 = scmp.ge.s32.totalorder %s24_s14, 2  ;;  %p48_p2 = scmp.eq.s32.totalorder %s2976_s13, 0 }
   0x5   : > { %s40_s16 = sadd.s32 1, %s2964_s10  ;;  %p2464_p5 = scmp.ge.s32.totalorder %s2976_s13, 2 }
   0x6   : > { %s3679_s14 = smov (%p25_p0, %s24_s14), 0  ;;  %p49_p3 = por %p48_p2, %p47_p1 }
   0x7   : > { %s36_s15 = ssub.s32 %s2972_s12, %s3679_s14  ;;  %129 = sbr.rel (%p2464_p5) target bundleno = 48 (0x30), region = 16 }
   0x8   : > { %p38_p4 = scmp.eq.s32.totalorder %s36_s15, 0 }
   0xa   : > { %s3029_s17 = scalar_select %p38_p4, %s2964_s10, %s40_s16  }
   0xc   : > { %132 = sbr.rel (!%p49_p3) target bundleno = 48 (0x30), region = 20  ;;  %s134_s18 = sand.u32 (%p49_p3), 1, %s2964_s10  }
   0xd   : > { %s2687_s19 = sshll.u32 (%p49_p3), %s2972_s12, 5  ;;  %s2465_s20 = sshll.u32 (%p49_p3), %s134_s18, 9 }
   0xe   : > { %s3037_s23 = scalar_lea.vmem (%p49_p3), %s3637_s0, %s2687_s19  ;;  %s3042_s24 = scalar_lea.vmem (%p49_p3), [#allocation3], %s2465_s20 }
   0xf   : > { %v155_v0 = vld [vmem:[%s3037_s23] sm:$0xff] (%p49_p3)  ;;  %v157_v1 = vld [vmem:[%s3037_s23 + $0x8] sm:$0xff] (%p49_p3)  ;;  %v159_v2 = vld [vmem:[%s3037_s23 + $0x10] sm:$0xff] (%p49_p3) }
  0x10   : > { %156 = vst [vmem:[%s3042_s24] sm:$0xff] (%p49_p3), %v155_v0  ;;  %158 = vst [vmem:[%s3042_s24 + $0x8] sm:$0xff] (%p49_p3), %v157_v1  ;;  %v161_v3 = vld [vmem:[%s3037_s23 + $0x18] sm:$0xff] (%p49_p3)  ;;  %v163_v4 = vld [vmem:[%s3037_s23 + $0x40] sm:$0xff] (%p49_p3) }
  0x11   : > { %160 = vst [vmem:[%s3042_s24 + $0x10] sm:$0xff] %v159_v2  ;;  %v165_v5 = vld [vmem:[%s3037_s23 + $0x48] sm:$0xff]  ;;  %162 = vst [vmem:[%s3042_s24 + $0x18] sm:$0xff] %v161_v3  ;;  %v167_v6 = vld [vmem:[%s3037_s23 + $0x50] sm:$0xff] }
  0x12   : > { %164 = vst [vmem:[%s3042_s24 + $0x20] sm:$0xff] %v163_v4  ;;  %166 = vst [vmem:[%s3042_s24 + $0x28] sm:$0xff] %v165_v5  ;;  %v169_v7 = vld [vmem:[%s3037_s23 + $0x58] sm:$0xff]  ;;  %v171_v8 = vld [vmem:[%s3037_s23 + $0x80] sm:$0xff] }
  0x13   : > { %168 = vst [vmem:[%s3042_s24 + $0x30] sm:$0xff] %v167_v6  ;;  %170 = vst [vmem:[%s3042_s24 + $0x38] sm:$0xff] %v169_v7  ;;  %v173_v9 = vld [vmem:[%s3037_s23 + $0x88] sm:$0xff]  ;;  %v175_v10 = vld [vmem:[%s3037_s23 + $0x90] sm:$0xff] }
  0x14   : > { %172 = vst [vmem:[%s3042_s24 + $0x40] sm:$0xff] %v171_v8  ;;  %v177_v11 = vld [vmem:[%s3037_s23 + $0x98] sm:$0xff]  ;;  %174 = vst [vmem:[%s3042_s24 + $0x48] sm:$0xff] %v173_v9  ;;  %v179_v12 = vld [vmem:[%s3037_s23 + $0xc0] sm:$0xff] }
  0x15   : > { %176 = vst [vmem:[%s3042_s24 + $0x50] sm:$0xff] %v175_v10  ;;  %178 = vst [vmem:[%s3042_s24 + $0x58] sm:$0xff] %v177_v11  ;;  %v181_v13 = vld [vmem:[%s3037_s23 + $0xc8] sm:$0xff]  ;;  %v183_v14 = vld [vmem:[%s3037_s23 + $0xd0] sm:$0xff] }
  0x16   : > { %180 = vst [vmem:[%s3042_s24 + $0x60] sm:$0xff] %v179_v12  ;;  %182 = vst [vmem:[%s3042_s24 + $0x68] sm:$0xff] %v181_v13  ;;  %v185_v15 = vld [vmem:[%s3037_s23 + $0xd8] sm:$0xff]  ;;  %v187_v16 = vld [vmem:[%s3037_s23 + $0x100] sm:$0xff] }
  0x17   : > { %184 = vst [vmem:[%s3042_s24 + $0x70] sm:$0xff] %v183_v14  ;;  %v189_v17 = vld [vmem:[%s3037_s23 + $0x108] sm:$0xff]  ;;  %186 = vst [vmem:[%s3042_s24 + $0x78] sm:$0xff] %v185_v15  ;;  %v191_v18 = vld [vmem:[%s3037_s23 + $0x110] sm:$0xff] }
  0x18   : > { %188 = vst [vmem:[%s3042_s24 + $0x80] sm:$0xff] %v187_v16  ;;  %190 = vst [vmem:[%s3042_s24 + $0x88] sm:$0xff] %v189_v17  ;;  %v193_v19 = vld [vmem:[%s3037_s23 + $0x118] sm:$0xff]  ;;  %v195_v20 = vld [vmem:[%s3037_s23 + $0x140] sm:$0xff] }
  0x19   : > { %192 = vst [vmem:[%s3042_s24 + $0x90] sm:$0xff] %v191_v18  ;;  %194 = vst [vmem:[%s3042_s24 + $0x98] sm:$0xff] %v193_v19  ;;  %v197_v21 = vld [vmem:[%s3037_s23 + $0x148] sm:$0xff]  ;;  %v199_v22 = vld [vmem:[%s3037_s23 + $0x150] sm:$0xff] }
  0x1a   : > { %196 = vst [vmem:[%s3042_s24 + $0xa0] sm:$0xff] %v195_v20  ;;  %v201_v23 = vld [vmem:[%s3037_s23 + $0x158] sm:$0xff]  ;;  %198 = vst [vmem:[%s3042_s24 + $0xa8] sm:$0xff] %v197_v21  ;;  %v203_v24 = vld [vmem:[%s3037_s23 + $0x180] sm:$0xff] }
  0x1b   : > { %200 = vst [vmem:[%s3042_s24 + $0xb0] sm:$0xff] %v199_v22  ;;  %202 = vst [vmem:[%s3042_s24 + $0xb8] sm:$0xff] %v201_v23  ;;  %v205_v25 = vld [vmem:[%s3037_s23 + $0x188] sm:$0xff]  ;;  %v207_v26 = vld [vmem:[%s3037_s23 + $0x190] sm:$0xff] }
  0x1c   : > { %204 = vst [vmem:[%s3042_s24 + $0xc0] sm:$0xff] %v203_v24  ;;  %206 = vst [vmem:[%s3042_s24 + $0xc8] sm:$0xff] %v205_v25  ;;  %v209_v27 = vld [vmem:[%s3037_s23 + $0x198] sm:$0xff]  ;;  %v211_v28 = vld [vmem:[%s3037_s23 + $0x1c0] sm:$0xff] }
  0x1d   : > { %208 = vst [vmem:[%s3042_s24 + $0xd0] sm:$0xff] %v207_v26  ;;  %v213_v29 = vld [vmem:[%s3037_s23 + $0x1c8] sm:$0xff]  ;;  %210 = vst [vmem:[%s3042_s24 + $0xd8] sm:$0xff] %v209_v27  ;;  %v215_v30 = vld [vmem:[%s3037_s23 + $0x1d0] sm:$0xff] }
  0x1e   : > { %212 = vst [vmem:[%s3042_s24 + $0xe0] sm:$0xff] %v211_v28  ;;  %214 = vst [vmem:[%s3042_s24 + $0xe8] sm:$0xff] %v213_v29  ;;  %v217_v31 = vld [vmem:[%s3037_s23 + $0x1d8] sm:$0xff]  ;;  %v219_v32 = vld [vmem:[%s3037_s23 + $0x200] sm:$0xff] }
  0x1f   : > { %216 = vst [vmem:[%s3042_s24 + $0xf0] sm:$0xff] %v215_v30  ;;  %218 = vst [vmem:[%s3042_s24 + $0xf8] sm:$0xff] %v217_v31  ;;  %v221_v33 = vld [vmem:[%s3037_s23 + $0x208] sm:$0xff]  ;;  %v223_v34 = vld [vmem:[%s3037_s23 + $0x210] sm:$0xff] }
  0x20   : > { %220 = vst [vmem:[%s3042_s24 + $0x100] sm:$0xff] %v219_v32  ;;  %v225_v35 = vld [vmem:[%s3037_s23 + $0x218] sm:$0xff]  ;;  %222 = vst [vmem:[%s3042_s24 + $0x108] sm:$0xff] %v221_v33  ;;  %v227_v36 = vld [vmem:[%s3037_s23 + $0x240] sm:$0xff] }
  0x21   : > { %224 = vst [vmem:[%s3042_s24 + $0x110] sm:$0xff] %v223_v34  ;;  %226 = vst [vmem:[%s3042_s24 + $0x118] sm:$0xff] %v225_v35  ;;  %v229_v37 = vld [vmem:[%s3037_s23 + $0x248] sm:$0xff]  ;;  %v231_v38 = vld [vmem:[%s3037_s23 + $0x250] sm:$0xff] }
  0x22   : > { %228 = vst [vmem:[%s3042_s24 + $0x120] sm:$0xff] %v227_v36  ;;  %230 = vst [vmem:[%s3042_s24 + $0x128] sm:$0xff] %v229_v37  ;;  %v233_v39 = vld [vmem:[%s3037_s23 + $0x258] sm:$0xff]  ;;  %v235_v40 = vld [vmem:[%s3037_s23 + $0x280] sm:$0xff] }
  0x23   : > { %232 = vst [vmem:[%s3042_s24 + $0x130] sm:$0xff] %v231_v38  ;;  %v237_v41 = vld [vmem:[%s3037_s23 + $0x288] sm:$0xff]  ;;  %234 = vst [vmem:[%s3042_s24 + $0x138] sm:$0xff] %v233_v39  ;;  %v239_v42 = vld [vmem:[%s3037_s23 + $0x290] sm:$0xff] }
  0x24   : > { %236 = vst [vmem:[%s3042_s24 + $0x140] sm:$0xff] %v235_v40  ;;  %238 = vst [vmem:[%s3042_s24 + $0x148] sm:$0xff] %v237_v41  ;;  %v241_v43 = vld [vmem:[%s3037_s23 + $0x298] sm:$0xff]  ;;  %v243_v44 = vld [vmem:[%s3037_s23 + $0x2c0] sm:$0xff] }
  0x25   : > { %240 = vst [vmem:[%s3042_s24 + $0x150] sm:$0xff] %v239_v42  ;;  %242 = vst [vmem:[%s3042_s24 + $0x158] sm:$0xff] %v241_v43  ;;  %v245_v45 = vld [vmem:[%s3037_s23 + $0x2c8] sm:$0xff]  ;;  %v247_v46 = vld [vmem:[%s3037_s23 + $0x2d0] sm:$0xff] }
  0x26   : > { %244 = vst [vmem:[%s3042_s24 + $0x160] sm:$0xff] %v243_v44  ;;  %v249_v47 = vld [vmem:[%s3037_s23 + $0x2d8] sm:$0xff]  ;;  %246 = vst [vmem:[%s3042_s24 + $0x168] sm:$0xff] %v245_v45  ;;  %v251_v48 = vld [vmem:[%s3037_s23 + $0x300] sm:$0xff] }
  0x27   : > { %248 = vst [vmem:[%s3042_s24 + $0x170] sm:$0xff] %v247_v46  ;;  %250 = vst [vmem:[%s3042_s24 + $0x178] sm:$0xff] %v249_v47  ;;  %v253_v49 = vld [vmem:[%s3037_s23 + $0x308] sm:$0xff]  ;;  %v255_v50 = vld [vmem:[%s3037_s23 + $0x310] sm:$0xff] }
  0x28   : > { %252 = vst [vmem:[%s3042_s24 + $0x180] sm:$0xff] %v251_v48  ;;  %254 = vst [vmem:[%s3042_s24 + $0x188] sm:$0xff] %v253_v49  ;;  %v257_v51 = vld [vmem:[%s3037_s23 + $0x318] sm:$0xff]  ;;  %v259_v52 = vld [vmem:[%s3037_s23 + $0x340] sm:$0xff] }
  0x29   : > { %256 = vst [vmem:[%s3042_s24 + $0x190] sm:$0xff] %v255_v50  ;;  %v261_v53 = vld [vmem:[%s3037_s23 + $0x348] sm:$0xff]  ;;  %258 = vst [vmem:[%s3042_s24 + $0x198] sm:$0xff] %v257_v51  ;;  %v263_v54 = vld [vmem:[%s3037_s23 + $0x350] sm:$0xff] }
  0x2a   : > { %260 = vst [vmem:[%s3042_s24 + $0x1a0] sm:$0xff] %v259_v52  ;;  %262 = vst [vmem:[%s3042_s24 + $0x1a8] sm:$0xff] %v261_v53  ;;  %v265_v55 = vld [vmem:[%s3037_s23 + $0x358] sm:$0xff]  ;;  %v267_v56 = vld [vmem:[%s3037_s23 + $0x380] sm:$0xff] }
  0x2b   : > { %264 = vst [vmem:[%s3042_s24 + $0x1b0] sm:$0xff] %v263_v54  ;;  %266 = vst [vmem:[%s3042_s24 + $0x1b8] sm:$0xff] %v265_v55  ;;  %v269_v57 = vld [vmem:[%s3037_s23 + $0x388] sm:$0xff]  ;;  %v271_v58 = vld [vmem:[%s3037_s23 + $0x390] sm:$0xff] }
  0x2c   : > { %268 = vst [vmem:[%s3042_s24 + $0x1c0] sm:$0xff] %v267_v56  ;;  %v273_v59 = vld [vmem:[%s3037_s23 + $0x398] sm:$0xff]  ;;  %270 = vst [vmem:[%s3042_s24 + $0x1c8] sm:$0xff] %v269_v57  ;;  %v275_v60 = vld [vmem:[%s3037_s23 + $0x3c0] sm:$0xff] }
  0x2d   : > { %272 = vst [vmem:[%s3042_s24 + $0x1d0] sm:$0xff] %v271_v58  ;;  %274 = vst [vmem:[%s3042_s24 + $0x1d8] sm:$0xff] %v273_v59  ;;  %v277_v61 = vld [vmem:[%s3037_s23 + $0x3c8] sm:$0xff]  ;;  %v279_v62 = vld [vmem:[%s3037_s23 + $0x3d0] sm:$0xff] }
  0x2e   : > { %276 = vst [vmem:[%s3042_s24 + $0x1e0] sm:$0xff] %v275_v60  ;;  %278 = vst [vmem:[%s3042_s24 + $0x1e8] sm:$0xff] %v277_v61  ;;  %v281_v63 = vld [vmem:[%s3037_s23 + $0x3d8] sm:$0xff] }
  0x2f   : > { %280 = vst [vmem:[%s3042_s24 + $0x1f0] sm:$0xff] %v279_v62  ;;  %282 = vst [vmem:[%s3042_s24 + $0x1f8] sm:$0xff] %v281_v63 }
  0x30 PF: > { %p2468_p6 = scmp.ge.s32.totalorder %s2976_s13, 1  ;;  %p302_p7 = scmp.lt.s32.totalorder %s2976_s13, 3 }
  0x32   : > { %p303_p8 = pnand %p2468_p6, %p302_p7 }
  0x34   : > { %306 = sbr.rel (%p303_p8) target bundleno = 508 (0x1fc), region = 47 }
  0x39   : > { %s309_s25 = sand.u32 1, %s2960_s9   ;;  %s2470_s26 = sshll.u32 %s2968_s11, 7 }
  0x3a   : > { %s2469_s27 = sshll.u32 %s309_s25, 9  ;;  %p349_p9 = scmp.lt.s32.totalorder %s2470_s26, 255 }
  0x3b   : > { %s3178_s4 = scalar_lea.vmem [#allocation3], %s2469_s27  ;;  %p2473_p10 = scmp.ne.s32.totalorder %s2968_s11, 0 }
  0x3c   : > { %s3681_s26 = smov (!%p349_p9, %s2470_s26), 255 }
  0x3d   : > { %s2688_s28 = sshll.u32 %s3681_s26, 3  ;;  %374 = sbr.rel (%p2473_p10) target bundleno = 83 (0x53), region = 55 }
  0x3e   : > { %s3176_s3 = scalar_lea.vmem %s3638_s1, %s2688_s28 }
  0x42   : > { %v2978_v0 = vmov 0.0  }
  0x43   : > { %375 = vst [vmem:[#allocation2 + $0xb0] sm:$0xff] %v2978_v0  ;;  %376 = vst [vmem:[#allocation2] sm:$0xff] %v2978_v0 }
  0x44   : > { %377 = vst [vmem:[#allocation2 + $0xd8] sm:$0xff] %v2978_v0  ;;  %378 = vst [vmem:[#allocation2 + $0x18] sm:$0xff] %v2978_v0 }
  0x45   : > { %379 = vst [vmem:[#allocation2 + $0x50] sm:$0xff] %v2978_v0  ;;  %380 = vst [vmem:[#allocation2 + $0x68] sm:$0xff] %v2978_v0 }
  0x46   : > { %381 = vst [vmem:[#allocation2 + $0x30] sm:$0xff] %v2978_v0  ;;  %382 = vst [vmem:[#allocation2 + $0x48] sm:$0xff] %v2978_v0 }
  0x47   : > { %383 = vst [vmem:[#allocation2 + $0x80] sm:$0xff] %v2978_v0  ;;  %384 = vst [vmem:[#allocation2 + $0x88] sm:$0xff] %v2978_v0 }
  0x48   : > { %385 = vst [vmem:[#allocation2 + $0xe8] sm:$0xff] %v2978_v0  ;;  %386 = vst [vmem:[#allocation2 + $0xb8] sm:$0xff] %v2978_v0 }
  0x49   : > { %387 = vst [vmem:[#allocation2 + $0x60] sm:$0xff] %v2978_v0  ;;  %388 = vst [vmem:[#allocation2 + $0xf0] sm:$0xff] %v2978_v0 }
  0x4a   : > { %389 = vst [vmem:[#allocation2 + $0x8] sm:$0xff] %v2978_v0  ;;  %390 = vst [vmem:[#allocation2 + $0x78] sm:$0xff] %v2978_v0 }
  0x4b   : > { %391 = vst [vmem:[#allocation2 + $0x38] sm:$0xff] %v2978_v0  ;;  %392 = vst [vmem:[#allocation2 + $0x58] sm:$0xff] %v2978_v0 }
  0x4c   : > { %393 = vst [vmem:[#allocation2 + $0x40] sm:$0xff] %v2978_v0  ;;  %394 = vst [vmem:[#allocation2 + $0xc8] sm:$0xff] %v2978_v0 }
  0x4d   : > { %395 = vst [vmem:[#allocation2 + $0xe0] sm:$0xff] %v2978_v0  ;;  %396 = vst [vmem:[#allocation2 + $0x90] sm:$0xff] %v2978_v0 }
  0x4e   : > { %397 = vst [vmem:[#allocation2 + $0x70] sm:$0xff] %v2978_v0  ;;  %398 = vst [vmem:[#allocation2 + $0xc0] sm:$0xff] %v2978_v0 }
  0x4f   : > { %399 = vst [vmem:[#allocation2 + $0xa8] sm:$0xff] %v2978_v0  ;;  %400 = vst [vmem:[#allocation2 + $0xd0] sm:$0xff] %v2978_v0 }
  0x50   : > { %401 = vst [vmem:[#allocation2 + $0x10] sm:$0xff] %v2978_v0  ;;  %402 = vst [vmem:[#allocation2 + $0x28] sm:$0xff] %v2978_v0 }
  0x51   : > { %403 = vst [vmem:[#allocation2 + $0xa0] sm:$0xff] %v2978_v0  ;;  %404 = vst [vmem:[#allocation2 + $0xf8] sm:$0xff] %v2978_v0 }
  0x52   : > { %405 = vst [vmem:[#allocation2 + $0x20] sm:$0xff] %v2978_v0  ;;  %406 = vst [vmem:[#allocation2 + $0x98] sm:$0xff] %v2978_v0 }
  0x53 PF: > { %v2746_v1 = vld [vmem:[%s3176_s3 + $0x74] ss:$8 sps:$4 sm:$0xff]   ;;  %v2750_v3 = vld [vmem:[%s3176_s3 + $0x70] ss:$8 sps:$4 sm:$0xff]   ;;  %v2752_v5 = vld [vmem:[%s3176_s3 + $0x64] ss:$8 sps:$4 sm:$0xff]  }
  0x54   : > { %v2748_v2 = vld [vmem:[%s3176_s3 + $0x174] ss:$8 sps:$4 sm:$0xff]   ;;  %1591 = vmatprep.subr.bf16.mxu0 %v2746_v1  ;;  %v2751_v4 = vld [vmem:[%s3176_s3 + $0x170] ss:$8 sps:$4 sm:$0xff]   ;;  %v2754_v6 = vld [vmem:[%s3176_s3 + $0x164] ss:$8 sps:$4 sm:$0xff]  }
  0x55   : > { %1704 = vmatprep.subr.bf16.mxu1 %v2748_v2  ;;  %1592 = vmatpush1.bf16.msra.mxu0 %v2750_v3  ;;  %v2756_v7 = vld [vmem:[%s3176_s3 + $0x60] ss:$8 sps:$4 sm:$0xff]   ;;  %v2758_v9 = vld [vmem:[%s3176_s3 + $0x54] ss:$8 sps:$4 sm:$0xff]   ;;  %v2762_v11 = vld [vmem:[%s3176_s3 + $0x50] ss:$8 sps:$4 sm:$0xff]  }
  0x56   : > { %1705 = vmatpush1.bf16.msra.mxu1 %v2751_v4  ;;  %1593 = vmatprep.subr.bf16.mxu0 %v2752_v5  ;;  %v2757_v8 = vld [vmem:[%s3176_s3 + $0x160] ss:$8 sps:$4 sm:$0xff]   ;;  %v2760_v10 = vld [vmem:[%s3176_s3 + $0x154] ss:$8 sps:$4 sm:$0xff]   ;;  %v2763_v12 = vld [vmem:[%s3176_s3 + $0x150] ss:$8 sps:$4 sm:$0xff]  }
  0x57   : > { %1706 = vmatprep.subr.bf16.mxu1 %v2754_v6  ;;  %v2764_v13 = vld [vmem:[%s3176_s3 + $0x44] ss:$8 sps:$4 sm:$0xff]   ;;  %v2768_v15 = vld [vmem:[%s3176_s3 + $0x40] ss:$8 sps:$4 sm:$0xff]   ;;  %v2770_v17 = vld [vmem:[%s3176_s3 + $0x34] ss:$8 sps:$4 sm:$0xff]  }
  0x58   : > { %v2766_v14 = vld [vmem:[%s3176_s3 + $0x144] ss:$8 sps:$4 sm:$0xff]   ;;  %v2769_v16 = vld [vmem:[%s3176_s3 + $0x140] ss:$8 sps:$4 sm:$0xff]   ;;  %v2772_v18 = vld [vmem:[%s3176_s3 + $0x134] ss:$8 sps:$4 sm:$0xff]  }
  0x59   : > { %1594 = vmatpush1.bf16.msra.mxu0 %v2756_v7  ;;  %v2774_v19 = vld [vmem:[%s3176_s3 + $0x30] ss:$8 sps:$4 sm:$0xff]   ;;  %v2776_v21 = vld [vmem:[%s3176_s3 + $0x24] ss:$8 sps:$4 sm:$0xff]   ;;  %v2780_v23 = vld [vmem:[%s3176_s3 + $0x20] ss:$8 sps:$4 sm:$0xff]  }
  0x5a   : > { %1707 = vmatpush1.bf16.msra.mxu1 %v2757_v8  ;;  %1595 = vmatprep.subr.bf16.mxu0 %v2758_v9  ;;  %v2775_v20 = vld [vmem:[%s3176_s3 + $0x130] ss:$8 sps:$4 sm:$0xff]   ;;  %v2778_v22 = vld [vmem:[%s3176_s3 + $0x124] ss:$8 sps:$4 sm:$0xff]   ;;  %v2781_v24 = vld [vmem:[%s3176_s3 + $0x120] ss:$8 sps:$4 sm:$0xff]  }
  0x5b   : > { %1708 = vmatprep.subr.bf16.mxu1 %v2760_v10  ;;  %v2782_v25 = vld [vmem:[%s3176_s3 + $0x14] ss:$8 sps:$4 sm:$0xff]   ;;  %v2786_v27 = vld [vmem:[%s3176_s3 + $0x10] ss:$8 sps:$4 sm:$0xff]   ;;  %v2788_v29 = vld [vmem:[%s3176_s3 + $0x4] ss:$8 sps:$4 sm:$0xff]  }
  0x5c   : > { %v2784_v26 = vld [vmem:[%s3176_s3 + $0x114] ss:$8 sps:$4 sm:$0xff]   ;;  %v2787_v28 = vld [vmem:[%s3176_s3 + $0x110] ss:$8 sps:$4 sm:$0xff]   ;;  %v2790_v30 = vld [vmem:[%s3176_s3 + $0x104] ss:$8 sps:$4 sm:$0xff]  }
  0x5d   : > { %1596 = vmatpush1.bf16.msra.mxu0 %v2762_v11  ;;  %v2792_v31 = vld [vmem:[%s3176_s3] ss:$8 sps:$4 sm:$0xff]   ;;  %v2794_v33 = vld [vmem:[%s3176_s3 + $0xf4] ss:$8 sps:$4 sm:$0xff]   ;;  %v2798_v35 = vld [vmem:[%s3176_s3 + $0xf0] ss:$8 sps:$4 sm:$0xff]  }
  0x5e   : > { %1709 = vmatpush1.bf16.msra.mxu1 %v2763_v12  ;;  %1597 = vmatprep.subr.bf16.mxu0 %v2764_v13  ;;  %v2793_v32 = vld [vmem:[%s3176_s3 + $0x100] ss:$8 sps:$4 sm:$0xff]   ;;  %v2796_v34 = vld [vmem:[%s3176_s3 + $0x1f4] ss:$8 sps:$4 sm:$0xff]   ;;  %v2799_v36 = vld [vmem:[%s3176_s3 + $0x1f0] ss:$8 sps:$4 sm:$0xff]  }
  0x5f   : > { %1710 = vmatprep.subr.bf16.mxu1 %v2766_v14  ;;  %v2800_v37 = vld [vmem:[%s3176_s3 + $0xe4] ss:$8 sps:$4 sm:$0xff]   ;;  %v2804_v39 = vld [vmem:[%s3176_s3 + $0xe0] ss:$8 sps:$4 sm:$0xff]   ;;  %v2806_v41 = vld [vmem:[%s3176_s3 + $0xd4] ss:$8 sps:$4 sm:$0xff]  }
  0x60   : > { %v2802_v38 = vld [vmem:[%s3176_s3 + $0x1e4] ss:$8 sps:$4 sm:$0xff]   ;;  %v2805_v40 = vld [vmem:[%s3176_s3 + $0x1e0] ss:$8 sps:$4 sm:$0xff]   ;;  %v2808_v42 = vld [vmem:[%s3176_s3 + $0x1d4] ss:$8 sps:$4 sm:$0xff]  }
  0x61   : > { %1598 = vmatpush1.bf16.msra.mxu0 %v2768_v15  ;;  %v2810_v43 = vld [vmem:[%s3176_s3 + $0xd0] ss:$8 sps:$4 sm:$0xff]   ;;  %v2812_v45 = vld [vmem:[%s3176_s3 + $0xc4] ss:$8 sps:$4 sm:$0xff]   ;;  %v2816_v47 = vld [vmem:[%s3176_s3 + $0xc0] ss:$8 sps:$4 sm:$0xff]  }
  0x62   : > { %1711 = vmatpush1.bf16.msra.mxu1 %v2769_v16  ;;  %1599 = vmatprep.subr.bf16.mxu0 %v2770_v17  ;;  %v2811_v44 = vld [vmem:[%s3176_s3 + $0x1d0] ss:$8 sps:$4 sm:$0xff]   ;;  %v2814_v46 = vld [vmem:[%s3176_s3 + $0x1c4] ss:$8 sps:$4 sm:$0xff]   ;;  %v2817_v48 = vld [vmem:[%s3176_s3 + $0x1c0] ss:$8 sps:$4 sm:$0xff]  }
  0x63   : > { %1712 = vmatprep.subr.bf16.mxu1 %v2772_v18  ;;  %v439_v49 = vld [vmem:[%s3178_s4] sm:$0xff]  ;;  %v440_v51 = vld [vmem:[%s3178_s4 + $0x8] sm:$0xff]  ;;  %v2818_v53 = vld [vmem:[%s3176_s3 + $0xb4] ss:$8 sps:$4 sm:$0xff]   ;;  %p2666_p11 = scmp.ne.s32.totalorder %s2968_s11, 1 }
  0x64   : > { %v443_v50 = vld [vmem:[%s3178_s4 + $0x20] sm:$0xff]  ;;  %v444_v52 = vld [vmem:[%s3178_s4 + $0x28] sm:$0xff]  ;;  %v2820_v55 = vld [vmem:[%s3176_s3 + $0x1b4] ss:$8 sps:$4 sm:$0xff]  }
  0x65   : > { %1600 = vmatpush1.bf16.msra.mxu0 %v2774_v19  ;;  %v2475_v54 = vcombine.high %v439_v49, %v443_v50  ;;  %v2477_v56 = vcombine.high %v440_v51, %v444_v52  ;;  %v2822_v57 = vld [vmem:[%s3176_s3 + $0xb0] ss:$8 sps:$4 sm:$0xff]   ;;  %v2824_v59 = vld [vmem:[%s3176_s3 + $0xa4] ss:$8 sps:$4 sm:$0xff]   ;;  %v2828_v61 = vld [vmem:[%s3176_s3 + $0xa0] ss:$8 sps:$4 sm:$0xff]   ;;  %v2474_v12 = vcombine.low %v439_v49, %v443_v50  ;;  %v2476_v13 = vcombine.low %v440_v51, %v444_v52 }
  0x66   : > { %1713 = vmatpush1.bf16.msra.mxu1 %v2775_v20  ;;  %1601 = vmatprep.subr.bf16.mxu0 %v2776_v21  ;;  %v2823_v58 = vld [vmem:[%s3176_s3 + $0x1b0] ss:$8 sps:$4 sm:$0xff]   ;;  %v2826_v60 = vld [vmem:[%s3176_s3 + $0x1a4] ss:$8 sps:$4 sm:$0xff]   ;;  %v2829_v62 = vld [vmem:[%s3176_s3 + $0x1a0] ss:$8 sps:$4 sm:$0xff]  }
  0x67   : > { %1714 = vmatprep.subr.bf16.mxu1 %v2778_v22  ;;  %1623 = vmatprep.mubr.bf16.mxu0 %v2475_v54  ;;  %v2830_v63 = vld [vmem:[%s3176_s3 + $0x94] ss:$8 sps:$4 sm:$0xff]   ;;  %v2834_v1 = vld [vmem:[%s3176_s3 + $0x90] ss:$8 sps:$4 sm:$0xff]   ;;  %v2836_v3 = vld [vmem:[%s3176_s3 + $0x84] ss:$8 sps:$4 sm:$0xff]  }
  0x68   : > { %1736 = vmatprep.mubr.bf16.mxu1 %v2477_v56  ;;  %v2832_v0 = vld [vmem:[%s3176_s3 + $0x194] ss:$8 sps:$4 sm:$0xff]   ;;  %v2835_v2 = vld [vmem:[%s3176_s3 + $0x190] ss:$8 sps:$4 sm:$0xff]   ;;  %v2838_v4 = vld [vmem:[%s3176_s3 + $0x184] ss:$8 sps:$4 sm:$0xff]  }
  0x69   : > { %1602 = vmatpush1.bf16.msra.mxu0 %v2780_v23  ;;  %v2840_v5 = vld [vmem:[%s3176_s3 + $0x80] ss:$8 sps:$4 sm:$0xff]   ;;  %v2844_v7 = vld [vmem:[%s3176_s3 + $0x274] ss:$8 sps:$4 sm:$0xff]   ;;  %v2842_v9 = vld [vmem:[%s3176_s3 + $0x270] ss:$8 sps:$4 sm:$0xff]  }
  0x6a   : > { %1715 = vmatpush1.bf16.msra.mxu1 %v2781_v24  ;;  %1603 = vmatprep.subr.bf16.mxu0 %v2782_v25  ;;  %v2841_v6 = vld [vmem:[%s3176_s3 + $0x180] ss:$8 sps:$4 sm:$0xff]   ;;  %v2847_v8 = vld [vmem:[%s3176_s3 + $0x374] ss:$8 sps:$4 sm:$0xff]   ;;  %v2845_v10 = vld [vmem:[%s3176_s3 + $0x370] ss:$8 sps:$4 sm:$0xff]  }
  0x6b   : > { %1716 = vmatprep.subr.bf16.mxu1 %v2784_v26  ;;  %v447_v11 = vld [vmem:[%s3178_s4 + $0x40] sm:$0xff]  ;;  %v448_v15 = vld [vmem:[%s3178_s4 + $0x48] sm:$0xff]  ;;  %v2856_v23 = vld [vmem:[%s3176_s3 + $0x254] ss:$8 sps:$4 sm:$0xff]  }
  0x6c   : > { %v451_v14 = vld [vmem:[%s3178_s4 + $0x60] sm:$0xff]  ;;  %v452_v16 = vld [vmem:[%s3178_s4 + $0x68] sm:$0xff]  ;;  %v2859_v24 = vld [vmem:[%s3176_s3 + $0x354] ss:$8 sps:$4 sm:$0xff]  }
  0x6d   : > { %1604 = vmatpush1.bf16.msra.mxu0 %v2786_v27  ;;  %v2850_v17 = vld [vmem:[%s3176_s3 + $0x264] ss:$8 sps:$4 sm:$0xff]   ;;  %v2483_v19 = vcombine.high %v447_v11, %v451_v14  ;;  %v2485_v20 = vcombine.high %v448_v15, %v452_v16  ;;  %v2848_v21 = vld [vmem:[%s3176_s3 + $0x260] ss:$8 sps:$4 sm:$0xff]   ;;  %v2854_v25 = vld [vmem:[%s3176_s3 + $0x250] ss:$8 sps:$4 sm:$0xff]  }
  0x6e   : > { %1717 = vmatpush1.bf16.msra.mxu1 %v2787_v28  ;;  %1605 = vmatprep.subr.bf16.mxu0 %v2788_v29  ;;  %v2853_v18 = vld [vmem:[%s3176_s3 + $0x364] ss:$8 sps:$4 sm:$0xff]   ;;  %v2851_v22 = vld [vmem:[%s3176_s3 + $0x360] ss:$8 sps:$4 sm:$0xff]   ;;  %v2857_v26 = vld [vmem:[%s3176_s3 + $0x350] ss:$8 sps:$4 sm:$0xff]   ;;  %v2482_v29 = vcombine.low %v447_v11, %v451_v14 }
  0x6f   : > { %1718 = vmatprep.subr.bf16.mxu1 %v2790_v30  ;;  %v455_v27 = vld [vmem:[%s3178_s4 + $0x80] sm:$0xff]  ;;  %v2484_v30 = vcombine.low %v448_v15, %v452_v16  ;;  %v2883_v56 = vld [vmem:[%s3176_s3 + $0x314] ss:$8 sps:$4 sm:$0xff]   ;;  %v484_v14 = vld [vmem:[%s3178_s4 + $0x168] sm:$0xff] }
  0x70   : > { %v459_v28 = vld [vmem:[%s3178_s4 + $0xa0] sm:$0xff]  ;;  %v2890_v15 = vld [vmem:[%s3176_s3 + $0x2f0] ss:$8 sps:$4 sm:$0xff]  }
  0x71   : > { %1606 = vmatpush1.bf16.msra.mxu0 %v2792_v31  ;;  %v456_v31 = vld [vmem:[%s3178_s4 + $0x88] sm:$0xff]  ;;  %v2893_v16 = vld [vmem:[%s3176_s3 + $0x3f0] ss:$8 sps:$4 sm:$0xff]  }
  0x72   : > { %1719 = vmatpush1.bf16.msra.mxu1 %v2793_v32  ;;  %1607 = vmatprep.subr.bf16.mxu0 %v2794_v33  ;;  %v460_v32 = vld [vmem:[%s3178_s4 + $0xa8] sm:$0xff] }
  0x73   : > { %1720 = vmatprep.subr.bf16.mxu1 %v2796_v34  ;;  %v2862_v33 = vld [vmem:[%s3176_s3 + $0x244] ss:$8 sps:$4 sm:$0xff]   ;;  %v2875_v54 = vld [vmem:[%s3176_s3 + $0x320] ss:$8 sps:$4 sm:$0xff]  }
  0x74   : > { %v2865_v34 = vld [vmem:[%s3176_s3 + $0x344] ss:$8 sps:$4 sm:$0xff]  }
  0x75   : > { %1608 = vmatpush2.bf16.msra.mxu0 %v2798_v35  ;;  %v2491_v35 = vcombine.high %v455_v27, %v459_v28  ;;  %v2874_v49 = vld [vmem:[%s3176_s3 + $0x224] ss:$8 sps:$4 sm:$0xff]  }
  0x76   : > { %1721 = vmatpush2.bf16.msra.mxu1 %v2799_v36  ;;  %1609 = vmatprep.subr.bf16.mxu0 %v2800_v37  ;;  %v2493_v36 = vcombine.high %v456_v31, %v460_v32  ;;  %v2860_v37 = vld [vmem:[%s3176_s3 + $0x240] ss:$8 sps:$4 sm:$0xff]   ;;  %v2877_v50 = vld [vmem:[%s3176_s3 + $0x324] ss:$8 sps:$4 sm:$0xff]  }
  0x77   : > { %1722 = vmatprep.subr.bf16.mxu1 %v2802_v38  ;;  %v2863_v38 = vld [vmem:[%s3176_s3 + $0x340] ss:$8 sps:$4 sm:$0xff]  }
  0x79   : > { %1610 = vmatpush2.bf16.msra.mxu0 %v2804_v39  ;;  %v2868_v39 = vld [vmem:[%s3176_s3 + $0x234] ss:$8 sps:$4 sm:$0xff]  }
  0x7a   : > { %1723 = vmatpush2.bf16.msra.mxu1 %v2805_v40  ;;  %1611 = vmatprep.subr.bf16.mxu0 %v2806_v41  ;;  %v2871_v40 = vld [vmem:[%s3176_s3 + $0x334] ss:$8 sps:$4 sm:$0xff]   ;;  %v2866_v41 = vld [vmem:[%s3176_s3 + $0x230] ss:$8 sps:$4 sm:$0xff]  }
  0x7b   : > { %1724 = vmatprep.subr.bf16.mxu1 %v2808_v42  ;;  %v2869_v42 = vld [vmem:[%s3176_s3 + $0x330] ss:$8 sps:$4 sm:$0xff]  }
  0x7d   : > { %1612 = vmatpush2.bf16.msra.mxu0 %v2810_v43  ;;  %v463_v43 = vld [vmem:[%s3178_s4 + $0xc0] sm:$0xff] }
  0x7e   : > { %1725 = vmatpush2.bf16.msra.mxu1 %v2811_v44  ;;  %1613 = vmatprep.subr.bf16.mxu0 %v2812_v45  ;;  %v467_v44 = vld [vmem:[%s3178_s4 + $0xe0] sm:$0xff]  ;;  %v2490_v45 = vcombine.low %v455_v27, %v459_v28 }
  0x7f   : > { %1726 = vmatprep.subr.bf16.mxu1 %v2814_v46  ;;  %v2492_v46 = vcombine.low %v456_v31, %v460_v32  ;;  %v2499_v51 = vcombine.high %v463_v43, %v467_v44  ;;  %v491_v28 = vld [vmem:[%s3178_s4 + $0x1a0] sm:$0xff]  ;;  %v2902_v31 = vld [vmem:[%s3176_s3 + $0x2d0] ss:$8 sps:$4 sm:$0xff]  }
  0x80   : > { %v2905_v32 = vld [vmem:[%s3176_s3 + $0x3d0] ss:$8 sps:$4 sm:$0xff]  }
  0x81   : > { %1614 = vmatpush2.bf16.msra.mxu0 %v2816_v47  ;;  %v464_v47 = vld [vmem:[%s3178_s4 + $0xc8] sm:$0xff] }
  0x82   : > { %1727 = vmatpush2.bf16.msra.mxu1 %v2817_v48  ;;  %1615 = vmatprep.subr.bf16.mxu0 %v2818_v53  ;;  %v468_v48 = vld [vmem:[%s3178_s4 + $0xe8] sm:$0xff] }
  0x83   : > { %1728 = vmatprep.subr.bf16.mxu1 %v2820_v55  ;;  %v2501_v52 = vcombine.high %v464_v47, %v468_v48  ;;  %v2872_v53 = vld [vmem:[%s3176_s3 + $0x220] ss:$8 sps:$4 sm:$0xff]   ;;  %v2880_v55 = vld [vmem:[%s3176_s3 + $0x214] ss:$8 sps:$4 sm:$0xff]  }
  0x85   : > { %1616 = vmatpush2.bf16.msra.mxu0 %v2822_v57  ;;  %v2878_v57 = vld [vmem:[%s3176_s3 + $0x210] ss:$8 sps:$4 sm:$0xff]  }
  0x86   : > { %1729 = vmatpush2.bf16.msra.mxu1 %v2823_v58  ;;  %1617 = vmatprep.subr.bf16.mxu0 %v2824_v59  ;;  %v471_v58 = vld [vmem:[%s3178_s4 + $0x100] sm:$0xff] }
  0x87   : > { %1730 = vmatprep.subr.bf16.mxu1 %v2826_v60  ;;  %v475_v59 = vld [vmem:[%s3178_s4 + $0x120] sm:$0xff]  ;;  %v2498_v60 = vcombine.low %v463_v43, %v467_v44 }
  0x88   : > { %v2506_v11 = vcombine.low %v471_v58, %v475_v59  ;;  %v499_v44 = vld [vmem:[%s3178_s4 + $0x1e0] sm:$0xff] }
  0x89   : > { %1618 = vmatpush2.bf16.msra.mxu0 %v2828_v61  ;;  %v2500_v61 = vcombine.low %v464_v47, %v468_v48  ;;  %v2914_v47 = vld [vmem:[%s3176_s3 + $0x2b0] ss:$8 sps:$4 sm:$0xff]  }
  0x8a   : > { %1731 = vmatpush2.bf16.msra.mxu1 %v2829_v62  ;;  %1619 = vmatprep.subr.bf16.mxu0 %v2830_v63  ;;  %v472_v62 = vld [vmem:[%s3178_s4 + $0x108] sm:$0xff]  ;;  %v2917_v48 = vld [vmem:[%s3176_s3 + $0x3b0] ss:$8 sps:$4 sm:$0xff]  }
  0x8b   : > { %1732 = vmatprep.subr.bf16.mxu1 %v2832_v0  ;;  %v476_v63 = vld [vmem:[%s3178_s4 + $0x128] sm:$0xff]  ;;  %v2881_v0 = vld [vmem:[%s3176_s3 + $0x310] ss:$8 sps:$4 sm:$0xff]  }
  0x8d   : > { %1620 = vmatpush2.bf16.msra.mxu0 %v2834_v1  ;;  %v2886_v1 = vld [vmem:[%s3176_s3 + $0x204] ss:$8 sps:$4 sm:$0xff]  }
  0x8e   : > { %1733 = vmatpush2.bf16.msra.mxu1 %v2835_v2  ;;  %1621 = vmatprep.subr.bf16.mxu0 %v2836_v3  ;;  %v2889_v2 = vld [vmem:[%s3176_s3 + $0x304] ss:$8 sps:$4 sm:$0xff]   ;;  %v2507_v3 = vcombine.high %v471_v58, %v475_v59 }
  0x8f   : > { %1734 = vmatprep.subr.bf16.mxu1 %v2838_v4  ;;  %v2509_v4 = vcombine.high %v472_v62, %v476_v63 }
  0x91   : > { %1622 = vmatpush2.bf16.msra.mxu0 %v2840_v5  ;;  %v2884_v5 = vld [vmem:[%s3176_s3 + $0x200] ss:$8 sps:$4 sm:$0xff]  }
  0x92   : > { %1735 = vmatpush2.bf16.msra.mxu1 %v2841_v6  ;;  %1817 = vmatprep.subr.bf16.mxu0 %v2844_v7  ;;  %v2887_v6 = vld [vmem:[%s3176_s3 + $0x300] ss:$8 sps:$4 sm:$0xff]   ;;  %v2892_v7 = vld [vmem:[%s3176_s3 + $0x2f4] ss:$8 sps:$4 sm:$0xff]  }
  0x93   : > { %1930 = vmatprep.subr.bf16.mxu1 %v2847_v8  ;;  %v2895_v8 = vld [vmem:[%s3176_s3 + $0x3f4] ss:$8 sps:$4 sm:$0xff]  }
  0x94   : > { %1624 = vmatmul.mubr.bf16.vlgmr.msra.gmra.mxu0 %v2474_v12  ;;  %v2508_v12 = vcombine.low %v472_v62, %v476_v63  ;;  %v446_v62 = vld [vmem:[%s3178_s4 + $0x38] sm:$0xff] }
  0x95   : > { %1737 = vmatmul.mubr.bf16.vlgmr.msra.gmra.mxu1 %v2476_v13  ;;  %1818 = vmatpush1.bf16.msra.mxu0 %v2842_v9  ;;  %v479_v9 = vld [vmem:[%s3178_s4 + $0x140] sm:$0xff]  ;;  %v480_v13 = vld [vmem:[%s3178_s4 + $0x148] sm:$0xff]  ;;  %v2926_v63 = vld [vmem:[%s3176_s3 + $0x290] ss:$8 sps:$4 sm:$0xff]  }
  0x96   : > { %1931 = vmatpush1.bf16.msra.mxu1 %v2845_v10  ;;  %1819 = vmatprep.subr.bf16.mxu0 %v2850_v17  ;;  %v483_v10 = vld [vmem:[%s3178_s4 + $0x160] sm:$0xff]  ;;  %v2516_v27 = vcombine.low %v480_v13, %v484_v14 }
  0x97   : > { %1932 = vmatprep.subr.bf16.mxu1 %v2853_v18  ;;  %1633 = vmatprep.mubr.bf16.mxu0 %v2483_v19  ;;  %v2898_v17 = vld [vmem:[%s3176_s3 + $0x2e4] ss:$8 sps:$4 sm:$0xff]   ;;  %v2515_v19 = vcombine.high %v479_v9, %v483_v10 }
  0x98   : > { %1746 = vmatprep.mubr.bf16.mxu1 %v2485_v20  ;;  %v2901_v18 = vld [vmem:[%s3176_s3 + $0x3e4] ss:$8 sps:$4 sm:$0xff]   ;;  %v2517_v20 = vcombine.high %v480_v13, %v484_v14 }
  0x99   : > { %1820 = vmatpush1.bf16.msra.mxu0 %v2848_v21  ;;  %v2896_v21 = vld [vmem:[%s3176_s3 + $0x2e0] ss:$8 sps:$4 sm:$0xff]  }
  0x9a   : > { %1933 = vmatpush1.bf16.msra.mxu1 %v2851_v22  ;;  %1821 = vmatprep.subr.bf16.mxu0 %v2856_v23  ;;  %v2899_v22 = vld [vmem:[%s3176_s3 + $0x3e0] ss:$8 sps:$4 sm:$0xff]   ;;  %v2904_v23 = vld [vmem:[%s3176_s3 + $0x2d4] ss:$8 sps:$4 sm:$0xff]  }
  0x9b   : > { %1934 = vmatprep.subr.bf16.mxu1 %v2859_v24  ;;  %v2907_v24 = vld [vmem:[%s3176_s3 + $0x3d4] ss:$8 sps:$4 sm:$0xff]  }
  0x9c   : > { %1634 = vmatmul.mubr.bf16.gmra.mxu0 %v2482_v29  ;;  %v488_v29 = vld [vmem:[%s3178_s4 + $0x188] sm:$0xff] }
  0x9d   : > { %1747 = vmatmul.mubr.bf16.gmra.mxu1 %v2484_v30  ;;  %1822 = vmatpush1.bf16.msra.mxu0 %v2854_v25  ;;  %v487_v25 = vld [vmem:[%s3178_s4 + $0x180] sm:$0xff]  ;;  %v492_v30 = vld [vmem:[%s3178_s4 + $0x1a8] sm:$0xff] }
  0x9e   : > { %1935 = vmatpush1.bf16.msra.mxu1 %v2857_v26  ;;  %1823 = vmatprep.subr.bf16.mxu0 %v2862_v33  ;;  %v2514_v26 = vcombine.low %v479_v9, %v483_v10  ;;  %v2910_v33 = vld [vmem:[%s3176_s3 + $0x2c4] ss:$8 sps:$4 sm:$0xff]   ;;  %v2524_v43 = vcombine.low %v488_v29, %v492_v30  ;;  %v450_v9 = vld [vmem:[%s3178_s4 + $0x58] sm:$0xff] }
  0x9f   : > { %1936 = vmatprep.subr.bf16.mxu1 %v2865_v34  ;;  %1643 = vmatprep.mubr.bf16.mxu0 %v2491_v35  ;;  %v2913_v34 = vld [vmem:[%s3176_s3 + $0x3c4] ss:$8 sps:$4 sm:$0xff]   ;;  %v2523_v35 = vcombine.high %v487_v25, %v491_v28  ;;  %v454_v10 = vld [vmem:[%s3178_s4 + $0x78] sm:$0xff] }
  0xa0   : > { %1756 = vmatprep.mubr.bf16.mxu1 %v2493_v36  ;;  %v2525_v36 = vcombine.high %v488_v29, %v492_v30  ;;  %v2489_v14 = vcombine.high %v450_v9, %v454_v10 }
  0xa1   : > { %1824 = vmatpush1.bf16.msra.mxu0 %v2860_v37  ;;  %v2908_v37 = vld [vmem:[%s3176_s3 + $0x2c0] ss:$8 sps:$4 sm:$0xff]  }
  0xa2   : > { %1937 = vmatpush1.bf16.msra.mxu1 %v2863_v38  ;;  %1825 = vmatprep.subr.bf16.mxu0 %v2868_v39  ;;  %v2911_v38 = vld [vmem:[%s3176_s3 + $0x3c0] ss:$8 sps:$4 sm:$0xff]   ;;  %v2916_v39 = vld [vmem:[%s3176_s3 + $0x2b4] ss:$8 sps:$4 sm:$0xff]  }
  0xa3   : > { %1938 = vmatprep.subr.bf16.mxu1 %v2871_v40  ;;  %v2919_v40 = vld [vmem:[%s3176_s3 + $0x3b4] ss:$8 sps:$4 sm:$0xff]  }
  0xa4   : > { %1644 = vmatmul.mubr.bf16.gmra.mxu0 %v2490_v45  ;;  %v496_v45 = vld [vmem:[%s3178_s4 + $0x1c8] sm:$0xff] }
  0xa5   : > { %1757 = vmatmul.mubr.bf16.gmra.mxu1 %v2492_v46  ;;  %1826 = vmatpush1.bf16.msra.mxu0 %v2866_v41  ;;  %v495_v41 = vld [vmem:[%s3178_s4 + $0x1c0] sm:$0xff]  ;;  %v500_v46 = vld [vmem:[%s3178_s4 + $0x1e8] sm:$0xff] }
  0xa6   : > { %1939 = vmatpush1.bf16.msra.mxu1 %v2869_v42  ;;  %1827 = vmatprep.subr.bf16.mxu0 %v2874_v49  ;;  %v2522_v42 = vcombine.low %v487_v25, %v491_v28  ;;  %v2922_v49 = vld [vmem:[%s3176_s3 + $0x2a4] ss:$8 sps:$4 sm:$0xff]   ;;  %v2530_v58 = vcombine.low %v495_v41, %v499_v44  ;;  %v2532_v59 = vcombine.low %v496_v45, %v500_v46  ;;  %v466_v25 = vld [vmem:[%s3178_s4 + $0xd8] sm:$0xff] }
  0xa7   : > { %1940 = vmatprep.subr.bf16.mxu1 %v2877_v50  ;;  %1653 = vmatprep.mubr.bf16.mxu0 %v2499_v51  ;;  %v2925_v50 = vld [vmem:[%s3176_s3 + $0x3a4] ss:$8 sps:$4 sm:$0xff]   ;;  %v2531_v51 = vcombine.high %v495_v41, %v499_v44  ;;  %v482_v41 = vld [vmem:[%s3178_s4 + $0x158] sm:$0xff] }
  0xa8   : > { %1766 = vmatprep.mubr.bf16.mxu1 %v2501_v52  ;;  %v2533_v52 = vcombine.high %v496_v45, %v500_v46 }
  0xa9   : > { %1828 = vmatpush1.bf16.msra.mxu0 %v2872_v53  ;;  %v2920_v53 = vld [vmem:[%s3176_s3 + $0x2a0] ss:$8 sps:$4 sm:$0xff]  }
  0xaa   : > { %1941 = vmatpush1.bf16.msra.mxu1 %v2875_v54  ;;  %1829 = vmatprep.subr.bf16.mxu0 %v2880_v55  ;;  %v2923_v54 = vld [vmem:[%s3176_s3 + $0x3a0] ss:$8 sps:$4 sm:$0xff]   ;;  %v2928_v55 = vld [vmem:[%s3176_s3 + $0x294] ss:$8 sps:$4 sm:$0xff]  }
  0xab   : > { %1942 = vmatprep.subr.bf16.mxu1 %v2883_v56  ;;  %v2931_v56 = vld [vmem:[%s3176_s3 + $0x394] ss:$8 sps:$4 sm:$0xff]  }
  0xac   : > { %1654 = vmatmul.mubr.bf16.gmra.mxu0 %v2498_v60  ;;  %v445_v60 = vld [vmem:[%s3178_s4 + $0x30] sm:$0xff] }
  0xad   : > { %1767 = vmatmul.mubr.bf16.gmra.mxu1 %v2500_v61  ;;  %1830 = vmatpush1.bf16.msra.mxu0 %v2878_v57  ;;  %v441_v57 = vld [vmem:[%s3178_s4 + $0x10] sm:$0xff]  ;;  %v442_v61 = vld [vmem:[%s3178_s4 + $0x18] sm:$0xff] }
  0xae   : > { %1943 = vmatpush1.bf16.msra.mxu1 %v2881_v0  ;;  %1831 = vmatprep.subr.bf16.mxu0 %v2886_v1  ;;  %v2929_v0 = vld [vmem:[%s3176_s3 + $0x390] ss:$8 sps:$4 sm:$0xff]   ;;  %v2934_v1 = vld [vmem:[%s3176_s3 + $0x284] ss:$8 sps:$4 sm:$0xff]  }
  0xaf   : > { %1944 = vmatprep.subr.bf16.mxu1 %v2889_v2  ;;  %1663 = vmatprep.mubr.bf16.mxu0 %v2507_v3  ;;  %v2937_v2 = vld [vmem:[%s3176_s3 + $0x384] ss:$8 sps:$4 sm:$0xff]   ;;  %v2479_v3 = vcombine.high %v441_v57, %v445_v60 }
  0xb0   : > { %1776 = vmatprep.mubr.bf16.mxu1 %v2509_v4  ;;  %v2481_v4 = vcombine.high %v442_v61, %v446_v62 }
  0xb1   : > { %1832 = vmatpush1.bf16.msra.mxu0 %v2884_v5  ;;  %v2932_v5 = vld [vmem:[%s3176_s3 + $0x280] ss:$8 sps:$4 sm:$0xff]  }
  0xb2   : > { %1945 = vmatpush1.bf16.msra.mxu1 %v2887_v6  ;;  %1833 = vmatprep.subr.bf16.mxu0 %v2892_v7  ;;  %v2935_v6 = vld [vmem:[%s3176_s3 + $0x380] ss:$8 sps:$4 sm:$0xff]   ;;  %v449_v7 = vld [vmem:[%s3178_s4 + $0x50] sm:$0xff] }
  0xb3   : > { %1946 = vmatprep.subr.bf16.mxu1 %v2895_v8  ;;  %v453_v8 = vld [vmem:[%s3178_s4 + $0x70] sm:$0xff] }
  0xb4   : > { %1664 = vmatmul.mubr.bf16.gmra.mxu0 %v2506_v11  ;;  %v2478_v11 = vcombine.low %v441_v57, %v445_v60  ;;  %v2487_v13 = vcombine.high %v449_v7, %v453_v8  ;;  %v498_v57 = vld [vmem:[%s3178_s4 + $0x1d8] sm:$0xff] }
  0xb5   : > { %1777 = vmatmul.mubr.bf16.gmra.mxu1 %v2508_v12  ;;  %1834 = vmatpush2.bf16.msra.mxu0 %v2890_v15  ;;  %v2480_v12 = vcombine.low %v442_v61, %v446_v62  ;;  %v457_v15 = vld [vmem:[%s3178_s4 + $0x90] sm:$0xff] }
  0xb6   : > { %1947 = vmatpush2.bf16.msra.mxu1 %v2893_v16  ;;  %1835 = vmatprep.subr.bf16.mxu0 %v2898_v17  ;;  %v461_v16 = vld [vmem:[%s3178_s4 + $0xb0] sm:$0xff]  ;;  %v458_v17 = vld [vmem:[%s3178_s4 + $0x98] sm:$0xff] }
  0xb7   : > { %1948 = vmatprep.subr.bf16.mxu1 %v2901_v18  ;;  %1673 = vmatprep.mubr.bf16.mxu0 %v2515_v19  ;;  %v462_v18 = vld [vmem:[%s3178_s4 + $0xb8] sm:$0xff]  ;;  %v2486_v19 = vcombine.low %v449_v7, %v453_v8 }
  0xb8   : > { %1786 = vmatprep.mubr.bf16.mxu1 %v2517_v20  ;;  %v2488_v20 = vcombine.low %v450_v9, %v454_v10  ;;  %v2496_v28 = vcombine.low %v458_v17, %v462_v18 }
  0xb9   : > { %1836 = vmatpush2.bf16.msra.mxu0 %v2896_v21  ;;  %v2495_v21 = vcombine.high %v457_v15, %v461_v16 }
  0xba   : > { %1949 = vmatpush2.bf16.msra.mxu1 %v2899_v22  ;;  %1837 = vmatprep.subr.bf16.mxu0 %v2904_v23  ;;  %v2497_v22 = vcombine.high %v458_v17, %v462_v18  ;;  %v465_v23 = vld [vmem:[%s3178_s4 + $0xd0] sm:$0xff] }
  0xbb   : > { %1950 = vmatprep.subr.bf16.mxu1 %v2907_v24  ;;  %v469_v24 = vld [vmem:[%s3178_s4 + $0xf0] sm:$0xff] }
  0xbc   : > { %1674 = vmatmul.mubr.bf16.gmra.mxu0 %v2514_v26  ;;  %v470_v26 = vld [vmem:[%s3178_s4 + $0xf8] sm:$0xff]  ;;  %v2503_v29 = vcombine.high %v465_v23, %v469_v24 }
  0xbd   : > { %1787 = vmatmul.mubr.bf16.gmra.mxu1 %v2516_v27  ;;  %1838 = vmatpush2.bf16.msra.mxu0 %v2902_v31  ;;  %v2494_v27 = vcombine.low %v457_v15, %v461_v16  ;;  %v2505_v30 = vcombine.high %v466_v25, %v470_v26  ;;  %v473_v31 = vld [vmem:[%s3178_s4 + $0x110] sm:$0xff] }
  0xbe   : > { %1951 = vmatpush2.bf16.msra.mxu1 %v2905_v32  ;;  %1839 = vmatprep.subr.bf16.mxu0 %v2910_v33  ;;  %v477_v32 = vld [vmem:[%s3178_s4 + $0x130] sm:$0xff]  ;;  %v474_v33 = vld [vmem:[%s3178_s4 + $0x118] sm:$0xff] }
  0xbf   : > { %1952 = vmatprep.subr.bf16.mxu1 %v2913_v34  ;;  %1683 = vmatprep.mubr.bf16.mxu0 %v2523_v35  ;;  %v478_v34 = vld [vmem:[%s3178_s4 + $0x138] sm:$0xff]  ;;  %v2502_v35 = vcombine.low %v465_v23, %v469_v24 }
  0xc0   : > { %1796 = vmatprep.mubr.bf16.mxu1 %v2525_v36  ;;  %v2504_v36 = vcombine.low %v466_v25, %v470_v26  ;;  %v2512_v44 = vcombine.low %v474_v33, %v478_v34 }
  0xc1   : > { %1840 = vmatpush2.bf16.msra.mxu0 %v2908_v37  ;;  %v2511_v37 = vcombine.high %v473_v31, %v477_v32 }
  0xc2   : > { %1953 = vmatpush2.bf16.msra.mxu1 %v2911_v38  ;;  %1841 = vmatprep.subr.bf16.mxu0 %v2916_v39  ;;  %v2513_v38 = vcombine.high %v474_v33, %v478_v34  ;;  %v481_v39 = vld [vmem:[%s3178_s4 + $0x150] sm:$0xff] }
  0xc3   : > { %1954 = vmatprep.subr.bf16.mxu1 %v2919_v40  ;;  %v485_v40 = vld [vmem:[%s3178_s4 + $0x170] sm:$0xff] }
  0xc4   : > { %1684 = vmatmul.mubr.bf16.gmra.mxu0 %v2522_v42  ;;  %v486_v42 = vld [vmem:[%s3178_s4 + $0x178] sm:$0xff]  ;;  %v2519_v45 = vcombine.high %v481_v39, %v485_v40 }
  0xc5   : > { %1797 = vmatmul.mubr.bf16.gmra.mxu1 %v2524_v43  ;;  %1842 = vmatpush2.bf16.msra.mxu0 %v2914_v47  ;;  %v2510_v43 = vcombine.low %v473_v31, %v477_v32  ;;  %v2521_v46 = vcombine.high %v482_v41, %v486_v42  ;;  %v489_v47 = vld [vmem:[%s3178_s4 + $0x190] sm:$0xff] }
  0xc6   : > { %1955 = vmatpush2.bf16.msra.mxu1 %v2917_v48  ;;  %1843 = vmatprep.subr.bf16.mxu0 %v2922_v49  ;;  %v493_v48 = vld [vmem:[%s3178_s4 + $0x1b0] sm:$0xff]  ;;  %v490_v49 = vld [vmem:[%s3178_s4 + $0x198] sm:$0xff] }
  0xc7   : > { %1956 = vmatprep.subr.bf16.mxu1 %v2925_v50  ;;  %1693 = vmatprep.mubr.bf16.mxu0 %v2531_v51  ;;  %v494_v50 = vld [vmem:[%s3178_s4 + $0x1b8] sm:$0xff]  ;;  %v2518_v51 = vcombine.low %v481_v39, %v485_v40 }
  0xc8   : > { %1806 = vmatprep.mubr.bf16.mxu1 %v2533_v52  ;;  %v2520_v52 = vcombine.low %v482_v41, %v486_v42  ;;  %v2528_v60 = vcombine.low %v490_v49, %v494_v50 }
  0xc9   : > { %1844 = vmatpush2.bf16.msra.mxu0 %v2920_v53  ;;  %v2527_v53 = vcombine.high %v489_v47, %v493_v48 }
  0xca   : > { %1957 = vmatpush2.bf16.msra.mxu1 %v2923_v54  ;;  %1845 = vmatprep.subr.bf16.mxu0 %v2928_v55  ;;  %v2529_v54 = vcombine.high %v490_v49, %v494_v50  ;;  %v497_v55 = vld [vmem:[%s3178_s4 + $0x1d0] sm:$0xff] }
  0xcb   : > { %1958 = vmatprep.subr.bf16.mxu1 %v2931_v56  ;;  %v501_v56 = vld [vmem:[%s3178_s4 + $0x1f0] sm:$0xff] }
  0xcc   : > { %1694 = vmatmul.mubr.bf16.gmra.mxu0 %v2530_v58  ;;  %v502_v58 = vld [vmem:[%s3178_s4 + $0x1f8] sm:$0xff]  ;;  %v2535_v61 = vcombine.high %v497_v55, %v501_v56 }
  0xcd   : > { %1807 = vmatmul.mubr.bf16.gmra.mxu1 %v2532_v59  ;;  %1846 = vmatpush2.bf16.msra.mxu0 %v2926_v63  ;;  %v2526_v59 = vcombine.low %v489_v47, %v493_v48  ;;  %v2537_v62 = vcombine.high %v498_v57, %v502_v58  ;;  %v2534_v63 = vcombine.low %v497_v55, %v501_v56 }
  0xce   : > { %1959 = vmatpush2.bf16.msra.mxu1 %v2929_v0  ;;  %1847 = vmatprep.subr.bf16.mxu0 %v2934_v1  ;;  %v2536_v0 = vcombine.low %v498_v57, %v502_v58 }
  0xcf   : > { %1960 = vmatprep.subr.bf16.mxu1 %v2937_v2  ;;  %1849 = vmatprep.mubr.bf16.mxu0 %v2479_v3 }
  0xd0   : > { %1962 = vmatprep.mubr.bf16.mxu1 %v2481_v4 }
  0xd1   : > { %1848 = vmatpush2.bf16.msra.mxu0 %v2932_v5 }
  0xd2   : > { %1961 = vmatpush2.bf16.msra.mxu1 %v2935_v6 }
  0xd4   : > { %1850 = vmatmul.mubr.bf16.vlgmr.msra.gmra.mxu0 %v2478_v11 }
  0xd5   : > { %1963 = vmatmul.mubr.bf16.vlgmr.msra.gmra.mxu1 %v2480_v12  ;;  %1859 = vmatprep.mubr.bf16.mxu0 %v2487_v13 }
  0xd6   : > { %1972 = vmatprep.mubr.bf16.mxu1 %v2489_v14 }
  0xdc   : > { %1860 = vmatmul.mubr.bf16.gmra.mxu0 %v2486_v19 }
  0xdd   : > { %1973 = vmatmul.mubr.bf16.gmra.mxu1 %v2488_v20  ;;  %1869 = vmatprep.mubr.bf16.mxu0 %v2495_v21 }
  0xde   : > { %1982 = vmatprep.mubr.bf16.mxu1 %v2497_v22 }
  0xe4   : > { %1870 = vmatmul.mubr.bf16.gmra.mxu0 %v2494_v27 }
  0xe5   : > { %1983 = vmatmul.mubr.bf16.gmra.mxu1 %v2496_v28  ;;  %1879 = vmatprep.mubr.bf16.mxu0 %v2503_v29 }
  0xe6   : > { %1992 = vmatprep.mubr.bf16.mxu1 %v2505_v30 }
  0xec   : > { %1880 = vmatmul.mubr.bf16.gmra.mxu0 %v2502_v35 }
  0xed   : > { %1993 = vmatmul.mubr.bf16.gmra.mxu1 %v2504_v36  ;;  %1889 = vmatprep.mubr.bf16.mxu0 %v2511_v37 }
  0xee   : > { %2002 = vmatprep.mubr.bf16.mxu1 %v2513_v38 }
  0xf4   : > { %1890 = vmatmul.mubr.bf16.gmra.mxu0 %v2510_v43 }
  0xf5   : > { %2003 = vmatmul.mubr.bf16.gmra.mxu1 %v2512_v44  ;;  %1899 = vmatprep.mubr.bf16.mxu0 %v2519_v45 }
  0xf6   : > { %2012 = vmatprep.mubr.bf16.mxu1 %v2521_v46 }
  0xfc   : > { %1900 = vmatmul.mubr.bf16.gmra.mxu0 %v2518_v51 }
  0xfd   : > { %2013 = vmatmul.mubr.bf16.gmra.mxu1 %v2520_v52  ;;  %1909 = vmatprep.mubr.bf16.mxu0 %v2527_v53 }
  0xfe   : > { %2022 = vmatprep.mubr.bf16.mxu1 %v2529_v54 }
 0x104   : > { %1910 = vmatmul.mubr.bf16.gmra.mxu0 %v2526_v59 }
 0x105   : > { %2023 = vmatmul.mubr.bf16.gmra.mxu1 %v2528_v60  ;;  %1919 = vmatprep.mubr.bf16.mxu0 %v2535_v61 }
 0x106   : > { %2032 = vmatprep.mubr.bf16.mxu1 %v2537_v62 }
 0x10c   : > { %1920 = vmatmul.mubr.bf16.gmra.mxu0 %v2534_v63 }
 0x10d   : > { %2033 = vmatmul.mubr.bf16.gmra.mxu1 %v2536_v0 }
 0x154   : > { %v3373_v1 = vpop.f32.mrf.mxu0 }
 0x155   : > { %v3375_v2 = vpop.f32.mrf.mxu1 }
 0x156   : > { %v3377_v3 = vpop.f32.mrf.mxu0 }
 0x157   : > { %v3379_v4 = vpop.f32.mrf.mxu1 }
 0x158   : > { %v3381_v5 = vpop.f32.mrf.mxu0 }
 0x159   : > { %v3383_v6 = vpop.f32.mrf.mxu1 }
 0x15a   : > { %v3385_v7 = vpop.f32.mrf.mxu0 }
 0x15b   : > { %v3387_v8 = vpop.f32.mrf.mxu1 }
 0x15c   : > { %v3389_v9 = vpop.f32.mrf.mxu0 }
 0x15d   : > { %v3391_v10 = vpop.f32.mrf.mxu1 }
 0x15e   : > { %v3393_v11 = vpop.f32.mrf.mxu0 }
 0x15f   : > { %v3395_v12 = vpop.f32.mrf.mxu1 }
 0x160   : > { %v3397_v13 = vpop.f32.mrf.mxu0 }
 0x161   : > { %v3399_v14 = vpop.f32.mrf.mxu1 }
 0x162   : > { %v3401_v15 = vpop.f32.mrf.mxu0 }
 0x163   : > { %v3403_v16 = vpop.f32.mrf.mxu1 }
 0x164   : > { %v3405_v17 = vpop.f32.mrf.mxu0 }
 0x165   : > { %v3407_v18 = vpop.f32.mrf.mxu1 }
 0x166   : > { %v3409_v19 = vpop.f32.mrf.mxu0 }
 0x167   : > { %v3411_v20 = vpop.f32.mrf.mxu1 }
 0x168   : > { %v3413_v21 = vpop.f32.mrf.mxu0 }
 0x169   : > { %v3415_v22 = vpop.f32.mrf.mxu1 }
 0x16a   : > { %v3417_v23 = vpop.f32.mrf.mxu0 }
 0x16b   : > { %v3419_v24 = vpop.f32.mrf.mxu1 }
 0x16c   : > { %v3421_v25 = vpop.f32.mrf.mxu0 }
 0x16d   : > { %v3423_v26 = vpop.f32.mrf.mxu1 }
 0x16e   : > { %v3425_v27 = vpop.f32.mrf.mxu0 }
 0x16f   : > { %v3427_v28 = vpop.f32.mrf.mxu1 }
 0x170   : > { %v3429_v29 = vpop.f32.mrf.mxu0 }
 0x171   : > { %v3431_v30 = vpop.f32.mrf.mxu1 }
 0x172   : > { %v3433_v31 = vpop.f32.mrf.mxu0 }
 0x173   : > { %v3435_v32 = vpop.f32.mrf.mxu1 }
 0x174   : > { %v3437_v33 = vpop.f32.mrf.mxu0 }
 0x175   : > { %v3439_v34 = vpop.f32.mrf.mxu1 }
 0x176   : > { %v3441_v35 = vpop.f32.mrf.mxu0 }
 0x177   : > { %v3443_v36 = vpop.f32.mrf.mxu1 }
 0x178   : > { %v3445_v37 = vpop.f32.mrf.mxu0 }
 0x179   : > { %v3447_v38 = vpop.f32.mrf.mxu1 }
 0x17a   : > { %v3449_v39 = vpop.f32.mrf.mxu0 }
 0x17b   : > { %v3451_v40 = vpop.f32.mrf.mxu1 }
 0x17c   : > { %v3453_v41 = vpop.f32.mrf.mxu0 }
 0x17d   : > { %v3455_v42 = vpop.f32.mrf.mxu1 }
 0x17e   : > { %v3457_v43 = vpop.f32.mrf.mxu0 }
 0x17f   : > { %v3459_v44 = vpop.f32.mrf.mxu1 }
 0x180   : > { %v3461_v45 = vpop.f32.mrf.mxu0 }
 0x181   : > { %v3463_v46 = vpop.f32.mrf.mxu1 }
 0x182   : > { %v3465_v47 = vpop.f32.mrf.mxu0 }
 0x183   : > { %v3467_v48 = vpop.f32.mrf.mxu1 }
 0x184   : > { %3640 = vst [vmem:[#allocation4_spill] sm:$0xff] %v3467_v48  ;;  %v3469_v49 = vpop.f32.mrf.mxu0  ;;  %v409_v48 = vld [vmem:[#allocation2 + $0xd8] sm:$0xff] }
 0x185   : > { %3641 = vst [vmem:[#allocation5_spill] sm:$0xff] %v3469_v49  ;;  %v3471_v50 = vpop.f32.mrf.mxu1 }
 0x186   : > { %3642 = vst [vmem:[#allocation6_spill] sm:$0xff] %v3471_v50  ;;  %v3473_v51 = vpop.f32.mrf.mxu0 }
 0x187   : > { %3643 = vst [vmem:[#allocation7_spill] sm:$0xff] %v3473_v51  ;;  %v3475_v52 = vpop.f32.mrf.mxu1 }
 0x188   : > { %3644 = vst [vmem:[#allocation8_spill] sm:$0xff] %v3475_v52  ;;  %v3477_v53 = vpop.f32.mrf.mxu0 }
 0x189   : > { %3645 = vst [vmem:[#allocation9_spill] sm:$0xff] %v3477_v53  ;;  %v3479_v54 = vpop.f32.mrf.mxu1 }
 0x18a   : > { %3646 = vst [vmem:[#allocation10_spill] sm:$0xff] %v3479_v54  ;;  %v3481_v55 = vpop.f32.mrf.mxu0 }
 0x18b   : > { %3647 = vst [vmem:[#allocation11_spill] sm:$0xff] %v3481_v55  ;;  %v3483_v56 = vpop.f32.mrf.mxu1  ;;  %v1739_v55 = vadd.f32 %v3375_v2, %v3373_v1  ;;  %v1745_v1 = vadd.f32 %v3387_v8, %v3385_v7 }
 0x18c   : > { %3648 = vst [vmem:[#allocation12_spill] sm:$0xff] %v3483_v56  ;;  %v3485_v57 = vpop.f32.mrf.mxu0 }
 0x18d   : > { %3649 = vst [vmem:[#allocation13_spill] sm:$0xff] %v3485_v57  ;;  %v3487_v58 = vpop.f32.mrf.mxu1 }
 0x18e   : > { %3650 = vst [vmem:[#allocation14_spill] sm:$0xff] %v3487_v58  ;;  %v3489_v59 = vpop.f32.mrf.mxu0  ;;  %v1741_v58 = vadd.f32 %v3379_v4, %v3377_v3 }
 0x18f   : > { %3651 = vst [vmem:[#allocation15_spill] sm:$0xff] %v3489_v59  ;;  %v3491_v60 = vpop.f32.mrf.mxu1  ;;  %v407_v59 = vld [vmem:[#allocation2 + $0xb0] sm:$0xff] }
 0x190   : > { %3652 = vst [vmem:[#allocation16_spill] sm:$0xff] %v3491_v60  ;;  %v3493_v61 = vpop.f32.mrf.mxu0 }
 0x191   : > { %3653 = vst [vmem:[#allocation17_spill] sm:$0xff] %v3493_v61  ;;  %v3495_v62 = vpop.f32.mrf.mxu1  ;;  %v1743_v61 = vadd.f32 %v3383_v6, %v3381_v5 }
 0x192   : > { %3654 = vst [vmem:[#allocation18_spill] sm:$0xff] %v3495_v62  ;;  %v3497_v63 = vpop.f32.mrf.mxu0 }
 0x193   : > { %3655 = vst [vmem:[#allocation19_spill] sm:$0xff] %v3497_v63  ;;  %v3499_v0 = vpop.f32.mrf.mxu1  ;;  %v408_v63 = vld [vmem:[#allocation2] sm:$0xff] }
 0x194   : > { %3656 = vst [vmem:[#allocation20_spill] sm:$0xff] %v3499_v0  ;;  %v1851_v56 = vpop.f32.mrf.mxu0 }
 0x195   : > { %v1964_v54 = vpop.f32.mrf.mxu1  ;;  %v1852_v57 = vadd.f32 %v1851_v56, %v1739_v55  ;;  %v1749_v55 = vadd.f32 %v3391_v10, %v3389_v9  ;;  %v1753_v9 = vadd.f32 %v3399_v14, %v3397_v13  ;;  %v1759_v13 = vadd.f32 %v3407_v18, %v3405_v17 }
 0x196   : > { %v1853_v53 = vpop.f32.mrf.mxu0  ;;  %v1763_v17 = vadd.f32 %v3415_v22, %v3413_v21  ;;  %v1769_v21 = vadd.f32 %v3423_v26, %v3421_v25  ;;  %v1773_v25 = vadd.f32 %v3431_v30, %v3429_v29  ;;  %v1779_v29 = vadd.f32 %v3439_v34, %v3437_v33 }
 0x197   : > { %v1966_v60 = vpop.f32.mrf.mxu1  ;;  %v1965_v62 = vadd.f32 %v1964_v54, %v1852_v57  ;;  %v1854_v52 = vadd.f32 %v1853_v53, %v1741_v58  ;;  %v410_v53 = vld [vmem:[#allocation2 + $0x18] sm:$0xff]  ;;  %v1751_v58 = vadd.f32 %v3395_v12, %v3393_v11  ;;  %v1755_v11 = vadd.f32 %v3403_v16, %v3401_v15 }
 0x198   : > { %v1855_v51 = vpop.f32.mrf.mxu0  ;;  %v1761_v15 = vadd.f32 %v3411_v20, %v3409_v19  ;;  %v1765_v19 = vadd.f32 %v3419_v24, %v3417_v23  ;;  %v1771_v23 = vadd.f32 %v3427_v28, %v3425_v27  ;;  %v1775_v27 = vadd.f32 %v3435_v32, %v3433_v31 }
 0x199   : > { %v1968_v0 = vpop.f32.mrf.mxu1  ;;  %v2043_v2 = vadd.f32 %v1965_v62, %v407_v59  ;;  %v1967_v50 = vadd.f32 %v1966_v60, %v1854_v52  ;;  %v1856_v49 = vadd.f32 %v1855_v51, %v1743_v61  ;;  %v411_v52 = vld [vmem:[#allocation2 + $0x50] sm:$0xff]  ;;  %v412_v61 = vld [vmem:[#allocation2 + $0x68] sm:$0xff]  ;;  %v1781_v31 = vadd.f32 %v3443_v36, %v3441_v35 }
 0x19a   : > { %v1857_v3 = vpop.f32.mrf.mxu0  ;;  %v1783_v33 = vadd.f32 %v3447_v38, %v3445_v37  ;;  %v1785_v35 = vadd.f32 %v3451_v40, %v3449_v39  ;;  %v1789_v37 = vadd.f32 %v3455_v42, %v3453_v41  ;;  %v1791_v39 = vadd.f32 %v3459_v44, %v3457_v43 }
 0x19b   : > { %v1970_v4 = vpop.f32.mrf.mxu1  ;;  %2075 = vst [vmem:[#allocation2 + $0xb0] sm:$0xff] %v2043_v2  ;;  %v2044_v56 = vadd.f32 %v1967_v50, %v408_v63  ;;  %v1969_v5 = vadd.f32 %v1968_v0, %v1856_v49  ;;  %v1858_v6 = vadd.f32 %v1857_v3, %v1745_v1  ;;  %v413_v1 = vld [vmem:[#allocation2 + $0x30] sm:$0xff]  ;;  %v1793_v41 = vadd.f32 %v3463_v46, %v3461_v45 }
 0x19c   : > { %v1861_v54 = vpop.f32.mrf.mxu0 }
 0x19d   : > { %v1974_v57 = vpop.f32.mrf.mxu1  ;;  %2076 = vst [vmem:[#allocation2] sm:$0xff] %v2044_v56  ;;  %v2045_v7 = vadd.f32 %v1969_v5, %v409_v48  ;;  %v1971_v8 = vadd.f32 %v1970_v4, %v1858_v6  ;;  %v1862_v51 = vadd.f32 %v1861_v54, %v1749_v55  ;;  %v414_v56 = vld [vmem:[#allocation2 + $0x48] sm:$0xff] }
 0x19e   : > { %v1863_v59 = vpop.f32.mrf.mxu0 }
 0x19f   : > { %v1976_v60 = vpop.f32.mrf.mxu1  ;;  %2077 = vst [vmem:[#allocation2 + $0xd8] sm:$0xff] %v2045_v7  ;;  %v2046_v10 = vadd.f32 %v1971_v8, %v410_v53  ;;  %v1975_v49 = vadd.f32 %v1974_v57, %v1862_v51  ;;  %v1864_v50 = vadd.f32 %v1863_v59, %v1751_v58  ;;  %v415_v57 = vld [vmem:[#allocation2 + $0x80] sm:$0xff] }
 0x1a0   : > { %v1865_v62 = vpop.f32.mrf.mxu0 }
 0x1a1   : > { %v1978_v63 = vpop.f32.mrf.mxu1  ;;  %2078 = vst [vmem:[#allocation2 + $0x18] sm:$0xff] %v2046_v10  ;;  %v2047_v12 = vadd.f32 %v1975_v49, %v411_v52  ;;  %v1977_v48 = vadd.f32 %v1976_v60, %v1864_v50  ;;  %v1866_v0 = vadd.f32 %v1865_v62, %v1753_v9  ;;  %v416_v52 = vld [vmem:[#allocation2 + $0x88] sm:$0xff] }
 0x1a2   : > { %v1867_v2 = vpop.f32.mrf.mxu0  ;;  %v417_v49 = vld [vmem:[#allocation2 + $0xe8] sm:$0xff] }
 0x1a3   : > { %v1980_v3 = vpop.f32.mrf.mxu1  ;;  %2079 = vst [vmem:[#allocation2 + $0x50] sm:$0xff] %v2047_v12  ;;  %v2048_v14 = vadd.f32 %v1977_v48, %v412_v61  ;;  %v1979_v4 = vadd.f32 %v1978_v63, %v1866_v0  ;;  %v1868_v55 = vadd.f32 %v1867_v2, %v1755_v11  ;;  %v418_v11 = vld [vmem:[#allocation2 + $0xb8] sm:$0xff]  ;;  %v419_v2 = vld [vmem:[#allocation2 + $0x60] sm:$0xff] }
 0x1a4   : > { %v1871_v5 = vpop.f32.mrf.mxu0 }
 0x1a5   : > { %v1984_v6 = vpop.f32.mrf.mxu1  ;;  %2080 = vst [vmem:[#allocation2 + $0x68] sm:$0xff] %v2048_v14  ;;  %v2049_v16 = vadd.f32 %v1979_v4, %v413_v1  ;;  %v1981_v53 = vadd.f32 %v1980_v3, %v1868_v55  ;;  %v1872_v54 = vadd.f32 %v1871_v5, %v1759_v13  ;;  %v420_v55 = vld [vmem:[#allocation2 + $0xf0] sm:$0xff] }
 0x1a6   : > { %v1873_v58 = vpop.f32.mrf.mxu0 }
 0x1a7   : > { %v1986_v7 = vpop.f32.mrf.mxu1  ;;  %2081 = vst [vmem:[#allocation2 + $0x30] sm:$0xff] %v2049_v16  ;;  %v2050_v18 = vadd.f32 %v1981_v53, %v414_v56  ;;  %v1985_v8 = vadd.f32 %v1984_v6, %v1872_v54  ;;  %v1874_v51 = vadd.f32 %v1873_v58, %v1761_v15  ;;  %v421_v16 = vld [vmem:[#allocation2 + $0x8] sm:$0xff] }
 0x1a8   : > { %v1875_v59 = vpop.f32.mrf.mxu0 }
 0x1a9   : > { %v1988_v60 = vpop.f32.mrf.mxu1  ;;  %2082 = vst [vmem:[#allocation2 + $0x48] sm:$0xff] %v2050_v18  ;;  %v2051_v20 = vadd.f32 %v1985_v8, %v415_v57  ;;  %v1987_v9 = vadd.f32 %v1986_v7, %v1874_v51  ;;  %v1876_v10 = vadd.f32 %v1875_v59, %v1763_v17  ;;  %v422_v7 = vld [vmem:[#allocation2 + $0x78] sm:$0xff] }
 0x1aa   : > { %v1877_v50 = vpop.f32.mrf.mxu0 }
 0x1ab   : > { %v1990_v61 = vpop.f32.mrf.mxu1  ;;  %2083 = vst [vmem:[#allocation2 + $0x80] sm:$0xff] %v2051_v20  ;;  %v2052_v22 = vadd.f32 %v1987_v9, %v416_v52  ;;  %v1989_v62 = vadd.f32 %v1988_v60, %v1876_v10  ;;  %v1878_v63 = vadd.f32 %v1877_v50, %v1765_v19  ;;  %v423_v52 = vld [vmem:[#allocation2 + $0x38] sm:$0xff] }
 0x1ac   : > { %v1881_v12 = vpop.f32.mrf.mxu0  ;;  %v424_v9 = vld [vmem:[#allocation2 + $0x58] sm:$0xff] }
 0x1ad   : > { %v1994_v48 = vpop.f32.mrf.mxu1  ;;  %2084 = vst [vmem:[#allocation2 + $0x88] sm:$0xff] %v2052_v22  ;;  %v2053_v24 = vadd.f32 %v1989_v62, %v417_v49  ;;  %v1991_v0 = vadd.f32 %v1990_v61, %v1878_v63  ;;  %v1882_v1 = vadd.f32 %v1881_v12, %v1769_v21  ;;  %v425_v21 = vld [vmem:[#allocation2 + $0x40] sm:$0xff]  ;;  %v426_v12 = vld [vmem:[#allocation2 + $0xc8] sm:$0xff] }
 0x1ae   : > { %v1883_v3 = vpop.f32.mrf.mxu0 }
 0x1af   : > { %v1996_v13 = vpop.f32.mrf.mxu1  ;;  %2085 = vst [vmem:[#allocation2 + $0xe8] sm:$0xff] %v2053_v24  ;;  %v2054_v26 = vadd.f32 %v1991_v0, %v418_v11  ;;  %v1995_v14 = vadd.f32 %v1994_v48, %v1882_v1  ;;  %v1884_v4 = vadd.f32 %v1883_v3, %v1771_v23  ;;  %v427_v1 = vld [vmem:[#allocation2 + $0xe0] sm:$0xff] }
 0x1b0   : > { %v1885_v56 = vpop.f32.mrf.mxu0 }
 0x1b1   : > { %v1998_v5 = vpop.f32.mrf.mxu1  ;;  %2086 = vst [vmem:[#allocation2 + $0xb8] sm:$0xff] %v2054_v26  ;;  %v2055_v28 = vadd.f32 %v1995_v14, %v419_v2  ;;  %v1997_v6 = vadd.f32 %v1996_v13, %v1884_v4  ;;  %v1886_v15 = vadd.f32 %v1885_v56, %v1773_v25  ;;  %v428_v26 = vld [vmem:[#allocation2 + $0x90] sm:$0xff] }
 0x1b2   : > { %v1887_v53 = vpop.f32.mrf.mxu0 }
 0x1b3   : > { %v2000_v54 = vpop.f32.mrf.mxu1  ;;  %2087 = vst [vmem:[#allocation2 + $0x60] sm:$0xff] %v2055_v28  ;;  %v2056_v30 = vadd.f32 %v1997_v6, %v420_v55  ;;  %v1999_v57 = vadd.f32 %v1998_v5, %v1886_v15  ;;  %v1888_v58 = vadd.f32 %v1887_v53, %v1775_v27  ;;  %v3657_v55 = vld [vmem:[#allocation4_spill] sm:$0xff]  ;;  %v429_v27 = vld [vmem:[#allocation2 + $0x70] sm:$0xff]  ;;  %v3658_v15 = vld [vmem:[#allocation5_spill] sm:$0xff] }
 0x1b4   : > { %v1891_v17 = vpop.f32.mrf.mxu0  ;;  %v1795_v43 = vadd.f32 %v3657_v55, %v3465_v47 }
 0x1b5   : > { %v2004_v18 = vpop.f32.mrf.mxu1  ;;  %2088 = vst [vmem:[#allocation2 + $0xf0] sm:$0xff] %v2056_v30  ;;  %v2057_v32 = vadd.f32 %v1999_v57, %v421_v16  ;;  %v2001_v8 = vadd.f32 %v2000_v54, %v1888_v58  ;;  %v1892_v51 = vadd.f32 %v1891_v17, %v1779_v29  ;;  %v3659_v16 = vld [vmem:[#allocation6_spill] sm:$0xff]  ;;  %v430_v29 = vld [vmem:[#allocation2 + $0xc0] sm:$0xff]  ;;  %v3660_v58 = vld [vmem:[#allocation7_spill] sm:$0xff] }
 0x1b6   : > { %v1893_v59 = vpop.f32.mrf.mxu0  ;;  %v1799_v45 = vadd.f32 %v3659_v16, %v3658_v15  ;;  %v3673_v15 = vld [vmem:[#allocation20_spill] sm:$0xff] }
 0x1b7   : > { %v2006_v60 = vpop.f32.mrf.mxu1  ;;  %2089 = vst [vmem:[#allocation2 + $0x8] sm:$0xff] %v2057_v32  ;;  %v2058_v34 = vadd.f32 %v2001_v8, %v422_v7  ;;  %v2005_v19 = vadd.f32 %v2004_v18, %v1892_v51  ;;  %v1894_v20 = vadd.f32 %v1893_v59, %v1781_v31  ;;  %v3661_v7 = vld [vmem:[#allocation8_spill] sm:$0xff]  ;;  %v431_v32 = vld [vmem:[#allocation2 + $0xa8] sm:$0xff]  ;;  %v3663_v59 = vld [vmem:[#allocation10_spill] sm:$0xff] }
 0x1b8   : > { %v1895_v10 = vpop.f32.mrf.mxu0  ;;  %v1801_v47 = vadd.f32 %v3661_v7, %v3660_v58  ;;  %v438_v7 = vld [vmem:[#allocation2 + $0x98] sm:$0xff] }
 0x1b9   : > { %v2008_v49 = vpop.f32.mrf.mxu1  ;;  %2090 = vst [vmem:[#allocation2 + $0x78] sm:$0xff] %v2058_v34  ;;  %v2059_v36 = vadd.f32 %v2005_v19, %v423_v52  ;;  %v2007_v50 = vadd.f32 %v2006_v60, %v1894_v20  ;;  %v1896_v61 = vadd.f32 %v1895_v10, %v1783_v33  ;;  %v3662_v52 = vld [vmem:[#allocation9_spill] sm:$0xff]  ;;  %v432_v20 = vld [vmem:[#allocation2 + $0xd0] sm:$0xff] }
 0x1ba   : > { %v1897_v22 = vpop.f32.mrf.mxu0  ;;  %v1803_v60 = vadd.f32 %v3663_v59, %v3662_v52 }
 0x1bb   : > { %v2010_v62 = vpop.f32.mrf.mxu1  ;;  %2091 = vst [vmem:[#allocation2 + $0x38] sm:$0xff] %v2059_v36  ;;  %v2060_v38 = vadd.f32 %v2007_v50, %v424_v9  ;;  %v2009_v63 = vadd.f32 %v2008_v49, %v1896_v61  ;;  %v1898_v11 = vadd.f32 %v1897_v22, %v1785_v35  ;;  %v3664_v49 = vld [vmem:[#allocation11_spill] sm:$0xff]  ;;  %v3665_v35 = vld [vmem:[#allocation12_spill] sm:$0xff]  ;;  %v433_v22 = vld [vmem:[#allocation2 + $0x10] sm:$0xff] }
 0x1bc   : > { %v1901_v48 = vpop.f32.mrf.mxu0  ;;  %v1805_v36 = vadd.f32 %v3665_v35, %v3664_v49 }
 0x1bd   : > { %v2014_v23 = vpop.f32.mrf.mxu1  ;;  %2092 = vst [vmem:[#allocation2 + $0x58] sm:$0xff] %v2060_v38  ;;  %v2061_v40 = vadd.f32 %v2009_v63, %v425_v21  ;;  %v2011_v24 = vadd.f32 %v2010_v62, %v1898_v11  ;;  %v1902_v0 = vadd.f32 %v1901_v48, %v1789_v37  ;;  %v3666_v38 = vld [vmem:[#allocation13_spill] sm:$0xff]  ;;  %v3667_v63 = vld [vmem:[#allocation14_spill] sm:$0xff] }
 0x1be   : > { %v1903_v2 = vpop.f32.mrf.mxu0  ;;  %v1809_v11 = vadd.f32 %v3667_v63, %v3666_v38 }
 0x1bf   : > { %v2016_v3 = vpop.f32.mrf.mxu1  ;;  %2093 = vst [vmem:[#allocation2 + $0x40] sm:$0xff] %v2061_v40  ;;  %v2062_v42 = vadd.f32 %v2011_v24, %v426_v12  ;;  %v2015_v13 = vadd.f32 %v2014_v23, %v1902_v0  ;;  %v1904_v25 = vadd.f32 %v1903_v2, %v1791_v39  ;;  %v434_v39 = vld [vmem:[#allocation2 + $0x28] sm:$0xff]  ;;  %v3668_v0 = vld [vmem:[#allocation15_spill] sm:$0xff] }
 0x1c0   : > { %v1905_v14 = vpop.f32.mrf.mxu0 }
 0x1c1   : > { %v2018_v4 = vpop.f32.mrf.mxu1  ;;  %2094 = vst [vmem:[#allocation2 + $0xc8] sm:$0xff] %v2062_v42  ;;  %v2063_v44 = vadd.f32 %v2015_v13, %v427_v1  ;;  %v2017_v56 = vadd.f32 %v2016_v3, %v1904_v25  ;;  %v1906_v5 = vadd.f32 %v1905_v14, %v1793_v41  ;;  %v3669_v1 = vld [vmem:[#allocation16_spill] sm:$0xff]  ;;  %v3670_v14 = vld [vmem:[#allocation17_spill] sm:$0xff] }
 0x1c2   : > { %v1907_v28 = vpop.f32.mrf.mxu0  ;;  %v1811_v2 = vadd.f32 %v3669_v1, %v3668_v0  ;;  %v435_v13 = vld [vmem:[#allocation2 + $0xa0] sm:$0xff] }
 0x1c3   : > { %v2020_v6 = vpop.f32.mrf.mxu1  ;;  %2095 = vst [vmem:[#allocation2 + $0xe0] sm:$0xff] %v2063_v44  ;;  %v2064_v46 = vadd.f32 %v2017_v56, %v428_v26  ;;  %v2019_v53 = vadd.f32 %v2018_v4, %v1906_v5  ;;  %v1908_v54 = vadd.f32 %v1907_v28, %v1795_v43  ;;  %v3671_v4 = vld [vmem:[#allocation18_spill] sm:$0xff]  ;;  %v436_v5 = vld [vmem:[#allocation2 + $0xf8] sm:$0xff] }
 0x1c4   : > { %v1911_v30 = vpop.f32.mrf.mxu0  ;;  %v1813_v55 = vadd.f32 %v3671_v4, %v3670_v14 }
 0x1c5   : > { %v2024_v57 = vpop.f32.mrf.mxu1  ;;  %2096 = vst [vmem:[#allocation2 + $0x90] sm:$0xff] %v2064_v46  ;;  %v2065_v17 = vadd.f32 %v2019_v53, %v429_v27  ;;  %v2021_v18 = vadd.f32 %v2020_v6, %v1908_v54  ;;  %v1912_v31 = vadd.f32 %v1911_v30, %v1799_v45  ;;  %v3672_v6 = vld [vmem:[#allocation19_spill] sm:$0xff]  ;;  %v437_v54 = vld [vmem:[#allocation2 + $0x20] sm:$0xff] }
 0x1c6   : > { %v1913_v8 = vpop.f32.mrf.mxu0  ;;  %v1815_v16 = vadd.f32 %v3673_v15, %v3672_v6 }
 0x1c7   : > { %v2026_v51 = vpop.f32.mrf.mxu1  ;;  %2097 = vst [vmem:[#allocation2 + $0x70] sm:$0xff] %v2065_v17  ;;  %v2066_v33 = vadd.f32 %v2021_v18, %v430_v29  ;;  %v2025_v34 = vadd.f32 %v2024_v57, %v1912_v31  ;;  %v1914_v19 = vadd.f32 %v1913_v8, %v1801_v47 }
 0x1c8   : > { %v1915_v9 = vpop.f32.mrf.mxu0 }
 0x1c9   : > { %v2028_v10 = vpop.f32.mrf.mxu1  ;;  %2098 = vst [vmem:[#allocation2 + $0xc0] sm:$0xff] %v2066_v33  ;;  %v2067_v50 = vadd.f32 %v2025_v34, %v431_v32  ;;  %v2027_v61 = vadd.f32 %v2026_v51, %v1914_v19  ;;  %v1916_v21 = vadd.f32 %v1915_v9, %v1803_v60 }
 0x1ca   : > { %v1917_v62 = vpop.f32.mrf.mxu0 }
 0x1cb   : > { %v2030_v37 = vpop.f32.mrf.mxu1  ;;  %2099 = vst [vmem:[#allocation2 + $0xa8] sm:$0xff] %v2067_v50  ;;  %v2068_v12 = vadd.f32 %v2027_v61, %v432_v20  ;;  %v2029_v48 = vadd.f32 %v2028_v10, %v1916_v21  ;;  %v1918_v23 = vadd.f32 %v1917_v62, %v1805_v36 }
 0x1cc   : > { %v1921_v40 = vpop.f32.mrf.mxu0 }
 0x1cd   : > { %v2034_v24 = vpop.f32.mrf.mxu1  ;;  %2100 = vst [vmem:[#allocation2 + $0xd0] sm:$0xff] %v2068_v12  ;;  %v2069_v3 = vadd.f32 %v2029_v48, %v433_v22  ;;  %v2031_v41 = vadd.f32 %v2030_v37, %v1918_v23  ;;  %v1922_v42 = vadd.f32 %v1921_v40, %v1809_v11 }
 0x1ce   : > { %v1923_v25 = vpop.f32.mrf.mxu0 }
 0x1cf   : > { %v2036_v26 = vpop.f32.mrf.mxu1  ;;  %2101 = vst [vmem:[#allocation2 + $0x10] sm:$0xff] %v2069_v3  ;;  %v2070_v43 = vadd.f32 %v2031_v41, %v434_v39  ;;  %v2035_v44 = vadd.f32 %v2034_v24, %v1922_v42  ;;  %v1924_v56 = vadd.f32 %v1923_v25, %v1811_v2 }
 0x1d0   : > { %v1925_v27 = vpop.f32.mrf.mxu0 }
 0x1d1   : > { %v2038_v28 = vpop.f32.mrf.mxu1  ;;  %2102 = vst [vmem:[#allocation2 + $0x28] sm:$0xff] %v2070_v43  ;;  %v2071_v45 = vadd.f32 %v2035_v44, %v435_v13  ;;  %v2037_v46 = vadd.f32 %v2036_v26, %v1924_v56  ;;  %v1926_v53 = vadd.f32 %v1925_v27, %v1813_v55 }
 0x1d2   : > { %v1927_v29 = vpop.f32.mrf.mxu0 }
 0x1d3   : > { %2103 = vst [vmem:[#allocation2 + $0xa0] sm:$0xff] %v2071_v45  ;;  %v2072_v30 = vadd.f32 %v2037_v46, %v436_v5  ;;  %v2039_v57 = vadd.f32 %v2038_v28, %v1926_v53  ;;  %v1928_v58 = vadd.f32 %v1927_v29, %v1815_v16  ;;  %v2040_v47 = vpop.f32.mrf.mxu1 }
 0x1d5   : > { %2104 = vst [vmem:[#allocation2 + $0xf8] sm:$0xff] %v2072_v30  ;;  %v2073_v17 = vadd.f32 %v2039_v57, %v437_v54  ;;  %v2041_v18 = vadd.f32 %v2040_v47, %v1928_v58  ;;  %2110 = sbr.rel (%p2666_p11) target bundleno = 508 (0x1fc), region = 59 }
 0x1d7   : > { %2105 = vst [vmem:[#allocation2 + $0x20] sm:$0xff] %v2073_v17  ;;  %v2074_v31 = vadd.f32 %v2041_v18, %v438_v7 }
 0x1d9   : > { %2106 = vst [vmem:[#allocation2 + $0x98] sm:$0xff] %v2074_v31 }
 0x1da   : > { %v2111_v32 = vld [vmem:[#allocation2 + $0xb0] sm:$0xff]  ;;  %v2112_v8 = vld [vmem:[#allocation2] sm:$0xff]  ;;  %v2113_v51 = vld [vmem:[#allocation2 + $0xd8] sm:$0xff] }
 0x1db   : > { %vm2143_vm0 = vcmp.ge.f32.partialorder %v2111_v32, 0.0  ;;  %vm2144_vm1 = vcmp.ge.f32.partialorder %v2112_v8, 0.0  ;;  %v2175_v52 = vmul.f32 0.2, %v2111_v32  ;;  %v2176_v59 = vmul.f32 0.2, %v2112_v8 }
 0x1dc   : > { %v2114_v60 = vld [vmem:[#allocation2 + $0x18] sm:$0xff]  ;;  %vm2145_vm2 = vcmp.ge.f32.partialorder %v2113_v51, 0.0  ;;  %v2177_v33 = vmul.f32 0.2, %v2113_v51  ;;  %v2115_v34 = vld [vmem:[#allocation2 + $0x50] sm:$0xff]  ;;  %v2116_v19 = vld [vmem:[#allocation2 + $0x68] sm:$0xff] }
 0x1dd   : > { %v2207_v20 = vsel %vm2143_vm0, %v2111_v32, %v2175_v52  ;;  %v2208_v9 = vsel %vm2144_vm1, %v2112_v8, %v2176_v59  ;;  %vm2146_vm3 = vcmp.ge.f32.partialorder %v2114_v60, 0.0  ;;  %v2178_v10 = vmul.f32 0.2, %v2114_v60  ;;  %v2117_v49 = vld [vmem:[#allocation2 + $0x30] sm:$0xff]  ;;  %v2118_v35 = vld [vmem:[#allocation2 + $0x48] sm:$0xff]  ;;  %v2119_v61 = vld [vmem:[#allocation2 + $0x80] sm:$0xff] }
 0x1de   : > { %v2689_v36 = vpack.c.bf16 %v2208_v9, %v2207_v20  ;;  %v2209_v50 = vsel %vm2145_vm2, %v2113_v51, %v2177_v33  ;;  %vm2147_vm4 = vcmp.ge.f32.partialorder %v2115_v34, 0.0  ;;  %vm2148_vm5 = vcmp.ge.f32.partialorder %v2116_v19, 0.0  ;;  %v2120_v21 = vld [vmem:[#allocation2 + $0x88] sm:$0xff]  ;;  %v2122_v48 = vld [vmem:[#allocation2 + $0xb8] sm:$0xff]  ;;  %v2123_v40 = vld [vmem:[#allocation2 + $0x60] sm:$0xff] }
 0x1df   : > { %v2210_v22 = vsel %vm2146_vm3, %v2114_v60, %v2178_v10  ;;  %v2179_v62 = vmul.f32 0.2, %v2115_v34  ;;  %v2180_v37 = vmul.f32 0.2, %v2116_v19  ;;  %vm2149_vm6 = vcmp.ge.f32.partialorder %v2117_v49, 0.0  ;;  %v2121_v38 = vld [vmem:[#allocation2 + $0xe8] sm:$0xff] }
 0x1e0   : > { %2335 = vst [vmem:[%s3639_s2] sm:$0xff] %v2689_v36  ;;  %v2690_v63 = vpack.c.bf16 %v2210_v22, %v2209_v50  ;;  %vm2150_vm7 = vcmp.ge.f32.partialorder %v2118_v35, 0.0  ;;  %v2181_v11 = vmul.f32 0.2, %v2117_v49  ;;  %v2182_v12 = vmul.f32 0.2, %v2118_v35  ;;  %v2124_v3 = vld [vmem:[#allocation2 + $0xf0] sm:$0xff] }
 0x1e1   : > { %v2211_v23 = vsel %vm2147_vm4, %v2115_v34, %v2179_v62  ;;  %v2212_v39 = vsel %vm2148_vm5, %v2116_v19, %v2180_v37  ;;  %vm2151_vm8 = vcmp.ge.f32.partialorder %v2119_v61, 0.0  ;;  %vm2152_vm9 = vcmp.ge.f32.partialorder %v2120_v21, 0.0  ;;  %v2125_v13 = vld [vmem:[#allocation2 + $0x8] sm:$0xff]  ;;  %v2126_v4 = vld [vmem:[#allocation2 + $0x78] sm:$0xff]  ;;  %v2129_v15 = vld [vmem:[#allocation2 + $0x40] sm:$0xff] }
 0x1e2   : > { %2336 = vst [vmem:[%s3639_s2 + $0x8] sm:$0xff] %v2690_v63  ;;  %v2691_v24 = vpack.c.bf16 %v2212_v39, %v2211_v23  ;;  %v2213_v0 = vsel %vm2149_vm6, %v2117_v49, %v2181_v11  ;;  %v2214_v1 = vsel %vm2150_vm7, %v2118_v35, %v2182_v12  ;;  %v2183_v2 = vmul.f32 0.2, %v2119_v61  ;;  %v2127_v56 = vld [vmem:[#allocation2 + $0x38] sm:$0xff]  ;;  %v2130_v53 = vld [vmem:[#allocation2 + $0xc8] sm:$0xff]  ;;  %v2131_v54 = vld [vmem:[#allocation2 + $0xe0] sm:$0xff] }
 0x1e3   : > { %v2692_v41 = vpack.c.bf16 %v2214_v1, %v2213_v0  ;;  %v2184_v42 = vmul.f32 0.2, %v2120_v21  ;;  %vm2153_vm10 = vcmp.ge.f32.partialorder %v2121_v38, 0.0  ;;  %vm2154_vm11 = vcmp.ge.f32.partialorder %v2122_v48, 0.0  ;;  %v2128_v6 = vld [vmem:[#allocation2 + $0x58] sm:$0xff]  ;;  %v2132_v58 = vld [vmem:[#allocation2 + $0x90] sm:$0xff] }
 0x1e4   : > { %2337 = vst [vmem:[%s3639_s2 + $0x10] sm:$0xff] %v2691_v24  ;;  %v2215_v25 = vsel %vm2151_vm8, %v2119_v61, %v2183_v2  ;;  %v2185_v26 = vmul.f32 0.2, %v2121_v38  ;;  %v2186_v14 = vmul.f32 0.2, %v2122_v48  ;;  %vm2155_vm12 = vcmp.ge.f32.partialorder %v2123_v40, 0.0 }
 0x1e5   : > { %2338 = vst [vmem:[%s3639_s2 + $0x18] sm:$0xff] %v2692_v41  ;;  %v2216_v55 = vsel %vm2152_vm9, %v2120_v21, %v2184_v42  ;;  %vm2156_vm13 = vcmp.ge.f32.partialorder %v2124_v3, 0.0  ;;  %v2187_v43 = vmul.f32 0.2, %v2123_v40  ;;  %v2188_v44 = vmul.f32 0.2, %v2124_v3 }
 0x1e6   : > { %v2693_v5 = vpack.c.bf16 %v2216_v55, %v2215_v25  ;;  %v2217_v27 = vsel %vm2153_vm10, %v2121_v38, %v2185_v26  ;;  %v2218_v28 = vsel %vm2154_vm11, %v2122_v48, %v2186_v14  ;;  %vm2157_vm14 = vcmp.ge.f32.partialorder %v2125_v13, 0.0  ;;  %v2133_v32 = vld [vmem:[#allocation2 + $0x70] sm:$0xff]  ;;  %v2134_v60 = vld [vmem:[#allocation2 + $0xc0] sm:$0xff]  ;;  %v2135_v19 = vld [vmem:[#allocation2 + $0xa8] sm:$0xff] }
 0x1e7   : > { %v2694_v16 = vpack.c.bf16 %v2218_v28, %v2217_v27  ;;  %v2219_v45 = vsel %vm2155_vm12, %v2123_v40, %v2187_v43  ;;  %v2220_v46 = vsel %vm2156_vm13, %v2124_v3, %v2188_v44  ;;  %vm2158_vm15 = vcmp.ge.f32.partialorder %v2126_v4, 0.0  ;;  %v2136_v20 = vld [vmem:[#allocation2 + $0xd0] sm:$0xff]  ;;  %v2138_v21 = vld [vmem:[#allocation2 + $0x28] sm:$0xff]  ;;  %v2139_v37 = vld [vmem:[#allocation2 + $0xa0] sm:$0xff] }
 0x1e8   : > { %2339 = vst [vmem:[%s3639_s2 + $0x20] sm:$0xff] %v2693_v5  ;;  %v2695_v29 = vpack.c.bf16 %v2220_v46, %v2219_v45  ;;  %v2189_v30 = vmul.f32 0.2, %v2125_v13  ;;  %v2190_v57 = vmul.f32 0.2, %v2126_v4  ;;  %vm2159_vm0 = vcmp.ge.f32.partialorder %v2127_v56, 0.0 }
 0x1e9   : > { %2340 = vst [vmem:[%s3639_s2 + $0x28] sm:$0xff] %v2694_v16  ;;  %vm2160_vm1 = vcmp.ge.f32.partialorder %v2128_v6, 0.0  ;;  %v2191_v7 = vmul.f32 0.2, %v2127_v56  ;;  %v2192_v47 = vmul.f32 0.2, %v2128_v6 }
 0x1ea   : > { %vm2161_vm2 = vcmp.ge.f32.partialorder %v2129_v15, 0.0  ;;  %2341 = vst [vmem:[%s3639_s2 + $0x30] sm:$0xff] %v2695_v29  ;;  %v2221_v17 = vsel %vm2157_vm14, %v2125_v13, %v2189_v30  ;;  %v2222_v18 = vsel %vm2158_vm15, %v2126_v4, %v2190_v57  ;;  %vm2162_vm3 = vcmp.ge.f32.partialorder %v2130_v53, 0.0  ;;  %v2137_v35 = vld [vmem:[#allocation2 + $0x10] sm:$0xff]  ;;  %v2140_v48 = vld [vmem:[#allocation2 + $0xf8] sm:$0xff]  ;;  %v2141_v40 = vld [vmem:[#allocation2 + $0x20] sm:$0xff] }
 0x1eb   : > { %v2193_v31 = vmul.f32 0.2, %v2129_v15  ;;  %v2696_v8 = vpack.c.bf16 %v2222_v18, %v2221_v17  ;;  %v2223_v51 = vsel %vm2159_vm0, %v2127_v56, %v2191_v7  ;;  %v2224_v52 = vsel %vm2160_vm1, %v2128_v6, %v2192_v47  ;;  %v2142_v2 = vld [vmem:[#allocation2 + $0x98] sm:$0xff] }
 0x1ec   : > { %v2194_v59 = vmul.f32 0.2, %v2130_v53  ;;  %v2697_v33 = vpack.c.bf16 %v2224_v52, %v2223_v51  ;;  %vm2163_vm4 = vcmp.ge.f32.partialorder %v2131_v54, 0.0  ;;  %vm2164_vm5 = vcmp.ge.f32.partialorder %v2132_v58, 0.0 }
 0x1ed   : > { %v2225_v34 = vsel %vm2161_vm2, %v2129_v15, %v2193_v31  ;;  %2342 = vst [vmem:[%s3639_s2 + $0x38] sm:$0xff] %v2696_v8  ;;  %v2195_v10 = vmul.f32 0.2, %v2131_v54  ;;  %v2196_v49 = vmul.f32 0.2, %v2132_v58  ;;  %vm2165_vm6 = vcmp.ge.f32.partialorder %v2133_v32, 0.0 }
 0x1ee   : > { %v2226_v9 = vsel %vm2162_vm3, %v2130_v53, %v2194_v59  ;;  %2343 = vst [vmem:[%s3639_s2 + $0x40] sm:$0xff] %v2697_v33  ;;  %vm2166_vm7 = vcmp.ge.f32.partialorder %v2134_v60, 0.0  ;;  %v2197_v50 = vmul.f32 0.2, %v2133_v32  ;;  %v2198_v61 = vmul.f32 0.2, %v2134_v60 }
 0x1ef   : > { %v2698_v36 = vpack.c.bf16 %v2226_v9, %v2225_v34  ;;  %v2227_v22 = vsel %vm2163_vm4, %v2131_v54, %v2195_v10  ;;  %v2228_v62 = vsel %vm2164_vm5, %v2132_v58, %v2196_v49  ;;  %vm2167_vm8 = vcmp.ge.f32.partialorder %v2135_v19, 0.0 }
 0x1f0   : > { %vm2168_vm9 = vcmp.ge.f32.partialorder %v2136_v20, 0.0  ;;  %v2699_v38 = vpack.c.bf16 %v2228_v62, %v2227_v22  ;;  %v2229_v63 = vsel %vm2165_vm6, %v2133_v32, %v2197_v50  ;;  %v2230_v11 = vsel %vm2166_vm7, %v2134_v60, %v2198_v61 }
 0x1f1   : > { %2344 = vst [vmem:[%s3639_s2 + $0x48] sm:$0xff] %v2698_v36  ;;  %v2199_v12 = vmul.f32 0.2, %v2135_v19  ;;  %v2700_v23 = vpack.c.bf16 %v2230_v11, %v2229_v63  ;;  %v2200_v39 = vmul.f32 0.2, %v2136_v20  ;;  %vm2169_vm10 = vcmp.ge.f32.partialorder %v2137_v35, 0.0 }
 0x1f2   : > { %vm2170_vm11 = vcmp.ge.f32.partialorder %v2138_v21, 0.0  ;;  %2345 = vst [vmem:[%s3639_s2 + $0x50] sm:$0xff] %v2699_v38  ;;  %v2201_v0 = vmul.f32 0.2, %v2137_v35  ;;  %v2202_v1 = vmul.f32 0.2, %v2138_v21 }
 0x1f3   : > { %v2231_v24 = vsel %vm2167_vm8, %v2135_v19, %v2199_v12  ;;  %vm2171_vm12 = vcmp.ge.f32.partialorder %v2139_v37, 0.0  ;;  %2346 = vst [vmem:[%s3639_s2 + $0x58] sm:$0xff] %v2700_v23  ;;  %v2232_v3 = vsel %vm2168_vm9, %v2136_v20, %v2200_v39  ;;  %vm2172_vm13 = vcmp.ge.f32.partialorder %v2140_v48, 0.0 }
 0x1f4   : > { %v2203_v41 = vmul.f32 0.2, %v2139_v37  ;;  %v2204_v42 = vmul.f32 0.2, %v2140_v48  ;;  %v2701_v13 = vpack.c.bf16 %v2232_v3, %v2231_v24  ;;  %v2233_v25 = vsel %vm2169_vm10, %v2137_v35, %v2201_v0 }
 0x1f5   : > { %v2234_v26 = vsel %vm2170_vm11, %v2138_v21, %v2202_v1  ;;  %vm2173_vm14 = vcmp.ge.f32.partialorder %v2141_v40, 0.0  ;;  %vm2174_vm15 = vcmp.ge.f32.partialorder %v2142_v2, 0.0  ;;  %v2205_v44 = vmul.f32 0.2, %v2141_v40 }
 0x1f6   : > { %v2702_v14 = vpack.c.bf16 %v2234_v26, %v2233_v25  ;;  %v2235_v4 = vsel %vm2171_vm12, %v2139_v37, %v2203_v41  ;;  %v2236_v55 = vsel %vm2172_vm13, %v2140_v48, %v2204_v42  ;;  %2347 = vst [vmem:[%s3639_s2 + $0x60] sm:$0xff] %v2701_v13  ;;  %v2206_v56 = vmul.f32 0.2, %v2142_v2 }
 0x1f7   : > { %v2703_v43 = vpack.c.bf16 %v2236_v55, %v2235_v4  ;;  %v2237_v5 = vsel %vm2173_vm14, %v2141_v40, %v2205_v44 }
 0x1f8   : > { %2348 = vst [vmem:[%s3639_s2 + $0x68] sm:$0xff] %v2702_v14  ;;  %v2238_v27 = vsel %vm2174_vm15, %v2142_v2, %v2206_v56 }
 0x1f9   : > { %2349 = vst [vmem:[%s3639_s2 + $0x70] sm:$0xff] %v2703_v43  ;;  %v2704_v28 = vpack.c.bf16 %v2238_v27, %v2237_v5 }
 0x1fb   : > { %2350 = vst [vmem:[%s3639_s2 + $0x78] sm:$0xff] %v2704_v28 }
 0x1fc PF: > { %s12_s13 = sadd.s32 1, %s2976_s13   ;;  %s3674_s9 = smov %s2964_s10 }
 0x1fd   : > { %p9_p12 = scmp.ge.s32.totalorder %s12_s13, 4   ;;  %s3675_s10 = smov %s3029_s17 }
 0x1fe   : > { %s3676_s11 = smov %s2972_s12  ;;  %s3677_s12 = smov %s3679_s14 }
 0x1ff   :  { %11 = sbr.rel (!%p9_p12) target bundleno = 3 (0x3), region = 97 }

// kernel: _forward.8
= control target key start
LH: loop header
LB: loop body
LE: loop exit
PB: predicated region body
PF: predicated region fallthrough
CT: control target
= control target key end

     0   :  { %s3296_s0 = inlined_call_operand.vmem [shape: bf16[32,4096], index: 0, kind: input, shape index: {}]   ;;  %s3297_s1 = inlined_call_operand.vmem [shape: bf16[4096,512], index: 1, kind: input, shape index: {}]   ;;  %s3298_s2 = inlined_call_operand.vmem [shape: bf16[32,512], index: 2, kind: output, shape index: {}]  }
   0x1   :  { %3299 = sst [smem:[#allocation6_spill]] %s3296_s0 }
   0x2   :  { %s2684_s9 = smov 0   ;;  %s2686_s10 = smov 0  }
   0x3   :  { %s2688_s11 = smov 0   ;;  %s2690_s12 = smov 0  }
   0x4   :  { %s2692_s13 = smov 0   ;;  %s2694_s14 = smov 0  }
   0x5   :  { %s2696_s15 = smov 0   ;;  %s2698_s16 = smov 0  }
   0x6   :  { %s2700_s17 = smov 0   ;;  %s2702_s18 = smov 0  }
   0x7   :  { %s2704_s19 = smov 0  }
   0x8 LB: > { %s2121_s20 = sadd.s32 4294967295, %s2666_s19   ;;  %s24_s21 = sadd.s32 1, %s2658_s17  ;;  %s2666_s19 = sphi %s2704_s19, %s12_s19   ;;  %s2662_s18 = sphi %s2702_s18, %s3313_s18   ;;  %s2658_s17 = sphi %s2700_s17, %s3312_s17   ;;  %s2654_s16 = sphi %s2698_s16, %s3311_s16   ;;  %s2650_s15 = sphi %s2696_s15, %s3310_s15   ;;  %s2646_s14 = sphi %s2694_s14, %s3309_s14   ;;  %s2642_s13 = sphi %s2692_s13, %s3308_s13   ;;  %s2638_s12 = sphi %s2690_s12, %s3307_s12   ;;  %s2634_s11 = sphi %s2688_s11, %s3306_s11   ;;  %s2630_s10 = sphi %s2686_s10, %s3305_s10   ;;  %s2626_s9 = sphi %s2684_s9, %s3304_s9  }
   0x9   : > { %p25_p0 = scmp.ge.s32.totalorder %s24_s21, 4  ;;  %s27_s22 = sadd.s32 1, %s2662_s18 }
   0xa   : > { %s40_s23 = sadd.s32 1, %s2646_s14  ;;  %p47_p1 = scmp.ne.s32.totalorder %s2646_s14, %s2642_s13 }
   0xb   : > { %s3315_s21 = smov (%p25_p0, %s24_s21), 0  ;;  %s3317_s22 = smov (!%p25_p0, %s27_s22), %s2662_s18 }
   0xc   : > { %s36_s24 = ssub.s32 %s2658_s17, %s3315_s21  ;;  %p48_p2 = scmp.eq.s32.totalorder %s2666_s19, 0 }
   0xd   : > { %p29_p3 = scmp.ge.s32.totalorder %s3317_s22, 2  ;;  %p38_p4 = scmp.eq.s32.totalorder %s36_s24, 0 }
   0xe   : > { %p2751_p5 = por %p48_p2, %p47_p1  ;;  %s68_s26 = sadd.s32 1, %s2638_s12 }
   0xf   : > { %s3319_s22 = smov (%p29_p3, %s3317_s22), 0  ;;  %p75_p6 = scmp.ne.s32.totalorder %s2638_s12, %s2634_s11 }
  0x10   : > { %s2759_s27 = scalar_select %p38_p4, %s2646_s14, %s40_s23  }
  0x11   : > { %s64_s28 = ssub.s32 %s2662_s18, %s3319_s22  ;;  %p2765_p9 = por %p75_p6, %p48_p2 }
  0x12   : > { %s65_s29 = sor.u32 %s64_s28, %s36_s24  ;;  %p94_p7 = scmp.eq.s32.totalorder %s64_s28, 0 }
  0x13   : > { %p66_p8 = scmp.eq.s32.totalorder %s65_s29, 0  ;;  %s96_s3 = sadd.s32 1, %s2630_s10 }
  0x14   : > { %p106_p10 = scmp.ne.s32.totalorder %s2630_s10, %s2626_s9  ;;  %p107_p11 = scmp.eq.s32.totalorder %s2121_s20, 7 }
  0x15   : > { %s2773_s4 = scalar_select %p66_p8, %s2638_s12, %s68_s26  }
  0x16   : > { %s2776_s5 = scalar_select %p94_p7, %s2630_s10, %s96_s3  }
  0x17   : > { %p2778_p12 = por %p107_p11, %p106_p10  ;;  %p2124_p13 = scmp.ge.s32.totalorder %s2666_s19, 8 }
  0x19   : > { %129 = sbr.rel (%p2124_p13) target bundleno = 119 (0x77), region = 16 }
  0x1e   : > { %132 = sbr.rel (!%p2751_p5) target bundleno = 48 (0x30), region = 20  ;;  %s134_s7 = sand.u32 (%p2751_p5), 1, %s2646_s14  }
  0x1f   : > { %s2292_s8 = sshll.u32 (%p2751_p5), %s2658_s17, 5  ;;  %s2125_s23 = sshll.u32 (%p2751_p5), %s134_s7, 7 }
  0x20   : > { %s3303_s0 = sld [smem:[#allocation6_spill]] (%p2751_p5)  ;;  %s136_s20 = scalar_lea.vmem (%p2751_p5), [#allocation3], %s2125_s23 }
  0x26   : > { %s2790_s28 = scalar_lea.vmem %s3303_s0, %s2292_s8 }
  0x27   : > { %v155_v0 = vld [vmem:[%s2790_s28] sm:$0xff]  ;;  %v157_v1 = vld [vmem:[%s2790_s28 + $0x8] sm:$0xff]  ;;  %v159_v2 = vld [vmem:[%s2790_s28 + $0x10] sm:$0xff] }
  0x28   : > { %156 = vst [vmem:[%s136_s20] sm:$0xff] %v155_v0  ;;  %158 = vst [vmem:[%s136_s20 + $0x8] sm:$0xff] %v157_v1  ;;  %v161_v3 = vld [vmem:[%s2790_s28 + $0x18] sm:$0xff]  ;;  %v163_v4 = vld [vmem:[%s2790_s28 + $0x80] sm:$0xff] }
  0x29   : > { %160 = vst [vmem:[%s136_s20 + $0x10] sm:$0xff] %v159_v2  ;;  %v165_v5 = vld [vmem:[%s2790_s28 + $0x88] sm:$0xff]  ;;  %162 = vst [vmem:[%s136_s20 + $0x18] sm:$0xff] %v161_v3  ;;  %v167_v6 = vld [vmem:[%s2790_s28 + $0x90] sm:$0xff] }
  0x2a   : > { %164 = vst [vmem:[%s136_s20 + $0x20] sm:$0xff] %v163_v4  ;;  %166 = vst [vmem:[%s136_s20 + $0x28] sm:$0xff] %v165_v5  ;;  %v169_v7 = vld [vmem:[%s2790_s28 + $0x98] sm:$0xff]  ;;  %v171_v8 = vld [vmem:[%s2790_s28 + $0x100] sm:$0xff] }
  0x2b   : > { %168 = vst [vmem:[%s136_s20 + $0x30] sm:$0xff] %v167_v6  ;;  %170 = vst [vmem:[%s136_s20 + $0x38] sm:$0xff] %v169_v7  ;;  %v173_v9 = vld [vmem:[%s2790_s28 + $0x108] sm:$0xff]  ;;  %v175_v10 = vld [vmem:[%s2790_s28 + $0x110] sm:$0xff] }
  0x2c   : > { %172 = vst [vmem:[%s136_s20 + $0x40] sm:$0xff] %v171_v8  ;;  %v177_v11 = vld [vmem:[%s2790_s28 + $0x118] sm:$0xff]  ;;  %174 = vst [vmem:[%s136_s20 + $0x48] sm:$0xff] %v173_v9  ;;  %v179_v12 = vld [vmem:[%s2790_s28 + $0x180] sm:$0xff] }
  0x2d   : > { %176 = vst [vmem:[%s136_s20 + $0x50] sm:$0xff] %v175_v10  ;;  %178 = vst [vmem:[%s136_s20 + $0x58] sm:$0xff] %v177_v11  ;;  %v181_v13 = vld [vmem:[%s2790_s28 + $0x188] sm:$0xff]  ;;  %v183_v14 = vld [vmem:[%s2790_s28 + $0x190] sm:$0xff] }
  0x2e   : > { %180 = vst [vmem:[%s136_s20 + $0x60] sm:$0xff] %v179_v12  ;;  %182 = vst [vmem:[%s136_s20 + $0x68] sm:$0xff] %v181_v13  ;;  %v185_v15 = vld [vmem:[%s2790_s28 + $0x198] sm:$0xff] }
  0x2f   : > { %184 = vst [vmem:[%s136_s20 + $0x70] sm:$0xff] %v183_v14  ;;  %186 = vst [vmem:[%s136_s20 + $0x78] sm:$0xff] %v185_v15 }
  0x30 PF: > { %192 = sbr.rel (!%p2765_p9) target bundleno = 119 (0x77), region = 43  ;;  %s194_s25 = sand.u32 (%p2765_p9), 1, %s2638_s12  }
  0x31   : > { %s2130_s29 = sshll.u32 (%p2765_p9), %s2662_s18, 1  ;;  %s2128_s3 = sshll.u32 (%p2765_p9), %s194_s25, 10 }
  0x32   : > { %s2293_s7 = sshll.u32 (%p2765_p9), %s2658_s17, 9  ;;  %s2821_s30 = scalar_lea.vmem (%p2765_p9), [#allocation4], %s2128_s3 }
  0x33   : > { %s200_s8 = sadd.s32 (%p2765_p9), %s2293_s7, %s2130_s29 }
  0x34   : > { %s2132_s23 = sshll.u32 (%p2765_p9), %s200_s8, 2 }
  0x35   : > { %s2816_s0 = scalar_lea.vmem %s3297_s1, %s2132_s23 }
  0x36   : > { %v485_v16 = vld [vmem:[%s2816_s0] sm:$0xff]  ;;  %v487_v17 = vld [vmem:[%s2816_s0 + $0x10] sm:$0xff] }
  0x37   : > { %v489_v18 = vld [vmem:[%s2816_s0 + $0x20] sm:$0xff]  ;;  %486 = vst [vmem:[%s2821_s30] sm:$0xff] %v485_v16  ;;  %488 = vst [vmem:[%s2821_s30 + $0x8] sm:$0xff] %v487_v17  ;;  %v491_v19 = vld [vmem:[%s2816_s0 + $0x30] sm:$0xff] }
  0x38   : > { %490 = vst [vmem:[%s2821_s30 + $0x10] sm:$0xff] %v489_v18  ;;  %v493_v20 = vld [vmem:[%s2816_s0 + $0x40] sm:$0xff]  ;;  %v495_v21 = vld [vmem:[%s2816_s0 + $0x50] sm:$0xff]  ;;  %492 = vst [vmem:[%s2821_s30 + $0x18] sm:$0xff] %v491_v19 }
  0x39   : > { %494 = vst [vmem:[%s2821_s30 + $0x20] sm:$0xff] %v493_v20  ;;  %496 = vst [vmem:[%s2821_s30 + $0x28] sm:$0xff] %v495_v21  ;;  %v497_v22 = vld [vmem:[%s2816_s0 + $0x60] sm:$0xff]  ;;  %v499_v23 = vld [vmem:[%s2816_s0 + $0x70] sm:$0xff] }
  0x3a   : > { %v501_v24 = vld [vmem:[%s2816_s0 + $0x80] sm:$0xff]  ;;  %498 = vst [vmem:[%s2821_s30 + $0x30] sm:$0xff] %v497_v22  ;;  %500 = vst [vmem:[%s2821_s30 + $0x38] sm:$0xff] %v499_v23  ;;  %v503_v25 = vld [vmem:[%s2816_s0 + $0x90] sm:$0xff] }
  0x3b   : > { %502 = vst [vmem:[%s2821_s30 + $0x40] sm:$0xff] %v501_v24  ;;  %v505_v26 = vld [vmem:[%s2816_s0 + $0xa0] sm:$0xff]  ;;  %v507_v27 = vld [vmem:[%s2816_s0 + $0xb0] sm:$0xff]  ;;  %504 = vst [vmem:[%s2821_s30 + $0x48] sm:$0xff] %v503_v25 }
  0x3c   : > { %506 = vst [vmem:[%s2821_s30 + $0x50] sm:$0xff] %v505_v26  ;;  %508 = vst [vmem:[%s2821_s30 + $0x58] sm:$0xff] %v507_v27  ;;  %v509_v28 = vld [vmem:[%s2816_s0 + $0xc0] sm:$0xff]  ;;  %v511_v29 = vld [vmem:[%s2816_s0 + $0xd0] sm:$0xff] }
  0x3d   : > { %v513_v30 = vld [vmem:[%s2816_s0 + $0xe0] sm:$0xff]  ;;  %510 = vst [vmem:[%s2821_s30 + $0x60] sm:$0xff] %v509_v28  ;;  %512 = vst [vmem:[%s2821_s30 + $0x68] sm:$0xff] %v511_v29  ;;  %v515_v31 = vld [vmem:[%s2816_s0 + $0xf0] sm:$0xff] }
  0x3e   : > { %514 = vst [vmem:[%s2821_s30 + $0x70] sm:$0xff] %v513_v30  ;;  %v517_v32 = vld [vmem:[%s2816_s0 + $0x100] sm:$0xff]  ;;  %v519_v33 = vld [vmem:[%s2816_s0 + $0x110] sm:$0xff]  ;;  %516 = vst [vmem:[%s2821_s30 + $0x78] sm:$0xff] %v515_v31 }
  0x3f   : > { %518 = vst [vmem:[%s2821_s30 + $0x80] sm:$0xff] %v517_v32  ;;  %520 = vst [vmem:[%s2821_s30 + $0x88] sm:$0xff] %v519_v33  ;;  %v521_v34 = vld [vmem:[%s2816_s0 + $0x120] sm:$0xff]  ;;  %v523_v35 = vld [vmem:[%s2816_s0 + $0x130] sm:$0xff] }
  0x40   : > { %v525_v36 = vld [vmem:[%s2816_s0 + $0x140] sm:$0xff]  ;;  %522 = vst [vmem:[%s2821_s30 + $0x90] sm:$0xff] %v521_v34  ;;  %524 = vst [vmem:[%s2821_s30 + $0x98] sm:$0xff] %v523_v35  ;;  %v527_v37 = vld [vmem:[%s2816_s0 + $0x150] sm:$0xff] }
  0x41   : > { %526 = vst [vmem:[%s2821_s30 + $0xa0] sm:$0xff] %v525_v36  ;;  %v529_v38 = vld [vmem:[%s2816_s0 + $0x160] sm:$0xff]  ;;  %v531_v39 = vld [vmem:[%s2816_s0 + $0x170] sm:$0xff]  ;;  %528 = vst [vmem:[%s2821_s30 + $0xa8] sm:$0xff] %v527_v37 }
  0x42   : > { %530 = vst [vmem:[%s2821_s30 + $0xb0] sm:$0xff] %v529_v38  ;;  %532 = vst [vmem:[%s2821_s30 + $0xb8] sm:$0xff] %v531_v39  ;;  %v533_v40 = vld [vmem:[%s2816_s0 + $0x180] sm:$0xff]  ;;  %v535_v41 = vld [vmem:[%s2816_s0 + $0x190] sm:$0xff] }
  0x43   : > { %v537_v42 = vld [vmem:[%s2816_s0 + $0x1a0] sm:$0xff]  ;;  %534 = vst [vmem:[%s2821_s30 + $0xc0] sm:$0xff] %v533_v40  ;;  %536 = vst [vmem:[%s2821_s30 + $0xc8] sm:$0xff] %v535_v41  ;;  %v539_v43 = vld [vmem:[%s2816_s0 + $0x1b0] sm:$0xff] }
  0x44   : > { %538 = vst [vmem:[%s2821_s30 + $0xd0] sm:$0xff] %v537_v42  ;;  %v541_v44 = vld [vmem:[%s2816_s0 + $0x1c0] sm:$0xff]  ;;  %v543_v45 = vld [vmem:[%s2816_s0 + $0x1d0] sm:$0xff]  ;;  %540 = vst [vmem:[%s2821_s30 + $0xd8] sm:$0xff] %v539_v43 }
  0x45   : > { %542 = vst [vmem:[%s2821_s30 + $0xe0] sm:$0xff] %v541_v44  ;;  %544 = vst [vmem:[%s2821_s30 + $0xe8] sm:$0xff] %v543_v45  ;;  %v545_v46 = vld [vmem:[%s2816_s0 + $0x1e0] sm:$0xff]  ;;  %v547_v47 = vld [vmem:[%s2816_s0 + $0x1f0] sm:$0xff] }
  0x46   : > { %v549_v48 = vld [vmem:[%s2816_s0 + $0x200] sm:$0xff]  ;;  %546 = vst [vmem:[%s2821_s30 + $0xf0] sm:$0xff] %v545_v46  ;;  %548 = vst [vmem:[%s2821_s30 + $0xf8] sm:$0xff] %v547_v47  ;;  %v551_v49 = vld [vmem:[%s2816_s0 + $0x210] sm:$0xff] }
  0x47   : > { %550 = vst [vmem:[%s2821_s30 + $0x100] sm:$0xff] %v549_v48  ;;  %v553_v50 = vld [vmem:[%s2816_s0 + $0x220] sm:$0xff]  ;;  %v555_v51 = vld [vmem:[%s2816_s0 + $0x230] sm:$0xff]  ;;  %552 = vst [vmem:[%s2821_s30 + $0x108] sm:$0xff] %v551_v49 }
  0x48   : > { %554 = vst [vmem:[%s2821_s30 + $0x110] sm:$0xff] %v553_v50  ;;  %556 = vst [vmem:[%s2821_s30 + $0x118] sm:$0xff] %v555_v51  ;;  %v557_v52 = vld [vmem:[%s2816_s0 + $0x240] sm:$0xff]  ;;  %v559_v53 = vld [vmem:[%s2816_s0 + $0x250] sm:$0xff] }
  0x49   : > { %v561_v54 = vld [vmem:[%s2816_s0 + $0x260] sm:$0xff]  ;;  %558 = vst [vmem:[%s2821_s30 + $0x120] sm:$0xff] %v557_v52  ;;  %560 = vst [vmem:[%s2821_s30 + $0x128] sm:$0xff] %v559_v53  ;;  %v563_v55 = vld [vmem:[%s2816_s0 + $0x270] sm:$0xff] }
  0x4a   : > { %562 = vst [vmem:[%s2821_s30 + $0x130] sm:$0xff] %v561_v54  ;;  %v565_v56 = vld [vmem:[%s2816_s0 + $0x280] sm:$0xff]  ;;  %v567_v57 = vld [vmem:[%s2816_s0 + $0x290] sm:$0xff]  ;;  %564 = vst [vmem:[%s2821_s30 + $0x138] sm:$0xff] %v563_v55 }
  0x4b   : > { %566 = vst [vmem:[%s2821_s30 + $0x140] sm:$0xff] %v565_v56  ;;  %568 = vst [vmem:[%s2821_s30 + $0x148] sm:$0xff] %v567_v57  ;;  %v569_v58 = vld [vmem:[%s2816_s0 + $0x2a0] sm:$0xff]  ;;  %v571_v59 = vld [vmem:[%s2816_s0 + $0x2b0] sm:$0xff] }
  0x4c   : > { %v573_v60 = vld [vmem:[%s2816_s0 + $0x2c0] sm:$0xff]  ;;  %570 = vst [vmem:[%s2821_s30 + $0x150] sm:$0xff] %v569_v58  ;;  %572 = vst [vmem:[%s2821_s30 + $0x158] sm:$0xff] %v571_v59  ;;  %v575_v61 = vld [vmem:[%s2816_s0 + $0x2d0] sm:$0xff] }
  0x4d   : > { %574 = vst [vmem:[%s2821_s30 + $0x160] sm:$0xff] %v573_v60  ;;  %v577_v62 = vld [vmem:[%s2816_s0 + $0x2e0] sm:$0xff]  ;;  %v579_v63 = vld [vmem:[%s2816_s0 + $0x2f0] sm:$0xff]  ;;  %576 = vst [vmem:[%s2821_s30 + $0x168] sm:$0xff] %v575_v61 }
  0x4e   : > { %578 = vst [vmem:[%s2821_s30 + $0x170] sm:$0xff] %v577_v62  ;;  %580 = vst [vmem:[%s2821_s30 + $0x178] sm:$0xff] %v579_v63  ;;  %v581_v0 = vld [vmem:[%s2816_s0 + $0x300] sm:$0xff]  ;;  %v583_v1 = vld [vmem:[%s2816_s0 + $0x310] sm:$0xff] }
  0x4f   : > { %v585_v2 = vld [vmem:[%s2816_s0 + $0x320] sm:$0xff]  ;;  %582 = vst [vmem:[%s2821_s30 + $0x180] sm:$0xff] %v581_v0  ;;  %584 = vst [vmem:[%s2821_s30 + $0x188] sm:$0xff] %v583_v1  ;;  %v587_v3 = vld [vmem:[%s2816_s0 + $0x330] sm:$0xff] }
  0x50   : > { %586 = vst [vmem:[%s2821_s30 + $0x190] sm:$0xff] %v585_v2  ;;  %v589_v4 = vld [vmem:[%s2816_s0 + $0x340] sm:$0xff]  ;;  %v591_v5 = vld [vmem:[%s2816_s0 + $0x350] sm:$0xff]  ;;  %588 = vst [vmem:[%s2821_s30 + $0x198] sm:$0xff] %v587_v3 }
  0x51   : > { %590 = vst [vmem:[%s2821_s30 + $0x1a0] sm:$0xff] %v589_v4  ;;  %592 = vst [vmem:[%s2821_s30 + $0x1a8] sm:$0xff] %v591_v5  ;;  %v593_v6 = vld [vmem:[%s2816_s0 + $0x360] sm:$0xff]  ;;  %v595_v7 = vld [vmem:[%s2816_s0 + $0x370] sm:$0xff] }
  0x52   : > { %v597_v8 = vld [vmem:[%s2816_s0 + $0x380] sm:$0xff]  ;;  %594 = vst [vmem:[%s2821_s30 + $0x1b0] sm:$0xff] %v593_v6  ;;  %596 = vst [vmem:[%s2821_s30 + $0x1b8] sm:$0xff] %v595_v7  ;;  %v599_v9 = vld [vmem:[%s2816_s0 + $0x390] sm:$0xff] }
  0x53   : > { %598 = vst [vmem:[%s2821_s30 + $0x1c0] sm:$0xff] %v597_v8  ;;  %v601_v10 = vld [vmem:[%s2816_s0 + $0x3a0] sm:$0xff]  ;;  %v603_v11 = vld [vmem:[%s2816_s0 + $0x3b0] sm:$0xff]  ;;  %600 = vst [vmem:[%s2821_s30 + $0x1c8] sm:$0xff] %v599_v9 }
  0x54   : > { %602 = vst [vmem:[%s2821_s30 + $0x1d0] sm:$0xff] %v601_v10  ;;  %604 = vst [vmem:[%s2821_s30 + $0x1d8] sm:$0xff] %v603_v11  ;;  %v605_v12 = vld [vmem:[%s2816_s0 + $0x3c0] sm:$0xff]  ;;  %v607_v13 = vld [vmem:[%s2816_s0 + $0x3d0] sm:$0xff] }
  0x55   : > { %v609_v14 = vld [vmem:[%s2816_s0 + $0x3e0] sm:$0xff]  ;;  %606 = vst [vmem:[%s2821_s30 + $0x1e0] sm:$0xff] %v605_v12  ;;  %608 = vst [vmem:[%s2821_s30 + $0x1e8] sm:$0xff] %v607_v13  ;;  %v611_v15 = vld [vmem:[%s2816_s0 + $0x3f0] sm:$0xff] }
  0x56   : > { %610 = vst [vmem:[%s2821_s30 + $0x1f0] sm:$0xff] %v609_v14  ;;  %v613_v16 = vld [vmem:[%s2816_s0 + $0x400] sm:$0xff]  ;;  %v615_v17 = vld [vmem:[%s2816_s0 + $0x410] sm:$0xff]  ;;  %612 = vst [vmem:[%s2821_s30 + $0x1f8] sm:$0xff] %v611_v15 }
  0x57   : > { %614 = vst [vmem:[%s2821_s30 + $0x200] sm:$0xff] %v613_v16  ;;  %616 = vst [vmem:[%s2821_s30 + $0x208] sm:$0xff] %v615_v17  ;;  %v617_v18 = vld [vmem:[%s2816_s0 + $0x420] sm:$0xff]  ;;  %v619_v19 = vld [vmem:[%s2816_s0 + $0x430] sm:$0xff] }
  0x58   : > { %v621_v20 = vld [vmem:[%s2816_s0 + $0x440] sm:$0xff]  ;;  %618 = vst [vmem:[%s2821_s30 + $0x210] sm:$0xff] %v617_v18  ;;  %620 = vst [vmem:[%s2821_s30 + $0x218] sm:$0xff] %v619_v19  ;;  %v623_v21 = vld [vmem:[%s2816_s0 + $0x450] sm:$0xff] }
  0x59   : > { %622 = vst [vmem:[%s2821_s30 + $0x220] sm:$0xff] %v621_v20  ;;  %v625_v22 = vld [vmem:[%s2816_s0 + $0x460] sm:$0xff]  ;;  %v627_v23 = vld [vmem:[%s2816_s0 + $0x470] sm:$0xff]  ;;  %624 = vst [vmem:[%s2821_s30 + $0x228] sm:$0xff] %v623_v21 }
  0x5a   : > { %626 = vst [vmem:[%s2821_s30 + $0x230] sm:$0xff] %v625_v22  ;;  %628 = vst [vmem:[%s2821_s30 + $0x238] sm:$0xff] %v627_v23  ;;  %v629_v24 = vld [vmem:[%s2816_s0 + $0x480] sm:$0xff]  ;;  %v631_v25 = vld [vmem:[%s2816_s0 + $0x490] sm:$0xff] }
  0x5b   : > { %v633_v26 = vld [vmem:[%s2816_s0 + $0x4a0] sm:$0xff]  ;;  %630 = vst [vmem:[%s2821_s30 + $0x240] sm:$0xff] %v629_v24  ;;  %632 = vst [vmem:[%s2821_s30 + $0x248] sm:$0xff] %v631_v25  ;;  %v635_v27 = vld [vmem:[%s2816_s0 + $0x4b0] sm:$0xff] }
  0x5c   : > { %634 = vst [vmem:[%s2821_s30 + $0x250] sm:$0xff] %v633_v26  ;;  %v637_v28 = vld [vmem:[%s2816_s0 + $0x4c0] sm:$0xff]  ;;  %v639_v29 = vld [vmem:[%s2816_s0 + $0x4d0] sm:$0xff]  ;;  %636 = vst [vmem:[%s2821_s30 + $0x258] sm:$0xff] %v635_v27 }
  0x5d   : > { %638 = vst [vmem:[%s2821_s30 + $0x260] sm:$0xff] %v637_v28  ;;  %640 = vst [vmem:[%s2821_s30 + $0x268] sm:$0xff] %v639_v29  ;;  %v641_v30 = vld [vmem:[%s2816_s0 + $0x4e0] sm:$0xff]  ;;  %v643_v31 = vld [vmem:[%s2816_s0 + $0x4f0] sm:$0xff] }
  0x5e   : > { %v645_v32 = vld [vmem:[%s2816_s0 + $0x500] sm:$0xff]  ;;  %642 = vst [vmem:[%s2821_s30 + $0x270] sm:$0xff] %v641_v30  ;;  %644 = vst [vmem:[%s2821_s30 + $0x278] sm:$0xff] %v643_v31  ;;  %v647_v33 = vld [vmem:[%s2816_s0 + $0x510] sm:$0xff] }
  0x5f   : > { %646 = vst [vmem:[%s2821_s30 + $0x280] sm:$0xff] %v645_v32  ;;  %v649_v34 = vld [vmem:[%s2816_s0 + $0x520] sm:$0xff]  ;;  %v651_v35 = vld [vmem:[%s2816_s0 + $0x530] sm:$0xff]  ;;  %648 = vst [vmem:[%s2821_s30 + $0x288] sm:$0xff] %v647_v33 }
  0x60   : > { %650 = vst [vmem:[%s2821_s30 + $0x290] sm:$0xff] %v649_v34  ;;  %652 = vst [vmem:[%s2821_s30 + $0x298] sm:$0xff] %v651_v35  ;;  %v653_v36 = vld [vmem:[%s2816_s0 + $0x540] sm:$0xff]  ;;  %v655_v37 = vld [vmem:[%s2816_s0 + $0x550] sm:$0xff] }
  0x61   : > { %v657_v38 = vld [vmem:[%s2816_s0 + $0x560] sm:$0xff]  ;;  %654 = vst [vmem:[%s2821_s30 + $0x2a0] sm:$0xff] %v653_v36  ;;  %656 = vst [vmem:[%s2821_s30 + $0x2a8] sm:$0xff] %v655_v37  ;;  %v659_v39 = vld [vmem:[%s2816_s0 + $0x570] sm:$0xff] }
  0x62   : > { %658 = vst [vmem:[%s2821_s30 + $0x2b0] sm:$0xff] %v657_v38  ;;  %v661_v40 = vld [vmem:[%s2816_s0 + $0x580] sm:$0xff]  ;;  %v663_v41 = vld [vmem:[%s2816_s0 + $0x590] sm:$0xff]  ;;  %660 = vst [vmem:[%s2821_s30 + $0x2b8] sm:$0xff] %v659_v39 }
  0x63   : > { %662 = vst [vmem:[%s2821_s30 + $0x2c0] sm:$0xff] %v661_v40  ;;  %664 = vst [vmem:[%s2821_s30 + $0x2c8] sm:$0xff] %v663_v41  ;;  %v665_v42 = vld [vmem:[%s2816_s0 + $0x5a0] sm:$0xff]  ;;  %v667_v43 = vld [vmem:[%s2816_s0 + $0x5b0] sm:$0xff] }
  0x64   : > { %v669_v44 = vld [vmem:[%s2816_s0 + $0x5c0] sm:$0xff]  ;;  %666 = vst [vmem:[%s2821_s30 + $0x2d0] sm:$0xff] %v665_v42  ;;  %668 = vst [vmem:[%s2821_s30 + $0x2d8] sm:$0xff] %v667_v43  ;;  %v671_v45 = vld [vmem:[%s2816_s0 + $0x5d0] sm:$0xff] }
  0x65   : > { %670 = vst [vmem:[%s2821_s30 + $0x2e0] sm:$0xff] %v669_v44  ;;  %v673_v46 = vld [vmem:[%s2816_s0 + $0x5e0] sm:$0xff]  ;;  %v675_v47 = vld [vmem:[%s2816_s0 + $0x5f0] sm:$0xff]  ;;  %672 = vst [vmem:[%s2821_s30 + $0x2e8] sm:$0xff] %v671_v45 }
  0x66   : > { %674 = vst [vmem:[%s2821_s30 + $0x2f0] sm:$0xff] %v673_v46  ;;  %676 = vst [vmem:[%s2821_s30 + $0x2f8] sm:$0xff] %v675_v47  ;;  %v677_v48 = vld [vmem:[%s2816_s0 + $0x600] sm:$0xff]  ;;  %v679_v49 = vld [vmem:[%s2816_s0 + $0x610] sm:$0xff] }
  0x67   : > { %v681_v50 = vld [vmem:[%s2816_s0 + $0x620] sm:$0xff]  ;;  %678 = vst [vmem:[%s2821_s30 + $0x300] sm:$0xff] %v677_v48  ;;  %680 = vst [vmem:[%s2821_s30 + $0x308] sm:$0xff] %v679_v49  ;;  %v683_v51 = vld [vmem:[%s2816_s0 + $0x630] sm:$0xff] }
  0x68   : > { %682 = vst [vmem:[%s2821_s30 + $0x310] sm:$0xff] %v681_v50  ;;  %v685_v52 = vld [vmem:[%s2816_s0 + $0x640] sm:$0xff]  ;;  %v687_v53 = vld [vmem:[%s2816_s0 + $0x650] sm:$0xff]  ;;  %684 = vst [vmem:[%s2821_s30 + $0x318] sm:$0xff] %v683_v51 }
  0x69   : > { %686 = vst [vmem:[%s2821_s30 + $0x320] sm:$0xff] %v685_v52  ;;  %688 = vst [vmem:[%s2821_s30 + $0x328] sm:$0xff] %v687_v53  ;;  %v689_v54 = vld [vmem:[%s2816_s0 + $0x660] sm:$0xff]  ;;  %v691_v55 = vld [vmem:[%s2816_s0 + $0x670] sm:$0xff] }
  0x6a   : > { %v693_v56 = vld [vmem:[%s2816_s0 + $0x680] sm:$0xff]  ;;  %690 = vst [vmem:[%s2821_s30 + $0x330] sm:$0xff] %v689_v54  ;;  %692 = vst [vmem:[%s2821_s30 + $0x338] sm:$0xff] %v691_v55  ;;  %v695_v57 = vld [vmem:[%s2816_s0 + $0x690] sm:$0xff] }
  0x6b   : > { %694 = vst [vmem:[%s2821_s30 + $0x340] sm:$0xff] %v693_v56  ;;  %v697_v58 = vld [vmem:[%s2816_s0 + $0x6a0] sm:$0xff]  ;;  %v699_v59 = vld [vmem:[%s2816_s0 + $0x6b0] sm:$0xff]  ;;  %696 = vst [vmem:[%s2821_s30 + $0x348] sm:$0xff] %v695_v57 }
  0x6c   : > { %698 = vst [vmem:[%s2821_s30 + $0x350] sm:$0xff] %v697_v58  ;;  %700 = vst [vmem:[%s2821_s30 + $0x358] sm:$0xff] %v699_v59  ;;  %v701_v60 = vld [vmem:[%s2816_s0 + $0x6c0] sm:$0xff]  ;;  %v703_v61 = vld [vmem:[%s2816_s0 + $0x6d0] sm:$0xff] }
  0x6d   : > { %v705_v62 = vld [vmem:[%s2816_s0 + $0x6e0] sm:$0xff]  ;;  %702 = vst [vmem:[%s2821_s30 + $0x360] sm:$0xff] %v701_v60  ;;  %704 = vst [vmem:[%s2821_s30 + $0x368] sm:$0xff] %v703_v61  ;;  %v707_v63 = vld [vmem:[%s2816_s0 + $0x6f0] sm:$0xff] }
  0x6e   : > { %706 = vst [vmem:[%s2821_s30 + $0x370] sm:$0xff] %v705_v62  ;;  %v709_v0 = vld [vmem:[%s2816_s0 + $0x700] sm:$0xff]  ;;  %v711_v1 = vld [vmem:[%s2816_s0 + $0x710] sm:$0xff]  ;;  %708 = vst [vmem:[%s2821_s30 + $0x378] sm:$0xff] %v707_v63 }
  0x6f   : > { %710 = vst [vmem:[%s2821_s30 + $0x380] sm:$0xff] %v709_v0  ;;  %712 = vst [vmem:[%s2821_s30 + $0x388] sm:$0xff] %v711_v1  ;;  %v713_v2 = vld [vmem:[%s2816_s0 + $0x720] sm:$0xff]  ;;  %v715_v3 = vld [vmem:[%s2816_s0 + $0x730] sm:$0xff] }
  0x70   : > { %v717_v4 = vld [vmem:[%s2816_s0 + $0x740] sm:$0xff]  ;;  %714 = vst [vmem:[%s2821_s30 + $0x390] sm:$0xff] %v713_v2  ;;  %716 = vst [vmem:[%s2821_s30 + $0x398] sm:$0xff] %v715_v3  ;;  %v719_v5 = vld [vmem:[%s2816_s0 + $0x750] sm:$0xff] }
  0x71   : > { %718 = vst [vmem:[%s2821_s30 + $0x3a0] sm:$0xff] %v717_v4  ;;  %v721_v6 = vld [vmem:[%s2816_s0 + $0x760] sm:$0xff]  ;;  %v723_v7 = vld [vmem:[%s2816_s0 + $0x770] sm:$0xff]  ;;  %720 = vst [vmem:[%s2821_s30 + $0x3a8] sm:$0xff] %v719_v5 }
  0x72   : > { %722 = vst [vmem:[%s2821_s30 + $0x3b0] sm:$0xff] %v721_v6  ;;  %724 = vst [vmem:[%s2821_s30 + $0x3b8] sm:$0xff] %v723_v7  ;;  %v725_v8 = vld [vmem:[%s2816_s0 + $0x780] sm:$0xff]  ;;  %v727_v9 = vld [vmem:[%s2816_s0 + $0x790] sm:$0xff] }
  0x73   : > { %v729_v10 = vld [vmem:[%s2816_s0 + $0x7a0] sm:$0xff]  ;;  %726 = vst [vmem:[%s2821_s30 + $0x3c0] sm:$0xff] %v725_v8  ;;  %728 = vst [vmem:[%s2821_s30 + $0x3c8] sm:$0xff] %v727_v9  ;;  %v731_v11 = vld [vmem:[%s2816_s0 + $0x7b0] sm:$0xff] }
  0x74   : > { %730 = vst [vmem:[%s2821_s30 + $0x3d0] sm:$0xff] %v729_v10  ;;  %v733_v12 = vld [vmem:[%s2816_s0 + $0x7c0] sm:$0xff]  ;;  %v735_v13 = vld [vmem:[%s2816_s0 + $0x7d0] sm:$0xff]  ;;  %732 = vst [vmem:[%s2821_s30 + $0x3d8] sm:$0xff] %v731_v11 }
  0x75   : > { %734 = vst [vmem:[%s2821_s30 + $0x3e0] sm:$0xff] %v733_v12  ;;  %736 = vst [vmem:[%s2821_s30 + $0x3e8] sm:$0xff] %v735_v13  ;;  %v737_v14 = vld [vmem:[%s2816_s0 + $0x7e0] sm:$0xff]  ;;  %v739_v15 = vld [vmem:[%s2816_s0 + $0x7f0] sm:$0xff] }
  0x76   : > { %738 = vst [vmem:[%s2821_s30 + $0x3f0] sm:$0xff] %v737_v14  ;;  %740 = vst [vmem:[%s2821_s30 + $0x3f8] sm:$0xff] %v739_v15 }
  0x77 PF: > { %p2133_p0 = scmp.ge.s32.totalorder %s2666_s19, 1  ;;  %p745_p1 = scmp.lt.s32.totalorder %s2666_s19, 9 }
  0x79   : > { %p746_p2 = pnand %p2133_p0, %p745_p1 }
  0x7a   : > { %s752_s28 = sand.u32 (!%p746_p2), 1, %s2642_s13   ;;  %s759_s20 = sand.u32 (!%p746_p2), 1, %s2634_s11  }
  0x7b   : > { %749 = sbr.rel (%p746_p2) target bundleno = 503 (0x1f7), region = 81  ;;  %s2134_s25 = sshll.u32 (!%p746_p2), %s752_s28, 7 }
  0x7c   : > { %s2135_s29 = sshll.u32 (!%p746_p2), %s759_s20, 10  ;;  %s780_s3 = sand.u32 (!%p746_p2), 1, %s2626_s9  }
  0x7d   : > { %s2136_s7 = sshll.u32 (!%p746_p2), %s780_s3, 5  ;;  %s3081_s0 = scalar_lea.vmem (!%p746_p2), [#allocation3], %s2134_s25 }
  0x7e   : > { %s3083_s8 = scalar_lea.vmem (!%p746_p2), [#allocation4], %s2135_s29  ;;  %s3085_s23 = scalar_lea.vmem (!%p746_p2), [#allocation5], %s2136_s7 }
  0x7f   : > { %p2137_p3 = scmp.ne.s32.totalorder (!%p746_p2), %s2650_s15, 0 }
  0x81   : > { %792 = sbr.rel (%p2137_p3) target bundleno = 139 (0x8b), region = 93 }
  0x86   : > { %v2668_v16 = vmov 0.0  }
  0x87   : > { %793 = vst [vmem:[#allocation2 + $0x30] sm:$0xff] %v2668_v16  ;;  %794 = vst [vmem:[#allocation2] sm:$0xff] %v2668_v16 }
  0x88   : > { %795 = vst [vmem:[#allocation2 + $0x18] sm:$0xff] %v2668_v16  ;;  %796 = vst [vmem:[#allocation2 + $0x10] sm:$0xff] %v2668_v16 }
  0x89   : > { %797 = vst [vmem:[#allocation2 + $0x8] sm:$0xff] %v2668_v16  ;;  %798 = vst [vmem:[#allocation2 + $0x20] sm:$0xff] %v2668_v16 }
  0x8a   : > { %799 = vst [vmem:[#allocation2 + $0x28] sm:$0xff] %v2668_v16  ;;  %800 = vst [vmem:[#allocation2 + $0x38] sm:$0xff] %v2668_v16 }
  0x8b PF: > { %v2388_v17 = vld [vmem:[%s3083_s8 + $0x74] ss:$8 sps:$4 sm:$0xff]   ;;  %v2392_v19 = vld [vmem:[%s3083_s8 + $0x70] ss:$8 sps:$4 sm:$0xff]   ;;  %v2394_v21 = vld [vmem:[%s3083_s8 + $0x64] ss:$8 sps:$4 sm:$0xff]  }
  0x8c   : > { %v2390_v18 = vld [vmem:[%s3083_s8 + $0x174] ss:$8 sps:$4 sm:$0xff]   ;;  %1673 = vmatprep.subr.bf16.mxu0 %v2388_v17  ;;  %v2393_v20 = vld [vmem:[%s3083_s8 + $0x170] ss:$8 sps:$4 sm:$0xff]   ;;  %v2396_v22 = vld [vmem:[%s3083_s8 + $0x164] ss:$8 sps:$4 sm:$0xff]  }
  0x8d   : > { %1726 = vmatprep.subr.bf16.mxu1 %v2390_v18  ;;  %1674 = vmatpush1.bf16.msra.mxu0 %v2392_v19  ;;  %v2398_v23 = vld [vmem:[%s3083_s8 + $0x60] ss:$8 sps:$4 sm:$0xff]   ;;  %v2400_v25 = vld [vmem:[%s3083_s8 + $0x54] ss:$8 sps:$4 sm:$0xff]   ;;  %v2404_v27 = vld [vmem:[%s3083_s8 + $0x50] ss:$8 sps:$4 sm:$0xff]  }
  0x8e   : > { %1727 = vmatpush1.bf16.msra.mxu1 %v2393_v20  ;;  %1675 = vmatprep.subr.bf16.mxu0 %v2394_v21  ;;  %v2399_v24 = vld [vmem:[%s3083_s8 + $0x160] ss:$8 sps:$4 sm:$0xff]   ;;  %v2402_v26 = vld [vmem:[%s3083_s8 + $0x154] ss:$8 sps:$4 sm:$0xff]   ;;  %v2405_v28 = vld [vmem:[%s3083_s8 + $0x150] ss:$8 sps:$4 sm:$0xff]  }
  0x8f   : > { %1728 = vmatprep.subr.bf16.mxu1 %v2396_v22  ;;  %v2406_v29 = vld [vmem:[%s3083_s8 + $0x44] ss:$8 sps:$4 sm:$0xff]   ;;  %v2410_v31 = vld [vmem:[%s3083_s8 + $0x40] ss:$8 sps:$4 sm:$0xff]   ;;  %v2412_v33 = vld [vmem:[%s3083_s8 + $0x34] ss:$8 sps:$4 sm:$0xff]  }
  0x90   : > { %v2408_v30 = vld [vmem:[%s3083_s8 + $0x144] ss:$8 sps:$4 sm:$0xff]   ;;  %v2411_v32 = vld [vmem:[%s3083_s8 + $0x140] ss:$8 sps:$4 sm:$0xff]   ;;  %v2414_v34 = vld [vmem:[%s3083_s8 + $0x134] ss:$8 sps:$4 sm:$0xff]  }
  0x91   : > { %1676 = vmatpush1.bf16.msra.mxu0 %v2398_v23  ;;  %v2416_v35 = vld [vmem:[%s3083_s8 + $0x30] ss:$8 sps:$4 sm:$0xff]   ;;  %v2418_v37 = vld [vmem:[%s3083_s8 + $0x24] ss:$8 sps:$4 sm:$0xff]   ;;  %v2422_v39 = vld [vmem:[%s3083_s8 + $0x20] ss:$8 sps:$4 sm:$0xff]  }
  0x92   : > { %1729 = vmatpush1.bf16.msra.mxu1 %v2399_v24  ;;  %1677 = vmatprep.subr.bf16.mxu0 %v2400_v25  ;;  %v2417_v36 = vld [vmem:[%s3083_s8 + $0x130] ss:$8 sps:$4 sm:$0xff]   ;;  %v2420_v38 = vld [vmem:[%s3083_s8 + $0x124] ss:$8 sps:$4 sm:$0xff]   ;;  %v2423_v40 = vld [vmem:[%s3083_s8 + $0x120] ss:$8 sps:$4 sm:$0xff]  }
  0x93   : > { %1730 = vmatprep.subr.bf16.mxu1 %v2402_v26  ;;  %v2424_v41 = vld [vmem:[%s3083_s8 + $0x14] ss:$8 sps:$4 sm:$0xff]   ;;  %v2428_v43 = vld [vmem:[%s3083_s8 + $0x10] ss:$8 sps:$4 sm:$0xff]   ;;  %v2430_v45 = vld [vmem:[%s3083_s8 + $0x4] ss:$8 sps:$4 sm:$0xff]  }
  0x94   : > { %v2426_v42 = vld [vmem:[%s3083_s8 + $0x114] ss:$8 sps:$4 sm:$0xff]   ;;  %v2429_v44 = vld [vmem:[%s3083_s8 + $0x110] ss:$8 sps:$4 sm:$0xff]   ;;  %v2432_v46 = vld [vmem:[%s3083_s8 + $0x104] ss:$8 sps:$4 sm:$0xff]  }
  0x95   : > { %1678 = vmatpush1.bf16.msra.mxu0 %v2404_v27  ;;  %v2434_v47 = vld [vmem:[%s3083_s8] ss:$8 sps:$4 sm:$0xff]   ;;  %v2436_v49 = vld [vmem:[%s3083_s8 + $0xf4] ss:$8 sps:$4 sm:$0xff]   ;;  %v2440_v51 = vld [vmem:[%s3083_s8 + $0xf0] ss:$8 sps:$4 sm:$0xff]  }
  0x96   : > { %1731 = vmatpush1.bf16.msra.mxu1 %v2405_v28  ;;  %1679 = vmatprep.subr.bf16.mxu0 %v2406_v29  ;;  %v2435_v48 = vld [vmem:[%s3083_s8 + $0x100] ss:$8 sps:$4 sm:$0xff]   ;;  %v2438_v50 = vld [vmem:[%s3083_s8 + $0x1f4] ss:$8 sps:$4 sm:$0xff]   ;;  %v2441_v52 = vld [vmem:[%s3083_s8 + $0x1f0] ss:$8 sps:$4 sm:$0xff]  }
  0x97   : > { %1732 = vmatprep.subr.bf16.mxu1 %v2408_v30  ;;  %v2442_v53 = vld [vmem:[%s3083_s8 + $0xe4] ss:$8 sps:$4 sm:$0xff]   ;;  %v2446_v55 = vld [vmem:[%s3083_s8 + $0xe0] ss:$8 sps:$4 sm:$0xff]   ;;  %v2448_v57 = vld [vmem:[%s3083_s8 + $0xd4] ss:$8 sps:$4 sm:$0xff]  }
  0x98   : > { %v2444_v54 = vld [vmem:[%s3083_s8 + $0x1e4] ss:$8 sps:$4 sm:$0xff]   ;;  %v2447_v56 = vld [vmem:[%s3083_s8 + $0x1e0] ss:$8 sps:$4 sm:$0xff]   ;;  %v2450_v58 = vld [vmem:[%s3083_s8 + $0x1d4] ss:$8 sps:$4 sm:$0xff]  }
  0x99   : > { %1680 = vmatpush1.bf16.msra.mxu0 %v2410_v31  ;;  %v2452_v59 = vld [vmem:[%s3083_s8 + $0xd0] ss:$8 sps:$4 sm:$0xff]   ;;  %v2454_v61 = vld [vmem:[%s3083_s8 + $0xc4] ss:$8 sps:$4 sm:$0xff]   ;;  %v2458_v63 = vld [vmem:[%s3083_s8 + $0xc0] ss:$8 sps:$4 sm:$0xff]  }
  0x9a   : > { %1733 = vmatpush1.bf16.msra.mxu1 %v2411_v32  ;;  %1681 = vmatprep.subr.bf16.mxu0 %v2412_v33  ;;  %v2453_v60 = vld [vmem:[%s3083_s8 + $0x1d0] ss:$8 sps:$4 sm:$0xff]   ;;  %v2456_v62 = vld [vmem:[%s3083_s8 + $0x1c4] ss:$8 sps:$4 sm:$0xff]   ;;  %v2459_v0 = vld [vmem:[%s3083_s8 + $0x1c0] ss:$8 sps:$4 sm:$0xff]  }
  0x9b   : > { %1734 = vmatprep.subr.bf16.mxu1 %v2414_v34  ;;  %v809_v1 = vld [vmem:[%s3081_s0] sm:$0xff]  ;;  %v810_v3 = vld [vmem:[%s3081_s0 + $0x8] sm:$0xff]  ;;  %v2460_v5 = vld [vmem:[%s3083_s8 + $0xb4] ss:$8 sps:$4 sm:$0xff]   ;;  %p2282_p4 = scmp.ne.s32.totalorder %s2650_s15, 3 }
  0x9c   : > { %v813_v2 = vld [vmem:[%s3081_s0 + $0x20] sm:$0xff]  ;;  %v814_v4 = vld [vmem:[%s3081_s0 + $0x28] sm:$0xff]  ;;  %v2462_v7 = vld [vmem:[%s3083_s8 + $0x1b4] ss:$8 sps:$4 sm:$0xff]  }
  0x9d   : > { %1682 = vmatpush1.bf16.msra.mxu0 %v2416_v35  ;;  %v2139_v6 = vcombine.high %v809_v1, %v813_v2  ;;  %v2141_v8 = vcombine.high %v810_v3, %v814_v4  ;;  %v2464_v9 = vld [vmem:[%s3083_s8 + $0xb0] ss:$8 sps:$4 sm:$0xff]   ;;  %v2466_v11 = vld [vmem:[%s3083_s8 + $0xa4] ss:$8 sps:$4 sm:$0xff]   ;;  %v2470_v13 = vld [vmem:[%s3083_s8 + $0xa0] ss:$8 sps:$4 sm:$0xff]   ;;  %v2138_v25 = vcombine.low %v809_v1, %v813_v2  ;;  %v2140_v26 = vcombine.low %v810_v3, %v814_v4 }
  0x9e   : > { %1735 = vmatpush1.bf16.msra.mxu1 %v2417_v36  ;;  %1683 = vmatprep.subr.bf16.mxu0 %v2418_v37  ;;  %v2465_v10 = vld [vmem:[%s3083_s8 + $0x1b0] ss:$8 sps:$4 sm:$0xff]   ;;  %v2468_v12 = vld [vmem:[%s3083_s8 + $0x1a4] ss:$8 sps:$4 sm:$0xff]   ;;  %v2471_v14 = vld [vmem:[%s3083_s8 + $0x1a0] ss:$8 sps:$4 sm:$0xff]  }
  0x9f   : > { %1736 = vmatprep.subr.bf16.mxu1 %v2420_v38  ;;  %1705 = vmatprep.mubr.bf16.mxu0 %v2139_v6  ;;  %v2472_v15 = vld [vmem:[%s3083_s8 + $0x94] ss:$8 sps:$4 sm:$0xff]   ;;  %v2476_v17 = vld [vmem:[%s3083_s8 + $0x90] ss:$8 sps:$4 sm:$0xff]   ;;  %v2478_v19 = vld [vmem:[%s3083_s8 + $0x84] ss:$8 sps:$4 sm:$0xff]  }
  0xa0   : > { %1758 = vmatprep.mubr.bf16.mxu1 %v2141_v8  ;;  %v2474_v16 = vld [vmem:[%s3083_s8 + $0x194] ss:$8 sps:$4 sm:$0xff]   ;;  %v2477_v18 = vld [vmem:[%s3083_s8 + $0x190] ss:$8 sps:$4 sm:$0xff]   ;;  %v2480_v20 = vld [vmem:[%s3083_s8 + $0x184] ss:$8 sps:$4 sm:$0xff]  }
  0xa1   : > { %1684 = vmatpush1.bf16.msra.mxu0 %v2422_v39  ;;  %v2482_v21 = vld [vmem:[%s3083_s8 + $0x80] ss:$8 sps:$4 sm:$0xff]   ;;  %v2486_v23 = vld [vmem:[%s3083_s8 + $0x274] ss:$8 sps:$4 sm:$0xff]   ;;  %v2484_v27 = vld [vmem:[%s3083_s8 + $0x270] ss:$8 sps:$4 sm:$0xff]  }
  0xa2   : > { %1737 = vmatpush1.bf16.msra.mxu1 %v2423_v40  ;;  %1685 = vmatprep.subr.bf16.mxu0 %v2424_v41  ;;  %v2483_v22 = vld [vmem:[%s3083_s8 + $0x180] ss:$8 sps:$4 sm:$0xff]   ;;  %v2489_v24 = vld [vmem:[%s3083_s8 + $0x374] ss:$8 sps:$4 sm:$0xff]   ;;  %v2487_v28 = vld [vmem:[%s3083_s8 + $0x370] ss:$8 sps:$4 sm:$0xff]  }
  0xa3   : > { %1738 = vmatprep.subr.bf16.mxu1 %v2426_v42  ;;  %v2492_v29 = vld [vmem:[%s3083_s8 + $0x264] ss:$8 sps:$4 sm:$0xff]   ;;  %v2490_v31 = vld [vmem:[%s3083_s8 + $0x260] ss:$8 sps:$4 sm:$0xff]   ;;  %v2498_v33 = vld [vmem:[%s3083_s8 + $0x254] ss:$8 sps:$4 sm:$0xff]  }
  0xa4   : > { %v2495_v30 = vld [vmem:[%s3083_s8 + $0x364] ss:$8 sps:$4 sm:$0xff]   ;;  %v2493_v32 = vld [vmem:[%s3083_s8 + $0x360] ss:$8 sps:$4 sm:$0xff]   ;;  %v2501_v34 = vld [vmem:[%s3083_s8 + $0x354] ss:$8 sps:$4 sm:$0xff]  }
  0xa5   : > { %1686 = vmatpush1.bf16.msra.mxu0 %v2428_v43  ;;  %v2496_v35 = vld [vmem:[%s3083_s8 + $0x250] ss:$8 sps:$4 sm:$0xff]   ;;  %v2504_v37 = vld [vmem:[%s3083_s8 + $0x244] ss:$8 sps:$4 sm:$0xff]   ;;  %v2502_v39 = vld [vmem:[%s3083_s8 + $0x240] ss:$8 sps:$4 sm:$0xff]  }
  0xa6   : > { %1739 = vmatpush1.bf16.msra.mxu1 %v2429_v44  ;;  %1687 = vmatprep.subr.bf16.mxu0 %v2430_v45  ;;  %v2499_v36 = vld [vmem:[%s3083_s8 + $0x350] ss:$8 sps:$4 sm:$0xff]   ;;  %v2507_v38 = vld [vmem:[%s3083_s8 + $0x344] ss:$8 sps:$4 sm:$0xff]   ;;  %v2505_v40 = vld [vmem:[%s3083_s8 + $0x340] ss:$8 sps:$4 sm:$0xff]  }
  0xa7   : > { %1740 = vmatprep.subr.bf16.mxu1 %v2432_v46  ;;  %v2510_v41 = vld [vmem:[%s3083_s8 + $0x234] ss:$8 sps:$4 sm:$0xff]   ;;  %v2508_v43 = vld [vmem:[%s3083_s8 + $0x230] ss:$8 sps:$4 sm:$0xff]   ;;  %v817_v45 = vld [vmem:[%s3081_s0 + $0x40] sm:$0xff] }
  0xa8   : > { %v2513_v42 = vld [vmem:[%s3083_s8 + $0x334] ss:$8 sps:$4 sm:$0xff]   ;;  %v2511_v44 = vld [vmem:[%s3083_s8 + $0x330] ss:$8 sps:$4 sm:$0xff]   ;;  %v821_v46 = vld [vmem:[%s3081_s0 + $0x60] sm:$0xff] }
  0xa9   : > { %1688 = vmatpush1.bf16.msra.mxu0 %v2434_v47  ;;  %v818_v47 = vld [vmem:[%s3081_s0 + $0x48] sm:$0xff]  ;;  %v3202_v3 = vld [vmem:[%s3081_s0 + $0x38] sm:$0xff] }
  0xaa   : > { %1741 = vmatpush1.bf16.msra.mxu1 %v2435_v48  ;;  %1689 = vmatprep.subr.bf16.mxu0 %v2436_v49  ;;  %v822_v48 = vld [vmem:[%s3081_s0 + $0x68] sm:$0xff]  ;;  %v2537_v8 = vld [vmem:[%s3083_s8 + $0x3f4] ss:$8 sps:$4 sm:$0xff]  }
  0xab   : > { %1742 = vmatprep.subr.bf16.mxu1 %v2438_v50  ;;  %v2516_v49 = vld [vmem:[%s3083_s8 + $0x224] ss:$8 sps:$4 sm:$0xff]   ;;  %v2147_v50 = vcombine.high %v817_v45, %v821_v46  ;;  %v2529_v6 = vld [vmem:[%s3083_s8 + $0x300] ss:$8 sps:$4 sm:$0xff]  }
  0xac   : > { %v2531_v1 = vld [vmem:[%s3083_s8 + $0x304] ss:$8 sps:$4 sm:$0xff]  }
  0xad   : > { %1690 = vmatpush2.bf16.msra.mxu0 %v2440_v51  ;;  %v2149_v51 = vcombine.high %v818_v47, %v822_v48 }
  0xae   : > { %1743 = vmatpush2.bf16.msra.mxu1 %v2441_v52  ;;  %1691 = vmatprep.subr.bf16.mxu0 %v2442_v53  ;;  %v2146_v52 = vcombine.low %v817_v45, %v821_v46  ;;  %v2519_v53 = vld [vmem:[%s3083_s8 + $0x324] ss:$8 sps:$4 sm:$0xff]  }
  0xaf   : > { %1744 = vmatprep.subr.bf16.mxu1 %v2444_v54  ;;  %v2148_v54 = vcombine.low %v818_v47, %v822_v48 }
  0xb1   : > { %1692 = vmatpush2.bf16.msra.mxu0 %v2446_v55  ;;  %v2514_v55 = vld [vmem:[%s3083_s8 + $0x220] ss:$8 sps:$4 sm:$0xff]  }
  0xb2   : > { %1745 = vmatpush2.bf16.msra.mxu1 %v2447_v56  ;;  %1693 = vmatprep.subr.bf16.mxu0 %v2448_v57  ;;  %v2517_v56 = vld [vmem:[%s3083_s8 + $0x320] ss:$8 sps:$4 sm:$0xff]   ;;  %v2522_v57 = vld [vmem:[%s3083_s8 + $0x214] ss:$8 sps:$4 sm:$0xff]  }
  0xb3   : > { %1746 = vmatprep.subr.bf16.mxu1 %v2450_v58  ;;  %v2525_v58 = vld [vmem:[%s3083_s8 + $0x314] ss:$8 sps:$4 sm:$0xff]  }
  0xb5   : > { %1694 = vmatpush2.bf16.msra.mxu0 %v2452_v59  ;;  %v2520_v59 = vld [vmem:[%s3083_s8 + $0x210] ss:$8 sps:$4 sm:$0xff]  }
  0xb6   : > { %1747 = vmatpush2.bf16.msra.mxu1 %v2453_v60  ;;  %1695 = vmatprep.subr.bf16.mxu0 %v2454_v61  ;;  %v2523_v60 = vld [vmem:[%s3083_s8 + $0x310] ss:$8 sps:$4 sm:$0xff]  }
  0xb7   : > { %1748 = vmatprep.subr.bf16.mxu1 %v2456_v62  ;;  %v3189_v61 = vld [vmem:[%s3081_s0 + $0x10] sm:$0xff] }
  0xb8   : > { %v3192_v62 = vld [vmem:[%s3081_s0 + $0x30] sm:$0xff] }
  0xb9   : > { %1696 = vmatpush2.bf16.msra.mxu0 %v2458_v63  ;;  %v3195_v63 = vld [vmem:[%s3081_s0 + $0x18] sm:$0xff]  ;;  %v2143_v2 = vcombine.high %v3189_v61, %v3192_v62 }
  0xba   : > { %1749 = vmatpush2.bf16.msra.mxu1 %v2459_v0  ;;  %1697 = vmatprep.subr.bf16.mxu0 %v2460_v5  ;;  %v2528_v0 = vld [vmem:[%s3083_s8 + $0x204] ss:$8 sps:$4 sm:$0xff]   ;;  %v2145_v4 = vcombine.high %v3195_v63, %v3202_v3  ;;  %v2526_v5 = vld [vmem:[%s3083_s8 + $0x200] ss:$8 sps:$4 sm:$0xff]  }
  0xbb   : > { %1750 = vmatprep.subr.bf16.mxu1 %v2462_v7  ;;  %v2534_v7 = vld [vmem:[%s3083_s8 + $0x2f4] ss:$8 sps:$4 sm:$0xff]  }
  0xbd   : > { %1698 = vmatpush2.bf16.msra.mxu0 %v2464_v9  ;;  %v2532_v9 = vld [vmem:[%s3083_s8 + $0x2f0] ss:$8 sps:$4 sm:$0xff]  }
  0xbe   : > { %1751 = vmatpush2.bf16.msra.mxu1 %v2465_v10  ;;  %1699 = vmatprep.subr.bf16.mxu0 %v2466_v11  ;;  %v2535_v10 = vld [vmem:[%s3083_s8 + $0x3f0] ss:$8 sps:$4 sm:$0xff]   ;;  %v2540_v11 = vld [vmem:[%s3083_s8 + $0x2e4] ss:$8 sps:$4 sm:$0xff]  }
  0xbf   : > { %1752 = vmatprep.subr.bf16.mxu1 %v2468_v12  ;;  %v2543_v12 = vld [vmem:[%s3083_s8 + $0x3e4] ss:$8 sps:$4 sm:$0xff]  }
  0xc1   : > { %1700 = vmatpush2.bf16.msra.mxu0 %v2470_v13  ;;  %v2538_v13 = vld [vmem:[%s3083_s8 + $0x2e0] ss:$8 sps:$4 sm:$0xff]  }
  0xc2   : > { %1753 = vmatpush2.bf16.msra.mxu1 %v2471_v14  ;;  %1701 = vmatprep.subr.bf16.mxu0 %v2472_v15  ;;  %v2541_v14 = vld [vmem:[%s3083_s8 + $0x3e0] ss:$8 sps:$4 sm:$0xff]   ;;  %v2546_v15 = vld [vmem:[%s3083_s8 + $0x2d4] ss:$8 sps:$4 sm:$0xff]  }
  0xc3   : > { %1754 = vmatprep.subr.bf16.mxu1 %v2474_v16  ;;  %v2549_v16 = vld [vmem:[%s3083_s8 + $0x3d4] ss:$8 sps:$4 sm:$0xff]  }
  0xc5   : > { %1702 = vmatpush2.bf16.msra.mxu0 %v2476_v17  ;;  %v2544_v17 = vld [vmem:[%s3083_s8 + $0x2d0] ss:$8 sps:$4 sm:$0xff]  }
  0xc6   : > { %1755 = vmatpush2.bf16.msra.mxu1 %v2477_v18  ;;  %1703 = vmatprep.subr.bf16.mxu0 %v2478_v19  ;;  %v2547_v18 = vld [vmem:[%s3083_s8 + $0x3d0] ss:$8 sps:$4 sm:$0xff]   ;;  %v2552_v19 = vld [vmem:[%s3083_s8 + $0x2c4] ss:$8 sps:$4 sm:$0xff]  }
  0xc7   : > { %1756 = vmatprep.subr.bf16.mxu1 %v2480_v20  ;;  %v2555_v20 = vld [vmem:[%s3083_s8 + $0x3c4] ss:$8 sps:$4 sm:$0xff]  }
  0xc9   : > { %1704 = vmatpush2.bf16.msra.mxu0 %v2482_v21  ;;  %v2550_v21 = vld [vmem:[%s3083_s8 + $0x2c0] ss:$8 sps:$4 sm:$0xff]  }
  0xca   : > { %1757 = vmatpush2.bf16.msra.mxu1 %v2483_v22  ;;  %1779 = vmatprep.subr.bf16.mxu0 %v2486_v23  ;;  %v2553_v22 = vld [vmem:[%s3083_s8 + $0x3c0] ss:$8 sps:$4 sm:$0xff]   ;;  %v2558_v23 = vld [vmem:[%s3083_s8 + $0x2b4] ss:$8 sps:$4 sm:$0xff]  }
  0xcb   : > { %1832 = vmatprep.subr.bf16.mxu1 %v2489_v24  ;;  %v2561_v24 = vld [vmem:[%s3083_s8 + $0x3b4] ss:$8 sps:$4 sm:$0xff]  }
  0xcc   : > { %1706 = vmatmul.mubr.bf16.vlgmr.msra.gmra.mxu0 %v2138_v25  ;;  %v2556_v25 = vld [vmem:[%s3083_s8 + $0x2b0] ss:$8 sps:$4 sm:$0xff]  }
  0xcd   : > { %1759 = vmatmul.mubr.bf16.vlgmr.msra.gmra.mxu1 %v2140_v26  ;;  %1780 = vmatpush1.bf16.msra.mxu0 %v2484_v27  ;;  %v2559_v26 = vld [vmem:[%s3083_s8 + $0x3b0] ss:$8 sps:$4 sm:$0xff]   ;;  %v2564_v27 = vld [vmem:[%s3083_s8 + $0x2a4] ss:$8 sps:$4 sm:$0xff]  }
  0xce   : > { %1833 = vmatpush1.bf16.msra.mxu1 %v2487_v28  ;;  %1781 = vmatprep.subr.bf16.mxu0 %v2492_v29  ;;  %v2567_v28 = vld [vmem:[%s3083_s8 + $0x3a4] ss:$8 sps:$4 sm:$0xff]   ;;  %v2562_v29 = vld [vmem:[%s3083_s8 + $0x2a0] ss:$8 sps:$4 sm:$0xff]  }
  0xcf   : > { %1834 = vmatprep.subr.bf16.mxu1 %v2495_v30  ;;  %1715 = vmatprep.mubr.bf16.mxu0 %v2147_v50  ;;  %v2565_v30 = vld [vmem:[%s3083_s8 + $0x3a0] ss:$8 sps:$4 sm:$0xff]  }
  0xd0   : > { %1768 = vmatprep.mubr.bf16.mxu1 %v2149_v51 }
  0xd1   : > { %1782 = vmatpush1.bf16.msra.mxu0 %v2490_v31  ;;  %v2570_v31 = vld [vmem:[%s3083_s8 + $0x294] ss:$8 sps:$4 sm:$0xff]  }
  0xd2   : > { %1835 = vmatpush1.bf16.msra.mxu1 %v2493_v32  ;;  %1783 = vmatprep.subr.bf16.mxu0 %v2498_v33  ;;  %v2573_v32 = vld [vmem:[%s3083_s8 + $0x394] ss:$8 sps:$4 sm:$0xff]   ;;  %v2568_v33 = vld [vmem:[%s3083_s8 + $0x290] ss:$8 sps:$4 sm:$0xff]  }
  0xd3   : > { %1836 = vmatprep.subr.bf16.mxu1 %v2501_v34  ;;  %v2571_v34 = vld [vmem:[%s3083_s8 + $0x390] ss:$8 sps:$4 sm:$0xff]  }
  0xd4   : > { %1716 = vmatmul.mubr.bf16.gmra.mxu0 %v2146_v52 }
  0xd5   : > { %1784 = vmatpush1.bf16.msra.mxu0 %v2496_v35  ;;  %1769 = vmatmul.mubr.bf16.gmra.mxu1 %v2148_v54  ;;  %v2576_v35 = vld [vmem:[%s3083_s8 + $0x284] ss:$8 sps:$4 sm:$0xff]  }
  0xd6   : > { %1837 = vmatpush1.bf16.msra.mxu1 %v2499_v36  ;;  %1785 = vmatprep.subr.bf16.mxu0 %v2504_v37  ;;  %v2579_v36 = vld [vmem:[%s3083_s8 + $0x384] ss:$8 sps:$4 sm:$0xff]   ;;  %v2574_v37 = vld [vmem:[%s3083_s8 + $0x280] ss:$8 sps:$4 sm:$0xff]  }
  0xd7   : > { %1838 = vmatprep.subr.bf16.mxu1 %v2507_v38  ;;  %1811 = vmatprep.mubr.bf16.mxu0 %v2143_v2  ;;  %v2577_v38 = vld [vmem:[%s3083_s8 + $0x380] ss:$8 sps:$4 sm:$0xff]  }
  0xd8   : > { %1864 = vmatprep.mubr.bf16.mxu1 %v2145_v4 }
  0xd9   : > { %1786 = vmatpush1.bf16.msra.mxu0 %v2502_v39  ;;  %v819_v39 = vld [vmem:[%s3081_s0 + $0x50] sm:$0xff] }
  0xda   : > { %1839 = vmatpush1.bf16.msra.mxu1 %v2505_v40  ;;  %1787 = vmatprep.subr.bf16.mxu0 %v2510_v41  ;;  %v823_v40 = vld [vmem:[%s3081_s0 + $0x70] sm:$0xff]  ;;  %v820_v41 = vld [vmem:[%s3081_s0 + $0x58] sm:$0xff] }
  0xdb   : > { %1840 = vmatprep.subr.bf16.mxu1 %v2513_v42  ;;  %v824_v42 = vld [vmem:[%s3081_s0 + $0x78] sm:$0xff]  ;;  %v2151_v45 = vcombine.high %v819_v39, %v823_v40  ;;  %v2150_v47 = vcombine.low %v819_v39, %v823_v40  ;;  %v806_v40 = vld [vmem:[#allocation2 + $0x20] sm:$0xff] }
  0xdc   : > { %v2153_v46 = vcombine.high %v820_v41, %v824_v42  ;;  %v2152_v48 = vcombine.low %v820_v41, %v824_v42 }
  0xdd   : > { %1788 = vmatpush1.bf16.msra.mxu0 %v2508_v43  ;;  %v2142_v43 = vcombine.low %v3189_v61, %v3192_v62 }
  0xde   : > { %1841 = vmatpush1.bf16.msra.mxu1 %v2511_v44  ;;  %1789 = vmatprep.subr.bf16.mxu0 %v2516_v49  ;;  %v2144_v44 = vcombine.low %v3195_v63, %v3202_v3 }
  0xdf   : > { %1842 = vmatprep.subr.bf16.mxu1 %v2519_v53 }
  0xe1   : > { %1790 = vmatpush1.bf16.msra.mxu0 %v2514_v55 }
  0xe2   : > { %1843 = vmatpush1.bf16.msra.mxu1 %v2517_v56  ;;  %1791 = vmatprep.subr.bf16.mxu0 %v2522_v57 }
  0xe3   : > { %1844 = vmatprep.subr.bf16.mxu1 %v2525_v58 }
  0xe5   : > { %1792 = vmatpush1.bf16.msra.mxu0 %v2520_v59 }
  0xe6   : > { %1845 = vmatpush1.bf16.msra.mxu1 %v2523_v60  ;;  %1793 = vmatprep.subr.bf16.mxu0 %v2528_v0 }
  0xe7   : > { %1846 = vmatprep.subr.bf16.mxu1 %v2531_v1 }
  0xe9   : > { %1794 = vmatpush1.bf16.msra.mxu0 %v2526_v5 }
  0xea   : > { %1847 = vmatpush1.bf16.msra.mxu1 %v2529_v6  ;;  %1795 = vmatprep.subr.bf16.mxu0 %v2534_v7  ;;  %v801_v6 = vld [vmem:[#allocation2 + $0x30] sm:$0xff] }
  0xeb   : > { %1848 = vmatprep.subr.bf16.mxu1 %v2537_v8 }
  0xed   : > { %1796 = vmatpush2.bf16.msra.mxu0 %v2532_v9 }
  0xee   : > { %1849 = vmatpush2.bf16.msra.mxu1 %v2535_v10  ;;  %1797 = vmatprep.subr.bf16.mxu0 %v2540_v11 }
  0xef   : > { %1850 = vmatprep.subr.bf16.mxu1 %v2543_v12  ;;  %v802_v12 = vld [vmem:[#allocation2] sm:$0xff] }
  0xf1   : > { %1798 = vmatpush2.bf16.msra.mxu0 %v2538_v13 }
  0xf2   : > { %1851 = vmatpush2.bf16.msra.mxu1 %v2541_v14  ;;  %1799 = vmatprep.subr.bf16.mxu0 %v2546_v15 }
  0xf3   : > { %1852 = vmatprep.subr.bf16.mxu1 %v2549_v16 }
  0xf5   : > { %1800 = vmatpush2.bf16.msra.mxu0 %v2544_v17 }
  0xf6   : > { %1853 = vmatpush2.bf16.msra.mxu1 %v2547_v18  ;;  %1801 = vmatprep.subr.bf16.mxu0 %v2552_v19  ;;  %v803_v19 = vld [vmem:[#allocation2 + $0x18] sm:$0xff] }
  0xf7   : > { %1854 = vmatprep.subr.bf16.mxu1 %v2555_v20 }
  0xf9   : > { %1802 = vmatpush2.bf16.msra.mxu0 %v2550_v21 }
  0xfa   : > { %1855 = vmatpush2.bf16.msra.mxu1 %v2553_v22  ;;  %1803 = vmatprep.subr.bf16.mxu0 %v2558_v23 }
  0xfb   : > { %1856 = vmatprep.subr.bf16.mxu1 %v2561_v24 }
  0xfd   : > { %1804 = vmatpush2.bf16.msra.mxu0 %v2556_v25 }
  0xfe   : > { %1857 = vmatpush2.bf16.msra.mxu1 %v2559_v26  ;;  %1805 = vmatprep.subr.bf16.mxu0 %v2564_v27  ;;  %v804_v26 = vld [vmem:[#allocation2 + $0x10] sm:$0xff] }
  0xff   : > { %1858 = vmatprep.subr.bf16.mxu1 %v2567_v28 }
 0x101   : > { %1806 = vmatpush2.bf16.msra.mxu0 %v2562_v29 }
 0x102   : > { %1859 = vmatpush2.bf16.msra.mxu1 %v2565_v30  ;;  %1807 = vmatprep.subr.bf16.mxu0 %v2570_v31 }
 0x103   : > { %1860 = vmatprep.subr.bf16.mxu1 %v2573_v32 }
 0x105   : > { %1808 = vmatpush2.bf16.msra.mxu0 %v2568_v33  ;;  %v805_v33 = vld [vmem:[#allocation2 + $0x8] sm:$0xff] }
 0x106   : > { %1861 = vmatpush2.bf16.msra.mxu1 %v2571_v34  ;;  %1809 = vmatprep.subr.bf16.mxu0 %v2576_v35 }
 0x107   : > { %1862 = vmatprep.subr.bf16.mxu1 %v2579_v36 }
 0x109   : > { %1810 = vmatpush2.bf16.msra.mxu0 %v2574_v37 }
 0x10a   : > { %1863 = vmatpush2.bf16.msra.mxu1 %v2577_v38 }
 0x10c   : > { %1812 = vmatmul.mubr.bf16.vlgmr.msra.gmra.mxu0 %v2142_v43 }
 0x10d   : > { %1865 = vmatmul.mubr.bf16.vlgmr.msra.gmra.mxu1 %v2144_v44  ;;  %1821 = vmatprep.mubr.bf16.mxu0 %v2151_v45 }
 0x10e   : > { %1874 = vmatprep.mubr.bf16.mxu1 %v2153_v46 }
 0x114   : > { %1822 = vmatmul.mubr.bf16.gmra.mxu0 %v2150_v47  ;;  %v807_v47 = vld [vmem:[#allocation2 + $0x28] sm:$0xff] }
 0x115   : > { %1875 = vmatmul.mubr.bf16.gmra.mxu1 %v2152_v48 }
 0x18c   : > { %v1707_v49 = vpop.f32.mrf.mxu0 }
 0x18d   : > { %v1760_v50 = vpop.f32.mrf.mxu1 }
 0x18e   : > { %v1709_v51 = vpop.f32.mrf.mxu0  ;;  %v1761_v1 = vadd.f32 %v1760_v50, %v1707_v49 }
 0x18f   : > { %v1762_v52 = vpop.f32.mrf.mxu1 }
 0x190   : > { %v1711_v53 = vpop.f32.mrf.mxu0  ;;  %v1763_v4 = vadd.f32 %v1762_v52, %v1709_v51  ;;  %v808_v52 = vld [vmem:[#allocation2 + $0x38] sm:$0xff] }
 0x191   : > { %v1764_v54 = vpop.f32.mrf.mxu1 }
 0x192   : > { %v1713_v55 = vpop.f32.mrf.mxu0  ;;  %v1765_v9 = vadd.f32 %v1764_v54, %v1711_v53 }
 0x193   : > { %v1766_v56 = vpop.f32.mrf.mxu1 }
 0x194   : > { %v1717_v57 = vpop.f32.mrf.mxu0  ;;  %v1767_v15 = vadd.f32 %v1766_v56, %v1713_v55 }
 0x195   : > { %v1770_v58 = vpop.f32.mrf.mxu1 }
 0x196   : > { %v1719_v59 = vpop.f32.mrf.mxu0  ;;  %v1771_v22 = vadd.f32 %v1770_v58, %v1717_v57 }
 0x197   : > { %v1772_v60 = vpop.f32.mrf.mxu1 }
 0x198   : > { %v1721_v61 = vpop.f32.mrf.mxu0  ;;  %v1773_v29 = vadd.f32 %v1772_v60, %v1719_v59 }
 0x199   : > { %v1774_v62 = vpop.f32.mrf.mxu1 }
 0x19a   : > { %v1723_v63 = vpop.f32.mrf.mxu0  ;;  %v1775_v36 = vadd.f32 %v1774_v62, %v1721_v61 }
 0x19b   : > { %v1776_v0 = vpop.f32.mrf.mxu1 }
 0x19c   : > { %v1777_v43 = vadd.f32 %v1776_v0, %v1723_v63 }
 0x1cc   : > { %v1813_v2 = vpop.f32.mrf.mxu0 }
 0x1cd   : > { %v1866_v3 = vpop.f32.mrf.mxu1  ;;  %v1814_v5 = vadd.f32 %v1813_v2, %v1761_v1 }
 0x1ce   : > { %v1815_v7 = vpop.f32.mrf.mxu0 }
 0x1cf   : > { %v1868_v8 = vpop.f32.mrf.mxu1  ;;  %v1867_v10 = vadd.f32 %v1866_v3, %v1814_v5  ;;  %v1816_v11 = vadd.f32 %v1815_v7, %v1763_v4 }
 0x1d0   : > { %v1817_v13 = vpop.f32.mrf.mxu0 }
 0x1d1   : > { %v1870_v14 = vpop.f32.mrf.mxu1  ;;  %v1885_v16 = vadd.f32 %v1867_v10, %v801_v6  ;;  %v1869_v17 = vadd.f32 %v1868_v8, %v1816_v11  ;;  %v1818_v18 = vadd.f32 %v1817_v13, %v1765_v9 }
 0x1d2   : > { %v1819_v20 = vpop.f32.mrf.mxu0 }
 0x1d3   : > { %v1872_v21 = vpop.f32.mrf.mxu1  ;;  %1893 = vst [vmem:[#allocation2 + $0x30] sm:$0xff] %v1885_v16  ;;  %v1886_v23 = vadd.f32 %v1869_v17, %v802_v12  ;;  %v1871_v24 = vadd.f32 %v1870_v14, %v1818_v18  ;;  %v1820_v25 = vadd.f32 %v1819_v20, %v1767_v15 }
 0x1d4   : > { %v1823_v27 = vpop.f32.mrf.mxu0 }
 0x1d5   : > { %v1876_v28 = vpop.f32.mrf.mxu1  ;;  %1894 = vst [vmem:[#allocation2] sm:$0xff] %v1886_v23  ;;  %v1887_v30 = vadd.f32 %v1871_v24, %v803_v19  ;;  %v1873_v31 = vadd.f32 %v1872_v21, %v1820_v25  ;;  %v1824_v32 = vadd.f32 %v1823_v27, %v1771_v22 }
 0x1d6   : > { %v1825_v34 = vpop.f32.mrf.mxu0 }
 0x1d7   : > { %v1878_v35 = vpop.f32.mrf.mxu1  ;;  %1895 = vst [vmem:[#allocation2 + $0x18] sm:$0xff] %v1887_v30  ;;  %v1888_v37 = vadd.f32 %v1873_v31, %v804_v26  ;;  %v1877_v38 = vadd.f32 %v1876_v28, %v1824_v32  ;;  %v1826_v39 = vadd.f32 %v1825_v34, %v1773_v29 }
 0x1d8   : > { %v1827_v41 = vpop.f32.mrf.mxu0 }
 0x1d9   : > { %v1880_v42 = vpop.f32.mrf.mxu1  ;;  %1896 = vst [vmem:[#allocation2 + $0x10] sm:$0xff] %v1888_v37  ;;  %v1889_v44 = vadd.f32 %v1877_v38, %v805_v33  ;;  %v1879_v45 = vadd.f32 %v1878_v35, %v1826_v39  ;;  %v1828_v46 = vadd.f32 %v1827_v41, %v1775_v36 }
 0x1da   : > { %v1829_v48 = vpop.f32.mrf.mxu0 }
 0x1db   : > { %1897 = vst [vmem:[#allocation2 + $0x8] sm:$0xff] %v1889_v44  ;;  %v1890_v49 = vadd.f32 %v1879_v45, %v806_v40  ;;  %v1881_v50 = vadd.f32 %v1880_v42, %v1828_v46  ;;  %v1830_v51 = vadd.f32 %v1829_v48, %v1777_v43  ;;  %v1882_v53 = vpop.f32.mrf.mxu1 }
 0x1dd   : > { %1898 = vst [vmem:[#allocation2 + $0x20] sm:$0xff] %v1890_v49  ;;  %v1891_v54 = vadd.f32 %v1881_v50, %v807_v47  ;;  %v1883_v55 = vadd.f32 %v1882_v53, %v1830_v51  ;;  %1904 = sbr.rel (%p2282_p4) target bundleno = 495 (0x1ef), region = 97 }
 0x1df   : > { %1899 = vst [vmem:[#allocation2 + $0x28] sm:$0xff] %v1891_v54  ;;  %v1892_v56 = vadd.f32 %v1883_v55, %v808_v52 }
 0x1e1   : > { %1900 = vst [vmem:[#allocation2 + $0x38] sm:$0xff] %v1892_v56 }
 0x1e2   : > { %v1905_v57 = vld [vmem:[#allocation2 + $0x30] sm:$0xff]  ;;  %v1906_v58 = vld [vmem:[#allocation2] sm:$0xff]  ;;  %v1907_v59 = vld [vmem:[#allocation2 + $0x18] sm:$0xff] }
 0x1e3   : > { %vm1913_vm0 = vcmp.ge.f32.partialorder %v1905_v57, 0.0  ;;  %vm1914_vm1 = vcmp.ge.f32.partialorder %v1906_v58, 0.0  ;;  %v1921_v60 = vmul.f32 0.2, %v1905_v57  ;;  %v1922_v61 = vmul.f32 0.2, %v1906_v58 }
 0x1e4   : > { %v1908_v62 = vld [vmem:[#allocation2 + $0x10] sm:$0xff]  ;;  %vm1915_vm2 = vcmp.ge.f32.partialorder %v1907_v59, 0.0  ;;  %v1923_v63 = vmul.f32 0.2, %v1907_v59  ;;  %v1909_v0 = vld [vmem:[#allocation2 + $0x8] sm:$0xff]  ;;  %v1910_v1 = vld [vmem:[#allocation2 + $0x20] sm:$0xff] }
 0x1e5   : > { %v1929_v2 = vsel %vm1913_vm0, %v1905_v57, %v1921_v60  ;;  %v1930_v3 = vsel %vm1914_vm1, %v1906_v58, %v1922_v61  ;;  %vm1916_vm3 = vcmp.ge.f32.partialorder %v1908_v62, 0.0  ;;  %v1924_v4 = vmul.f32 0.2, %v1908_v62 }
 0x1e6   : > { %v1911_v5 = vld [vmem:[#allocation2 + $0x28] sm:$0xff]  ;;  %v2294_v7 = vpack.c.bf16 %v1930_v3, %v1929_v2  ;;  %v1931_v8 = vsel %vm1915_vm2, %v1907_v59, %v1923_v63  ;;  %vm1917_vm4 = vcmp.ge.f32.partialorder %v1909_v0, 0.0  ;;  %vm1918_vm5 = vcmp.ge.f32.partialorder %v1910_v1, 0.0 }
 0x1e7   : > { %v1932_v9 = vsel %vm1916_vm3, %v1908_v62, %v1924_v4  ;;  %v1925_v10 = vmul.f32 0.2, %v1909_v0  ;;  %v1926_v11 = vmul.f32 0.2, %v1910_v1  ;;  %vm1919_vm6 = vcmp.ge.f32.partialorder %v1911_v5, 0.0 }
 0x1e8   : > { %v1912_v6 = vld [vmem:[#allocation2 + $0x38] sm:$0xff]  ;;  %1961 = vst [vmem:[%s3085_s23] sm:$0xff] %v2294_v7  ;;  %v2295_v12 = vpack.c.bf16 %v1932_v9, %v1931_v8  ;;  %v1927_v13 = vmul.f32 0.2, %v1911_v5 }
 0x1e9   : > { %vm1920_vm7 = vcmp.ge.f32.partialorder %v1912_v6, 0.0  ;;  %v1928_v14 = vmul.f32 0.2, %v1912_v6  ;;  %v1933_v15 = vsel %vm1917_vm4, %v1909_v0, %v1925_v10  ;;  %v1934_v16 = vsel %vm1918_vm5, %v1910_v1, %v1926_v11 }
 0x1ea   : > { %1962 = vst [vmem:[%s3085_s23 + $0x8] sm:$0xff] %v2295_v12  ;;  %v2296_v17 = vpack.c.bf16 %v1934_v16, %v1933_v15  ;;  %v1935_v18 = vsel %vm1919_vm6, %v1911_v5, %v1927_v13 }
 0x1eb   : > { %v1936_v19 = vsel %vm1920_vm7, %v1912_v6, %v1928_v14 }
 0x1ec   : > { %v2297_v20 = vpack.c.bf16 %v1936_v19, %v1935_v18  ;;  %1963 = vst [vmem:[%s3085_s23 + $0x10] sm:$0xff] %v2296_v17 }
 0x1ee   : > { %1964 = vst [vmem:[%s3085_s23 + $0x18] sm:$0xff] %v2297_v20 }
 0x1ef PF: > { %1971 = sbr.rel (!%p2778_p12) target bundleno = 503 (0x1f7), region = 101  ;;  %s2298_s9 = sshll.u32 (%p2778_p12), %s2654_s16, 3  ;;  %v2012_v21 = vld [vmem:[%s3085_s23] sm:$0xff] (%p2778_p12) }
 0x1f0   : > { %s1977_s15 = scalar_lea.vmem (%p2778_p12), %s3298_s2, %s2298_s9 }
 0x1f1   : > { %v2014_v22 = vld [vmem:[%s3085_s23 + $0x8] sm:$0xff] (%p2778_p12)  ;;  %2013 = vst [vmem:[%s1977_s15] sm:$0xff] (%p2778_p12), %v2012_v21 }
 0x1f2   : > { %2015 = vst [vmem:[%s1977_s15 + $0x10] sm:$0xff] (%p2778_p12), %v2014_v22 }
 0x1f3   : > { %v2016_v23 = vld [vmem:[%s3085_s23 + $0x10] sm:$0xff] (%p2778_p12) }
 0x1f4   : > { %2017 = vst [vmem:[%s1977_s15 + $0x20] sm:$0xff] %v2016_v23 }
 0x1f5   : > { %v2018_v24 = vld [vmem:[%s3085_s23 + $0x18] sm:$0xff] }
 0x1f6   : > { %2019 = vst [vmem:[%s1977_s15 + $0x30] sm:$0xff] %v2018_v24 }
 0x1f7 PF: > { %s12_s19 = sadd.s32 1, %s2666_s19   ;;  %s3304_s9 = smov %s2630_s10 }
 0x1f8   : > { %p9_p5 = scmp.ge.s32.totalorder %s12_s19, 10   ;;  %s3305_s10 = smov %s2776_s5 }
 0x1f9   : > { %s3306_s11 = smov %s2638_s12  ;;  %s3307_s12 = smov %s2773_s4 }
 0x1fa   : > { %s3308_s13 = smov %s2646_s14  ;;  %s3309_s14 = smov %s2759_s27 }
 0x1fb   : > { %s3310_s15 = smov %s2658_s17  ;;  %s3311_s16 = smov %s2662_s18 }
 0x1fc   : > { %s3312_s17 = smov %s3315_s21  ;;  %s3313_s18 = smov %s3319_s22 }
 0x1fd   :  { %11 = sbr.rel (!%p9_p5) target bundleno = 8 (0x8), region = 178 }

// kernel: _forward.9
= control target key start
LH: loop header
LB: loop body
LE: loop exit
PB: predicated region body
PF: predicated region fallthrough
CT: control target
= control target key end

     0   :  { %s1360_s9 = smov 0   ;;  %s1362_s10 = smov 0   ;;  %s1489_s0 = inlined_call_operand.vmem [shape: bf16[2,8192], index: 0, kind: input, shape index: {}]   ;;  %s1490_s1 = inlined_call_operand.vmem [shape: bf16[8192,1], index: 1, kind: input, shape index: {}]   ;;  %s1491_s2 = inlined_call_operand.vmem [shape: f32[2,1], index: 2, kind: output, shape index: {}]  }
   0x1   :  { %s1364_s11 = smov 0  }
   0x2 LB: > { %s24_s12 = sadd.s32 1, %s1337_s10  ;;  %p1062_p0 = scmp.ge.s32.totalorder %s1341_s11, 1  ;;  %s1341_s11 = sphi %s1364_s11, %s12_s11   ;;  %s1337_s10 = sphi %s1362_s10, %s1493_s10   ;;  %s1333_s9 = sphi %s1360_s9, %s1492_s9  }
   0x3   : > { %p25_p1 = scmp.ge.s32.totalorder %s24_s12, 8  ;;  %p155_p2 = scmp.lt.s32.totalorder %s1341_s11, 9 }
   0x5   : > { %s1495_s12 = smov (%p25_p1, %s24_s12), 0  ;;  %p156_p3 = pnand %p1062_p0, %p155_p2 }
   0x6   : > { %s1063_s13 = sshll.u32 (!%p156_p3), %s1333_s9, 3  ;;  %s1064_s14 = sshll.u32 (!%p156_p3), %s1333_s9, 7 }
   0x7   : > { %159 = sbr.rel (%p156_p3) target bundleno = 331 (0x14b), region = 28  ;;  %p193_p4 = scmp.lt.s32.totalorder (!%p156_p3), %s1063_s13, 63 }
   0x8   : > { %p200_p5 = scmp.lt.s32.totalorder (!%p156_p3), %s1064_s14, 1023  ;;  %p1066_p6 = scmp.ne.s32.totalorder (!%p156_p3), %s1333_s9, 0 }
   0xc   : > { %s1497_s13 = smov (!%p193_p4, %s1063_s13), 63  ;;  %s1499_s14 = smov (!%p200_p5, %s1064_s14), 1023 }
   0xd   : > { %s197_s17 = scalar_lea.vmem %s1489_s0, %s1497_s13  ;;  %s1065_s18 = sshll.u32 %s1499_s14, 2 }
   0xe   : > { %s1391_s21 = scalar_lea.vmem %s1490_s1, %s1065_s18  ;;  %219 = sbr.rel (%p1066_p6) target bundleno = 21 (0x15), region = 32 }
  0x13   : > { %vm220_vm0 = vcmask 1024   ;;  %v1343_v0 = vmov 0.0  }
  0x14   : > { %221 = vst.msk [vmem:[#allocation2] sm:$0x3] %vm220_vm0, %v1343_v0 }
  0x15 PF: > { %v1250_v1 = vld [vmem:[%s1391_s21 + $0x78] sm:$0xff]   ;;  %v1254_v5 = vld [vmem:[%s1391_s21 + $0x70] sm:$0xff]   ;;  %v1258_v9 = vld [vmem:[%s1391_s21 + $0x68] sm:$0xff]   ;;  %v357_v29 = vlaneseq  ;;  %v1344_v37 = vmov 1966171168   ;;  %vm955_vm1 = vcmask 1024  }
  0x16   : > { %v1251_v2 = vld [vmem:[%s1391_s21 + $0xf8] sm:$0xff]   ;;  %1136 = vmatprep.subr.bf16.mxu0 %v1250_v1  ;;  %v1255_v6 = vld [vmem:[%s1391_s21 + $0xf0] sm:$0xff]   ;;  %v1259_v10 = vld [vmem:[%s1391_s21 + $0xe8] sm:$0xff]   ;;  %v355_v38 = vunpack.c.l.s4 %v1344_v37  ;;  %p1131_p7 = scmp.ne.s32.totalorder %s1333_s9, 7 }
  0x17   : > { %v1252_v3 = vld [vmem:[%s1391_s21 + $0x38] sm:$0xff]   ;;  %1158 = vmatprep.subr.bf16.mxu1 %v1251_v2  ;;  %v1256_v7 = vld [vmem:[%s1391_s21 + $0x30] sm:$0xff]   ;;  %v1260_v11 = vld [vmem:[%s1391_s21 + $0x28] sm:$0xff]   ;;  %v358_v34 = vshrl.u32 %v357_v29, 7 }
  0x18   : > { %v1253_v4 = vld [vmem:[%s1391_s21 + $0xb8] sm:$0xff]   ;;  %1137 = vmatpush3.bf16.msra.mxu0 %v1252_v3  ;;  %v1257_v8 = vld [vmem:[%s1391_s21 + $0xb0] sm:$0xff]   ;;  %v1261_v12 = vld [vmem:[%s1391_s21 + $0xa8] sm:$0xff]   ;;  %v356_v41 = vunpack.c.0.s8 %v355_v38 }
  0x19   : > { %1159 = vmatpush3.bf16.msra.mxu1 %v1253_v4  ;;  %1138 = vmatprep.subr.bf16.mxu0 %v1254_v5  ;;  %v1262_v13 = vld [vmem:[%s1391_s21 + $0x60] sm:$0xff]   ;;  %v1266_v17 = vld [vmem:[%s1391_s21 + $0x58] sm:$0xff]   ;;  %v1270_v21 = vld [vmem:[%s1391_s21 + $0x50] sm:$0xff]  }
  0x1a   : > { %1160 = vmatprep.subr.bf16.mxu1 %v1255_v6  ;;  %v1263_v14 = vld [vmem:[%s1391_s21 + $0xe0] sm:$0xff]   ;;  %v1267_v18 = vld [vmem:[%s1391_s21 + $0xd8] sm:$0xff]   ;;  %v1271_v22 = vld [vmem:[%s1391_s21 + $0xd0] sm:$0xff]   ;;  %v1433_v42 = vsub.s32 %v356_v41, %v358_v34 }
  0x1b   : > { %v1264_v15 = vld [vmem:[%s1391_s21 + $0x20] sm:$0xff]   ;;  %v1268_v19 = vld [vmem:[%s1391_s21 + $0x18] sm:$0xff]   ;;  %v1272_v23 = vld [vmem:[%s1391_s21 + $0x10] sm:$0xff]  }
  0x1c   : > { %1139 = vmatpush3.bf16.msra.mxu0 %v1256_v7  ;;  %v1265_v16 = vld [vmem:[%s1391_s21 + $0xa0] sm:$0xff]   ;;  %v1269_v20 = vld [vmem:[%s1391_s21 + $0x98] sm:$0xff]   ;;  %v1273_v24 = vld [vmem:[%s1391_s21 + $0x90] sm:$0xff]  }
  0x1d   : > { %1161 = vmatpush3.bf16.msra.mxu1 %v1257_v8  ;;  %1140 = vmatprep.subr.bf16.mxu0 %v1258_v9  ;;  %v1274_v25 = vld [vmem:[%s1391_s21 + $0x48] sm:$0xff]   ;;  %v1278_v30 = vld [vmem:[%s1391_s21 + $0x40] sm:$0xff]   ;;  %v1283_v36 = vld [vmem:[%s1391_s21 + $0x178] sm:$0xff]  }
  0x1e   : > { %1162 = vmatprep.subr.bf16.mxu1 %v1259_v10  ;;  %v1275_v26 = vld [vmem:[%s1391_s21 + $0xc8] sm:$0xff]   ;;  %v1279_v31 = vld [vmem:[%s1391_s21 + $0xc0] sm:$0xff]   ;;  %v1284_v39 = vld [vmem:[%s1391_s21 + $0x1f8] sm:$0xff]  }
  0x1f   : > { %v1276_v27 = vld [vmem:[%s1391_s21 + $0x8] sm:$0xff]   ;;  %v1280_v32 = vld [vmem:[%s1391_s21] sm:$0xff]   ;;  %v1285_v49 = vld [vmem:[%s1391_s21 + $0x138] sm:$0xff]  }
  0x20   : > { %1141 = vmatpush3.bf16.msra.mxu0 %v1260_v11  ;;  %v1277_v28 = vld [vmem:[%s1391_s21 + $0x88] sm:$0xff]   ;;  %v1281_v33 = vld [vmem:[%s1391_s21 + $0x80] sm:$0xff]   ;;  %v1287_v52 = vld [vmem:[%s1391_s21 + $0x170] sm:$0xff]  }
  0x21   : > { %1163 = vmatpush3.bf16.msra.mxu1 %v1261_v12  ;;  %1142 = vmatprep.subr.bf16.mxu0 %v1262_v13  ;;  %v223_v35 = vld [vmem:[%s197_s17] sm:$0xff]  ;;  %v1286_v54 = vld [vmem:[%s1391_s21 + $0x1b8] sm:$0xff]   ;;  %v1288_v55 = vld [vmem:[%s1391_s21 + $0x1f0] sm:$0xff]  }
  0x22   : > { %1164 = vmatprep.subr.bf16.mxu1 %v1263_v14  ;;  %v353_v40 = vcombine.high %v223_v35, %v223_v35  ;;  %v360_v43 = vrot.slane %v223_v35, %v1433_v42  ;;  %v1289_v57 = vld [vmem:[%s1391_s21 + $0x130] sm:$0xff]   ;;  %v1291_v58 = vld [vmem:[%s1391_s21 + $0x168] sm:$0xff]   ;;  %v1295_v62 = vld [vmem:[%s1391_s21 + $0x160] sm:$0xff]  }
  0x23   : > { %v1290_v59 = vld [vmem:[%s1391_s21 + $0x1b0] sm:$0xff]   ;;  %v1292_v60 = vld [vmem:[%s1391_s21 + $0x1e8] sm:$0xff]   ;;  %v1296_v0 = vld [vmem:[%s1391_s21 + $0x1e0] sm:$0xff]  }
  0x24   : > { %1143 = vmatpush3.bf16.msra.mxu0 %v1264_v15  ;;  %v1437_v44 = vrot.slane %v353_v40, %v1433_v42  ;;  %v368_v45 = vcombine.high %v360_v43, %v360_v43  ;;  %v376_v46 = vrot.slane %v360_v43, %v1433_v42  ;;  %v1293_v61 = vld [vmem:[%s1391_s21 + $0x128] sm:$0xff]   ;;  %v1297_v1 = vld [vmem:[%s1391_s21 + $0x120] sm:$0xff]   ;;  %v1299_v2 = vld [vmem:[%s1391_s21 + $0x158] sm:$0xff]  }
  0x25   : > { %1165 = vmatpush3.bf16.msra.mxu1 %v1265_v16  ;;  %1144 = vmatprep.subr.bf16.mxu0 %v1266_v17  ;;  %v1294_v63 = vld [vmem:[%s1391_s21 + $0x1a8] sm:$0xff]   ;;  %v1298_v3 = vld [vmem:[%s1391_s21 + $0x1a0] sm:$0xff]   ;;  %v1300_v4 = vld [vmem:[%s1391_s21 + $0x1d8] sm:$0xff]  }
  0x26   : > { %1166 = vmatprep.subr.bf16.mxu1 %v1267_v18  ;;  %v369_v47 = vcombine.high %v1437_v44, %v1437_v44  ;;  %v390_v48 = vrot.slane %v368_v45, %v1433_v42  ;;  %v398_v51 = vcombine.high %v376_v46, %v376_v46  ;;  %v1301_v5 = vld [vmem:[%s1391_s21 + $0x118] sm:$0xff]   ;;  %v1303_v6 = vld [vmem:[%s1391_s21 + $0x150] sm:$0xff]   ;;  %v1307_v10 = vld [vmem:[%s1391_s21 + $0x148] sm:$0xff]   ;;  %v383_v18 = vrot.slane %v1437_v44, %v1433_v42 }
  0x27   : > { %v1302_v7 = vld [vmem:[%s1391_s21 + $0x198] sm:$0xff]   ;;  %v1304_v8 = vld [vmem:[%s1391_s21 + $0x1d0] sm:$0xff]   ;;  %v1308_v12 = vld [vmem:[%s1391_s21 + $0x1c8] sm:$0xff]  }
  0x28   : > { %1145 = vmatpush3.bf16.msra.mxu0 %v1268_v19  ;;  %v397_v50 = vrot.slane %v369_v47, %v1433_v42  ;;  %826 = vmatprep.mubr.bf16.mxu0 %v390_v48  ;;  %v400_v53 = vcombine.high %v390_v48, %v390_v48  ;;  %v1305_v9 = vld [vmem:[%s1391_s21 + $0x110] sm:$0xff]   ;;  %v1309_v13 = vld [vmem:[%s1391_s21 + $0x108] sm:$0xff]   ;;  %v1311_v14 = vld [vmem:[%s1391_s21 + $0x140] sm:$0xff]  }
  0x29   : > { %1167 = vmatpush3.bf16.msra.mxu1 %v1269_v20  ;;  %1146 = vmatprep.subr.bf16.mxu0 %v1270_v21  ;;  %v1306_v11 = vld [vmem:[%s1391_s21 + $0x190] sm:$0xff]   ;;  %v1310_v15 = vld [vmem:[%s1391_s21 + $0x188] sm:$0xff]   ;;  %v1312_v16 = vld [vmem:[%s1391_s21 + $0x1c0] sm:$0xff]   ;;  %v399_v20 = vcombine.high %v383_v18, %v383_v18 }
  0x2a   : > { %1168 = vmatprep.subr.bf16.mxu1 %v1271_v22  ;;  %v401_v56 = vcombine.high %v397_v50, %v397_v50  ;;  %866 = vmatprep.mubr.bf16.mxu1 %v400_v53  ;;  %v1313_v17 = vld [vmem:[%s1391_s21 + $0x100] sm:$0xff]  }
  0x2b   : > { %v1314_v19 = vld [vmem:[%s1391_s21 + $0x180] sm:$0xff]  }
  0x2c   : > { %1147 = vmatpush3.bf16.msra.mxu0 %v1272_v23  ;;  %v222_v40 = vld [vmem:[#allocation2] sm:$0x3] }
  0x2d   : > { %1169 = vmatpush3.bf16.msra.mxu1 %v1273_v24  ;;  %1148 = vmatprep.subr.bf16.mxu0 %v1274_v25 }
  0x2e   : > { %1170 = vmatprep.subr.bf16.mxu1 %v1275_v26 }
  0x30   : > { %1149 = vmatpush3.bf16.msra.mxu0 %v1276_v27 }
  0x31   : > { %1171 = vmatpush3.bf16.msra.mxu1 %v1277_v28  ;;  %1150 = vmatprep.subr.bf16.mxu0 %v1278_v30 }
  0x32   : > { %1172 = vmatprep.subr.bf16.mxu1 %v1279_v31 }
  0x34   : > { %1151 = vmatpush3.bf16.msra.mxu0 %v1280_v32 }
  0x35   : > { %1173 = vmatpush3.bf16.msra.mxu1 %v1281_v33  ;;  %1180 = vmatprep.subr.bf16.mxu0 %v1283_v36 }
  0x36   : > { %1202 = vmatprep.subr.bf16.mxu1 %v1284_v39 }
  0x37   : > { %827 = vmatmul.mubr.bf16.vlgmr.msra.gmra.mxu0 %v376_v46 }
  0x38   : > { %1181 = vmatpush3.bf16.msra.mxu0 %v1285_v49  ;;  %867 = vmatmul.mubr.bf16.vlgmr.msra.gmra.mxu1 %v398_v51 }
  0x39   : > { %1182 = vmatprep.subr.bf16.mxu0 %v1287_v52  ;;  %1203 = vmatpush3.bf16.msra.mxu1 %v1286_v54 }
  0x3a   : > { %906 = vmatprep.mubr.bf16.mxu0 %v397_v50  ;;  %1204 = vmatprep.subr.bf16.mxu1 %v1288_v55 }
  0x3b   : > { %946 = vmatprep.mubr.bf16.mxu1 %v401_v56 }
  0x3c   : > { %1183 = vmatpush3.bf16.msra.mxu0 %v1289_v57 }
  0x3d   : > { %1184 = vmatprep.subr.bf16.mxu0 %v1291_v58  ;;  %1205 = vmatpush3.bf16.msra.mxu1 %v1290_v59 }
  0x3e   : > { %1206 = vmatprep.subr.bf16.mxu1 %v1292_v60 }
  0x40   : > { %1185 = vmatpush3.bf16.msra.mxu0 %v1293_v61 }
  0x41   : > { %1186 = vmatprep.subr.bf16.mxu0 %v1295_v62  ;;  %1207 = vmatpush3.bf16.msra.mxu1 %v1294_v63 }
  0x42   : > { %1208 = vmatprep.subr.bf16.mxu1 %v1296_v0 }
  0x44   : > { %1187 = vmatpush3.bf16.msra.mxu0 %v1297_v1 }
  0x45   : > { %1188 = vmatprep.subr.bf16.mxu0 %v1299_v2  ;;  %1209 = vmatpush3.bf16.msra.mxu1 %v1298_v3 }
  0x46   : > { %1210 = vmatprep.subr.bf16.mxu1 %v1300_v4 }
  0x48   : > { %1189 = vmatpush3.bf16.msra.mxu0 %v1301_v5 }
  0x49   : > { %1190 = vmatprep.subr.bf16.mxu0 %v1303_v6  ;;  %1211 = vmatpush3.bf16.msra.mxu1 %v1302_v7 }
  0x4a   : > { %1212 = vmatprep.subr.bf16.mxu1 %v1304_v8 }
  0x4c   : > { %1191 = vmatpush3.bf16.msra.mxu0 %v1305_v9 }
  0x4d   : > { %1192 = vmatprep.subr.bf16.mxu0 %v1307_v10  ;;  %1213 = vmatpush3.bf16.msra.mxu1 %v1306_v11 }
  0x4e   : > { %1214 = vmatprep.subr.bf16.mxu1 %v1308_v12 }
  0x50   : > { %1193 = vmatpush3.bf16.msra.mxu0 %v1309_v13 }
  0x51   : > { %1194 = vmatprep.subr.bf16.mxu0 %v1311_v14  ;;  %1215 = vmatpush3.bf16.msra.mxu1 %v1310_v15 }
  0x52   : > { %1216 = vmatprep.subr.bf16.mxu1 %v1312_v16 }
  0x54   : > { %1195 = vmatpush3.bf16.msra.mxu0 %v1313_v17 }
  0x55   : > { %1217 = vmatpush3.bf16.msra.mxu1 %v1314_v19 }
  0x57   : > { %907 = vmatmul.mubr.bf16.vlgmr.msra.gmra.mxu0 %v383_v18 }
  0x58   : > { %947 = vmatmul.mubr.bf16.vlgmr.msra.gmra.mxu1 %v399_v20 }
  0xf7   : > { %v1152_v21 = vpop.f32.mrf.mxu0 }
  0xf8   : > { %v1174_v22 = vpop.f32.mrf.mxu1 }
  0xf9   : > { %v1153_v23 = vpop.f32.mrf.mxu0 }
  0xfa   : > { %v1175_v24 = vpop.f32.mrf.mxu1  ;;  %v1154_v29 = vadd.f32 %v1153_v23, %v1152_v21 }
  0xfb   : > { %v1155_v25 = vpop.f32.mrf.mxu0  ;;  %v1176_v30 = vadd.f32 %v1175_v24, %v1174_v22 }
  0xfc   : > { %v1177_v26 = vpop.f32.mrf.mxu1 }
  0xfd   : > { %v1156_v27 = vpop.f32.mrf.mxu0  ;;  %v869_v34 = vadd.f32 %v1176_v30, %v1154_v29 }
  0xfe   : > { %v1178_v28 = vpop.f32.mrf.mxu1 }
 0x117   : > { %v1196_v31 = vpop.f32.mrf.mxu0 }
 0x118   : > { %v1218_v32 = vpop.f32.mrf.mxu1 }
 0x119   : > { %v1197_v33 = vpop.f32.mrf.mxu0 }
 0x11a   : > { %v1198_v35 = vadd.f32 %v1197_v33, %v1196_v31  ;;  %v1219_v36 = vpop.f32.mrf.mxu1 }
 0x11b   : > { %v1199_v37 = vpop.f32.mrf.mxu0  ;;  %v1220_v39 = vadd.f32 %v1219_v36, %v1218_v32 }
 0x11c   : > { %v909_v38 = vadd.f32 %v1198_v35, %v869_v34  ;;  %v1221_v41 = vpop.f32.mrf.mxu1 }
 0x11d   : > { %v1200_v42 = vpop.f32.mrf.mxu0 }
 0x11e   : > { %v949_v43 = vadd.f32 %v1220_v39, %v909_v38  ;;  %v1222_v44 = vpop.f32.mrf.mxu1  ;;  %960 = sbr.rel (%p1131_p7) target bundleno = 331 (0x14b), region = 36 }
 0x120   : > { %v954_v45 = vadd.f32 %v949_v43, %v222_v40 }
 0x122   : > { %956 = vst.msk [vmem:[#allocation2] sm:$0x3] %vm955_vm1, %v954_v45 }
 0x129   : > { %v961_v46 = vld [vmem:[#allocation2] sm:$0x3] }
 0x12a   : > { %v1132_v47 = vmul.f32 -1.442695, %v961_v46 }
 0x12c   : > { %1315 = vpow2.f32 %v1132_v47 }
 0x139   : > { %v1316_v48 = vpop.eup %1315 }
 0x13a   : > { %v965_v49 = vadd.f32 1.0, %v1316_v48 }
 0x13c   : > { %1317 = vrcp.f32 %v965_v49 }
 0x149   : > { %v1318_v50 = vpop.eup %1317 }
 0x14a   : > { %968 = vst.msk [vmem:[%s1491_s2] sm:$0x3] %vm955_vm1, %v1318_v50 }
 0x14b PF: > { %s12_s11 = sadd.s32 1, %s1341_s11   ;;  %s1492_s9 = smov %s1337_s10 }
 0x14c   : > { %p9_p8 = scmp.ge.s32.totalorder %s12_s11, 10   ;;  %s1493_s10 = smov %s1495_s12 }
 0x14e   :  { %11 = sbr.rel (!%p9_p8) target bundleno = 2 (0x2), region = 69 }

</bundles_post_ra>
